<compile_context>
chip_gen: v7x
topology: tpu7x:2x2x1
jax: 0.10.0
libtpu: 0.0.40
codegen_flags: <defaults>
</compile_context>

<pallas_src>
import jax
import jax.numpy as jnp
import numpy as np
from jax.experimental import pallas as pl
from jax.experimental.pallas import tpu as pltpu

INPUT_SIZE = 1
OUTPUT_SIZE = 1
HIDDEN = 40          # H  (PyTorch hidden size)
HPAD = 128           # padded hidden (one full lane group)
G = 4 * HPAD         # 512: padded gate width per direction
IN_PAD = 8           # padded layer-0 input feature dim (x, y, 1.0, zeros)
BIAS_COL = INPUT_SIZE + OUTPUT_SIZE   # the 1.0 column used to fold layer-0 bias
NUM_LAYERS = 2
EMB_DIMS = (80, 80)
TASKS_PER_BLOCK = 8  # B: tasks packed along the sublane axis per grid step
GATE_ORDER = (0, 1, 3, 2)  # dest 128-block g takes PyTorch gate GATE_ORDER[g]
                           # (PyTorch order i,f,g,o -> packed order i,f,o,g~)
assert max(EMB_DIMS) <= HPAD


def _sigmoid(x):
    # divide-free sigmoid: tanh goes to the EUP, rest is cheap VPU work.
    return 0.5 * (jnp.tanh(0.5 * x) + 1.0)


def _lstm_model_kernel(x_ref, wih0_ref, wih1_ref, bias1_ref, whh_ref,
                       wemb_ref, bemb_ref, out_ref, xw_ref, slab_ref):
    B = out_ref.shape[0]          # tasks per block (sublane-packed)
    NB = x_ref.shape[0]           # N * B (time-major rows)
    N = NB // B

    def gate_act(g, c):
        # g: (B, G) padded gates in packed order i, f, o, g~ (128 lanes each).
        sig = _sigmoid(g[:, 0:3 * HPAD])              # one chain over 3 vregs
        i_g = sig[:, 0:HPAD]
        f_g = sig[:, HPAD:2 * HPAD]
        o_g = sig[:, 2 * HPAD:3 * HPAD]
        g_g = jnp.tanh(g[:, 3 * HPAD:G])
        c_new = f_g * c + i_g * g_g
        h_new = o_g * jnp.tanh(c_new)
        return h_new, c_new

    def run_layer(whh_f, whh_b, store_slab):
        """Fused fwd+bwd recurrence over the xw_ref scratch slab.
        Row block k of xw_ref holds the precomputed input projections for all B
        tasks at time k: cols [0:G] fwd gates, [G:2G] bwd gates."""
        hf = jnp.zeros((B, HPAD), jnp.float32)
        cf = jnp.zeros((B, HPAD), jnp.float32)
        hb = jnp.zeros((B, HPAD), jnp.float32)
        cb = jnp.zeros((B, HPAD), jnp.float32)
        for k in range(N):                            # static -> fully unrolled
            tb = N - 1 - k
            gf = jnp.dot(hf, whh_f, preferred_element_type=jnp.float32) \
                + xw_ref[k * B:(k + 1) * B, 0:G]
            gb = jnp.dot(hb, whh_b, preferred_element_type=jnp.float32) \
                + xw_ref[tb * B:(tb + 1) * B, G:2 * G]
            hf, cf = gate_act(gf, cf)
            hb, cb = gate_act(gb, cb)
            if store_slab:
                slab_ref[k * B:(k + 1) * B, 0:HPAD] = hf
                slab_ref[tb * B:(tb + 1) * B, HPAD:2 * HPAD] = hb
        return hf, hb

    # ---- Layer 0: hoisted input projection (bias folded via the 1.0 column).
    xw_ref[...] = jnp.dot(x_ref[...], wih0_ref[...],
                          preferred_element_type=jnp.float32)
    run_layer(whh_ref[0:HPAD, 0:G], whh_ref[0:HPAD, G:2 * G], store_slab=True)

    # ---- Layer 1: input = layer-0 hidden slab (N*B, 2*HPAD), one hoisted
    #      projection matmul (explicit bias add, off the serial path).
    xw_ref[...] = jnp.dot(slab_ref[...], wih1_ref[...],
                          preferred_element_type=jnp.float32) + bias1_ref[0:1, :]
    h1f, h1b = run_layer(whh_ref[HPAD:2 * HPAD, 0:G],
                         whh_ref[HPAD:2 * HPAD, G:2 * G], store_slab=False)

    # ---- Fused embedding heads: emb_in = cat(h_fwd_final, h_bwd_final).
    emb_in = jnp.concatenate([h1f, h1b], axis=1)            # (B, 2*HPAD)
    out_ref[...] = (jnp.dot(emb_in, wemb_ref[...],
                            preferred_element_type=jnp.float32)
                    + bemb_ref[...])


def lstm_embedding_forward(x, y, packed, *, tasks_per_block=TASKS_PER_BLOCK):
    """x: (T, N, 1), y: (T, N, 1)  (T tasks, N support points each).
    Returns [ (T, 80), (T, 80) ] embeddings (one row per task)."""
    T, N, _ = x.shape
    B = tasks_per_block
    assert T % B == 0, "pad the task count to a multiple of tasks_per_block"
    num_blocks = T // B
    NB = N * B

    # Time-major, sublane-packed input layout:
    #   global row = tblk*(N*B) + k*B + b  holds task (tblk*B + b) at time k.
    feats = jnp.zeros((T, N, IN_PAD), jnp.float32)
    feats = feats.at[:, :, 0:INPUT_SIZE].set(x.astype(jnp.float32))
    feats = feats.at[:, :, INPUT_SIZE:INPUT_SIZE + OUTPUT_SIZE].set(
        y.astype(jnp.float32))
    feats = feats.at[:, :, BIAS_COL].set(1.0)               # bias-fold column
    feats = feats.reshape(num_blocks, B, N, IN_PAD).transpose(0, 2, 1, 3)
    inputs = feats.reshape(num_blocks * NB, IN_PAD)

    wih0c, wih1c, bias1, whh_all, wemb, bemb = packed

    def fixed(a):   # weight slab: stays resident across the task-block grid
        return pl.BlockSpec(a.shape, lambda t: (0, 0))

    grid_spec = pltpu.PrefetchScalarGridSpec(
        num_scalar_prefetch=0,
        grid=(num_blocks,),
        in_specs=[
            pl.BlockSpec((NB, IN_PAD), lambda t: (t, 0)),   # streamed inputs
            fixed(wih0c), fixed(wih1c), fixed(bias1),
            fixed(whh_all), fixed(wemb), fixed(bemb),
        ],
        out_specs=pl.BlockSpec((B, 2 * HPAD), lambda t: (t, 0)),
        scratch_shapes=[
            pltpu.VMEM((NB, 2 * G), jnp.float32),       # input-projection slab
            pltpu.VMEM((NB, 2 * HPAD), jnp.float32),    # layer-0 hidden slab
        ],
    )

    # Rough cost hint so XLA can overlap the call with surrounding graph work.
    flops_per_block = (2 * NB * IN_PAD * 2 * G
                       + 2 * NB * (2 * HPAD) * (2 * G)
                       + NUM_LAYERS * N * 2 * (2 * B * HPAD * G)
                       + 2 * B * (2 * HPAD) * (2 * HPAD))
    transc_per_block = NUM_LAYERS * N * 2 * (B * 5 * HPAD)
    weight_bytes = sum(int(np.prod(a.shape)) * 4
                       for a in (wih0c, wih1c, bias1, whh_all, wemb, bemb))
    io_bytes_per_block = NB * IN_PAD * 4 + B * 2 * HPAD * 4
    cost = pl.CostEstimate(
        flops=flops_per_block * num_blocks,
        transcendentals=transc_per_block * num_blocks,
        bytes_accessed=weight_bytes + io_bytes_per_block * num_blocks,
    )

    out = pl.pallas_call(
        _lstm_model_kernel,
        out_shape=jax.ShapeDtypeStruct((T, 2 * HPAD), jnp.float32),
        grid_spec=grid_spec,
        compiler_params=pltpu.CompilerParams(
            dimension_semantics=("parallel",)),
        cost_estimate=cost,
    )(inputs, wih0c, wih1c, bias1, whh_all, wemb, bemb)

    return [out[:, 0:EMB_DIMS[0]], out[:, HPAD:HPAD + EMB_DIMS[1]]]


# ----------------------------------------------------------------------------
# Parameter construction (PyTorch layout) + packing into the padded kernel
# layout.
# ----------------------------------------------------------------------------
def init_params(key):
    """PyTorch-style uniform init.  Returns (raw_lstm, heads) in native layout:
       raw_lstm = [(W_ih(4H,in), W_hh(4H,H), b_ih(4H,), b_hh(4H,)) x 4]
                  ordered layer0-fwd, layer0-bwd, layer1-fwd, layer1-bwd,
       heads    = [(W(dim,2H), b(dim,)) x 2]."""
    bound = 1.0 / np.sqrt(HIDDEN)

    def u(k, shape, b):
        return jax.random.uniform(k, shape, jnp.float32, -b, b)

    ks = iter(jax.random.split(key, 24))
    raw = []
    in_dims = [INPUT_SIZE + OUTPUT_SIZE, 2 * HIDDEN]
    for layer in range(NUM_LAYERS):
        for _direction in range(2):
            wih = u(next(ks), (4 * HIDDEN, in_dims[layer]), bound)
            whh = u(next(ks), (4 * HIDDEN, HIDDEN), bound)
            bih = u(next(ks), (4 * HIDDEN,), bound)
            bhh = u(next(ks), (4 * HIDDEN,), bound)
            raw.append((wih, whh, bih, bhh))
    eb = 1.0 / np.sqrt(2 * HIDDEN)
    heads = []
    for dim in EMB_DIMS:
        w = u(next(ks), (dim, 2 * HIDDEN), eb)
        b = u(next(ks), (dim,), eb)
        heads.append((w, b))
    return raw, heads


def pack_params(raw, heads):
    """Pad H->128 lanes, reorder gates i,f,g,o -> i,f,o,g~, fold layer-0 bias
    into the input projection, fuse fwd/bwd + both layers + both heads into 6
    padded slabs."""
    H, HP = HIDDEN, HPAD

    def reorder_gates(w_t):            # (rows, 4H) -> (rows, G), packed order
        rows = w_t.shape[0]
        out = jnp.zeros((rows, G), jnp.float32)
        for dst, src in enumerate(GATE_ORDER):
            out = out.at[:, dst * HP:dst * HP + H].set(
                w_t[:, src * H:(src + 1) * H])
        return out

    def pad_bidir_rows(w_t):           # (2H, cols) -> (2HP, cols)
        cols = w_t.shape[1]
        out = jnp.zeros((2 * HP, cols), jnp.float32)
        out = out.at[0:H].set(w_t[0:H])
        out = out.at[HP:HP + H].set(w_t[H:2 * H])
        return out

    (wih0f, whh0f, bi0f, bh0f) = raw[0]
    (wih0b, whh0b, bi0b, bh0b) = raw[1]
    (wih1f, whh1f, bi1f, bh1f) = raw[2]
    (wih1b, whh1b, bi1b, bh1b) = raw[3]

    def wih0_pack(wih, bi, bh):        # (4H, 2) -> (IN_PAD, G), bias in BIAS_COL
        w = reorder_gates(wih.T)                         # (2, G)
        b = reorder_gates((bi + bh).reshape(1, 4 * H))   # (1, G)
        out = jnp.zeros((IN_PAD, G), jnp.float32)
        out = out.at[0:INPUT_SIZE + OUTPUT_SIZE].set(w)
        out = out.at[BIAS_COL:BIAS_COL + 1].set(b)
        return out

    wih0c = jnp.concatenate([wih0_pack(wih0f, bi0f, bh0f),
                             wih0_pack(wih0b, bi0b, bh0b)], axis=1)

    def wih1_pack(wih):                # (4H, 2H) -> (2HP, G)
        return pad_bidir_rows(reorder_gates(wih.T))

    wih1c = jnp.concatenate([wih1_pack(wih1f), wih1_pack(wih1b)], axis=1)

    def whh_pack(whh):                 # (4H, H) -> (HP, G)
        w = reorder_gates(whh.T)
        out = jnp.zeros((HP, G), jnp.float32)
        return out.at[0:H].set(w)

    whh_all = jnp.concatenate(
        [jnp.concatenate([whh_pack(whh0f), whh_pack(whh0b)], axis=1),
         jnp.concatenate([whh_pack(whh1f), whh_pack(whh1b)], axis=1)], axis=0)

    bias1 = jnp.concatenate(
        [reorder_gates((bi1f + bh1f).reshape(1, 4 * H)),
         reorder_gates((bi1b + bh1b).reshape(1, 4 * H))], axis=1)  # (1, 2G)

    wemb = jnp.zeros((2 * HP, 2 * HP), jnp.float32)
    bemb = jnp.zeros((1, 2 * HP), jnp.float32)
    for hidx, (w, b) in enumerate(heads):
        w_t = pad_bidir_rows(w.T)      # (2HP, dim)
        dim = w.shape[0]
        col = hidx * HP
        wemb = wemb.at[:, col:col + dim].set(w_t)
        bemb = bemb.at[:, col:col + dim].set(b.reshape(1, dim))

    return [wih0c, wih1c, bias1, whh_all, wemb, bemb]


# ----------------------------------------------------------------------------
# Pure-JAX reference (native layout, identical PyTorch semantics, per task).
# ----------------------------------------------------------------------------
def forward_ref(x, y, raw, heads):
    inputs = jnp.concatenate([x, y], axis=1).astype(jnp.float32)
    H = HIDDEN

    def run(xs, wih, whh, bi, bh, reverse):
        N = xs.shape[0]
        wih_t, whh_t = wih.T, whh.T
        b = (bi + bh).reshape(1, 4 * H)
        h = jnp.zeros((1, H), jnp.float32)
        c = jnp.zeros((1, H), jnp.float32)
        order = range(N - 1, -1, -1) if reverse else range(N)
        outs = [None] * N
        for t in order:
            gates = xs[t:t + 1] @ wih_t + h @ whh_t + b
            i_g = jax.nn.sigmoid(gates[:, 0:H])
            f_g = jax.nn.sigmoid(gates[:, H:2 * H])
            g_g = jnp.tanh(gates[:, 2 * H:3 * H])
            o_g = jax.nn.sigmoid(gates[:, 3 * H:4 * H])
            c = f_g * c + i_g * g_g
            h = o_g * jnp.tanh(c)
            outs[t] = h
        return jnp.concatenate(outs, axis=0), h

    l0f, _ = run(inputs, *raw[0], False)
    l0b, _ = run(inputs, *raw[1], True)
    l1_in = jnp.concatenate([l0f, l0b], axis=1)
    _, h1f = run(l1_in, *raw[2], False)
    _, h1b = run(l1_in, *raw[3], True)
    emb_in = jnp.concatenate([h1f, h1b], axis=1)
    return [emb_in @ w.T + b.reshape(1, -1) for (w, b) in heads]


if __name__ == "__main__":
    key = jax.random.PRNGKey(0)
    kx, ky, kp = jax.random.split(key, 3)
    T = 16  # number of tasks (2 grid blocks of 8 sublane-packed tasks)
    N = 8   # sequence length (number of support points per task)

    x = jax.random.normal(kx, (T, N, INPUT_SIZE), jnp.float32)   # tsk.X_sp x T
    y = jax.random.normal(ky, (T, N, OUTPUT_SIZE), jnp.float32)  # tsk.y_sp x T

    raw, heads = init_params(kp)
    packed = pack_params(raw, heads)

    outs = lstm_embedding_forward(x, y, packed)
    outs = jax.block_until_ready(outs)

    for t in range(T):
        refs = forward_ref(x[t], y[t], raw, heads)
        for o, r in zip(outs, refs):
            np.testing.assert_allclose(np.asarray(o[t:t + 1]), np.asarray(r),
                                       rtol=1e-4, atol=1e-4)

    print("KERNEL_OK")
</pallas_src>

<mosaic_0001>
module attributes {stable_mosaic.version = 11 : i64} {
  func.func @_lstm_model_kernel(%arg0: i32, %arg1: memref<64x8xf32, #tpu.memory_space<vmem>>, %arg2: memref<8x1024xf32, #tpu.memory_space<vmem>>, %arg3: memref<256x1024xf32, #tpu.memory_space<vmem>>, %arg4: memref<1x1024xf32, #tpu.memory_space<vmem>>, %arg5: memref<256x1024xf32, #tpu.memory_space<vmem>>, %arg6: memref<256x256xf32, #tpu.memory_space<vmem>>, %arg7: memref<1x256xf32, #tpu.memory_space<vmem>>, %arg8: memref<8x256xf32, #tpu.memory_space<vmem>>, %arg9: memref<64x1024xf32, #tpu.memory_space<vmem>>, %arg10: memref<64x256xf32, #tpu.memory_space<vmem>>) attributes {dimension_semantics = [#tpu.dimension_semantics<parallel>], iteration_bounds = array<i64: 2>, scalar_prefetch = 0 : i64, scratch_operands = 2 : i64, tpu.core_type = #tpu.core_type<tc>, window_params = [{transform_indices = @transform_0, window_bounds = array<i64: 64, 8>}, {pipeline_mode = #tpu.pipeline_mode<synchronous>, transform_indices = @transform_1, window_bounds = array<i64: 8, 1024>}, {pipeline_mode = #tpu.pipeline_mode<synchronous>, transform_indices = @transform_2, window_bounds = array<i64: 256, 1024>}, {pipeline_mode = #tpu.pipeline_mode<synchronous>, transform_indices = @transform_3, window_bounds = array<i64: 1, 1024>}, {pipeline_mode = #tpu.pipeline_mode<synchronous>, transform_indices = @transform_4, window_bounds = array<i64: 256, 1024>}, {pipeline_mode = #tpu.pipeline_mode<synchronous>, transform_indices = @transform_5, window_bounds = array<i64: 256, 256>}, {pipeline_mode = #tpu.pipeline_mode<synchronous>, transform_indices = @transform_6, window_bounds = array<i64: 1, 256>}, {transform_indices = @transform_7, window_bounds = array<i64: 8, 256>}]} {
    %c0 = arith.constant 0 : index
    %c0_0 = arith.constant 0 : index
    %0 = vector.load %arg1[%c0, %c0_0] : memref<64x8xf32, #tpu.memory_space<vmem>>, vector<64x8xf32>
    %c0_1 = arith.constant 0 : index
    %c0_2 = arith.constant 0 : index
    %1 = vector.load %arg2[%c0_1, %c0_2] : memref<8x1024xf32, #tpu.memory_space<vmem>>, vector<8x1024xf32>
    %cst = arith.constant dense<0.000000e+00> : vector<64x1024xf32>
    %2 = tpu.matmul %0, %1, %cst {dimension_numbers = #tpu.dot_dimension_numbers<[1], [0], [0], [1], [0, 0, 1, 1], [], []>} : vector<64x8xf32>, vector<8x1024xf32>, vector<64x1024xf32> -> vector<64x1024xf32>
    %c0_3 = arith.constant 0 : index
    %c0_4 = arith.constant 0 : index
    %3 = vector.load %arg9[%c0_3, %c0_4] : memref<64x1024xf32, #tpu.memory_space<vmem>>, vector<64x1024xf32>
    tpu.vector_store %arg9[%c0_3, %c0_4], %2 {strides = array<i32>} : memref<64x1024xf32, #tpu.memory_space<vmem>>, vector<64x1024xf32>,
    %c0_5 = arith.constant 0 : index
    %c0_6 = arith.constant 0 : index
    %4 = vector.load %arg5[%c0_5, %c0_6] : memref<256x1024xf32, #tpu.memory_space<vmem>>, vector<128x512xf32>
    %c0_7 = arith.constant 0 : index
    %c512 = arith.constant 512 : index
    %5 = vector.load %arg5[%c0_7, %c512] : memref<256x1024xf32, #tpu.memory_space<vmem>>, vector<128x512xf32>
    %cst_8 = arith.constant 0.000000e+00 : f32
    %6 = vector.broadcast %cst_8 : f32 to vector<8x128xf32>
    %cst_9 = arith.constant 0.000000e+00 : f32
    %7 = vector.broadcast %cst_9 : f32 to vector<8x128xf32>
    %cst_10 = arith.constant 0.000000e+00 : f32
    %8 = vector.broadcast %cst_10 : f32 to vector<8x128xf32>
    %cst_11 = arith.constant 0.000000e+00 : f32
    %9 = vector.broadcast %cst_11 : f32 to vector<8x128xf32>
    %cst_12 = arith.constant dense<0.000000e+00> : vector<8x512xf32>
    %10 = tpu.matmul %6, %4, %cst_12 {dimension_numbers = #tpu.dot_dimension_numbers<[1], [0], [0], [1], [0, 0, 1, 1], [], []>} : vector<8x128xf32>, vector<128x512xf32>, vector<8x512xf32> -> vector<8x512xf32>
    %c0_13 = arith.constant 0 : index
    %c0_14 = arith.constant 0 : index
    %11 = vector.load %arg9[%c0_13, %c0_14] : memref<64x1024xf32, #tpu.memory_space<vmem>>, vector<8x512xf32>
    %12 = arith.addf %10, %11 : vector<8x512xf32>
    %cst_15 = arith.constant dense<0.000000e+00> : vector<8x512xf32>
    %13 = tpu.matmul %8, %5, %cst_15 {dimension_numbers = #tpu.dot_dimension_numbers<[1], [0], [0], [1], [0, 0, 1, 1], [], []>} : vector<8x128xf32>, vector<128x512xf32>, vector<8x512xf32> -> vector<8x512xf32>
    %c56 = arith.constant 56 : index
    %c512_16 = arith.constant 512 : index
    %14 = vector.load %arg9[%c56, %c512_16] : memref<64x1024xf32, #tpu.memory_space<vmem>>, vector<8x512xf32>
    %15 = arith.addf %13, %14 : vector<8x512xf32>
    %16 = vector.extract_strided_slice %12 {offsets = [0, 0], sizes = [8, 384], strides = [1, 1]} : vector<8x512xf32> to vector<8x384xf32>
    %cst_17 = arith.constant 5.000000e-01 : f32
    %17 = vector.broadcast %cst_17 : f32 to vector<8x384xf32>
    %18 = arith.mulf %17, %16 : vector<8x384xf32>
    %19 = math.tanh %18 : vector<8x384xf32>
    %cst_18 = arith.constant 1.000000e+00 : f32
    %20 = vector.broadcast %cst_18 : f32 to vector<8x384xf32>
    %21 = arith.addf %19, %20 : vector<8x384xf32>
    %cst_19 = arith.constant 5.000000e-01 : f32
    %22 = vector.broadcast %cst_19 : f32 to vector<8x384xf32>
    %23 = arith.mulf %22, %21 : vector<8x384xf32>
    %24 = vector.extract_strided_slice %23 {offsets = [0, 0], sizes = [8, 128], strides = [1, 1]} : vector<8x384xf32> to vector<8x128xf32>
    %25 = vector.extract_strided_slice %23 {offsets = [0, 128], sizes = [8, 128], strides = [1, 1]} : vector<8x384xf32> to vector<8x128xf32>
    %26 = vector.extract_strided_slice %23 {offsets = [0, 256], sizes = [8, 128], strides = [1, 1]} : vector<8x384xf32> to vector<8x128xf32>
    %27 = vector.extract_strided_slice %12 {offsets = [0, 384], sizes = [8, 128], strides = [1, 1]} : vector<8x512xf32> to vector<8x128xf32>
    %28 = math.tanh %27 : vector<8x128xf32>
    %29 = arith.mulf %25, %7 : vector<8x128xf32>
    %30 = arith.mulf %24, %28 : vector<8x128xf32>
    %31 = arith.addf %29, %30 : vector<8x128xf32>
    %32 = math.tanh %31 : vector<8x128xf32>
    %33 = arith.mulf %26, %32 : vector<8x128xf32>
    %34 = vector.extract_strided_slice %15 {offsets = [0, 0], sizes = [8, 384], strides = [1, 1]} : vector<8x512xf32> to vector<8x384xf32>
    %cst_20 = arith.constant 5.000000e-01 : f32
    %35 = vector.broadcast %cst_20 : f32 to vector<8x384xf32>
    %36 = arith.mulf %35, %34 : vector<8x384xf32>
    %37 = math.tanh %36 : vector<8x384xf32>
    %cst_21 = arith.constant 1.000000e+00 : f32
    %38 = vector.broadcast %cst_21 : f32 to vector<8x384xf32>
    %39 = arith.addf %37, %38 : vector<8x384xf32>
    %cst_22 = arith.constant 5.000000e-01 : f32
    %40 = vector.broadcast %cst_22 : f32 to vector<8x384xf32>
    %41 = arith.mulf %40, %39 : vector<8x384xf32>
    %42 = vector.extract_strided_slice %41 {offsets = [0, 0], sizes = [8, 128], strides = [1, 1]} : vector<8x384xf32> to vector<8x128xf32>
    %43 = vector.extract_strided_slice %41 {offsets = [0, 128], sizes = [8, 128], strides = [1, 1]} : vector<8x384xf32> to vector<8x128xf32>
    %44 = vector.extract_strided_slice %41 {offsets = [0, 256], sizes = [8, 128], strides = [1, 1]} : vector<8x384xf32> to vector<8x128xf32>
    %45 = vector.extract_strided_slice %15 {offsets = [0, 384], sizes = [8, 128], strides = [1, 1]} : vector<8x512xf32> to vector<8x128xf32>
    %46 = math.tanh %45 : vector<8x128xf32>
    %47 = arith.mulf %43, %9 : vector<8x128xf32>
    %48 = arith.mulf %42, %46 : vector<8x128xf32>
    %49 = arith.addf %47, %48 : vector<8x128xf32>
    %50 = math.tanh %49 : vector<8x128xf32>
    %51 = arith.mulf %44, %50 : vector<8x128xf32>
    %c0_23 = arith.constant 0 : index
    %c0_24 = arith.constant 0 : index
    %52 = vector.load %arg10[%c0_23, %c0_24] : memref<64x256xf32, #tpu.memory_space<vmem>>, vector<8x128xf32>
    tpu.vector_store %arg10[%c0_23, %c0_24], %33 {strides = array<i32>} : memref<64x256xf32, #tpu.memory_space<vmem>>, vector<8x128xf32>,
    %c56_25 = arith.constant 56 : index
    %c128 = arith.constant 128 : index
    %53 = vector.load %arg10[%c56_25, %c128] : memref<64x256xf32, #tpu.memory_space<vmem>>, vector<8x128xf32>
    tpu.vector_store %arg10[%c56_25, %c128], %51 {strides = array<i32>} : memref<64x256xf32, #tpu.memory_space<vmem>>, vector<8x128xf32>,
    %cst_26 = arith.constant dense<0.000000e+00> : vector<8x512xf32>
    %54 = tpu.matmul %33, %4, %cst_26 {dimension_numbers = #tpu.dot_dimension_numbers<[1], [0], [0], [1], [0, 0, 1, 1], [], []>} : vector<8x128xf32>, vector<128x512xf32>, vector<8x512xf32> -> vector<8x512xf32>
    %c8 = arith.constant 8 : index
    %c0_27 = arith.constant 0 : index
    %55 = vector.load %arg9[%c8, %c0_27] : memref<64x1024xf32, #tpu.memory_space<vmem>>, vector<8x512xf32>
    %56 = arith.addf %54, %55 : vector<8x512xf32>
    %cst_28 = arith.constant dense<0.000000e+00> : vector<8x512xf32>
    %57 = tpu.matmul %51, %5, %cst_28 {dimension_numbers = #tpu.dot_dimension_numbers<[1], [0], [0], [1], [0, 0, 1, 1], [], []>} : vector<8x128xf32>, vector<128x512xf32>, vector<8x512xf32> -> vector<8x512xf32>
    %c48 = arith.constant 48 : index
    %c512_29 = arith.constant 512 : index
    %58 = vector.load %arg9[%c48, %c512_29] : memref<64x1024xf32, #tpu.memory_space<vmem>>, vector<8x512xf32>
    %59 = arith.addf %57, %58 : vector<8x512xf32>
    %60 = vector.extract_strided_slice %56 {offsets = [0, 0], sizes = [8, 384], strides = [1, 1]} : vector<8x512xf32> to vector<8x384xf32>
    %cst_30 = arith.constant 5.000000e-01 : f32
    %61 = vector.broadcast %cst_30 : f32 to vector<8x384xf32>
    %62 = arith.mulf %61, %60 : vector<8x384xf32>
    %63 = math.tanh %62 : vector<8x384xf32>
    %cst_31 = arith.constant 1.000000e+00 : f32
    %64 = vector.broadcast %cst_31 : f32 to vector<8x384xf32>
    %65 = arith.addf %63, %64 : vector<8x384xf32>
    %cst_32 = arith.constant 5.000000e-01 : f32
    %66 = vector.broadcast %cst_32 : f32 to vector<8x384xf32>
    %67 = arith.mulf %66, %65 : vector<8x384xf32>
    %68 = vector.extract_strided_slice %67 {offsets = [0, 0], sizes = [8, 128], strides = [1, 1]} : vector<8x384xf32> to vector<8x128xf32>
    %69 = vector.extract_strided_slice %67 {offsets = [0, 128], sizes = [8, 128], strides = [1, 1]} : vector<8x384xf32> to vector<8x128xf32>
    %70 = vector.extract_strided_slice %67 {offsets = [0, 256], sizes = [8, 128], strides = [1, 1]} : vector<8x384xf32> to vector<8x128xf32>
    %71 = vector.extract_strided_slice %56 {offsets = [0, 384], sizes = [8, 128], strides = [1, 1]} : vector<8x512xf32> to vector<8x128xf32>
    %72 = math.tanh %71 : vector<8x128xf32>
    %73 = arith.mulf %69, %31 : vector<8x128xf32>
    %74 = arith.mulf %68, %72 : vector<8x128xf32>
    %75 = arith.addf %73, %74 : vector<8x128xf32>
    %76 = math.tanh %75 : vector<8x128xf32>
    %77 = arith.mulf %70, %76 : vector<8x128xf32>
    %78 = vector.extract_strided_slice %59 {offsets = [0, 0], sizes = [8, 384], strides = [1, 1]} : vector<8x512xf32> to vector<8x384xf32>
    %cst_33 = arith.constant 5.000000e-01 : f32
    %79 = vector.broadcast %cst_33 : f32 to vector<8x384xf32>
    %80 = arith.mulf %79, %78 : vector<8x384xf32>
    %81 = math.tanh %80 : vector<8x384xf32>
    %cst_34 = arith.constant 1.000000e+00 : f32
    %82 = vector.broadcast %cst_34 : f32 to vector<8x384xf32>
    %83 = arith.addf %81, %82 : vector<8x384xf32>
    %cst_35 = arith.constant 5.000000e-01 : f32
    %84 = vector.broadcast %cst_35 : f32 to vector<8x384xf32>
    %85 = arith.mulf %84, %83 : vector<8x384xf32>
    %86 = vector.extract_strided_slice %85 {offsets = [0, 0], sizes = [8, 128], strides = [1, 1]} : vector<8x384xf32> to vector<8x128xf32>
    %87 = vector.extract_strided_slice %85 {offsets = [0, 128], sizes = [8, 128], strides = [1, 1]} : vector<8x384xf32> to vector<8x128xf32>
    %88 = vector.extract_strided_slice %85 {offsets = [0, 256], sizes = [8, 128], strides = [1, 1]} : vector<8x384xf32> to vector<8x128xf32>
    %89 = vector.extract_strided_slice %59 {offsets = [0, 384], sizes = [8, 128], strides = [1, 1]} : vector<8x512xf32> to vector<8x128xf32>
    %90 = math.tanh %89 : vector<8x128xf32>
    %91 = arith.mulf %87, %49 : vector<8x128xf32>
    %92 = arith.mulf %86, %90 : vector<8x128xf32>
    %93 = arith.addf %91, %92 : vector<8x128xf32>
    %94 = math.tanh %93 : vector<8x128xf32>
    %95 = arith.mulf %88, %94 : vector<8x128xf32>
    %c8_36 = arith.constant 8 : index
    %c0_37 = arith.constant 0 : index
    %96 = vector.load %arg10[%c8_36, %c0_37] : memref<64x256xf32, #tpu.memory_space<vmem>>, vector<8x128xf32>
    tpu.vector_store %arg10[%c8_36, %c0_37], %77 {strides = array<i32>} : memref<64x256xf32, #tpu.memory_space<vmem>>, vector<8x128xf32>,
    %c48_38 = arith.constant 48 : index
    %c128_39 = arith.constant 128 : index
    %97 = vector.load %arg10[%c48_38, %c128_39] : memref<64x256xf32, #tpu.memory_space<vmem>>, vector<8x128xf32>
    tpu.vector_store %arg10[%c48_38, %c128_39], %95 {strides = array<i32>} : memref<64x256xf32, #tpu.memory_space<vmem>>, vector<8x128xf32>,
    %cst_40 = arith.constant dense<0.000000e+00> : vector<8x512xf32>
    %98 = tpu.matmul %77, %4, %cst_40 {dimension_numbers = #tpu.dot_dimension_numbers<[1], [0], [0], [1], [0, 0, 1, 1], [], []>} : vector<8x128xf32>, vector<128x512xf32>, vector<8x512xf32> -> vector<8x512xf32>
    %c16 = arith.constant 16 : index
    %c0_41 = arith.constant 0 : index
    %99 = vector.load %arg9[%c16, %c0_41] : memref<64x1024xf32, #tpu.memory_space<vmem>>, vector<8x512xf32>
    %100 = arith.addf %98, %99 : vector<8x512xf32>
    %cst_42 = arith.constant dense<0.000000e+00> : vector<8x512xf32>
    %101 = tpu.matmul %95, %5, %cst_42 {dimension_numbers = #tpu.dot_dimension_numbers<[1], [0], [0], [1], [0, 0, 1, 1], [], []>} : vector<8x128xf32>, vector<128x512xf32>, vector<8x512xf32> -> vector<8x512xf32>
    %c40 = arith.constant 40 : index
    %c512_43 = arith.constant 512 : index
    %102 = vector.load %arg9[%c40, %c512_43] : memref<64x1024xf32, #tpu.memory_space<vmem>>, vector<8x512xf32>
    %103 = arith.addf %101, %102 : vector<8x512xf32>
    %104 = vector.extract_strided_slice %100 {offsets = [0, 0], sizes = [8, 384], strides = [1, 1]} : vector<8x512xf32> to vector<8x384xf32>
    %cst_44 = arith.constant 5.000000e-01 : f32
    %105 = vector.broadcast %cst_44 : f32 to vector<8x384xf32>
    %106 = arith.mulf %105, %104 : vector<8x384xf32>
    %107 = math.tanh %106 : vector<8x384xf32>
    %cst_45 = arith.constant 1.000000e+00 : f32
    %108 = vector.broadcast %cst_45 : f32 to vector<8x384xf32>
    %109 = arith.addf %107, %108 : vector<8x384xf32>
    %cst_46 = arith.constant 5.000000e-01 : f32
    %110 = vector.broadcast %cst_46 : f32 to vector<8x384xf32>
    %111 = arith.mulf %110, %109 : vector<8x384xf32>
    %112 = vector.extract_strided_slice %111 {offsets = [0, 0], sizes = [8, 128], strides = [1, 1]} : vector<8x384xf32> to vector<8x128xf32>
    %113 = vector.extract_strided_slice %111 {offsets = [0, 128], sizes = [8, 128], strides = [1, 1]} : vector<8x384xf32> to vector<8x128xf32>
    %114 = vector.extract_strided_slice %111 {offsets = [0, 256], sizes = [8, 128], strides = [1, 1]} : vector<8x384xf32> to vector<8x128xf32>
    %115 = vector.extract_strided_slice %100 {offsets = [0, 384], sizes = [8, 128], strides = [1, 1]} : vector<8x512xf32> to vector<8x128xf32>
    %116 = math.tanh %115 : vector<8x128xf32>
    %117 = arith.mulf %113, %75 : vector<8x128xf32>
    %118 = arith.mulf %112, %116 : vector<8x128xf32>
    %119 = arith.addf %117, %118 : vector<8x128xf32>
    %120 = math.tanh %119 : vector<8x128xf32>
    %121 = arith.mulf %114, %120 : vector<8x128xf32>
    %122 = vector.extract_strided_slice %103 {offsets = [0, 0], sizes = [8, 384], strides = [1, 1]} : vector<8x512xf32> to vector<8x384xf32>
    %cst_47 = arith.constant 5.000000e-01 : f32
    %123 = vector.broadcast %cst_47 : f32 to vector<8x384xf32>
    %124 = arith.mulf %123, %122 : vector<8x384xf32>
    %125 = math.tanh %124 : vector<8x384xf32>
    %cst_48 = arith.constant 1.000000e+00 : f32
    %126 = vector.broadcast %cst_48 : f32 to vector<8x384xf32>
    %127 = arith.addf %125, %126 : vector<8x384xf32>
    %cst_49 = arith.constant 5.000000e-01 : f32
    %128 = vector.broadcast %cst_49 : f32 to vector<8x384xf32>
    %129 = arith.mulf %128, %127 : vector<8x384xf32>
    %130 = vector.extract_strided_slice %129 {offsets = [0, 0], sizes = [8, 128], strides = [1, 1]} : vector<8x384xf32> to vector<8x128xf32>
    %131 = vector.extract_strided_slice %129 {offsets = [0, 128], sizes = [8, 128], strides = [1, 1]} : vector<8x384xf32> to vector<8x128xf32>
    %132 = vector.extract_strided_slice %129 {offsets = [0, 256], sizes = [8, 128], strides = [1, 1]} : vector<8x384xf32> to vector<8x128xf32>
    %133 = vector.extract_strided_slice %103 {offsets = [0, 384], sizes = [8, 128], strides = [1, 1]} : vector<8x512xf32> to vector<8x128xf32>
    %134 = math.tanh %133 : vector<8x128xf32>
    %135 = arith.mulf %131, %93 : vector<8x128xf32>
    %136 = arith.mulf %130, %134 : vector<8x128xf32>
    %137 = arith.addf %135, %136 : vector<8x128xf32>
    %138 = math.tanh %137 : vector<8x128xf32>
    %139 = arith.mulf %132, %138 : vector<8x128xf32>
    %c16_50 = arith.constant 16 : index
    %c0_51 = arith.constant 0 : index
    %140 = vector.load %arg10[%c16_50, %c0_51] : memref<64x256xf32, #tpu.memory_space<vmem>>, vector<8x128xf32>
    tpu.vector_store %arg10[%c16_50, %c0_51], %121 {strides = array<i32>} : memref<64x256xf32, #tpu.memory_space<vmem>>, vector<8x128xf32>,
    %c40_52 = arith.constant 40 : index
    %c128_53 = arith.constant 128 : index
    %141 = vector.load %arg10[%c40_52, %c128_53] : memref<64x256xf32, #tpu.memory_space<vmem>>, vector<8x128xf32>
    tpu.vector_store %arg10[%c40_52, %c128_53], %139 {strides = array<i32>} : memref<64x256xf32, #tpu.memory_space<vmem>>, vector<8x128xf32>,
    %cst_54 = arith.constant dense<0.000000e+00> : vector<8x512xf32>
    %142 = tpu.matmul %121, %4, %cst_54 {dimension_numbers = #tpu.dot_dimension_numbers<[1], [0], [0], [1], [0, 0, 1, 1], [], []>} : vector<8x128xf32>, vector<128x512xf32>, vector<8x512xf32> -> vector<8x512xf32>
    %c24 = arith.constant 24 : index
    %c0_55 = arith.constant 0 : index
    %143 = vector.load %arg9[%c24, %c0_55] : memref<64x1024xf32, #tpu.memory_space<vmem>>, vector<8x512xf32>
    %144 = arith.addf %142, %143 : vector<8x512xf32>
    %cst_56 = arith.constant dense<0.000000e+00> : vector<8x512xf32>
    %145 = tpu.matmul %139, %5, %cst_56 {dimension_numbers = #tpu.dot_dimension_numbers<[1], [0], [0], [1], [0, 0, 1, 1], [], []>} : vector<8x128xf32>, vector<128x512xf32>, vector<8x512xf32> -> vector<8x512xf32>
    %c32 = arith.constant 32 : index
    %c512_57 = arith.constant 512 : index
    %146 = vector.load %arg9[%c32, %c512_57] : memref<64x1024xf32, #tpu.memory_space<vmem>>, vector<8x512xf32>
    %147 = arith.addf %145, %146 : vector<8x512xf32>
    %148 = vector.extract_strided_slice %144 {offsets = [0, 0], sizes = [8, 384], strides = [1, 1]} : vector<8x512xf32> to vector<8x384xf32>
    %cst_58 = arith.constant 5.000000e-01 : f32
    %149 = vector.broadcast %cst_58 : f32 to vector<8x384xf32>
    %150 = arith.mulf %149, %148 : vector<8x384xf32>
    %151 = math.tanh %150 : vector<8x384xf32>
    %cst_59 = arith.constant 1.000000e+00 : f32
    %152 = vector.broadcast %cst_59 : f32 to vector<8x384xf32>
    %153 = arith.addf %151, %152 : vector<8x384xf32>
    %cst_60 = arith.constant 5.000000e-01 : f32
    %154 = vector.broadcast %cst_60 : f32 to vector<8x384xf32>
    %155 = arith.mulf %154, %153 : vector<8x384xf32>
    %156 = vector.extract_strided_slice %155 {offsets = [0, 0], sizes = [8, 128], strides = [1, 1]} : vector<8x384xf32> to vector<8x128xf32>
    %157 = vector.extract_strided_slice %155 {offsets = [0, 128], sizes = [8, 128], strides = [1, 1]} : vector<8x384xf32> to vector<8x128xf32>
    %158 = vector.extract_strided_slice %155 {offsets = [0, 256], sizes = [8, 128], strides = [1, 1]} : vector<8x384xf32> to vector<8x128xf32>
    %159 = vector.extract_strided_slice %144 {offsets = [0, 384], sizes = [8, 128], strides = [1, 1]} : vector<8x512xf32> to vector<8x128xf32>
    %160 = math.tanh %159 : vector<8x128xf32>
    %161 = arith.mulf %157, %119 : vector<8x128xf32>
    %162 = arith.mulf %156, %160 : vector<8x128xf32>
    %163 = arith.addf %161, %162 : vector<8x128xf32>
    %164 = math.tanh %163 : vector<8x128xf32>
    %165 = arith.mulf %158, %164 : vector<8x128xf32>
    %166 = vector.extract_strided_slice %147 {offsets = [0, 0], sizes = [8, 384], strides = [1, 1]} : vector<8x512xf32> to vector<8x384xf32>
    %cst_61 = arith.constant 5.000000e-01 : f32
    %167 = vector.broadcast %cst_61 : f32 to vector<8x384xf32>
    %168 = arith.mulf %167, %166 : vector<8x384xf32>
    %169 = math.tanh %168 : vector<8x384xf32>
    %cst_62 = arith.constant 1.000000e+00 : f32
    %170 = vector.broadcast %cst_62 : f32 to vector<8x384xf32>
    %171 = arith.addf %169, %170 : vector<8x384xf32>
    %cst_63 = arith.constant 5.000000e-01 : f32
    %172 = vector.broadcast %cst_63 : f32 to vector<8x384xf32>
    %173 = arith.mulf %172, %171 : vector<8x384xf32>
    %174 = vector.extract_strided_slice %173 {offsets = [0, 0], sizes = [8, 128], strides = [1, 1]} : vector<8x384xf32> to vector<8x128xf32>
    %175 = vector.extract_strided_slice %173 {offsets = [0, 128], sizes = [8, 128], strides = [1, 1]} : vector<8x384xf32> to vector<8x128xf32>
    %176 = vector.extract_strided_slice %173 {offsets = [0, 256], sizes = [8, 128], strides = [1, 1]} : vector<8x384xf32> to vector<8x128xf32>
    %177 = vector.extract_strided_slice %147 {offsets = [0, 384], sizes = [8, 128], strides = [1, 1]} : vector<8x512xf32> to vector<8x128xf32>
    %178 = math.tanh %177 : vector<8x128xf32>
    %179 = arith.mulf %175, %137 : vector<8x128xf32>
    %180 = arith.mulf %174, %178 : vector<8x128xf32>
    %181 = arith.addf %179, %180 : vector<8x128xf32>
    %182 = math.tanh %181 : vector<8x128xf32>
    %183 = arith.mulf %176, %182 : vector<8x128xf32>
    %c24_64 = arith.constant 24 : index
    %c0_65 = arith.constant 0 : index
    %184 = vector.load %arg10[%c24_64, %c0_65] : memref<64x256xf32, #tpu.memory_space<vmem>>, vector<8x128xf32>
    tpu.vector_store %arg10[%c24_64, %c0_65], %165 {strides = array<i32>} : memref<64x256xf32, #tpu.memory_space<vmem>>, vector<8x128xf32>,
    %c32_66 = arith.constant 32 : index
    %c128_67 = arith.constant 128 : index
    %185 = vector.load %arg10[%c32_66, %c128_67] : memref<64x256xf32, #tpu.memory_space<vmem>>, vector<8x128xf32>
    tpu.vector_store %arg10[%c32_66, %c128_67], %183 {strides = array<i32>} : memref<64x256xf32, #tpu.memory_space<vmem>>, vector<8x128xf32>,
    %cst_68 = arith.constant dense<0.000000e+00> : vector<8x512xf32>
    %186 = tpu.matmul %165, %4, %cst_68 {dimension_numbers = #tpu.dot_dimension_numbers<[1], [0], [0], [1], [0, 0, 1, 1], [], []>} : vector<8x128xf32>, vector<128x512xf32>, vector<8x512xf32> -> vector<8x512xf32>
    %c32_69 = arith.constant 32 : index
    %c0_70 = arith.constant 0 : index
    %187 = vector.load %arg9[%c32_69, %c0_70] : memref<64x1024xf32, #tpu.memory_space<vmem>>, vector<8x512xf32>
    %188 = arith.addf %186, %187 : vector<8x512xf32>
    %cst_71 = arith.constant dense<0.000000e+00> : vector<8x512xf32>
    %189 = tpu.matmul %183, %5, %cst_71 {dimension_numbers = #tpu.dot_dimension_numbers<[1], [0], [0], [1], [0, 0, 1, 1], [], []>} : vector<8x128xf32>, vector<128x512xf32>, vector<8x512xf32> -> vector<8x512xf32>
    %c24_72 = arith.constant 24 : index
    %c512_73 = arith.constant 512 : index
    %190 = vector.load %arg9[%c24_72, %c512_73] : memref<64x1024xf32, #tpu.memory_space<vmem>>, vector<8x512xf32>
    %191 = arith.addf %189, %190 : vector<8x512xf32>
    %192 = vector.extract_strided_slice %188 {offsets = [0, 0], sizes = [8, 384], strides = [1, 1]} : vector<8x512xf32> to vector<8x384xf32>
    %cst_74 = arith.constant 5.000000e-01 : f32
    %193 = vector.broadcast %cst_74 : f32 to vector<8x384xf32>
    %194 = arith.mulf %193, %192 : vector<8x384xf32>
    %195 = math.tanh %194 : vector<8x384xf32>
    %cst_75 = arith.constant 1.000000e+00 : f32
    %196 = vector.broadcast %cst_75 : f32 to vector<8x384xf32>
    %197 = arith.addf %195, %196 : vector<8x384xf32>
    %cst_76 = arith.constant 5.000000e-01 : f32
    %198 = vector.broadcast %cst_76 : f32 to vector<8x384xf32>
    %199 = arith.mulf %198, %197 : vector<8x384xf32>
    %200 = vector.extract_strided_slice %199 {offsets = [0, 0], sizes = [8, 128], strides = [1, 1]} : vector<8x384xf32> to vector<8x128xf32>
    %201 = vector.extract_strided_slice %199 {offsets = [0, 128], sizes = [8, 128], strides = [1, 1]} : vector<8x384xf32> to vector<8x128xf32>
    %202 = vector.extract_strided_slice %199 {offsets = [0, 256], sizes = [8, 128], strides = [1, 1]} : vector<8x384xf32> to vector<8x128xf32>
    %203 = vector.extract_strided_slice %188 {offsets = [0, 384], sizes = [8, 128], strides = [1, 1]} : vector<8x512xf32> to vector<8x128xf32>
    %204 = math.tanh %203 : vector<8x128xf32>
    %205 = arith.mulf %201, %163 : vector<8x128xf32>
    %206 = arith.mulf %200, %204 : vector<8x128xf32>
    %207 = arith.addf %205, %206 : vector<8x128xf32>
    %208 = math.tanh %207 : vector<8x128xf32>
    %209 = arith.mulf %202, %208 : vector<8x128xf32>
    %210 = vector.extract_strided_slice %191 {offsets = [0, 0], sizes = [8, 384], strides = [1, 1]} : vector<8x512xf32> to vector<8x384xf32>
    %cst_77 = arith.constant 5.000000e-01 : f32
    %211 = vector.broadcast %cst_77 : f32 to vector<8x384xf32>
    %212 = arith.mulf %211, %210 : vector<8x384xf32>
    %213 = math.tanh %212 : vector<8x384xf32>
    %cst_78 = arith.constant 1.000000e+00 : f32
    %214 = vector.broadcast %cst_78 : f32 to vector<8x384xf32>
    %215 = arith.addf %213, %214 : vector<8x384xf32>
    %cst_79 = arith.constant 5.000000e-01 : f32
    %216 = vector.broadcast %cst_79 : f32 to vector<8x384xf32>
    %217 = arith.mulf %216, %215 : vector<8x384xf32>
    %218 = vector.extract_strided_slice %217 {offsets = [0, 0], sizes = [8, 128], strides = [1, 1]} : vector<8x384xf32> to vector<8x128xf32>
    %219 = vector.extract_strided_slice %217 {offsets = [0, 128], sizes = [8, 128], strides = [1, 1]} : vector<8x384xf32> to vector<8x128xf32>
    %220 = vector.extract_strided_slice %217 {offsets = [0, 256], sizes = [8, 128], strides = [1, 1]} : vector<8x384xf32> to vector<8x128xf32>
    %221 = vector.extract_strided_slice %191 {offsets = [0, 384], sizes = [8, 128], strides = [1, 1]} : vector<8x512xf32> to vector<8x128xf32>
    %222 = math.tanh %221 : vector<8x128xf32>
    %223 = arith.mulf %219, %181 : vector<8x128xf32>
    %224 = arith.mulf %218, %222 : vector<8x128xf32>
    %225 = arith.addf %223, %224 : vector<8x128xf32>
    %226 = math.tanh %225 : vector<8x128xf32>
    %227 = arith.mulf %220, %226 : vector<8x128xf32>
    %c32_80 = arith.constant 32 : index
    %c0_81 = arith.constant 0 : index
    %228 = vector.load %arg10[%c32_80, %c0_81] : memref<64x256xf32, #tpu.memory_space<vmem>>, vector<8x128xf32>
    tpu.vector_store %arg10[%c32_80, %c0_81], %209 {strides = array<i32>} : memref<64x256xf32, #tpu.memory_space<vmem>>, vector<8x128xf32>,
    %c24_82 = arith.constant 24 : index
    %c128_83 = arith.constant 128 : index
    %229 = vector.load %arg10[%c24_82, %c128_83] : memref<64x256xf32, #tpu.memory_space<vmem>>, vector<8x128xf32>
    tpu.vector_store %arg10[%c24_82, %c128_83], %227 {strides = array<i32>} : memref<64x256xf32, #tpu.memory_space<vmem>>, vector<8x128xf32>,
    %cst_84 = arith.constant dense<0.000000e+00> : vector<8x512xf32>
    %230 = tpu.matmul %209, %4, %cst_84 {dimension_numbers = #tpu.dot_dimension_numbers<[1], [0], [0], [1], [0, 0, 1, 1], [], []>} : vector<8x128xf32>, vector<128x512xf32>, vector<8x512xf32> -> vector<8x512xf32>
    %c40_85 = arith.constant 40 : index
    %c0_86 = arith.constant 0 : index
    %231 = vector.load %arg9[%c40_85, %c0_86] : memref<64x1024xf32, #tpu.memory_space<vmem>>, vector<8x512xf32>
    %232 = arith.addf %230, %231 : vector<8x512xf32>
    %cst_87 = arith.constant dense<0.000000e+00> : vector<8x512xf32>
    %233 = tpu.matmul %227, %5, %cst_87 {dimension_numbers = #tpu.dot_dimension_numbers<[1], [0], [0], [1], [0, 0, 1, 1], [], []>} : vector<8x128xf32>, vector<128x512xf32>, vector<8x512xf32> -> vector<8x512xf32>
    %c16_88 = arith.constant 16 : index
    %c512_89 = arith.constant 512 : index
    %234 = vector.load %arg9[%c16_88, %c512_89] : memref<64x1024xf32, #tpu.memory_space<vmem>>, vector<8x512xf32>
    %235 = arith.addf %233, %234 : vector<8x512xf32>
    %236 = vector.extract_strided_slice %232 {offsets = [0, 0], sizes = [8, 384], strides = [1, 1]} : vector<8x512xf32> to vector<8x384xf32>
    %cst_90 = arith.constant 5.000000e-01 : f32
    %237 = vector.broadcast %cst_90 : f32 to vector<8x384xf32>
    %238 = arith.mulf %237, %236 : vector<8x384xf32>
    %239 = math.tanh %238 : vector<8x384xf32>
    %cst_91 = arith.constant 1.000000e+00 : f32
    %240 = vector.broadcast %cst_91 : f32 to vector<8x384xf32>
    %241 = arith.addf %239, %240 : vector<8x384xf32>
    %cst_92 = arith.constant 5.000000e-01 : f32
    %242 = vector.broadcast %cst_92 : f32 to vector<8x384xf32>
    %243 = arith.mulf %242, %241 : vector<8x384xf32>
    %244 = vector.extract_strided_slice %243 {offsets = [0, 0], sizes = [8, 128], strides = [1, 1]} : vector<8x384xf32> to vector<8x128xf32>
    %245 = vector.extract_strided_slice %243 {offsets = [0, 128], sizes = [8, 128], strides = [1, 1]} : vector<8x384xf32> to vector<8x128xf32>
    %246 = vector.extract_strided_slice %243 {offsets = [0, 256], sizes = [8, 128], strides = [1, 1]} : vector<8x384xf32> to vector<8x128xf32>
    %247 = vector.extract_strided_slice %232 {offsets = [0, 384], sizes = [8, 128], strides = [1, 1]} : vector<8x512xf32> to vector<8x128xf32>
    %248 = math.tanh %247 : vector<8x128xf32>
    %249 = arith.mulf %245, %207 : vector<8x128xf32>
    %250 = arith.mulf %244, %248 : vector<8x128xf32>
    %251 = arith.addf %249, %250 : vector<8x128xf32>
    %252 = math.tanh %251 : vector<8x128xf32>
    %253 = arith.mulf %246, %252 : vector<8x128xf32>
    %254 = vector.extract_strided_slice %235 {offsets = [0, 0], sizes = [8, 384], strides = [1, 1]} : vector<8x512xf32> to vector<8x384xf32>
    %cst_93 = arith.constant 5.000000e-01 : f32
    %255 = vector.broadcast %cst_93 : f32 to vector<8x384xf32>
    %256 = arith.mulf %255, %254 : vector<8x384xf32>
    %257 = math.tanh %256 : vector<8x384xf32>
    %cst_94 = arith.constant 1.000000e+00 : f32
    %258 = vector.broadcast %cst_94 : f32 to vector<8x384xf32>
    %259 = arith.addf %257, %258 : vector<8x384xf32>
    %cst_95 = arith.constant 5.000000e-01 : f32
    %260 = vector.broadcast %cst_95 : f32 to vector<8x384xf32>
    %261 = arith.mulf %260, %259 : vector<8x384xf32>
    %262 = vector.extract_strided_slice %261 {offsets = [0, 0], sizes = [8, 128], strides = [1, 1]} : vector<8x384xf32> to vector<8x128xf32>
    %263 = vector.extract_strided_slice %261 {offsets = [0, 128], sizes = [8, 128], strides = [1, 1]} : vector<8x384xf32> to vector<8x128xf32>
    %264 = vector.extract_strided_slice %261 {offsets = [0, 256], sizes = [8, 128], strides = [1, 1]} : vector<8x384xf32> to vector<8x128xf32>
    %265 = vector.extract_strided_slice %235 {offsets = [0, 384], sizes = [8, 128], strides = [1, 1]} : vector<8x512xf32> to vector<8x128xf32>
    %266 = math.tanh %265 : vector<8x128xf32>
    %267 = arith.mulf %263, %225 : vector<8x128xf32>
    %268 = arith.mulf %262, %266 : vector<8x128xf32>
    %269 = arith.addf %267, %268 : vector<8x128xf32>
    %270 = math.tanh %269 : vector<8x128xf32>
    %271 = arith.mulf %264, %270 : vector<8x128xf32>
    %c40_96 = arith.constant 40 : index
    %c0_97 = arith.constant 0 : index
    %272 = vector.load %arg10[%c40_96, %c0_97] : memref<64x256xf32, #tpu.memory_space<vmem>>, vector<8x128xf32>
    tpu.vector_store %arg10[%c40_96, %c0_97], %253 {strides = array<i32>} : memref<64x256xf32, #tpu.memory_space<vmem>>, vector<8x128xf32>,
    %c16_98 = arith.constant 16 : index
    %c128_99 = arith.constant 128 : index
    %273 = vector.load %arg10[%c16_98, %c128_99] : memref<64x256xf32, #tpu.memory_space<vmem>>, vector<8x128xf32>
    tpu.vector_store %arg10[%c16_98, %c128_99], %271 {strides = array<i32>} : memref<64x256xf32, #tpu.memory_space<vmem>>, vector<8x128xf32>,
    %cst_100 = arith.constant dense<0.000000e+00> : vector<8x512xf32>
    %274 = tpu.matmul %253, %4, %cst_100 {dimension_numbers = #tpu.dot_dimension_numbers<[1], [0], [0], [1], [0, 0, 1, 1], [], []>} : vector<8x128xf32>, vector<128x512xf32>, vector<8x512xf32> -> vector<8x512xf32>
    %c48_101 = arith.constant 48 : index
    %c0_102 = arith.constant 0 : index
    %275 = vector.load %arg9[%c48_101, %c0_102] : memref<64x1024xf32, #tpu.memory_space<vmem>>, vector<8x512xf32>
    %276 = arith.addf %274, %275 : vector<8x512xf32>
    %cst_103 = arith.constant dense<0.000000e+00> : vector<8x512xf32>
    %277 = tpu.matmul %271, %5, %cst_103 {dimension_numbers = #tpu.dot_dimension_numbers<[1], [0], [0], [1], [0, 0, 1, 1], [], []>} : vector<8x128xf32>, vector<128x512xf32>, vector<8x512xf32> -> vector<8x512xf32>
    %c8_104 = arith.constant 8 : index
    %c512_105 = arith.constant 512 : index
    %278 = vector.load %arg9[%c8_104, %c512_105] : memref<64x1024xf32, #tpu.memory_space<vmem>>, vector<8x512xf32>
    %279 = arith.addf %277, %278 : vector<8x512xf32>
    %280 = vector.extract_strided_slice %276 {offsets = [0, 0], sizes = [8, 384], strides = [1, 1]} : vector<8x512xf32> to vector<8x384xf32>
    %cst_106 = arith.constant 5.000000e-01 : f32
    %281 = vector.broadcast %cst_106 : f32 to vector<8x384xf32>
    %282 = arith.mulf %281, %280 : vector<8x384xf32>
    %283 = math.tanh %282 : vector<8x384xf32>
    %cst_107 = arith.constant 1.000000e+00 : f32
    %284 = vector.broadcast %cst_107 : f32 to vector<8x384xf32>
    %285 = arith.addf %283, %284 : vector<8x384xf32>
    %cst_108 = arith.constant 5.000000e-01 : f32
    %286 = vector.broadcast %cst_108 : f32 to vector<8x384xf32>
    %287 = arith.mulf %286, %285 : vector<8x384xf32>
    %288 = vector.extract_strided_slice %287 {offsets = [0, 0], sizes = [8, 128], strides = [1, 1]} : vector<8x384xf32> to vector<8x128xf32>
    %289 = vector.extract_strided_slice %287 {offsets = [0, 128], sizes = [8, 128], strides = [1, 1]} : vector<8x384xf32> to vector<8x128xf32>
    %290 = vector.extract_strided_slice %287 {offsets = [0, 256], sizes = [8, 128], strides = [1, 1]} : vector<8x384xf32> to vector<8x128xf32>
    %291 = vector.extract_strided_slice %276 {offsets = [0, 384], sizes = [8, 128], strides = [1, 1]} : vector<8x512xf32> to vector<8x128xf32>
    %292 = math.tanh %291 : vector<8x128xf32>
    %293 = arith.mulf %289, %251 : vector<8x128xf32>
    %294 = arith.mulf %288, %292 : vector<8x128xf32>
    %295 = arith.addf %293, %294 : vector<8x128xf32>
    %296 = math.tanh %295 : vector<8x128xf32>
    %297 = arith.mulf %290, %296 : vector<8x128xf32>
    %298 = vector.extract_strided_slice %279 {offsets = [0, 0], sizes = [8, 384], strides = [1, 1]} : vector<8x512xf32> to vector<8x384xf32>
    %cst_109 = arith.constant 5.000000e-01 : f32
    %299 = vector.broadcast %cst_109 : f32 to vector<8x384xf32>
    %300 = arith.mulf %299, %298 : vector<8x384xf32>
    %301 = math.tanh %300 : vector<8x384xf32>
    %cst_110 = arith.constant 1.000000e+00 : f32
    %302 = vector.broadcast %cst_110 : f32 to vector<8x384xf32>
    %303 = arith.addf %301, %302 : vector<8x384xf32>
    %cst_111 = arith.constant 5.000000e-01 : f32
    %304 = vector.broadcast %cst_111 : f32 to vector<8x384xf32>
    %305 = arith.mulf %304, %303 : vector<8x384xf32>
    %306 = vector.extract_strided_slice %305 {offsets = [0, 0], sizes = [8, 128], strides = [1, 1]} : vector<8x384xf32> to vector<8x128xf32>
    %307 = vector.extract_strided_slice %305 {offsets = [0, 128], sizes = [8, 128], strides = [1, 1]} : vector<8x384xf32> to vector<8x128xf32>
    %308 = vector.extract_strided_slice %305 {offsets = [0, 256], sizes = [8, 128], strides = [1, 1]} : vector<8x384xf32> to vector<8x128xf32>
    %309 = vector.extract_strided_slice %279 {offsets = [0, 384], sizes = [8, 128], strides = [1, 1]} : vector<8x512xf32> to vector<8x128xf32>
    %310 = math.tanh %309 : vector<8x128xf32>
    %311 = arith.mulf %307, %269 : vector<8x128xf32>
    %312 = arith.mulf %306, %310 : vector<8x128xf32>
    %313 = arith.addf %311, %312 : vector<8x128xf32>
    %314 = math.tanh %313 : vector<8x128xf32>
    %315 = arith.mulf %308, %314 : vector<8x128xf32>
    %c48_112 = arith.constant 48 : index
    %c0_113 = arith.constant 0 : index
    %316 = vector.load %arg10[%c48_112, %c0_113] : memref<64x256xf32, #tpu.memory_space<vmem>>, vector<8x128xf32>
    tpu.vector_store %arg10[%c48_112, %c0_113], %297 {strides = array<i32>} : memref<64x256xf32, #tpu.memory_space<vmem>>, vector<8x128xf32>,
    %c8_114 = arith.constant 8 : index
    %c128_115 = arith.constant 128 : index
    %317 = vector.load %arg10[%c8_114, %c128_115] : memref<64x256xf32, #tpu.memory_space<vmem>>, vector<8x128xf32>
    tpu.vector_store %arg10[%c8_114, %c128_115], %315 {strides = array<i32>} : memref<64x256xf32, #tpu.memory_space<vmem>>, vector<8x128xf32>,
    %cst_116 = arith.constant dense<0.000000e+00> : vector<8x512xf32>
    %318 = tpu.matmul %297, %4, %cst_116 {dimension_numbers = #tpu.dot_dimension_numbers<[1], [0], [0], [1], [0, 0, 1, 1], [], []>} : vector<8x128xf32>, vector<128x512xf32>, vector<8x512xf32> -> vector<8x512xf32>
    %c56_117 = arith.constant 56 : index
    %c0_118 = arith.constant 0 : index
    %319 = vector.load %arg9[%c56_117, %c0_118] : memref<64x1024xf32, #tpu.memory_space<vmem>>, vector<8x512xf32>
    %320 = arith.addf %318, %319 : vector<8x512xf32>
    %cst_119 = arith.constant dense<0.000000e+00> : vector<8x512xf32>
    %321 = tpu.matmul %315, %5, %cst_119 {dimension_numbers = #tpu.dot_dimension_numbers<[1], [0], [0], [1], [0, 0, 1, 1], [], []>} : vector<8x128xf32>, vector<128x512xf32>, vector<8x512xf32> -> vector<8x512xf32>
    %c0_120 = arith.constant 0 : index
    %c512_121 = arith.constant 512 : index
    %322 = vector.load %arg9[%c0_120, %c512_121] : memref<64x1024xf32, #tpu.memory_space<vmem>>, vector<8x512xf32>
    %323 = arith.addf %321, %322 : vector<8x512xf32>
    %324 = vector.extract_strided_slice %320 {offsets = [0, 0], sizes = [8, 384], strides = [1, 1]} : vector<8x512xf32> to vector<8x384xf32>
    %cst_122 = arith.constant 5.000000e-01 : f32
    %325 = vector.broadcast %cst_122 : f32 to vector<8x384xf32>
    %326 = arith.mulf %325, %324 : vector<8x384xf32>
    %327 = math.tanh %326 : vector<8x384xf32>
    %cst_123 = arith.constant 1.000000e+00 : f32
    %328 = vector.broadcast %cst_123 : f32 to vector<8x384xf32>
    %329 = arith.addf %327, %328 : vector<8x384xf32>
    %cst_124 = arith.constant 5.000000e-01 : f32
    %330 = vector.broadcast %cst_124 : f32 to vector<8x384xf32>
    %331 = arith.mulf %330, %329 : vector<8x384xf32>
    %332 = vector.extract_strided_slice %331 {offsets = [0, 0], sizes = [8, 128], strides = [1, 1]} : vector<8x384xf32> to vector<8x128xf32>
    %333 = vector.extract_strided_slice %331 {offsets = [0, 128], sizes = [8, 128], strides = [1, 1]} : vector<8x384xf32> to vector<8x128xf32>
    %334 = vector.extract_strided_slice %331 {offsets = [0, 256], sizes = [8, 128], strides = [1, 1]} : vector<8x384xf32> to vector<8x128xf32>
    %335 = vector.extract_strided_slice %320 {offsets = [0, 384], sizes = [8, 128], strides = [1, 1]} : vector<8x512xf32> to vector<8x128xf32>
    %336 = math.tanh %335 : vector<8x128xf32>
    %337 = arith.mulf %333, %295 : vector<8x128xf32>
    %338 = arith.mulf %332, %336 : vector<8x128xf32>
    %339 = arith.addf %337, %338 : vector<8x128xf32>
    %340 = math.tanh %339 : vector<8x128xf32>
    %341 = arith.mulf %334, %340 : vector<8x128xf32>
    %342 = vector.extract_strided_slice %323 {offsets = [0, 0], sizes = [8, 384], strides = [1, 1]} : vector<8x512xf32> to vector<8x384xf32>
    %cst_125 = arith.constant 5.000000e-01 : f32
    %343 = vector.broadcast %cst_125 : f32 to vector<8x384xf32>
    %344 = arith.mulf %343, %342 : vector<8x384xf32>
    %345 = math.tanh %344 : vector<8x384xf32>
    %cst_126 = arith.constant 1.000000e+00 : f32
    %346 = vector.broadcast %cst_126 : f32 to vector<8x384xf32>
    %347 = arith.addf %345, %346 : vector<8x384xf32>
    %cst_127 = arith.constant 5.000000e-01 : f32
    %348 = vector.broadcast %cst_127 : f32 to vector<8x384xf32>
    %349 = arith.mulf %348, %347 : vector<8x384xf32>
    %350 = vector.extract_strided_slice %349 {offsets = [0, 0], sizes = [8, 128], strides = [1, 1]} : vector<8x384xf32> to vector<8x128xf32>
    %351 = vector.extract_strided_slice %349 {offsets = [0, 128], sizes = [8, 128], strides = [1, 1]} : vector<8x384xf32> to vector<8x128xf32>
    %352 = vector.extract_strided_slice %349 {offsets = [0, 256], sizes = [8, 128], strides = [1, 1]} : vector<8x384xf32> to vector<8x128xf32>
    %353 = vector.extract_strided_slice %323 {offsets = [0, 384], sizes = [8, 128], strides = [1, 1]} : vector<8x512xf32> to vector<8x128xf32>
    %354 = math.tanh %353 : vector<8x128xf32>
    %355 = arith.mulf %351, %313 : vector<8x128xf32>
    %356 = arith.mulf %350, %354 : vector<8x128xf32>
    %357 = arith.addf %355, %356 : vector<8x128xf32>
    %358 = math.tanh %357 : vector<8x128xf32>
    %359 = arith.mulf %352, %358 : vector<8x128xf32>
    %c56_128 = arith.constant 56 : index
    %c0_129 = arith.constant 0 : index
    %360 = vector.load %arg10[%c56_128, %c0_129] : memref<64x256xf32, #tpu.memory_space<vmem>>, vector<8x128xf32>
    tpu.vector_store %arg10[%c56_128, %c0_129], %341 {strides = array<i32>} : memref<64x256xf32, #tpu.memory_space<vmem>>, vector<8x128xf32>,
    %c0_130 = arith.constant 0 : index
    %c128_131 = arith.constant 128 : index
    %361 = vector.load %arg10[%c0_130, %c128_131] : memref<64x256xf32, #tpu.memory_space<vmem>>, vector<8x128xf32>
    tpu.vector_store %arg10[%c0_130, %c128_131], %359 {strides = array<i32>} : memref<64x256xf32, #tpu.memory_space<vmem>>, vector<8x128xf32>,
    %c0_132 = arith.constant 0 : index
    %c0_133 = arith.constant 0 : index
    %362 = vector.load %arg10[%c0_132, %c0_133] : memref<64x256xf32, #tpu.memory_space<vmem>>, vector<64x256xf32>
    %c0_134 = arith.constant 0 : index
    %c0_135 = arith.constant 0 : index
    %363 = vector.load %arg3[%c0_134, %c0_135] : memref<256x1024xf32, #tpu.memory_space<vmem>>, vector<256x1024xf32>
    %cst_136 = arith.constant dense<0.000000e+00> : vector<64x1024xf32>
    %364 = tpu.matmul %362, %363, %cst_136 {dimension_numbers = #tpu.dot_dimension_numbers<[1], [0], [0], [1], [0, 0, 1, 1], [], []>} : vector<64x256xf32>, vector<256x1024xf32>, vector<64x1024xf32> -> vector<64x1024xf32>
    %c0_137 = arith.constant 0 : index
    %c0_138 = arith.constant 0 : index
    %365 = vector.load %arg4[%c0_137, %c0_138] : memref<1x1024xf32, #tpu.memory_space<vmem>>, vector<1x1024xf32>
    %366 = vector.broadcast %365 : vector<1x1024xf32> to vector<64x1024xf32>
    %367 = arith.addf %364, %366 : vector<64x1024xf32>
    %c0_139 = arith.constant 0 : index
    %c0_140 = arith.constant 0 : index
    %368 = vector.load %arg9[%c0_139, %c0_140] : memref<64x1024xf32, #tpu.memory_space<vmem>>, vector<64x1024xf32>
    tpu.vector_store %arg9[%c0_139, %c0_140], %367 {strides = array<i32>} : memref<64x1024xf32, #tpu.memory_space<vmem>>, vector<64x1024xf32>,
    %c128_141 = arith.constant 128 : index
    %c0_142 = arith.constant 0 : index
    %369 = vector.load %arg5[%c128_141, %c0_142] : memref<256x1024xf32, #tpu.memory_space<vmem>>, vector<128x512xf32>
    %c128_143 = arith.constant 128 : index
    %c512_144 = arith.constant 512 : index
    %370 = vector.load %arg5[%c128_143, %c512_144] : memref<256x1024xf32, #tpu.memory_space<vmem>>, vector<128x512xf32>
    %cst_145 = arith.constant 0.000000e+00 : f32
    %371 = vector.broadcast %cst_145 : f32 to vector<8x128xf32>
    %cst_146 = arith.constant 0.000000e+00 : f32
    %372 = vector.broadcast %cst_146 : f32 to vector<8x128xf32>
    %cst_147 = arith.constant 0.000000e+00 : f32
    %373 = vector.broadcast %cst_147 : f32 to vector<8x128xf32>
    %cst_148 = arith.constant 0.000000e+00 : f32
    %374 = vector.broadcast %cst_148 : f32 to vector<8x128xf32>
    %cst_149 = arith.constant dense<0.000000e+00> : vector<8x512xf32>
    %375 = tpu.matmul %371, %369, %cst_149 {dimension_numbers = #tpu.dot_dimension_numbers<[1], [0], [0], [1], [0, 0, 1, 1], [], []>} : vector<8x128xf32>, vector<128x512xf32>, vector<8x512xf32> -> vector<8x512xf32>
    %c0_150 = arith.constant 0 : index
    %c0_151 = arith.constant 0 : index
    %376 = vector.load %arg9[%c0_150, %c0_151] : memref<64x1024xf32, #tpu.memory_space<vmem>>, vector<8x512xf32>
    %377 = arith.addf %375, %376 : vector<8x512xf32>
    %cst_152 = arith.constant dense<0.000000e+00> : vector<8x512xf32>
    %378 = tpu.matmul %373, %370, %cst_152 {dimension_numbers = #tpu.dot_dimension_numbers<[1], [0], [0], [1], [0, 0, 1, 1], [], []>} : vector<8x128xf32>, vector<128x512xf32>, vector<8x512xf32> -> vector<8x512xf32>
    %c56_153 = arith.constant 56 : index
    %c512_154 = arith.constant 512 : index
    %379 = vector.load %arg9[%c56_153, %c512_154] : memref<64x1024xf32, #tpu.memory_space<vmem>>, vector<8x512xf32>
    %380 = arith.addf %378, %379 : vector<8x512xf32>
    %381 = vector.extract_strided_slice %377 {offsets = [0, 0], sizes = [8, 384], strides = [1, 1]} : vector<8x512xf32> to vector<8x384xf32>
    %cst_155 = arith.constant 5.000000e-01 : f32
    %382 = vector.broadcast %cst_155 : f32 to vector<8x384xf32>
    %383 = arith.mulf %382, %381 : vector<8x384xf32>
    %384 = math.tanh %383 : vector<8x384xf32>
    %cst_156 = arith.constant 1.000000e+00 : f32
    %385 = vector.broadcast %cst_156 : f32 to vector<8x384xf32>
    %386 = arith.addf %384, %385 : vector<8x384xf32>
    %cst_157 = arith.constant 5.000000e-01 : f32
    %387 = vector.broadcast %cst_157 : f32 to vector<8x384xf32>
    %388 = arith.mulf %387, %386 : vector<8x384xf32>
    %389 = vector.extract_strided_slice %388 {offsets = [0, 0], sizes = [8, 128], strides = [1, 1]} : vector<8x384xf32> to vector<8x128xf32>
    %390 = vector.extract_strided_slice %388 {offsets = [0, 128], sizes = [8, 128], strides = [1, 1]} : vector<8x384xf32> to vector<8x128xf32>
    %391 = vector.extract_strided_slice %388 {offsets = [0, 256], sizes = [8, 128], strides = [1, 1]} : vector<8x384xf32> to vector<8x128xf32>
    %392 = vector.extract_strided_slice %377 {offsets = [0, 384], sizes = [8, 128], strides = [1, 1]} : vector<8x512xf32> to vector<8x128xf32>
    %393 = math.tanh %392 : vector<8x128xf32>
    %394 = arith.mulf %390, %372 : vector<8x128xf32>
    %395 = arith.mulf %389, %393 : vector<8x128xf32>
    %396 = arith.addf %394, %395 : vector<8x128xf32>
    %397 = math.tanh %396 : vector<8x128xf32>
    %398 = arith.mulf %391, %397 : vector<8x128xf32>
    %399 = vector.extract_strided_slice %380 {offsets = [0, 0], sizes = [8, 384], strides = [1, 1]} : vector<8x512xf32> to vector<8x384xf32>
    %cst_158 = arith.constant 5.000000e-01 : f32
    %400 = vector.broadcast %cst_158 : f32 to vector<8x384xf32>
    %401 = arith.mulf %400, %399 : vector<8x384xf32>
    %402 = math.tanh %401 : vector<8x384xf32>
    %cst_159 = arith.constant 1.000000e+00 : f32
    %403 = vector.broadcast %cst_159 : f32 to vector<8x384xf32>
    %404 = arith.addf %402, %403 : vector<8x384xf32>
    %cst_160 = arith.constant 5.000000e-01 : f32
    %405 = vector.broadcast %cst_160 : f32 to vector<8x384xf32>
    %406 = arith.mulf %405, %404 : vector<8x384xf32>
    %407 = vector.extract_strided_slice %406 {offsets = [0, 0], sizes = [8, 128], strides = [1, 1]} : vector<8x384xf32> to vector<8x128xf32>
    %408 = vector.extract_strided_slice %406 {offsets = [0, 128], sizes = [8, 128], strides = [1, 1]} : vector<8x384xf32> to vector<8x128xf32>
    %409 = vector.extract_strided_slice %406 {offsets = [0, 256], sizes = [8, 128], strides = [1, 1]} : vector<8x384xf32> to vector<8x128xf32>
    %410 = vector.extract_strided_slice %380 {offsets = [0, 384], sizes = [8, 128], strides = [1, 1]} : vector<8x512xf32> to vector<8x128xf32>
    %411 = math.tanh %410 : vector<8x128xf32>
    %412 = arith.mulf %408, %374 : vector<8x128xf32>
    %413 = arith.mulf %407, %411 : vector<8x128xf32>
    %414 = arith.addf %412, %413 : vector<8x128xf32>
    %415 = math.tanh %414 : vector<8x128xf32>
    %416 = arith.mulf %409, %415 : vector<8x128xf32>
    %cst_161 = arith.constant dense<0.000000e+00> : vector<8x512xf32>
    %417 = tpu.matmul %398, %369, %cst_161 {dimension_numbers = #tpu.dot_dimension_numbers<[1], [0], [0], [1], [0, 0, 1, 1], [], []>} : vector<8x128xf32>, vector<128x512xf32>, vector<8x512xf32> -> vector<8x512xf32>
    %c8_162 = arith.constant 8 : index
    %c0_163 = arith.constant 0 : index
    %418 = vector.load %arg9[%c8_162, %c0_163] : memref<64x1024xf32, #tpu.memory_space<vmem>>, vector<8x512xf32>
    %419 = arith.addf %417, %418 : vector<8x512xf32>
    %cst_164 = arith.constant dense<0.000000e+00> : vector<8x512xf32>
    %420 = tpu.matmul %416, %370, %cst_164 {dimension_numbers = #tpu.dot_dimension_numbers<[1], [0], [0], [1], [0, 0, 1, 1], [], []>} : vector<8x128xf32>, vector<128x512xf32>, vector<8x512xf32> -> vector<8x512xf32>
    %c48_165 = arith.constant 48 : index
    %c512_166 = arith.constant 512 : index
    %421 = vector.load %arg9[%c48_165, %c512_166] : memref<64x1024xf32, #tpu.memory_space<vmem>>, vector<8x512xf32>
    %422 = arith.addf %420, %421 : vector<8x512xf32>
    %423 = vector.extract_strided_slice %419 {offsets = [0, 0], sizes = [8, 384], strides = [1, 1]} : vector<8x512xf32> to vector<8x384xf32>
    %cst_167 = arith.constant 5.000000e-01 : f32
    %424 = vector.broadcast %cst_167 : f32 to vector<8x384xf32>
    %425 = arith.mulf %424, %423 : vector<8x384xf32>
    %426 = math.tanh %425 : vector<8x384xf32>
    %cst_168 = arith.constant 1.000000e+00 : f32
    %427 = vector.broadcast %cst_168 : f32 to vector<8x384xf32>
    %428 = arith.addf %426, %427 : vector<8x384xf32>
    %cst_169 = arith.constant 5.000000e-01 : f32
    %429 = vector.broadcast %cst_169 : f32 to vector<8x384xf32>
    %430 = arith.mulf %429, %428 : vector<8x384xf32>
    %431 = vector.extract_strided_slice %430 {offsets = [0, 0], sizes = [8, 128], strides = [1, 1]} : vector<8x384xf32> to vector<8x128xf32>
    %432 = vector.extract_strided_slice %430 {offsets = [0, 128], sizes = [8, 128], strides = [1, 1]} : vector<8x384xf32> to vector<8x128xf32>
    %433 = vector.extract_strided_slice %430 {offsets = [0, 256], sizes = [8, 128], strides = [1, 1]} : vector<8x384xf32> to vector<8x128xf32>
    %434 = vector.extract_strided_slice %419 {offsets = [0, 384], sizes = [8, 128], strides = [1, 1]} : vector<8x512xf32> to vector<8x128xf32>
    %435 = math.tanh %434 : vector<8x128xf32>
    %436 = arith.mulf %432, %396 : vector<8x128xf32>
    %437 = arith.mulf %431, %435 : vector<8x128xf32>
    %438 = arith.addf %436, %437 : vector<8x128xf32>
    %439 = math.tanh %438 : vector<8x128xf32>
    %440 = arith.mulf %433, %439 : vector<8x128xf32>
    %441 = vector.extract_strided_slice %422 {offsets = [0, 0], sizes = [8, 384], strides = [1, 1]} : vector<8x512xf32> to vector<8x384xf32>
    %cst_170 = arith.constant 5.000000e-01 : f32
    %442 = vector.broadcast %cst_170 : f32 to vector<8x384xf32>
    %443 = arith.mulf %442, %441 : vector<8x384xf32>
    %444 = math.tanh %443 : vector<8x384xf32>
    %cst_171 = arith.constant 1.000000e+00 : f32
    %445 = vector.broadcast %cst_171 : f32 to vector<8x384xf32>
    %446 = arith.addf %444, %445 : vector<8x384xf32>
    %cst_172 = arith.constant 5.000000e-01 : f32
    %447 = vector.broadcast %cst_172 : f32 to vector<8x384xf32>
    %448 = arith.mulf %447, %446 : vector<8x384xf32>
    %449 = vector.extract_strided_slice %448 {offsets = [0, 0], sizes = [8, 128], strides = [1, 1]} : vector<8x384xf32> to vector<8x128xf32>
    %450 = vector.extract_strided_slice %448 {offsets = [0, 128], sizes = [8, 128], strides = [1, 1]} : vector<8x384xf32> to vector<8x128xf32>
    %451 = vector.extract_strided_slice %448 {offsets = [0, 256], sizes = [8, 128], strides = [1, 1]} : vector<8x384xf32> to vector<8x128xf32>
    %452 = vector.extract_strided_slice %422 {offsets = [0, 384], sizes = [8, 128], strides = [1, 1]} : vector<8x512xf32> to vector<8x128xf32>
    %453 = math.tanh %452 : vector<8x128xf32>
    %454 = arith.mulf %450, %414 : vector<8x128xf32>
    %455 = arith.mulf %449, %453 : vector<8x128xf32>
    %456 = arith.addf %454, %455 : vector<8x128xf32>
    %457 = math.tanh %456 : vector<8x128xf32>
    %458 = arith.mulf %451, %457 : vector<8x128xf32>
    %cst_173 = arith.constant dense<0.000000e+00> : vector<8x512xf32>
    %459 = tpu.matmul %440, %369, %cst_173 {dimension_numbers = #tpu.dot_dimension_numbers<[1], [0], [0], [1], [0, 0, 1, 1], [], []>} : vector<8x128xf32>, vector<128x512xf32>, vector<8x512xf32> -> vector<8x512xf32>
    %c16_174 = arith.constant 16 : index
    %c0_175 = arith.constant 0 : index
    %460 = vector.load %arg9[%c16_174, %c0_175] : memref<64x1024xf32, #tpu.memory_space<vmem>>, vector<8x512xf32>
    %461 = arith.addf %459, %460 : vector<8x512xf32>
    %cst_176 = arith.constant dense<0.000000e+00> : vector<8x512xf32>
    %462 = tpu.matmul %458, %370, %cst_176 {dimension_numbers = #tpu.dot_dimension_numbers<[1], [0], [0], [1], [0, 0, 1, 1], [], []>} : vector<8x128xf32>, vector<128x512xf32>, vector<8x512xf32> -> vector<8x512xf32>
    %c40_177 = arith.constant 40 : index
    %c512_178 = arith.constant 512 : index
    %463 = vector.load %arg9[%c40_177, %c512_178] : memref<64x1024xf32, #tpu.memory_space<vmem>>, vector<8x512xf32>
    %464 = arith.addf %462, %463 : vector<8x512xf32>
    %465 = vector.extract_strided_slice %461 {offsets = [0, 0], sizes = [8, 384], strides = [1, 1]} : vector<8x512xf32> to vector<8x384xf32>
    %cst_179 = arith.constant 5.000000e-01 : f32
    %466 = vector.broadcast %cst_179 : f32 to vector<8x384xf32>
    %467 = arith.mulf %466, %465 : vector<8x384xf32>
    %468 = math.tanh %467 : vector<8x384xf32>
    %cst_180 = arith.constant 1.000000e+00 : f32
    %469 = vector.broadcast %cst_180 : f32 to vector<8x384xf32>
    %470 = arith.addf %468, %469 : vector<8x384xf32>
    %cst_181 = arith.constant 5.000000e-01 : f32
    %471 = vector.broadcast %cst_181 : f32 to vector<8x384xf32>
    %472 = arith.mulf %471, %470 : vector<8x384xf32>
    %473 = vector.extract_strided_slice %472 {offsets = [0, 0], sizes = [8, 128], strides = [1, 1]} : vector<8x384xf32> to vector<8x128xf32>
    %474 = vector.extract_strided_slice %472 {offsets = [0, 128], sizes = [8, 128], strides = [1, 1]} : vector<8x384xf32> to vector<8x128xf32>
    %475 = vector.extract_strided_slice %472 {offsets = [0, 256], sizes = [8, 128], strides = [1, 1]} : vector<8x384xf32> to vector<8x128xf32>
    %476 = vector.extract_strided_slice %461 {offsets = [0, 384], sizes = [8, 128], strides = [1, 1]} : vector<8x512xf32> to vector<8x128xf32>
    %477 = math.tanh %476 : vector<8x128xf32>
    %478 = arith.mulf %474, %438 : vector<8x128xf32>
    %479 = arith.mulf %473, %477 : vector<8x128xf32>
    %480 = arith.addf %478, %479 : vector<8x128xf32>
    %481 = math.tanh %480 : vector<8x128xf32>
    %482 = arith.mulf %475, %481 : vector<8x128xf32>
    %483 = vector.extract_strided_slice %464 {offsets = [0, 0], sizes = [8, 384], strides = [1, 1]} : vector<8x512xf32> to vector<8x384xf32>
    %cst_182 = arith.constant 5.000000e-01 : f32
    %484 = vector.broadcast %cst_182 : f32 to vector<8x384xf32>
    %485 = arith.mulf %484, %483 : vector<8x384xf32>
    %486 = math.tanh %485 : vector<8x384xf32>
    %cst_183 = arith.constant 1.000000e+00 : f32
    %487 = vector.broadcast %cst_183 : f32 to vector<8x384xf32>
    %488 = arith.addf %486, %487 : vector<8x384xf32>
    %cst_184 = arith.constant 5.000000e-01 : f32
    %489 = vector.broadcast %cst_184 : f32 to vector<8x384xf32>
    %490 = arith.mulf %489, %488 : vector<8x384xf32>
    %491 = vector.extract_strided_slice %490 {offsets = [0, 0], sizes = [8, 128], strides = [1, 1]} : vector<8x384xf32> to vector<8x128xf32>
    %492 = vector.extract_strided_slice %490 {offsets = [0, 128], sizes = [8, 128], strides = [1, 1]} : vector<8x384xf32> to vector<8x128xf32>
    %493 = vector.extract_strided_slice %490 {offsets = [0, 256], sizes = [8, 128], strides = [1, 1]} : vector<8x384xf32> to vector<8x128xf32>
    %494 = vector.extract_strided_slice %464 {offsets = [0, 384], sizes = [8, 128], strides = [1, 1]} : vector<8x512xf32> to vector<8x128xf32>
    %495 = math.tanh %494 : vector<8x128xf32>
    %496 = arith.mulf %492, %456 : vector<8x128xf32>
    %497 = arith.mulf %491, %495 : vector<8x128xf32>
    %498 = arith.addf %496, %497 : vector<8x128xf32>
    %499 = math.tanh %498 : vector<8x128xf32>
    %500 = arith.mulf %493, %499 : vector<8x128xf32>
    %cst_185 = arith.constant dense<0.000000e+00> : vector<8x512xf32>
    %501 = tpu.matmul %482, %369, %cst_185 {dimension_numbers = #tpu.dot_dimension_numbers<[1], [0], [0], [1], [0, 0, 1, 1], [], []>} : vector<8x128xf32>, vector<128x512xf32>, vector<8x512xf32> -> vector<8x512xf32>
    %c24_186 = arith.constant 24 : index
    %c0_187 = arith.constant 0 : index
    %502 = vector.load %arg9[%c24_186, %c0_187] : memref<64x1024xf32, #tpu.memory_space<vmem>>, vector<8x512xf32>
    %503 = arith.addf %501, %502 : vector<8x512xf32>
    %cst_188 = arith.constant dense<0.000000e+00> : vector<8x512xf32>
    %504 = tpu.matmul %500, %370, %cst_188 {dimension_numbers = #tpu.dot_dimension_numbers<[1], [0], [0], [1], [0, 0, 1, 1], [], []>} : vector<8x128xf32>, vector<128x512xf32>, vector<8x512xf32> -> vector<8x512xf32>
    %c32_189 = arith.constant 32 : index
    %c512_190 = arith.constant 512 : index
    %505 = vector.load %arg9[%c32_189, %c512_190] : memref<64x1024xf32, #tpu.memory_space<vmem>>, vector<8x512xf32>
    %506 = arith.addf %504, %505 : vector<8x512xf32>
    %507 = vector.extract_strided_slice %503 {offsets = [0, 0], sizes = [8, 384], strides = [1, 1]} : vector<8x512xf32> to vector<8x384xf32>
    %cst_191 = arith.constant 5.000000e-01 : f32
    %508 = vector.broadcast %cst_191 : f32 to vector<8x384xf32>
    %509 = arith.mulf %508, %507 : vector<8x384xf32>
    %510 = math.tanh %509 : vector<8x384xf32>
    %cst_192 = arith.constant 1.000000e+00 : f32
    %511 = vector.broadcast %cst_192 : f32 to vector<8x384xf32>
    %512 = arith.addf %510, %511 : vector<8x384xf32>
    %cst_193 = arith.constant 5.000000e-01 : f32
    %513 = vector.broadcast %cst_193 : f32 to vector<8x384xf32>
    %514 = arith.mulf %513, %512 : vector<8x384xf32>
    %515 = vector.extract_strided_slice %514 {offsets = [0, 0], sizes = [8, 128], strides = [1, 1]} : vector<8x384xf32> to vector<8x128xf32>
    %516 = vector.extract_strided_slice %514 {offsets = [0, 128], sizes = [8, 128], strides = [1, 1]} : vector<8x384xf32> to vector<8x128xf32>
    %517 = vector.extract_strided_slice %514 {offsets = [0, 256], sizes = [8, 128], strides = [1, 1]} : vector<8x384xf32> to vector<8x128xf32>
    %518 = vector.extract_strided_slice %503 {offsets = [0, 384], sizes = [8, 128], strides = [1, 1]} : vector<8x512xf32> to vector<8x128xf32>
    %519 = math.tanh %518 : vector<8x128xf32>
    %520 = arith.mulf %516, %480 : vector<8x128xf32>
    %521 = arith.mulf %515, %519 : vector<8x128xf32>
    %522 = arith.addf %520, %521 : vector<8x128xf32>
    %523 = math.tanh %522 : vector<8x128xf32>
    %524 = arith.mulf %517, %523 : vector<8x128xf32>
    %525 = vector.extract_strided_slice %506 {offsets = [0, 0], sizes = [8, 384], strides = [1, 1]} : vector<8x512xf32> to vector<8x384xf32>
    %cst_194 = arith.constant 5.000000e-01 : f32
    %526 = vector.broadcast %cst_194 : f32 to vector<8x384xf32>
    %527 = arith.mulf %526, %525 : vector<8x384xf32>
    %528 = math.tanh %527 : vector<8x384xf32>
    %cst_195 = arith.constant 1.000000e+00 : f32
    %529 = vector.broadcast %cst_195 : f32 to vector<8x384xf32>
    %530 = arith.addf %528, %529 : vector<8x384xf32>
    %cst_196 = arith.constant 5.000000e-01 : f32
    %531 = vector.broadcast %cst_196 : f32 to vector<8x384xf32>
    %532 = arith.mulf %531, %530 : vector<8x384xf32>
    %533 = vector.extract_strided_slice %532 {offsets = [0, 0], sizes = [8, 128], strides = [1, 1]} : vector<8x384xf32> to vector<8x128xf32>
    %534 = vector.extract_strided_slice %532 {offsets = [0, 128], sizes = [8, 128], strides = [1, 1]} : vector<8x384xf32> to vector<8x128xf32>
    %535 = vector.extract_strided_slice %532 {offsets = [0, 256], sizes = [8, 128], strides = [1, 1]} : vector<8x384xf32> to vector<8x128xf32>
    %536 = vector.extract_strided_slice %506 {offsets = [0, 384], sizes = [8, 128], strides = [1, 1]} : vector<8x512xf32> to vector<8x128xf32>
    %537 = math.tanh %536 : vector<8x128xf32>
    %538 = arith.mulf %534, %498 : vector<8x128xf32>
    %539 = arith.mulf %533, %537 : vector<8x128xf32>
    %540 = arith.addf %538, %539 : vector<8x128xf32>
    %541 = math.tanh %540 : vector<8x128xf32>
    %542 = arith.mulf %535, %541 : vector<8x128xf32>
    %cst_197 = arith.constant dense<0.000000e+00> : vector<8x512xf32>
    %543 = tpu.matmul %524, %369, %cst_197 {dimension_numbers = #tpu.dot_dimension_numbers<[1], [0], [0], [1], [0, 0, 1, 1], [], []>} : vector<8x128xf32>, vector<128x512xf32>, vector<8x512xf32> -> vector<8x512xf32>
    %c32_198 = arith.constant 32 : index
    %c0_199 = arith.constant 0 : index
    %544 = vector.load %arg9[%c32_198, %c0_199] : memref<64x1024xf32, #tpu.memory_space<vmem>>, vector<8x512xf32>
    %545 = arith.addf %543, %544 : vector<8x512xf32>
    %cst_200 = arith.constant dense<0.000000e+00> : vector<8x512xf32>
    %546 = tpu.matmul %542, %370, %cst_200 {dimension_numbers = #tpu.dot_dimension_numbers<[1], [0], [0], [1], [0, 0, 1, 1], [], []>} : vector<8x128xf32>, vector<128x512xf32>, vector<8x512xf32> -> vector<8x512xf32>
    %c24_201 = arith.constant 24 : index
    %c512_202 = arith.constant 512 : index
    %547 = vector.load %arg9[%c24_201, %c512_202] : memref<64x1024xf32, #tpu.memory_space<vmem>>, vector<8x512xf32>
    %548 = arith.addf %546, %547 : vector<8x512xf32>
    %549 = vector.extract_strided_slice %545 {offsets = [0, 0], sizes = [8, 384], strides = [1, 1]} : vector<8x512xf32> to vector<8x384xf32>
    %cst_203 = arith.constant 5.000000e-01 : f32
    %550 = vector.broadcast %cst_203 : f32 to vector<8x384xf32>
    %551 = arith.mulf %550, %549 : vector<8x384xf32>
    %552 = math.tanh %551 : vector<8x384xf32>
    %cst_204 = arith.constant 1.000000e+00 : f32
    %553 = vector.broadcast %cst_204 : f32 to vector<8x384xf32>
    %554 = arith.addf %552, %553 : vector<8x384xf32>
    %cst_205 = arith.constant 5.000000e-01 : f32
    %555 = vector.broadcast %cst_205 : f32 to vector<8x384xf32>
    %556 = arith.mulf %555, %554 : vector<8x384xf32>
    %557 = vector.extract_strided_slice %556 {offsets = [0, 0], sizes = [8, 128], strides = [1, 1]} : vector<8x384xf32> to vector<8x128xf32>
    %558 = vector.extract_strided_slice %556 {offsets = [0, 128], sizes = [8, 128], strides = [1, 1]} : vector<8x384xf32> to vector<8x128xf32>
    %559 = vector.extract_strided_slice %556 {offsets = [0, 256], sizes = [8, 128], strides = [1, 1]} : vector<8x384xf32> to vector<8x128xf32>
    %560 = vector.extract_strided_slice %545 {offsets = [0, 384], sizes = [8, 128], strides = [1, 1]} : vector<8x512xf32> to vector<8x128xf32>
    %561 = math.tanh %560 : vector<8x128xf32>
    %562 = arith.mulf %558, %522 : vector<8x128xf32>
    %563 = arith.mulf %557, %561 : vector<8x128xf32>
    %564 = arith.addf %562, %563 : vector<8x128xf32>
    %565 = math.tanh %564 : vector<8x128xf32>
    %566 = arith.mulf %559, %565 : vector<8x128xf32>
    %567 = vector.extract_strided_slice %548 {offsets = [0, 0], sizes = [8, 384], strides = [1, 1]} : vector<8x512xf32> to vector<8x384xf32>
    %cst_206 = arith.constant 5.000000e-01 : f32
    %568 = vector.broadcast %cst_206 : f32 to vector<8x384xf32>
    %569 = arith.mulf %568, %567 : vector<8x384xf32>
    %570 = math.tanh %569 : vector<8x384xf32>
    %cst_207 = arith.constant 1.000000e+00 : f32
    %571 = vector.broadcast %cst_207 : f32 to vector<8x384xf32>
    %572 = arith.addf %570, %571 : vector<8x384xf32>
    %cst_208 = arith.constant 5.000000e-01 : f32
    %573 = vector.broadcast %cst_208 : f32 to vector<8x384xf32>
    %574 = arith.mulf %573, %572 : vector<8x384xf32>
    %575 = vector.extract_strided_slice %574 {offsets = [0, 0], sizes = [8, 128], strides = [1, 1]} : vector<8x384xf32> to vector<8x128xf32>
    %576 = vector.extract_strided_slice %574 {offsets = [0, 128], sizes = [8, 128], strides = [1, 1]} : vector<8x384xf32> to vector<8x128xf32>
    %577 = vector.extract_strided_slice %574 {offsets = [0, 256], sizes = [8, 128], strides = [1, 1]} : vector<8x384xf32> to vector<8x128xf32>
    %578 = vector.extract_strided_slice %548 {offsets = [0, 384], sizes = [8, 128], strides = [1, 1]} : vector<8x512xf32> to vector<8x128xf32>
    %579 = math.tanh %578 : vector<8x128xf32>
    %580 = arith.mulf %576, %540 : vector<8x128xf32>
    %581 = arith.mulf %575, %579 : vector<8x128xf32>
    %582 = arith.addf %580, %581 : vector<8x128xf32>
    %583 = math.tanh %582 : vector<8x128xf32>
    %584 = arith.mulf %577, %583 : vector<8x128xf32>
    %cst_209 = arith.constant dense<0.000000e+00> : vector<8x512xf32>
    %585 = tpu.matmul %566, %369, %cst_209 {dimension_numbers = #tpu.dot_dimension_numbers<[1], [0], [0], [1], [0, 0, 1, 1], [], []>} : vector<8x128xf32>, vector<128x512xf32>, vector<8x512xf32> -> vector<8x512xf32>
    %c40_210 = arith.constant 40 : index
    %c0_211 = arith.constant 0 : index
    %586 = vector.load %arg9[%c40_210, %c0_211] : memref<64x1024xf32, #tpu.memory_space<vmem>>, vector<8x512xf32>
    %587 = arith.addf %585, %586 : vector<8x512xf32>
    %cst_212 = arith.constant dense<0.000000e+00> : vector<8x512xf32>
    %588 = tpu.matmul %584, %370, %cst_212 {dimension_numbers = #tpu.dot_dimension_numbers<[1], [0], [0], [1], [0, 0, 1, 1], [], []>} : vector<8x128xf32>, vector<128x512xf32>, vector<8x512xf32> -> vector<8x512xf32>
    %c16_213 = arith.constant 16 : index
    %c512_214 = arith.constant 512 : index
    %589 = vector.load %arg9[%c16_213, %c512_214] : memref<64x1024xf32, #tpu.memory_space<vmem>>, vector<8x512xf32>
    %590 = arith.addf %588, %589 : vector<8x512xf32>
    %591 = vector.extract_strided_slice %587 {offsets = [0, 0], sizes = [8, 384], strides = [1, 1]} : vector<8x512xf32> to vector<8x384xf32>
    %cst_215 = arith.constant 5.000000e-01 : f32
    %592 = vector.broadcast %cst_215 : f32 to vector<8x384xf32>
    %593 = arith.mulf %592, %591 : vector<8x384xf32>
    %594 = math.tanh %593 : vector<8x384xf32>
    %cst_216 = arith.constant 1.000000e+00 : f32
    %595 = vector.broadcast %cst_216 : f32 to vector<8x384xf32>
    %596 = arith.addf %594, %595 : vector<8x384xf32>
    %cst_217 = arith.constant 5.000000e-01 : f32
    %597 = vector.broadcast %cst_217 : f32 to vector<8x384xf32>
    %598 = arith.mulf %597, %596 : vector<8x384xf32>
    %599 = vector.extract_strided_slice %598 {offsets = [0, 0], sizes = [8, 128], strides = [1, 1]} : vector<8x384xf32> to vector<8x128xf32>
    %600 = vector.extract_strided_slice %598 {offsets = [0, 128], sizes = [8, 128], strides = [1, 1]} : vector<8x384xf32> to vector<8x128xf32>
    %601 = vector.extract_strided_slice %598 {offsets = [0, 256], sizes = [8, 128], strides = [1, 1]} : vector<8x384xf32> to vector<8x128xf32>
    %602 = vector.extract_strided_slice %587 {offsets = [0, 384], sizes = [8, 128], strides = [1, 1]} : vector<8x512xf32> to vector<8x128xf32>
    %603 = math.tanh %602 : vector<8x128xf32>
    %604 = arith.mulf %600, %564 : vector<8x128xf32>
    %605 = arith.mulf %599, %603 : vector<8x128xf32>
    %606 = arith.addf %604, %605 : vector<8x128xf32>
    %607 = math.tanh %606 : vector<8x128xf32>
    %608 = arith.mulf %601, %607 : vector<8x128xf32>
    %609 = vector.extract_strided_slice %590 {offsets = [0, 0], sizes = [8, 384], strides = [1, 1]} : vector<8x512xf32> to vector<8x384xf32>
    %cst_218 = arith.constant 5.000000e-01 : f32
    %610 = vector.broadcast %cst_218 : f32 to vector<8x384xf32>
    %611 = arith.mulf %610, %609 : vector<8x384xf32>
    %612 = math.tanh %611 : vector<8x384xf32>
    %cst_219 = arith.constant 1.000000e+00 : f32
    %613 = vector.broadcast %cst_219 : f32 to vector<8x384xf32>
    %614 = arith.addf %612, %613 : vector<8x384xf32>
    %cst_220 = arith.constant 5.000000e-01 : f32
    %615 = vector.broadcast %cst_220 : f32 to vector<8x384xf32>
    %616 = arith.mulf %615, %614 : vector<8x384xf32>
    %617 = vector.extract_strided_slice %616 {offsets = [0, 0], sizes = [8, 128], strides = [1, 1]} : vector<8x384xf32> to vector<8x128xf32>
    %618 = vector.extract_strided_slice %616 {offsets = [0, 128], sizes = [8, 128], strides = [1, 1]} : vector<8x384xf32> to vector<8x128xf32>
    %619 = vector.extract_strided_slice %616 {offsets = [0, 256], sizes = [8, 128], strides = [1, 1]} : vector<8x384xf32> to vector<8x128xf32>
    %620 = vector.extract_strided_slice %590 {offsets = [0, 384], sizes = [8, 128], strides = [1, 1]} : vector<8x512xf32> to vector<8x128xf32>
    %621 = math.tanh %620 : vector<8x128xf32>
    %622 = arith.mulf %618, %582 : vector<8x128xf32>
    %623 = arith.mulf %617, %621 : vector<8x128xf32>
    %624 = arith.addf %622, %623 : vector<8x128xf32>
    %625 = math.tanh %624 : vector<8x128xf32>
    %626 = arith.mulf %619, %625 : vector<8x128xf32>
    %cst_221 = arith.constant dense<0.000000e+00> : vector<8x512xf32>
    %627 = tpu.matmul %608, %369, %cst_221 {dimension_numbers = #tpu.dot_dimension_numbers<[1], [0], [0], [1], [0, 0, 1, 1], [], []>} : vector<8x128xf32>, vector<128x512xf32>, vector<8x512xf32> -> vector<8x512xf32>
    %c48_222 = arith.constant 48 : index
    %c0_223 = arith.constant 0 : index
    %628 = vector.load %arg9[%c48_222, %c0_223] : memref<64x1024xf32, #tpu.memory_space<vmem>>, vector<8x512xf32>
    %629 = arith.addf %627, %628 : vector<8x512xf32>
    %cst_224 = arith.constant dense<0.000000e+00> : vector<8x512xf32>
    %630 = tpu.matmul %626, %370, %cst_224 {dimension_numbers = #tpu.dot_dimension_numbers<[1], [0], [0], [1], [0, 0, 1, 1], [], []>} : vector<8x128xf32>, vector<128x512xf32>, vector<8x512xf32> -> vector<8x512xf32>
    %c8_225 = arith.constant 8 : index
    %c512_226 = arith.constant 512 : index
    %631 = vector.load %arg9[%c8_225, %c512_226] : memref<64x1024xf32, #tpu.memory_space<vmem>>, vector<8x512xf32>
    %632 = arith.addf %630, %631 : vector<8x512xf32>
    %633 = vector.extract_strided_slice %629 {offsets = [0, 0], sizes = [8, 384], strides = [1, 1]} : vector<8x512xf32> to vector<8x384xf32>
    %cst_227 = arith.constant 5.000000e-01 : f32
    %634 = vector.broadcast %cst_227 : f32 to vector<8x384xf32>
    %635 = arith.mulf %634, %633 : vector<8x384xf32>
    %636 = math.tanh %635 : vector<8x384xf32>
    %cst_228 = arith.constant 1.000000e+00 : f32
    %637 = vector.broadcast %cst_228 : f32 to vector<8x384xf32>
    %638 = arith.addf %636, %637 : vector<8x384xf32>
    %cst_229 = arith.constant 5.000000e-01 : f32
    %639 = vector.broadcast %cst_229 : f32 to vector<8x384xf32>
    %640 = arith.mulf %639, %638 : vector<8x384xf32>
    %641 = vector.extract_strided_slice %640 {offsets = [0, 0], sizes = [8, 128], strides = [1, 1]} : vector<8x384xf32> to vector<8x128xf32>
    %642 = vector.extract_strided_slice %640 {offsets = [0, 128], sizes = [8, 128], strides = [1, 1]} : vector<8x384xf32> to vector<8x128xf32>
    %643 = vector.extract_strided_slice %640 {offsets = [0, 256], sizes = [8, 128], strides = [1, 1]} : vector<8x384xf32> to vector<8x128xf32>
    %644 = vector.extract_strided_slice %629 {offsets = [0, 384], sizes = [8, 128], strides = [1, 1]} : vector<8x512xf32> to vector<8x128xf32>
    %645 = math.tanh %644 : vector<8x128xf32>
    %646 = arith.mulf %642, %606 : vector<8x128xf32>
    %647 = arith.mulf %641, %645 : vector<8x128xf32>
    %648 = arith.addf %646, %647 : vector<8x128xf32>
    %649 = math.tanh %648 : vector<8x128xf32>
    %650 = arith.mulf %643, %649 : vector<8x128xf32>
    %651 = vector.extract_strided_slice %632 {offsets = [0, 0], sizes = [8, 384], strides = [1, 1]} : vector<8x512xf32> to vector<8x384xf32>
    %cst_230 = arith.constant 5.000000e-01 : f32
    %652 = vector.broadcast %cst_230 : f32 to vector<8x384xf32>
    %653 = arith.mulf %652, %651 : vector<8x384xf32>
    %654 = math.tanh %653 : vector<8x384xf32>
    %cst_231 = arith.constant 1.000000e+00 : f32
    %655 = vector.broadcast %cst_231 : f32 to vector<8x384xf32>
    %656 = arith.addf %654, %655 : vector<8x384xf32>
    %cst_232 = arith.constant 5.000000e-01 : f32
    %657 = vector.broadcast %cst_232 : f32 to vector<8x384xf32>
    %658 = arith.mulf %657, %656 : vector<8x384xf32>
    %659 = vector.extract_strided_slice %658 {offsets = [0, 0], sizes = [8, 128], strides = [1, 1]} : vector<8x384xf32> to vector<8x128xf32>
    %660 = vector.extract_strided_slice %658 {offsets = [0, 128], sizes = [8, 128], strides = [1, 1]} : vector<8x384xf32> to vector<8x128xf32>
    %661 = vector.extract_strided_slice %658 {offsets = [0, 256], sizes = [8, 128], strides = [1, 1]} : vector<8x384xf32> to vector<8x128xf32>
    %662 = vector.extract_strided_slice %632 {offsets = [0, 384], sizes = [8, 128], strides = [1, 1]} : vector<8x512xf32> to vector<8x128xf32>
    %663 = math.tanh %662 : vector<8x128xf32>
    %664 = arith.mulf %660, %624 : vector<8x128xf32>
    %665 = arith.mulf %659, %663 : vector<8x128xf32>
    %666 = arith.addf %664, %665 : vector<8x128xf32>
    %667 = math.tanh %666 : vector<8x128xf32>
    %668 = arith.mulf %661, %667 : vector<8x128xf32>
    %cst_233 = arith.constant dense<0.000000e+00> : vector<8x512xf32>
    %669 = tpu.matmul %650, %369, %cst_233 {dimension_numbers = #tpu.dot_dimension_numbers<[1], [0], [0], [1], [0, 0, 1, 1], [], []>} : vector<8x128xf32>, vector<128x512xf32>, vector<8x512xf32> -> vector<8x512xf32>
    %c56_234 = arith.constant 56 : index
    %c0_235 = arith.constant 0 : index
    %670 = vector.load %arg9[%c56_234, %c0_235] : memref<64x1024xf32, #tpu.memory_space<vmem>>, vector<8x512xf32>
    %671 = arith.addf %669, %670 : vector<8x512xf32>
    %cst_236 = arith.constant dense<0.000000e+00> : vector<8x512xf32>
    %672 = tpu.matmul %668, %370, %cst_236 {dimension_numbers = #tpu.dot_dimension_numbers<[1], [0], [0], [1], [0, 0, 1, 1], [], []>} : vector<8x128xf32>, vector<128x512xf32>, vector<8x512xf32> -> vector<8x512xf32>
    %c0_237 = arith.constant 0 : index
    %c512_238 = arith.constant 512 : index
    %673 = vector.load %arg9[%c0_237, %c512_238] : memref<64x1024xf32, #tpu.memory_space<vmem>>, vector<8x512xf32>
    %674 = arith.addf %672, %673 : vector<8x512xf32>
    %675 = vector.extract_strided_slice %671 {offsets = [0, 0], sizes = [8, 384], strides = [1, 1]} : vector<8x512xf32> to vector<8x384xf32>
    %cst_239 = arith.constant 5.000000e-01 : f32
    %676 = vector.broadcast %cst_239 : f32 to vector<8x384xf32>
    %677 = arith.mulf %676, %675 : vector<8x384xf32>
    %678 = math.tanh %677 : vector<8x384xf32>
    %cst_240 = arith.constant 1.000000e+00 : f32
    %679 = vector.broadcast %cst_240 : f32 to vector<8x384xf32>
    %680 = arith.addf %678, %679 : vector<8x384xf32>
    %cst_241 = arith.constant 5.000000e-01 : f32
    %681 = vector.broadcast %cst_241 : f32 to vector<8x384xf32>
    %682 = arith.mulf %681, %680 : vector<8x384xf32>
    %683 = vector.extract_strided_slice %682 {offsets = [0, 0], sizes = [8, 128], strides = [1, 1]} : vector<8x384xf32> to vector<8x128xf32>
    %684 = vector.extract_strided_slice %682 {offsets = [0, 128], sizes = [8, 128], strides = [1, 1]} : vector<8x384xf32> to vector<8x128xf32>
    %685 = vector.extract_strided_slice %682 {offsets = [0, 256], sizes = [8, 128], strides = [1, 1]} : vector<8x384xf32> to vector<8x128xf32>
    %686 = vector.extract_strided_slice %671 {offsets = [0, 384], sizes = [8, 128], strides = [1, 1]} : vector<8x512xf32> to vector<8x128xf32>
    %687 = math.tanh %686 : vector<8x128xf32>
    %688 = arith.mulf %684, %648 : vector<8x128xf32>
    %689 = arith.mulf %683, %687 : vector<8x128xf32>
    %690 = arith.addf %688, %689 : vector<8x128xf32>
    %691 = math.tanh %690 : vector<8x128xf32>
    %692 = arith.mulf %685, %691 : vector<8x128xf32>
    %693 = vector.extract_strided_slice %674 {offsets = [0, 0], sizes = [8, 384], strides = [1, 1]} : vector<8x512xf32> to vector<8x384xf32>
    %cst_242 = arith.constant 5.000000e-01 : f32
    %694 = vector.broadcast %cst_242 : f32 to vector<8x384xf32>
    %695 = arith.mulf %694, %693 : vector<8x384xf32>
    %696 = math.tanh %695 : vector<8x384xf32>
    %cst_243 = arith.constant 1.000000e+00 : f32
    %697 = vector.broadcast %cst_243 : f32 to vector<8x384xf32>
    %698 = arith.addf %696, %697 : vector<8x384xf32>
    %cst_244 = arith.constant 5.000000e-01 : f32
    %699 = vector.broadcast %cst_244 : f32 to vector<8x384xf32>
    %700 = arith.mulf %699, %698 : vector<8x384xf32>
    %701 = vector.extract_strided_slice %700 {offsets = [0, 0], sizes = [8, 128], strides = [1, 1]} : vector<8x384xf32> to vector<8x128xf32>
    %702 = vector.extract_strided_slice %700 {offsets = [0, 128], sizes = [8, 128], strides = [1, 1]} : vector<8x384xf32> to vector<8x128xf32>
    %703 = vector.extract_strided_slice %700 {offsets = [0, 256], sizes = [8, 128], strides = [1, 1]} : vector<8x384xf32> to vector<8x128xf32>
    %704 = vector.extract_strided_slice %674 {offsets = [0, 384], sizes = [8, 128], strides = [1, 1]} : vector<8x512xf32> to vector<8x128xf32>
    %705 = math.tanh %704 : vector<8x128xf32>
    %706 = arith.mulf %702, %666 : vector<8x128xf32>
    %707 = arith.mulf %701, %705 : vector<8x128xf32>
    %708 = arith.addf %706, %707 : vector<8x128xf32>
    %709 = math.tanh %708 : vector<8x128xf32>
    %710 = arith.mulf %703, %709 : vector<8x128xf32>
    %711 = tpu.concatenate %692, %710 in 1 : vector<8x128xf32>, vector<8x128xf32> -> vector<8x256xf32>
    %c0_245 = arith.constant 0 : index
    %c0_246 = arith.constant 0 : index
    %712 = vector.load %arg6[%c0_245, %c0_246] : memref<256x256xf32, #tpu.memory_space<vmem>>, vector<256x256xf32>
    %cst_247 = arith.constant dense<0.000000e+00> : vector<8x256xf32>
    %713 = tpu.matmul %711, %712, %cst_247 {dimension_numbers = #tpu.dot_dimension_numbers<[1], [0], [0], [1], [0, 0, 1, 1], [], []>} : vector<8x256xf32>, vector<256x256xf32>, vector<8x256xf32> -> vector<8x256xf32>
    %c0_248 = arith.constant 0 : index
    %c0_249 = arith.constant 0 : index
    %714 = vector.load %arg7[%c0_248, %c0_249] : memref<1x256xf32, #tpu.memory_space<vmem>>, vector<1x256xf32>
    %715 = vector.broadcast %714 : vector<1x256xf32> to vector<8x256xf32>
    %716 = arith.addf %713, %715 : vector<8x256xf32>
    %c0_250 = arith.constant 0 : index
    %c0_251 = arith.constant 0 : index
    %717 = vector.load %arg8[%c0_250, %c0_251] : memref<8x256xf32, #tpu.memory_space<vmem>>, vector<8x256xf32>
    tpu.vector_store %arg8[%c0_250, %c0_251], %716 {strides = array<i32>} : memref<8x256xf32, #tpu.memory_space<vmem>>, vector<8x256xf32>,
    return
  }
  func.func @transform_0(%arg0: i32) -> (i32, i32) {
    %c0_i32 = arith.constant 0 : i32
    %c0_i32_0 = arith.constant 0 : i32
    return %arg0, %c0_i32 : i32, i32
  }
  func.func @transform_1(%arg0: i32) -> (i32, i32) {
    %c0_i32 = arith.constant 0 : i32
    %c0_i32_0 = arith.constant 0 : i32
    %c0_i32_1 = arith.constant 0 : i32
    return %c0_i32, %c0_i32_0 : i32, i32
  }
  func.func @transform_2(%arg0: i32) -> (i32, i32) {
    %c0_i32 = arith.constant 0 : i32
    %c0_i32_0 = arith.constant 0 : i32
    %c0_i32_1 = arith.constant 0 : i32
    return %c0_i32, %c0_i32_0 : i32, i32
  }
  func.func @transform_3(%arg0: i32) -> (i32, i32) {
    %c0_i32 = arith.constant 0 : i32
    %c0_i32_0 = arith.constant 0 : i32
    %c0_i32_1 = arith.constant 0 : i32
    return %c0_i32, %c0_i32_0 : i32, i32
  }
  func.func @transform_4(%arg0: i32) -> (i32, i32) {
    %c0_i32 = arith.constant 0 : i32
    %c0_i32_0 = arith.constant 0 : i32
    %c0_i32_1 = arith.constant 0 : i32
    return %c0_i32, %c0_i32_0 : i32, i32
  }
  func.func @transform_5(%arg0: i32) -> (i32, i32) {
    %c0_i32 = arith.constant 0 : i32
    %c0_i32_0 = arith.constant 0 : i32
    %c0_i32_1 = arith.constant 0 : i32
    return %c0_i32, %c0_i32_0 : i32, i32
  }
  func.func @transform_6(%arg0: i32) -> (i32, i32) {
    %c0_i32 = arith.constant 0 : i32
    %c0_i32_0 = arith.constant 0 : i32
    %c0_i32_1 = arith.constant 0 : i32
    return %c0_i32, %c0_i32_0 : i32, i32
  }
  func.func @transform_7(%arg0: i32) -> (i32, i32) {
    %c0_i32 = arith.constant 0 : i32
    %c0_i32_0 = arith.constant 0 : i32
    return %arg0, %c0_i32 : i32, i32
  }
}

</mosaic_0001>

<bundles_post_ra>
// kernel: tpu_custom_call.1
= control target key start
LH: loop header
LB: loop body
LE: loop exit
PB: predicated region body
PF: predicated region fallthrough
CT: control target
= control target key end

     0   :  { %12 = vsyncpa [#allocation5], 0  ;;  %s12774_s0 = inlined_call_operand.vmem [shape: f32[128,8], index: 0, kind: input, shape index: {}]   ;;  %s12775_s1 = inlined_call_operand.vmem [shape: f32[8,1024], index: 1, kind: input, shape index: {}]   ;;  %s12776_s2 = inlined_call_operand.hbm [shape: f32[256,1024], index: 2, kind: input, shape index: {}]   ;;  %s12777_s3 = inlined_call_operand.vmem [shape: f32[1,1024], index: 3, kind: input, shape index: {}]   ;;  %s12778_s4 = inlined_call_operand.hbm [shape: f32[256,1024], index: 4, kind: input, shape index: {}]   ;;  %s12779_s5 = inlined_call_operand.hbm [shape: f32[256,256], index: 5, kind: input, shape index: {}]   ;;  %s12780_s6 = inlined_call_operand.vmem [shape: f32[1,256], index: 6, kind: input, shape index: {}]   ;;  %s12781_s7 = inlined_call_operand.hbm [shape: f32[16,256], index: 7, kind: output, shape index: {}]  }
   0x1   :  { %13 = vsyncpa [#allocation8], 0 }
   0x2   :  { %14 = vsyncpa [#allocation6], 0 }
   0x3   :  { %16 = vsyncpa [#allocation6 + $0x1], 0  ;;  %s10695_s24 = smov 0   ;;  %s10697_s25 = smov 0  }
   0x4   :  { %s10699_s26 = smov 0   ;;  %s10701_s27 = smov 0  }
   0x5 LB: > { %12943 = sst [smem:[#allocation14_spill]] %s10640_s26  ;;  %s10716_s28 = sadd.s32 4294967295, %s10644_s27   ;;  %s10644_s27 = sphi %s10701_s27, %s13377_s27   ;;  %s10640_s26 = sphi %s10699_s26, %s13379_s26   ;;  %s10636_s25 = sphi %s10697_s25, %s13381_s25   ;;  %s10632_s24 = sphi %s10695_s24, %s13380_s24  }
   0x6   : > { %s7484_s29 = sadd.s32 4294967294, %s10644_s27   ;;  %s10720_s30 = sadd.s32 1, %s10644_s27  }
   0x7   : > { %12944 = sst [smem:[#allocation15_spill]] %s10720_s30  ;;  %s181_s8 = sadd.s32 1, %s10640_s26 }
   0x8   : > { %s178_s9 = ssub.s32 %s10644_s27, %s10720_s30  ;;  %p191_p0 = scmp.ne.s32.totalorder %s10640_s26, %s10636_s25 }
   0x9   : > { %p179_p1 = scmp.eq.s32.totalorder %s178_s9, 0  ;;  %p192_p2 = scmp.eq.s32.totalorder %s10716_s28, 1 }
   0xa   : > { %p197_p3 = scmp.ne.s32.totalorder %s10636_s25, %s10632_s24  ;;  %p198_p4 = scmp.eq.s32.totalorder %s7484_s29, 1 }
   0xb   : > { %s10731_s10 = scalar_select %p179_p1, %s10640_s26, %s181_s8  }
   0xc   : > { %p10733_p5 = por %p192_p2, %p191_p0  ;;  %p10737_p6 = por %p198_p4, %p197_p3 }
   0xd   : > { %12945 = sst [smem:[#allocation16_spill]] %s10731_s10  ;;  %p7485_p7 = scmp.ge.s32.totalorder %s10644_s27, 1 }
   0xe   : > { %s12946_s11 = scalar_select %p10733_p5, 1, 0 }
   0xf   : > { %s12947_s12 = scalar_select %p10737_p6, 1, 0 }
  0x10   : > { %p205_p8 = scmp.lt.s32.totalorder %s10644_s27, 3  ;;  %p12782_p9 = scmp.eq.s32.totalorder %s10716_s28, 0 }
  0x11   : > { %s10646_s14 = smov [#allocation7]   ;;  %s10647_s17 = smov [#allocation4]  }
  0x12   : > { %p10744_p10 = pnand %p7485_p7, %p205_p8  ;;  %s236_s15 = sshll.u32 %s10646_s14, 4  ;;  %s10750_s15 = int_to_ptr.vmem [resolvable:$true] %s236_s15 }
  0x13   : > { %s220_s18 = sshll.u32 %s10647_s17, 4  ;;  %s10648_s19 = smov [#allocation9]   ;;  %s10758_s18 = int_to_ptr.vmem [resolvable:$true] %s220_s18 }
  0x14   : > { %s12948_s13 = scalar_select %p10744_p10, 1, 0 }
  0x15   : > { %p10109_p11 = pneg %p10744_p10  ;;  %s10760_s20 = sshll.u32 %s10648_s19, 4  ;;  %s250_s20 = int_to_ptr.vmem [resolvable:$true] %s10760_s20 }
  0x16   : > { %s10490_s23 = scalar_lea.hbm %s12778_s4, 32768 }
  0x17   : > { %p10754_p12 = pnand %p12782_p9, %p10109_p11  ;;  %p10491_p13 = scmp.ne.s32.totalorder %s12778_s4, %s10490_s23 }
  0x18   : > { %p10497_p3 = scmp.lt.u32.totalorder %s10490_s23, %s12778_s4 }
  0x19   : > { %p10770_p0 = pneg %p10754_p12 }
  0x1b   : > { %p10493_p1 = pnand %p10770_p0, %p10491_p13 }
  0x1d   : > { %p10494_p2 = pneg %p10493_p1 }
  0x1f   : > { %p10499_p4 = pnand %p10497_p3, %p10494_p2 }
  0x21   : > { %10502 = shalt.err (!%p10499_p4)
}
  0x22   : > { %s10503_s19 = scalar_lea.vmem %s10750_s15, 32768  ;;  %p10511_p9 = scmp.lt.s32.totalorder %s10750_s15, %s10750_s15 }
  0x23   : > { %p10504_p7 = scmp.ne.s32.totalorder %s10750_s15, %s10503_s19  ;;  %p10512_p6 = scmp.lt.s32.totalorder %s10503_s19, %s10503_s19 }
  0x25   : > { %p10506_p8 = pnand %p10504_p7, %p10770_p0  ;;  %p10513_p13 = por %p10512_p6, %p10511_p9 }
  0x27   : > { %p10507_p11 = pneg %p10506_p8 }
  0x29   : > { %p10514_p1 = pnand %p10513_p13, %p10507_p11 }
  0x2b   : > { %10517 = shalt.err (!%p10514_p1)
}
  0x2c   : > { %s10649_s21 = smov 1024   ;;  %s10650_s22 = smov 64  }
  0x2d   : > { %10115 = dma.hbm_to_vmem [thread:$0]  (!%p10754_p12), %s12778_s4, 32768, %s10750_s15, [#allocation8], %s10649_s21, %s10649_s21, %s10650_s22  }
  0x2e   : > { %s10518_s17 = scalar_lea.hbm %s12776_s2, 32768 }
  0x2f   : > { %p10519_p6 = scmp.ne.s32.totalorder %s12776_s2, %s10518_s17  ;;  %p10525_p3 = scmp.lt.u32.totalorder %s10518_s17, %s12776_s2 }
  0x31   : > { %p10521_p9 = pnand %p10519_p6, %p10770_p0 }
  0x33   : > { %p10522_p2 = pneg %p10521_p9 }
  0x35   : > { %p10527_p4 = pnand %p10525_p3, %p10522_p2 }
  0x37   : > { %10530 = shalt.err (!%p10527_p4)
}
  0x38   : > { %s10531_s15 = scalar_lea.vmem %s10758_s18, 32768  ;;  %p10539_p13 = scmp.lt.s32.totalorder %s10758_s18, %s10758_s18 }
  0x39   : > { %p10532_p7 = scmp.ne.s32.totalorder %s10758_s18, %s10531_s15  ;;  %p10540_p1 = scmp.lt.s32.totalorder %s10531_s15, %s10531_s15 }
  0x3b   : > { %p10534_p8 = pnand %p10532_p7, %p10770_p0  ;;  %p10541_p6 = por %p10540_p1, %p10539_p13 }
  0x3d   : > { %p10535_p11 = pneg %p10534_p8 }
  0x3f   : > { %p10542_p9 = pnand %p10541_p6, %p10535_p11 }
  0x41   : > { %10545 = shalt.err (!%p10542_p9)
}
  0x42   : > { %10112 = dma.hbm_to_vmem [thread:$0]  (!%p10754_p12), %s12776_s2, 32768, %s10758_s18, [#allocation5], %s10649_s21, %s10649_s21, %s10650_s22  }
  0x43   : > { %s10546_s29 = scalar_lea.hbm %s12779_s5, 8192 }
  0x44   : > { %p10547_p2 = scmp.ne.s32.totalorder %s12779_s5, %s10546_s29  ;;  %p10553_p7 = scmp.lt.u32.totalorder %s10546_s29, %s12779_s5 }
  0x46   : > { %p10549_p3 = pnand %p10547_p2, %p10770_p0 }
  0x48   : > { %p10550_p4 = pneg %p10549_p3 }
  0x4a   : > { %p10555_p8 = pnand %p10553_p7, %p10550_p4 }
  0x4c   : > { %10558 = shalt.err (!%p10555_p8)
}
  0x4d   : > { %s10559_s15 = scalar_lea.vmem %s250_s20, 8192  ;;  %p10567_p6 = scmp.lt.s32.totalorder %s250_s20, %s250_s20 }
  0x4e   : > { %p10560_p11 = scmp.ne.s32.totalorder %s250_s20, %s10559_s15  ;;  %p10568_p9 = scmp.lt.s32.totalorder %s10559_s15, %s10559_s15 }
  0x50   : > { %p10562_p13 = pnand %p10560_p11, %p10770_p0  ;;  %p10569_p5 = por %p10568_p9, %p10567_p6 }
  0x52   : > { %p10563_p1 = pneg %p10562_p13 }
  0x54   : > { %p10570_p10 = pnand %p10569_p5, %p10563_p1 }
  0x56   : > { %10573 = shalt.err (!%p10570_p10)
}
  0x57   : > { %s10651_s18 = smov 256   ;;  %s10652_s21 = smov 16  }
  0x58   : > { %10118 = dma.hbm_to_vmem [thread:$0]  (!%p10754_p12), %s12779_s5, 8192, %s250_s20, [#allocation8], %s10651_s18, %s10651_s18, %s10652_s21  }
  0x59   : > { %p12951_p2 = scmp.ne.s32.totalorder %s12948_s13, 0 }
  0x5b   : > { %277 = sbr.rel (%p12951_p2) target bundleno = 4574 (0x11de), region = 48 }
  0x62   : > { %p12952_p3 = scmp.eq.s32.totalorder %s10716_s28, 0 }
  0x64   : > { %10619 = dma.done.wait (%p12952_p3), [#allocation5], 32768   ;;  %p12953_p0 = pmov %p12952_p3 }
  0x66   : > { %10621 = vsyncadd (%p12953_p0), [#allocation5], 4294934528  ;;  %p12954_p5 = pmov %p12953_p0 }
  0x67   : > { %p12955_p10 = pmov %p12953_p0 }
  0x68   : > { %10623 = dma.done.wait (%p12954_p5), [#allocation8], 40960  }
  0x69   : > { %10625 = vsyncadd (%p12955_p10), [#allocation8], 4294926336  ;;  %s7495_s16 = sshll.u32 %s10716_s28, 3  ;;  %v12790_v0 = vmov 0.0   ;;  %v332_v1 = vld [vmem:[%s12775_s1 + $0x8] sm:$0xff]  ;;  %v331_v3 = vld [vmem:[%s12775_s1] sm:$0xff] }
  0x6a   : > { %428 = vmatprep.mubr.f32.mxu1 %v12790_v0  ;;  %654 = vmatprep.mubr.f32.mxu0 %v12790_v0  ;;  %p318_p12 = scmp.lt.s32.totalorder %s7495_s16, 15  ;;  %v336_v2 = vld [vmem:[%s12775_s1 + $0x28] sm:$0xff]  ;;  %vm339_vm0 = vcmask 64512   ;;  %v335_v4 = vld [vmem:[%s12775_s1 + $0x20] sm:$0xff]  ;;  %v334_v6 = vld [vmem:[%s12775_s1 + $0x18] sm:$0xff]  ;;  %s314_s23 = sand.u32 1, %s10636_s25  }
  0x6b   : > { %364 = vmatprep.subr.mxu1 %v332_v1  ;;  %590 = vmatprep.subr.mxu0 %v336_v2  ;;  %v881_v7 = vld [vmem:[#allocation7 + $0x8] sm:$0xff]  ;;  %v333_v9 = vld [vmem:[%s12775_s1 + $0x10] sm:$0xff]  ;;  %v880_v11 = vld [vmem:[#allocation7] sm:$0xff]  ;;  %s7494_s29 = sshll.u32 %s314_s23, 4  ;;  %s7534_s17 = sshll.u32 %s10716_s28, 8 }
  0x6c   : > { %s13383_s16 = smov (!%p318_p12, %s7495_s16), 15  ;;  %365 = vmatpush1.msra.mxu1 %v331_v3  ;;  %591 = vmatpush1.msra.mxu0 %v335_v4  ;;  %v885_v8 = vld [vmem:[#allocation7 + $0x48] sm:$0xff]  ;;  %v884_v12 = vld [vmem:[#allocation7 + $0x40] sm:$0xff]  ;;  %v338_v40 = vld [vmem:[%s12775_s1 + $0x38] sm:$0xff]  ;;  %s316_s19 = scalar_lea.vmem [#allocation10], %s7494_s29 }
  0x6d   : > { %s7496_s13 = sshll.u32 %s13383_s16, 3  ;;  %477 = vmatprep.subr.mxu1 %v334_v6  ;;  %v10874_v10 = vpack.c.bf16 %v885_v8, %v881_v7  ;;  %v10881_v14 = vpack.c.bf16 %v884_v12, %v880_v11  ;;  %v889_v15 = vld [vmem:[#allocation7 + $0x88] sm:$0xff]  ;;  %v888_v17 = vld [vmem:[#allocation7 + $0x80] sm:$0xff]  ;;  %v883_v3 = vld [vmem:[#allocation7 + $0x18] sm:$0xff]  ;;  %s7394_s15 = sshll.u32 %s316_s19, 4  ;;  %s12734_s15 = int_to_ptr.vmem [resolvable:$true] %s7394_s15 }
  0x6e   : > { %s10849_s30 = scalar_lea.vmem %s12774_s0, %s7496_s13  ;;  %v893_v16 = vld [vmem:[#allocation7 + $0xc8] sm:$0xff]  ;;  %v892_v19 = vld [vmem:[#allocation7 + $0xc0] sm:$0xff]  ;;  %v887_v4 = vld [vmem:[#allocation7 + $0x58] sm:$0xff]  ;;  %s12732_s22 = scalar_lea.hbm %s12781_s7, %s7534_s17 }
  0x6f   : > { %v10864_v5 = vld [vmem:[%s10849_s30] sm:$0xff]  ;;  %v10877_v13 = vld [vmem:[%s10849_s30 + $0x8] sm:$0xff]  ;;  %7536 = vmatprep.subr.bf16.mxu0 %v10874_v10  ;;  %v10885_v18 = vpack.c.bf16 %v893_v16, %v889_v15  ;;  %v10889_v21 = vpack.c.bf16 %v892_v19, %v888_v17  ;;  %v10900_v26 = vld [vmem:[%s10849_s30 + $0x10] sm:$0xff]  ;;  %v10996_v15 = vpack.c.bf16 %v887_v4, %v883_v3  ;;  %s7380_s26 = scalar_lea.sflag [#allocation6], %s314_s23  ;;  %s10574_s28 = scalar_lea.vmem %s12734_s15, 256 }
  0x70   : > { %7497 = vmatmul.mubr.msk.f32.vlgmr.msra.gmra.mrb[0].mxu1 %vm339_vm0, %v10864_v5  ;;  %7513 = vmatmul.mubr.msk.f32.vlgmr.msra.gmra.mrb[0].mxu0 %vm339_vm0, %v10864_v5  ;;  %v897_v20 = vld [vmem:[#allocation7 + $0x108] sm:$0xff]  ;;  %v896_v24 = vld [vmem:[#allocation7 + $0x100] sm:$0xff]  ;;  %v10915_v33 = vld [vmem:[%s10849_s30 + $0x18] sm:$0xff]  ;;  %p10575_p4 = scmp.ne.s32.totalorder %s12734_s15, %s10574_s28  ;;  %p13375_p7 = scmp.ne.s32.totalorder %s12946_s11, 0 }
  0x71   : > { %478 = vmatpush1.msra.mxu1 %v333_v9  ;;  %434 = vmatprep.mubr.f32.mxu1 %v12790_v0  ;;  %v901_v22 = vld [vmem:[#allocation7 + $0x148] sm:$0xff]  ;;  %v900_v25 = vld [vmem:[#allocation7 + $0x140] sm:$0xff]  ;;  %v10963_v55 = vld [vmem:[%s10849_s30 + $0x30] sm:$0xff]  ;;  %s10654_s16 = smov [#allocation10]  }
  0x72   : > { %7538 = vmatpush1.bf16.msra.mxu0 %v10881_v14  ;;  %660 = vmatprep.mubr.f32.mxu0 %v12790_v0  ;;  %v10894_v23 = vpack.c.bf16 %v901_v22, %v897_v20  ;;  %v905_v27 = vld [vmem:[#allocation7 + $0x188] sm:$0xff]  ;;  %v10904_v29 = vpack.c.bf16 %v900_v25, %v896_v24  ;;  %v904_v31 = vld [vmem:[#allocation7 + $0x180] sm:$0xff]  ;;  %v10978_v62 = vld [vmem:[%s10849_s30 + $0x38] sm:$0xff]  ;;  %p10576_p8 = pnand %p10575_p4, %p13375_p7  ;;  %s10578_s13 = sshll.u32 %s10654_s16, 4  ;;  %s10579_s13 = int_to_ptr.vmem [resolvable:$false] %s10578_s13 }
  0x73   : > { %7540 = vmatprep.subr.bf16.mxu0 %v10885_v18  ;;  %v909_v28 = vld [vmem:[#allocation7 + $0x1c8] sm:$0xff]  ;;  %v908_v32 = vld [vmem:[#allocation7 + $0x1c0] sm:$0xff]  ;;  %703 = vmatprep.subr.mxu1 %v338_v40  ;;  %v337_v12 = vld [vmem:[%s12775_s1 + $0x30] sm:$0xff]  ;;  %s10580_s20 = scalar_lea.vmem %s10579_s13, 512  ;;  %p10581_p13 = scmp.lt.s32.totalorder %s12734_s15, %s10579_s13 }
  0x74   : > { %7498 = vmatmul.mubr.msk.f32.gmra.mrb[2].mxu1 %vm339_vm0, %v10877_v13  ;;  %7514 = vmatmul.mubr.msk.f32.gmra.mrb[2].mxu0 %vm339_vm0, %v10877_v13  ;;  %v10909_v30 = vpack.c.bf16 %v909_v28, %v905_v27  ;;  %v913_v34 = vld [vmem:[#allocation7 + $0x208] sm:$0xff]  ;;  %v10919_v36 = vpack.c.bf16 %v908_v32, %v904_v31  ;;  %v912_v38 = vld [vmem:[#allocation7 + $0x200] sm:$0xff]  ;;  %p10577_p11 = pneg %p10576_p8  ;;  %p10582_p1 = scmp.lt.s32.totalorder %s10580_s20, %s10574_s28 }
  0x75   : > { %440 = vmatprep.mubr.f32.mxu1 %v12790_v0  ;;  %666 = vmatprep.mubr.f32.mxu0 %v12790_v0  ;;  %v917_v35 = vld [vmem:[#allocation7 + $0x248] sm:$0xff]  ;;  %v916_v39 = vld [vmem:[#allocation7 + $0x240] sm:$0xff] }
  0x76   : > { %7542 = vmatpush1.bf16.msra.mxu0 %v10889_v21  ;;  %12956 = vst [vmem:[#allocation17_spill] sm:$0xff] %v10909_v30  ;;  %12957 = vst [vmem:[#allocation18_spill] sm:$0xff] %v10919_v36  ;;  %v10924_v37 = vpack.c.bf16 %v917_v35, %v913_v34  ;;  %v10933_v41 = vld [vmem:[%s10849_s30 + $0x20] sm:$0xff]  ;;  %v921_v42 = vld [vmem:[#allocation7 + $0x288] sm:$0xff]  ;;  %v10937_v44 = vpack.c.bf16 %v916_v39, %v912_v38  ;;  %p10583_p6 = por %p10582_p1, %p10581_p13 }
  0x77   : > { %7544 = vmatprep.subr.bf16.mxu0 %v10894_v23  ;;  %v925_v43 = vld [vmem:[#allocation7 + $0x2c8] sm:$0xff]  ;;  %v920_v46 = vld [vmem:[#allocation7 + $0x280] sm:$0xff] }
  0x78   : > { %7499 = vmatmul.mubr.msk.f32.gmra.mrb[4].mxu1 %vm339_vm0, %v10900_v26  ;;  %7515 = vmatmul.mubr.msk.f32.gmra.mrb[4].mxu0 %vm339_vm0, %v10900_v26  ;;  %12958 = vst [vmem:[#allocation19_spill] sm:$0xff] %v10924_v37  ;;  %12959 = vst [vmem:[#allocation20_spill] sm:$0xff] %v10937_v44  ;;  %v10942_v45 = vpack.c.bf16 %v925_v43, %v921_v42  ;;  %v924_v47 = vld [vmem:[#allocation7 + $0x2c0] sm:$0xff]  ;;  %v10948_v48 = vld [vmem:[%s10849_s30 + $0x28] sm:$0xff]  ;;  %p10584_p9 = pnand %p10583_p6, %p10577_p11 }
  0x79   : > { %446 = vmatprep.mubr.f32.mxu1 %v12790_v0  ;;  %672 = vmatprep.mubr.f32.mxu0 %v12790_v0  ;;  %v929_v49 = vld [vmem:[#allocation7 + $0x308] sm:$0xff]  ;;  %v10952_v51 = vpack.c.bf16 %v924_v47, %v920_v46  ;;  %v928_v53 = vld [vmem:[#allocation7 + $0x300] sm:$0xff] }
  0x7a   : > { %7546 = vmatpush1.bf16.msra.mxu0 %v10904_v29  ;;  %12960 = vst [vmem:[#allocation21_spill] sm:$0xff] %v10942_v45  ;;  %v933_v50 = vld [vmem:[#allocation7 + $0x348] sm:$0xff]  ;;  %v932_v54 = vld [vmem:[#allocation7 + $0x340] sm:$0xff] }
  0x7b   : > { %7548 = vmatprep.subr.bf16.mxu0 %v10909_v30  ;;  %12961 = vst [vmem:[#allocation22_spill] sm:$0xff] %v10952_v51  ;;  %v10957_v52 = vpack.c.bf16 %v933_v50, %v929_v49  ;;  %v937_v56 = vld [vmem:[#allocation7 + $0x388] sm:$0xff]  ;;  %v10967_v58 = vpack.c.bf16 %v932_v54, %v928_v53  ;;  %v936_v60 = vld [vmem:[#allocation7 + $0x380] sm:$0xff] }
  0x7c   : > { %7500 = vmatmul.mubr.msk.f32.gmra.mrb[6].mxu1 %vm339_vm0, %v10915_v33  ;;  %7516 = vmatmul.mubr.msk.f32.gmra.mrb[6].mxu0 %vm339_vm0, %v10915_v33  ;;  %v941_v57 = vld [vmem:[#allocation7 + $0x3c8] sm:$0xff]  ;;  %v940_v61 = vld [vmem:[#allocation7 + $0x3c0] sm:$0xff] }
  0x7d   : > { %452 = vmatprep.mubr.f32.mxu1 %v12790_v0  ;;  %678 = vmatprep.mubr.f32.mxu0 %v12790_v0  ;;  %12962 = vst [vmem:[#allocation23_spill] sm:$0xff] %v10957_v52  ;;  %12963 = vst [vmem:[#allocation24_spill] sm:$0xff] %v10967_v58  ;;  %v10972_v59 = vpack.c.bf16 %v941_v57, %v937_v56  ;;  %v945_v63 = vld [vmem:[#allocation7 + $0x28] sm:$0xff]  ;;  %v10982_v2 = vpack.c.bf16 %v940_v61, %v936_v60  ;;  %v944_v7 = vld [vmem:[#allocation7 + $0x20] sm:$0xff] }
  0x7e   : > { %7550 = vmatpush1.bf16.msra.mxu0 %v10919_v36  ;;  %v949_v1 = vld [vmem:[#allocation7 + $0x68] sm:$0xff]  ;;  %v948_v8 = vld [vmem:[#allocation7 + $0x60] sm:$0xff] }
  0x7f   : > { %7552 = vmatprep.subr.bf16.mxu0 %v10924_v37  ;;  %12964 = vst [vmem:[#allocation25_spill] sm:$0xff] %v10972_v59  ;;  %12965 = vst [vmem:[#allocation26_spill] sm:$0xff] %v10982_v2  ;;  %v10987_v6 = vpack.c.bf16 %v949_v1, %v945_v63  ;;  %v953_v9 = vld [vmem:[#allocation7 + $0xa8] sm:$0xff]  ;;  %v10999_v16 = vpack.c.bf16 %v948_v8, %v944_v7  ;;  %v952_v19 = vld [vmem:[#allocation7 + $0xa0] sm:$0xff] }
  0x80   : > { %7501 = vmatmul.mubr.msk.f32.gmra.mrb[8].mxu1 %vm339_vm0, %v10933_v41  ;;  %7517 = vmatmul.mubr.msk.f32.gmra.mrb[8].mxu0 %vm339_vm0, %v10933_v41  ;;  %v957_v11 = vld [vmem:[#allocation7 + $0xe8] sm:$0xff]  ;;  %v956_v20 = vld [vmem:[#allocation7 + $0xe0] sm:$0xff] }
  0x81   : > { %458 = vmatprep.mubr.f32.mxu1 %v12790_v0  ;;  %684 = vmatprep.mubr.f32.mxu0 %v12790_v0  ;;  %12966 = vst [vmem:[#allocation27_spill] sm:$0xff] %v10987_v6  ;;  %v11004_v17 = vpack.c.bf16 %v957_v11, %v953_v9  ;;  %v961_v22 = vld [vmem:[#allocation7 + $0x128] sm:$0xff]  ;;  %v11010_v25 = vpack.c.bf16 %v956_v20, %v952_v19  ;;  %v960_v28 = vld [vmem:[#allocation7 + $0x120] sm:$0xff] }
  0x82   : > { %7554 = vmatpush1.bf16.msra.mxu0 %v10937_v44  ;;  %v965_v24 = vld [vmem:[#allocation7 + $0x168] sm:$0xff]  ;;  %v964_v31 = vld [vmem:[#allocation7 + $0x160] sm:$0xff] }
  0x83   : > { %7556 = vmatprep.subr.bf16.mxu0 %v10942_v45  ;;  %v11016_v27 = vpack.c.bf16 %v965_v24, %v961_v22  ;;  %v969_v32 = vld [vmem:[#allocation7 + $0x1a8] sm:$0xff]  ;;  %v11020_v35 = vpack.c.bf16 %v964_v31, %v960_v28  ;;  %v968_v39 = vld [vmem:[#allocation7 + $0x1a0] sm:$0xff]  ;;  %v882_v24 = vld [vmem:[#allocation7 + $0x10] sm:$0xff] }
  0x84   : > { %7502 = vmatmul.mubr.msk.f32.gmra.mrb[10].mxu1 %vm339_vm0, %v10948_v48  ;;  %7518 = vmatmul.mubr.msk.f32.gmra.mrb[10].mxu0 %vm339_vm0, %v10948_v48  ;;  %v973_v34 = vld [vmem:[#allocation7 + $0x1e8] sm:$0xff]  ;;  %v972_v40 = vld [vmem:[#allocation7 + $0x1e0] sm:$0xff]  ;;  %v886_v28 = vld [vmem:[#allocation7 + $0x50] sm:$0xff] }
  0x85   : > { %464 = vmatprep.mubr.f32.mxu1 %v12790_v0  ;;  %690 = vmatprep.mubr.f32.mxu0 %v12790_v0  ;;  %v11025_v38 = vpack.c.bf16 %v973_v34, %v969_v32  ;;  %v977_v42 = vld [vmem:[#allocation7 + $0x228] sm:$0xff]  ;;  %v11029_v46 = vpack.c.bf16 %v972_v40, %v968_v39  ;;  %v976_v49 = vld [vmem:[#allocation7 + $0x220] sm:$0xff]  ;;  %v891_v31 = vld [vmem:[#allocation7 + $0x98] sm:$0xff]  ;;  %v11071_v39 = vpack.c.bf16 %v886_v28, %v882_v24 }
  0x86   : > { %7558 = vmatpush1.bf16.msra.mxu0 %v10952_v51  ;;  %v981_v43 = vld [vmem:[#allocation7 + $0x268] sm:$0xff]  ;;  %v980_v50 = vld [vmem:[#allocation7 + $0x260] sm:$0xff]  ;;  %v895_v32 = vld [vmem:[#allocation7 + $0xd8] sm:$0xff] }
  0x87   : > { %7560 = vmatprep.subr.bf16.mxu0 %v10957_v52  ;;  %v11034_v47 = vpack.c.bf16 %v981_v43, %v977_v42  ;;  %v985_v53 = vld [vmem:[#allocation7 + $0x2a8] sm:$0xff]  ;;  %v11038_v56 = vpack.c.bf16 %v980_v50, %v976_v49  ;;  %v984_v60 = vld [vmem:[#allocation7 + $0x2a0] sm:$0xff]  ;;  %v11073_v40 = vpack.c.bf16 %v895_v32, %v891_v31  ;;  %v890_v42 = vld [vmem:[#allocation7 + $0x90] sm:$0xff] }
  0x88   : > { %7503 = vmatmul.mubr.msk.f32.gmra.mrb[12].mxu1 %vm339_vm0, %v10963_v55  ;;  %7519 = vmatmul.mubr.msk.f32.gmra.mrb[12].mxu0 %vm339_vm0, %v10963_v55  ;;  %v989_v54 = vld [vmem:[#allocation7 + $0x2e8] sm:$0xff]  ;;  %v988_v61 = vld [vmem:[#allocation7 + $0x2e0] sm:$0xff]  ;;  %v894_v43 = vld [vmem:[#allocation7 + $0xd0] sm:$0xff] }
  0x89   : > { %470 = vmatprep.mubr.f32.mxu1 %v12790_v0  ;;  %696 = vmatprep.mubr.f32.mxu0 %v12790_v0  ;;  %v11043_v57 = vpack.c.bf16 %v989_v54, %v985_v53  ;;  %v993_v63 = vld [vmem:[#allocation7 + $0x328] sm:$0xff]  ;;  %v11047_v3 = vpack.c.bf16 %v988_v61, %v984_v60  ;;  %v992_v7 = vld [vmem:[#allocation7 + $0x320] sm:$0xff]  ;;  %v899_v49 = vld [vmem:[#allocation7 + $0x118] sm:$0xff]  ;;  %v11081_v53 = vpack.c.bf16 %v894_v43, %v890_v42 }
  0x8a   : > { %7562 = vmatpush1.bf16.msra.mxu0 %v10967_v58  ;;  %v997_v1 = vld [vmem:[#allocation7 + $0x368] sm:$0xff]  ;;  %v996_v8 = vld [vmem:[#allocation7 + $0x360] sm:$0xff]  ;;  %v903_v50 = vld [vmem:[#allocation7 + $0x158] sm:$0xff] }
  0x8b   : > { %7564 = vmatprep.subr.bf16.mxu0 %v10972_v59  ;;  %v11052_v4 = vpack.c.bf16 %v997_v1, %v993_v63  ;;  %v1001_v9 = vld [vmem:[#allocation7 + $0x3a8] sm:$0xff]  ;;  %v1000_v20 = vld [vmem:[#allocation7 + $0x3a0] sm:$0xff]  ;;  %v11084_v54 = vpack.c.bf16 %v903_v50, %v899_v49  ;;  %v898_v60 = vld [vmem:[#allocation7 + $0x110] sm:$0xff] }
  0x8c   : > { %7504 = vmatmul.mubr.msk.f32.gmra.mrb[14].mxu1 %vm339_vm0, %v10978_v62  ;;  %7520 = vmatmul.mubr.msk.f32.gmra.mrb[14].mxu0 %vm339_vm0, %v10978_v62  ;;  %v1005_v11 = vld [vmem:[#allocation7 + $0x3e8] sm:$0xff]  ;;  %v1004_v22 = vld [vmem:[#allocation7 + $0x3e0] sm:$0xff]  ;;  %v902_v61 = vld [vmem:[#allocation7 + $0x150] sm:$0xff] }
  0x8d   : > { %541 = vmatprep.mubr.f32.mxu1 %v12790_v0  ;;  %1076 = vmatprep.mubr.f32.mxu0 %v12790_v0  ;;  %v11061_v19 = vpack.c.bf16 %v1005_v11, %v1001_v9  ;;  %v11065_v34 = vpack.c.bf16 %v1004_v22, %v1000_v20  ;;  %v907_v63 = vld [vmem:[#allocation7 + $0x198] sm:$0xff]  ;;  %v910_v9 = vld [vmem:[#allocation7 + $0x1d0] sm:$0xff] }
  0x8e   : > { %7566 = vmatpush1.bf16.msra.mxu0 %v10982_v2  ;;  %v911_v1 = vld [vmem:[#allocation7 + $0x1d8] sm:$0xff]  ;;  %v914_v24 = vld [vmem:[#allocation7 + $0x210] sm:$0xff] }
  0x8f   : > { %7600 = vmatprep.subr.bf16.mxu0 %v10987_v6  ;;  %v915_v11 = vld [vmem:[#allocation7 + $0x218] sm:$0xff]  ;;  %v918_v28 = vld [vmem:[#allocation7 + $0x250] sm:$0xff] }
  0x90   : > { %7505 = vmatmul.mubr.msk.f32.vlgmr.msra.gmra.mrb[16].mxu1 %vm339_vm0, %v10864_v5  ;;  %v919_v20 = vld [vmem:[#allocation7 + $0x258] sm:$0xff]  ;;  %v922_v43 = vld [vmem:[#allocation7 + $0x290] sm:$0xff] }
  0x91   : > { %704 = vmatpush1.msra.mxu1 %v337_v12  ;;  %547 = vmatprep.mubr.f32.mxu1 %v12790_v0  ;;  %v11056_v12 = vpack.c.bf16 %v996_v8, %v992_v7  ;;  %v11097_v7 = vpack.c.bf16 %v911_v1, %v907_v63  ;;  %v906_v8 = vld [vmem:[#allocation7 + $0x190] sm:$0xff]  ;;  %v11108_v22 = vpack.c.bf16 %v919_v20, %v915_v11  ;;  %v923_v31 = vld [vmem:[#allocation7 + $0x298] sm:$0xff] }
  0x92   : > { %1077 = vmatmul.mubr.f32.vlgmr.msra.gmra.mrb[16].mxu0 %v12790_v0  ;;  %7568 = vmatprep.subr.bf16.mxu1 %v10996_v15  ;;  %v927_v32 = vld [vmem:[#allocation7 + $0x2d8] sm:$0xff]  ;;  %v926_v49 = vld [vmem:[#allocation7 + $0x2d0] sm:$0xff] }
  0x93   : > { %7602 = vmatpush1.bf16.msra.mxu0 %v10999_v16  ;;  %1222 = vmatprep.mubr.f32.mxu0 %v12790_v0  ;;  %12967 = vst [vmem:[#allocation28_spill] sm:$0xff] %v11097_v7  ;;  %12969 = vst [vmem:[#allocation30_spill] sm:$0xff] %v11108_v22  ;;  %v11119_v42 = vpack.c.bf16 %v927_v32, %v923_v31  ;;  %v931_v50 = vld [vmem:[#allocation7 + $0x318] sm:$0xff]  ;;  %v930_v63 = vld [vmem:[#allocation7 + $0x310] sm:$0xff] }
  0x94   : > { %7506 = vmatmul.mubr.msk.f32.gmra.mrb[18].mxu1 %vm339_vm0, %v10877_v13  ;;  %7604 = vmatprep.subr.bf16.mxu0 %v11004_v17  ;;  %v934_v1 = vld [vmem:[#allocation7 + $0x350] sm:$0xff]  ;;  %v951_v31 = vld [vmem:[#allocation7 + $0x78] sm:$0xff] }
  0x95   : > { %553 = vmatprep.mubr.f32.mxu1 %v12790_v0  ;;  %12971 = vst [vmem:[#allocation32_spill] sm:$0xff] %v11119_v42  ;;  %v938_v20 = vld [vmem:[#allocation7 + $0x390] sm:$0xff] }
  0x97   : > { %7606 = vmatpush1.bf16.msra.mxu0 %v11010_v25 }
  0x98   : > { %7507 = vmatmul.mubr.msk.f32.gmra.mrb[20].mxu1 %vm339_vm0, %v10900_v26  ;;  %7608 = vmatprep.subr.bf16.mxu0 %v11016_v27 }
  0x99   : > { %559 = vmatprep.mubr.f32.mxu1 %v12790_v0 }
  0x9b   : > { %7610 = vmatpush1.bf16.msra.mxu0 %v11020_v35 }
  0x9c   : > { %7508 = vmatmul.mubr.msk.f32.gmra.mrb[22].mxu1 %vm339_vm0, %v10915_v33  ;;  %7612 = vmatprep.subr.bf16.mxu0 %v11025_v38 }
  0x9d   : > { %565 = vmatprep.mubr.f32.mxu1 %v12790_v0 }
  0x9f   : > { %7614 = vmatpush1.bf16.msra.mxu0 %v11029_v46 }
  0xa0   : > { %7509 = vmatmul.mubr.msk.f32.gmra.mrb[24].mxu1 %vm339_vm0, %v10933_v41  ;;  %7616 = vmatprep.subr.bf16.mxu0 %v11034_v47 }
  0xa1   : > { %571 = vmatprep.mubr.f32.mxu1 %v12790_v0 }
  0xa3   : > { %7618 = vmatpush1.bf16.msra.mxu0 %v11038_v56 }
  0xa4   : > { %7510 = vmatmul.mubr.msk.f32.gmra.mrb[26].mxu1 %vm339_vm0, %v10948_v48  ;;  %7620 = vmatprep.subr.bf16.mxu0 %v11043_v57 }
  0xa5   : > { %577 = vmatprep.mubr.f32.mxu1 %v12790_v0 }
  0xa7   : > { %7622 = vmatpush1.bf16.msra.mxu0 %v11047_v3 }
  0xa8   : > { %7511 = vmatmul.mubr.msk.f32.gmra.mrb[28].mxu1 %vm339_vm0, %v10963_v55  ;;  %7624 = vmatprep.subr.bf16.mxu0 %v11052_v4 }
  0xa9   : > { %583 = vmatprep.mubr.f32.mxu1 %v12790_v0 }
  0xab   : > { %7626 = vmatpush1.bf16.msra.mxu0 %v11056_v12 }
  0xac   : > { %7512 = vmatmul.mubr.msk.f32.gmra.mrb[30].mxu1 %vm339_vm0, %v10978_v62  ;;  %7628 = vmatprep.subr.bf16.mxu0 %v11061_v19 }
  0xad   : > { %767 = vmatprep.mubr.f32.mxu1 %v12790_v0 }
  0xaf   : > { %7630 = vmatpush1.bf16.msra.mxu0 %v11065_v34 }
  0xb0   : > { %7521 = vmatmul.mubr.msk.f32.vlgmr.msra.gmra.mrb[32].mxu1 %vm339_vm0, %v10864_v5  ;;  %7664 = vmatprep.subr.bf16.mxu0 %v10874_v10  ;;  %v11094_v5 = vpack.c.bf16 %v902_v61, %v898_v60  ;;  %v935_v60 = vld [vmem:[#allocation7 + $0x358] sm:$0xff] }
  0xb1   : > { %7570 = vmatpush1.bf16.msra.mxu1 %v11071_v39  ;;  %773 = vmatprep.mubr.f32.mxu1 %v12790_v0  ;;  %v11130_v61 = vpack.c.bf16 %v935_v60, %v931_v50  ;;  %v955_v50 = vld [vmem:[#allocation7 + $0xb8] sm:$0xff] }
  0xb2   : > { %7572 = vmatprep.subr.bf16.mxu1 %v11073_v40  ;;  %1223 = vmatmul.mubr.f32.vlgmr.msra.gmra.mrb[14].mxu0 %v12790_v0  ;;  %v959_v60 = vld [vmem:[#allocation7 + $0xf8] sm:$0xff] }
  0xb3   : > { %7666 = vmatpush1.bf16.msra.mxu0 %v10881_v14  ;;  %1406 = vmatprep.mubr.f32.mxu0 %v12790_v0  ;;  %12973 = vst [vmem:[#allocation34_spill] sm:$0xff] %v11130_v61 }
  0xb4   : > { %7522 = vmatmul.mubr.msk.f32.gmra.mrb[34].mxu1 %vm339_vm0, %v10877_v13  ;;  %7668 = vmatprep.subr.bf16.mxu0 %v10885_v18  ;;  %v11105_v13 = vpack.c.bf16 %v910_v9, %v906_v8  ;;  %v939_v8 = vld [vmem:[#allocation7 + $0x398] sm:$0xff] }
  0xb5   : > { %7574 = vmatpush1.bf16.msra.mxu1 %v11081_v53  ;;  %779 = vmatprep.mubr.f32.mxu1 %v12790_v0  ;;  %v943_v9 = vld [vmem:[#allocation7 + $0x3d8] sm:$0xff] }
  0xb6   : > { %7576 = vmatprep.subr.bf16.mxu1 %v11084_v54  ;;  %12968 = vst [vmem:[#allocation29_spill] sm:$0xff] %v11105_v13  ;;  %v11141_v11 = vpack.c.bf16 %v943_v9, %v939_v8  ;;  %v958_v8 = vld [vmem:[#allocation7 + $0xf0] sm:$0xff]  ;;  %v963_v9 = vld [vmem:[#allocation7 + $0x138] sm:$0xff] }
  0xb7   : > { %7670 = vmatpush1.bf16.msra.mxu0 %v10889_v21 }
  0xb8   : > { %7523 = vmatmul.mubr.msk.f32.gmra.mrb[36].mxu1 %vm339_vm0, %v10900_v26  ;;  %7672 = vmatprep.subr.bf16.mxu0 %v10894_v23  ;;  %v11116_v26 = vpack.c.bf16 %v918_v28, %v914_v24  ;;  %12975 = vst [vmem:[#allocation36_spill] sm:$0xff] %v11141_v11  ;;  %v942_v24 = vld [vmem:[#allocation7 + $0x3d0] sm:$0xff]  ;;  %v947_v28 = vld [vmem:[#allocation7 + $0x38] sm:$0xff] }
  0xb9   : > { %7578 = vmatpush1.bf16.msra.mxu1 %v11094_v5  ;;  %785 = vmatprep.mubr.f32.mxu1 %v12790_v0  ;;  %v11152_v32 = vpack.c.bf16 %v951_v31, %v947_v28  ;;  %v962_v28 = vld [vmem:[#allocation7 + $0x130] sm:$0xff] }
  0xba   : > { %7580 = vmatprep.subr.bf16.mxu1 %v11097_v7  ;;  %12970 = vst [vmem:[#allocation31_spill] sm:$0xff] %v11116_v26  ;;  %v966_v31 = vld [vmem:[#allocation7 + $0x170] sm:$0xff] }
  0xbb   : > { %7674 = vmatpush1.bf16.msra.mxu0 %v10904_v29  ;;  %12977 = vst [vmem:[#allocation38_spill] sm:$0xff] %v11152_v32 }
  0xbc   : > { %7524 = vmatmul.mubr.msk.f32.gmra.mrb[38].mxu1 %vm339_vm0, %v10915_v33  ;;  %7676 = vmatprep.subr.bf16.mxu0 %v10909_v30  ;;  %v11127_v33 = vpack.c.bf16 %v926_v49, %v922_v43  ;;  %v946_v43 = vld [vmem:[#allocation7 + $0x30] sm:$0xff] }
  0xbd   : > { %7582 = vmatpush1.bf16.msra.mxu1 %v11105_v13  ;;  %791 = vmatprep.mubr.f32.mxu1 %v12790_v0  ;;  %v950_v49 = vld [vmem:[#allocation7 + $0x70] sm:$0xff] }
  0xbe   : > { %7584 = vmatprep.subr.bf16.mxu1 %v11108_v22  ;;  %12972 = vst [vmem:[#allocation33_spill] sm:$0xff] %v11127_v33 }
  0xbf   : > { %7678 = vmatpush1.bf16.msra.mxu0 %v10919_v36 }
  0xc0   : > { %7525 = vmatmul.mubr.msk.f32.gmra.mrb[40].mxu1 %vm339_vm0, %v10933_v41  ;;  %7680 = vmatprep.subr.bf16.mxu0 %v10924_v37  ;;  %v11138_v41 = vpack.c.bf16 %v934_v1, %v930_v63  ;;  %v11163_v63 = vpack.c.bf16 %v959_v60, %v955_v50  ;;  %v954_v1 = vld [vmem:[#allocation7 + $0xb0] sm:$0xff]  ;;  %v11176_v50 = vpack.c.bf16 %v966_v31, %v962_v28  ;;  %v987_v28 = vld [vmem:[#allocation7 + $0x2b8] sm:$0xff] }
  0xc1   : > { %7586 = vmatpush1.bf16.msra.mxu1 %v11116_v26  ;;  %797 = vmatprep.mubr.f32.mxu1 %v12790_v0  ;;  %v991_v31 = vld [vmem:[#allocation7 + $0x2f8] sm:$0xff]  ;;  %v1006_v37 = vld [vmem:[#allocation7 + $0x3f0] sm:$0xff] }
  0xc2   : > { %7588 = vmatprep.subr.bf16.mxu1 %v11119_v42  ;;  %12974 = vst [vmem:[#allocation35_spill] sm:$0xff] %v11138_v41 }
  0xc3   : > { %7682 = vmatpush1.bf16.msra.mxu0 %v10937_v44  ;;  %v1002_v44 = vld [vmem:[#allocation7 + $0x3b0] sm:$0xff] }
  0xc4   : > { %7526 = vmatmul.mubr.msk.f32.gmra.mrb[42].mxu1 %vm339_vm0, %v10948_v48  ;;  %7684 = vmatprep.subr.bf16.mxu0 %v10942_v45  ;;  %v11149_v48 = vpack.c.bf16 %v942_v24, %v938_v20  ;;  %v967_v20 = vld [vmem:[#allocation7 + $0x178] sm:$0xff]  ;;  %v998_v45 = vld [vmem:[#allocation7 + $0x370] sm:$0xff] }
  0xc5   : > { %7590 = vmatpush1.bf16.msra.mxu1 %v11127_v33  ;;  %803 = vmatprep.mubr.f32.mxu1 %v12790_v0  ;;  %v11173_v24 = vpack.c.bf16 %v967_v20, %v963_v9 }
  0xc6   : > { %7592 = vmatprep.subr.bf16.mxu1 %v11130_v61  ;;  %12976 = vst [vmem:[#allocation37_spill] sm:$0xff] %v11149_v48 }
  0xc7   : > { %7686 = vmatpush1.bf16.msra.mxu0 %v10952_v51  ;;  %v994_v51 = vld [vmem:[#allocation7 + $0x330] sm:$0xff] }
  0xc8   : > { %7527 = vmatmul.mubr.msk.f32.gmra.mrb[44].mxu1 %vm339_vm0, %v10963_v55  ;;  %7688 = vmatprep.subr.bf16.mxu0 %v10957_v52  ;;  %v11160_v55 = vpack.c.bf16 %v950_v49, %v946_v43  ;;  %v971_v43 = vld [vmem:[#allocation7 + $0x1b8] sm:$0xff]  ;;  %v990_v52 = vld [vmem:[#allocation7 + $0x2f0] sm:$0xff] }
  0xc9   : > { %7594 = vmatpush1.bf16.msra.mxu1 %v11138_v41  ;;  %809 = vmatprep.mubr.f32.mxu1 %v12790_v0  ;;  %v975_v49 = vld [vmem:[#allocation7 + $0x1f8] sm:$0xff] }
  0xca   : > { %7596 = vmatprep.subr.bf16.mxu1 %v11141_v11  ;;  %v11179_v60 = vpack.c.bf16 %v975_v49, %v971_v43  ;;  %v11191_v49 = vpack.c.bf16 %v991_v31, %v987_v28  ;;  %v11200_v28 = vpack.c.bf16 %v998_v45, %v994_v51 }
  0xcb   : > { %7690 = vmatpush1.bf16.msra.mxu0 %v10967_v58  ;;  %v986_v58 = vld [vmem:[#allocation7 + $0x2b0] sm:$0xff] }
  0xcc   : > { %7528 = vmatmul.mubr.msk.f32.gmra.mrb[46].mxu1 %vm339_vm0, %v10978_v62  ;;  %7692 = vmatprep.subr.bf16.mxu0 %v10972_v59  ;;  %v11169_v62 = vpack.c.bf16 %v958_v8, %v954_v1  ;;  %v970_v1 = vld [vmem:[#allocation7 + $0x1b0] sm:$0xff] }
  0xcd   : > { %7598 = vmatpush1.bf16.msra.mxu1 %v11149_v48  ;;  %1147 = vmatprep.mubr.f32.mxu1 %v12790_v0  ;;  %v974_v8 = vld [vmem:[#allocation7 + $0x1f0] sm:$0xff] }
  0xce   : > { %7632 = vmatprep.subr.bf16.mxu1 %v11152_v32  ;;  %v11182_v9 = vpack.c.bf16 %v974_v8, %v970_v1  ;;  %v982_v59 = vld [vmem:[#allocation7 + $0x270] sm:$0xff]  ;;  %v995_v1 = vld [vmem:[#allocation7 + $0x338] sm:$0xff] }
  0xcf   : > { %7694 = vmatpush1.bf16.msra.mxu0 %v10982_v2  ;;  %v978_v2 = vld [vmem:[#allocation7 + $0x230] sm:$0xff]  ;;  %v999_v8 = vld [vmem:[#allocation7 + $0x378] sm:$0xff] }
  0xd0   : > { %1148 = vmatmul.mubr.f32.vlgmr.msra.gmra.mrb[16].mxu1 %v12790_v0  ;;  %7728 = vmatprep.subr.bf16.mxu0 %v10987_v6  ;;  %v979_v6 = vld [vmem:[#allocation7 + $0x238] sm:$0xff]  ;;  %v11188_v43 = vpack.c.bf16 %v982_v59, %v978_v2 }
  0xd1   : > { %7634 = vmatpush1.bf16.msra.mxu1 %v11160_v55  ;;  %1293 = vmatprep.mubr.f32.mxu1 %v12790_v0  ;;  %v983_v0 = vld [vmem:[#allocation7 + $0x278] sm:$0xff] }
  0xd2   : > { %7636 = vmatprep.subr.bf16.mxu1 %v11163_v63  ;;  %v11185_v20 = vpack.c.bf16 %v983_v0, %v979_v6  ;;  %v11194_v0 = vpack.c.bf16 %v990_v52, %v986_v58  ;;  %v11197_v6 = vpack.c.bf16 %v999_v8, %v995_v1  ;;  %v1003_v59 = vld [vmem:[#allocation7 + $0x3b8] sm:$0xff]  ;;  %v11206_v52 = vpack.c.bf16 %v1006_v37, %v1002_v44 }
  0xd3   : > { %v1007_v2 = vld [vmem:[#allocation7 + $0x3f8] sm:$0xff]  ;;  %v12978_v58 = vmov 0.0  }
  0xd4   : > { %v11203_v31 = vpack.c.bf16 %v1007_v2, %v1003_v59 }
  0xd5   : > { %7638 = vmatpush1.bf16.msra.mxu1 %v11169_v62 }
  0xd6   : > { %7640 = vmatprep.subr.bf16.mxu1 %v11173_v24 }
  0xd9   : > { %7642 = vmatpush1.bf16.msra.mxu1 %v11176_v50 }
  0xda   : > { %7644 = vmatprep.subr.bf16.mxu1 %v11179_v60 }
  0xdd   : > { %7646 = vmatpush1.bf16.msra.mxu1 %v11182_v9 }
  0xde   : > { %7648 = vmatprep.subr.bf16.mxu1 %v11185_v20 }
  0xe1   : > { %7650 = vmatpush1.bf16.msra.mxu1 %v11188_v43 }
  0xe2   : > { %7652 = vmatprep.subr.bf16.mxu1 %v11191_v49 }
  0xe5   : > { %7654 = vmatpush1.bf16.msra.mxu1 %v11194_v0 }
  0xe6   : > { %7656 = vmatprep.subr.bf16.mxu1 %v11197_v6 }
  0xe9   : > { %7658 = vmatpush1.bf16.msra.mxu1 %v11200_v28 }
  0xea   : > { %7660 = vmatprep.subr.bf16.mxu1 %v11203_v31 }
  0xed   : > { %7662 = vmatpush1.bf16.msra.mxu1 %v11206_v52 }
  0xee   : > { %7696 = vmatprep.subr.bf16.mxu1 %v10996_v15 }
  0xf0   : > { %1294 = vmatmul.mubr.f32.vlgmr.msra.gmra.mrb[46].mxu1 %v12978_v58 }
  0xf1   : > { %7698 = vmatpush1.bf16.msra.mxu1 %v11071_v39  ;;  %1477 = vmatprep.mubr.f32.mxu1 %v12978_v58 }
  0xf2   : > { %7700 = vmatprep.subr.bf16.mxu1 %v11073_v40 }
  0xf5   : > { %7702 = vmatpush1.bf16.msra.mxu1 %v11081_v53 }
  0xf6   : > { %7704 = vmatprep.subr.bf16.mxu1 %v11084_v54 }
  0xf9   : > { %7706 = vmatpush1.bf16.msra.mxu1 %v11094_v5 }
  0xfa   : > { %7708 = vmatprep.subr.bf16.mxu1 %v11097_v7 }
  0xfd   : > { %7710 = vmatpush1.bf16.msra.mxu1 %v11105_v13 }
  0xfe   : > { %7712 = vmatprep.subr.bf16.mxu1 %v11108_v22 }
 0x101   : > { %7714 = vmatpush1.bf16.msra.mxu1 %v11116_v26 }
 0x102   : > { %7716 = vmatprep.subr.bf16.mxu1 %v11119_v42 }
 0x105   : > { %7718 = vmatpush1.bf16.msra.mxu1 %v11127_v33 }
 0x106   : > { %7720 = vmatprep.subr.bf16.mxu1 %v11130_v61 }
 0x109   : > { %7722 = vmatpush1.bf16.msra.mxu1 %v11138_v41 }
 0x10a   : > { %7724 = vmatprep.subr.bf16.mxu1 %v11141_v11 }
 0x10d   : > { %7726 = vmatpush1.bf16.msra.mxu1 %v11149_v48 }
 0x10e   : > { %7760 = vmatprep.subr.bf16.mxu1 %v11152_v32 }
 0x143   : > { %v430_v37 = vpop.f32.mrb[0].mxu1 }
 0x144   : > { %v432_v44 = vpop.f32.mrb[1].mxu1 }
 0x147   : > { %v11229_v45 = vpop.f32.mrb[2].mxu1 }
 0x148   : > { %12979 = vst [vmem:[#allocation39_spill] sm:$0xff] %v11229_v45  ;;  %v11231_v51 = vpop.f32.mrb[3].mxu1 }
 0x149   : > { %12980 = vst [vmem:[#allocation40_spill] sm:$0xff] %v11231_v51 }
 0x14b   : > { %v11233_v1 = vpop.f32.mrb[4].mxu1 }
 0x14c   : > { %12981 = vst [vmem:[#allocation41_spill] sm:$0xff] %v11233_v1  ;;  %v11235_v8 = vpop.f32.mrb[5].mxu1 }
 0x14d   : > { %12982 = vst [vmem:[#allocation42_spill] sm:$0xff] %v11235_v8 }
 0x14f   : > { %v11237_v59 = vpop.f32.mrb[6].mxu1 }
 0x150   : > { %12983 = vst [vmem:[#allocation43_spill] sm:$0xff] %v11237_v59  ;;  %v11239_v2 = vpop.f32.mrb[7].mxu1 }
 0x151   : > { %12984 = vst [vmem:[#allocation44_spill] sm:$0xff] %v11239_v2 }
 0x153   : > { %v11241_v41 = vpop.f32.mrb[8].mxu1 }
 0x154   : > { %12985 = vst [vmem:[#allocation45_spill] sm:$0xff] %v11241_v41  ;;  %v11243_v11 = vpop.f32.mrb[9].mxu1 }
 0x155   : > { %12986 = vst [vmem:[#allocation46_spill] sm:$0xff] %v11243_v11 }
 0x157   : > { %v11245_v48 = vpop.f32.mrb[10].mxu1 }
 0x158   : > { %12987 = vst [vmem:[#allocation47_spill] sm:$0xff] %v11245_v48  ;;  %v11247_v32 = vpop.f32.mrb[11].mxu1 }
 0x159   : > { %12988 = vst [vmem:[#allocation48_spill] sm:$0xff] %v11247_v32 }
 0x15b   : > { %v11249_v61 = vpop.f32.mrb[12].mxu1 }
 0x15c   : > { %12989 = vst [vmem:[#allocation49_spill] sm:$0xff] %v11249_v61  ;;  %v11251_v45 = vpop.f32.mrb[13].mxu1 }
 0x15d   : > { %12990 = vst [vmem:[#allocation50_spill] sm:$0xff] %v11251_v45 }
 0x15f   : > { %v11253_v51 = vpop.f32.mrb[14].mxu1 }
 0x160   : > { %12991 = vst [vmem:[#allocation51_spill] sm:$0xff] %v11253_v51  ;;  %v11255_v1 = vpop.f32.mrb[15].mxu1 }
 0x161   : > { %12992 = vst [vmem:[#allocation52_spill] sm:$0xff] %v11255_v1 }
 0x165   : > { %v1078_v8 = vpop.f32.mrb[16].mxu0 }
 0x166   : > { %v1079_v59 = vadd.f32 %v1078_v8, %v430_v37  ;;  %v1080_v33 = vpop.f32.mrb[17].mxu0 }
 0x167   : > { %v1081_v2 = vadd.f32 %v1080_v33, %v432_v44 }
 0x168   : > { %v1300_v11 = vmul.f32 0.5, %v1079_v59 }
 0x169   : > { %v1301_v26 = vmul.f32 0.5, %v1081_v2 }
 0x16b   : > { %10170 = vtanh.f32 %v1301_v26 }
 0x16c   : > { %10172 = vtanh.f32 %v1300_v11 }
 0x175   : > { %v10171_v22 = vpop.eup %10170 }
 0x176   : > { %v10173_v61 = vpop.eup %10172  ;;  %v1307_v45 = vadd.f32 1.0, %v10171_v22 }
 0x177   : > { %v1306_v51 = vadd.f32 1.0, %v10173_v61 }
 0x178   : > { %v1310_v36 = vmul.f32 0.5, %v1307_v45 }
 0x179   : > { %v1309_v1 = vmul.f32 0.5, %v1306_v51 }
 0x17a   : > { %v1313_v8 = vmul.f32 0.0, %v1310_v36 }
 0x185   : > { %v1224_v42 = vpop.f32.mrb[14].mxu0 }
 0x186   : > { %v1226_v41 = vpop.f32.mrb[15].mxu0  ;;  %v1318_v59 = vmul.f32 0.5, %v1224_v42 }
 0x187   : > { %v1319_v11 = vmul.f32 0.5, %v1226_v41 }
 0x1a3   : > { %v1149_v48 = vpop.f32.mrb[16].mxu1 }
 0x1a4   : > { %v1151_v32 = vpop.f32.mrb[17].mxu1  ;;  %v1302_v13 = vmul.f32 0.5, %v1149_v48 }
 0x1a5   : > { %10174 = vtanh.f32 %v1151_v32 }
 0x1a6   : > { %10176 = vtanh.f32 %v1302_v13 }
 0x1af   : > { %v10175_v37 = vpop.eup %10174 }
 0x1b0   : > { %v1314_v33 = vmul.f32 %v10175_v37, %v1309_v1  ;;  %v10177_v26 = vpop.eup %10176 }
 0x1b1   : > { %v1308_v2 = vadd.f32 1.0, %v10177_v26 }
 0x1b2   : > { %v11257_v44 = vadd.f32 %v1314_v33, %v1313_v8 }
 0x1b3   : > { %v1311_v32 = vmul.f32 0.5, %v1308_v2 }
 0x1b4   : > { %10178 = vtanh.f32 %v11257_v44 }
 0x1b5   : > { %10180 = vtanh.f32 %v1319_v11 }
 0x1b6   : > { %10182 = vtanh.f32 %v1318_v59 }
 0x1be   : > { %v10179_v22 = vpop.eup %10178 }
 0x1bf   : > { %v11260_v48 = vmul.f32 %v10179_v22, %v1311_v32  ;;  %v10181_v42 = vpop.eup %10180 }
 0x1c0   : > { %v10183_v61 = vpop.eup %10182  ;;  %v1325_v41 = vadd.f32 1.0, %v10181_v42  ;;  %v12996_v42 = vld [vmem:[#allocation29_spill] sm:$0xff] }
 0x1c1   : > { %12993 = vst [vmem:[#allocation53_spill] sm:$0xff] %v11260_v48  ;;  %1407 = vmatmul.mubr.f32.vlgmr.msra.gmra.mrb[18].mxu0 %v11260_v48  ;;  %1478 = vmatmul.mubr.f32.vlgmr.msra.gmra.mrb[18].mxu1 %v11260_v48  ;;  %v1324_v51 = vadd.f32 1.0, %v10183_v61  ;;  %v12997_v61 = vld [vmem:[#allocation19_spill] sm:$0xff]  ;;  %v13011_v48 = vld [vmem:[#allocation26_spill] sm:$0xff] }
 0x1c2   : > { %7730 = vmatpush1.bf16.msra.mxu0 %v10999_v16  ;;  %7762 = vmatpush1.bf16.msra.mxu1 %v11160_v55  ;;  %v1328_v1 = vmul.f32 0.5, %v1325_v41  ;;  %v12998_v41 = vld [vmem:[#allocation30_spill] sm:$0xff] }
 0x1c3   : > { %v1295_v36 = vpop.f32.mrb[46].mxu1  ;;  %7732 = vmatprep.subr.bf16.mxu0 %v11004_v17  ;;  %7764 = vmatprep.subr.bf16.mxu1 %v11163_v63  ;;  %v1327_v37 = vmul.f32 0.5, %v1324_v51  ;;  %v13000_v51 = vld [vmem:[#allocation31_spill] sm:$0xff] }
 0x1c4   : > { %v1297_v13 = vpop.f32.mrb[47].mxu1  ;;  %1552 = vmatprep.mubr.f32.mxu0 %v12978_v58  ;;  %1623 = vmatprep.mubr.f32.mxu1 %v12978_v58  ;;  %v1320_v45 = vmul.f32 0.5, %v1295_v36  ;;  %v1331_v33 = vmul.f32 0.0, %v1328_v1  ;;  %v13001_v1 = vld [vmem:[#allocation21_spill] sm:$0xff] }
 0x1c5   : > { %10184 = vtanh.f32 %v1297_v13  ;;  %v12995_v13 = vld [vmem:[#allocation18_spill] sm:$0xff] }
 0x1c6   : > { %7734 = vmatpush1.bf16.msra.mxu0 %v11010_v25  ;;  %7766 = vmatpush1.bf16.msra.mxu1 %v11169_v62  ;;  %10186 = vtanh.f32 %v1320_v45  ;;  %v12999_v45 = vld [vmem:[#allocation20_spill] sm:$0xff] }
 0x1c7   : > { %7736 = vmatprep.subr.bf16.mxu0 %v11016_v27  ;;  %7768 = vmatprep.subr.bf16.mxu1 %v11173_v24 }
 0x1ca   : > { %7738 = vmatpush1.bf16.msra.mxu0 %v11020_v35  ;;  %7770 = vmatpush1.bf16.msra.mxu1 %v11176_v50 }
 0x1cb   : > { %7740 = vmatprep.subr.bf16.mxu0 %v11025_v38  ;;  %7772 = vmatprep.subr.bf16.mxu1 %v11179_v60 }
 0x1ce   : > { %7742 = vmatpush1.bf16.msra.mxu0 %v11029_v46  ;;  %7774 = vmatpush1.bf16.msra.mxu1 %v11182_v9 }
 0x1cf   : > { %v10185_v8 = vpop.eup %10184  ;;  %7744 = vmatprep.subr.bf16.mxu0 %v11034_v47  ;;  %7776 = vmatprep.subr.bf16.mxu1 %v11185_v20 }
 0x1d0   : > { %v1332_v26 = vmul.f32 %v10185_v8, %v1327_v37  ;;  %v10187_v59 = vpop.eup %10186  ;;  %v13002_v37 = vld [vmem:[#allocation32_spill] sm:$0xff]  ;;  %v13003_v8 = vld [vmem:[#allocation22_spill] sm:$0xff] }
 0x1d1   : > { %v1326_v2 = vadd.f32 1.0, %v10187_v59  ;;  %v13006_v59 = vld [vmem:[#allocation34_spill] sm:$0xff] }
 0x1d2   : > { %v11282_v11 = vadd.f32 %v1332_v26, %v1331_v33  ;;  %7746 = vmatpush1.bf16.msra.mxu0 %v11038_v56  ;;  %7778 = vmatpush1.bf16.msra.mxu1 %v11188_v43  ;;  %v13004_v33 = vld [vmem:[#allocation33_spill] sm:$0xff]  ;;  %v13005_v26 = vld [vmem:[#allocation23_spill] sm:$0xff] }
 0x1d3   : > { %7748 = vmatprep.subr.bf16.mxu0 %v11043_v57  ;;  %7780 = vmatprep.subr.bf16.mxu1 %v11191_v49  ;;  %v1329_v32 = vmul.f32 0.5, %v1326_v2  ;;  %v13007_v2 = vld [vmem:[#allocation24_spill] sm:$0xff] }
 0x1d4   : > { %10188 = vtanh.f32 %v11282_v11 }
 0x1d6   : > { %7750 = vmatpush1.bf16.msra.mxu0 %v11047_v3  ;;  %7782 = vmatpush1.bf16.msra.mxu1 %v11194_v0 }
 0x1d7   : > { %7752 = vmatprep.subr.bf16.mxu0 %v11052_v4  ;;  %7784 = vmatprep.subr.bf16.mxu1 %v11197_v6 }
 0x1da   : > { %7754 = vmatpush1.bf16.msra.mxu0 %v11056_v12  ;;  %7786 = vmatpush1.bf16.msra.mxu1 %v11200_v28 }
 0x1db   : > { %7756 = vmatprep.subr.bf16.mxu0 %v11061_v19  ;;  %7788 = vmatprep.subr.bf16.mxu1 %v11203_v31 }
 0x1de   : > { %v10189_v22 = vpop.eup %10188  ;;  %7758 = vmatpush1.bf16.msra.mxu0 %v11065_v34  ;;  %7790 = vmatpush1.bf16.msra.mxu1 %v11206_v52 }
 0x1df   : > { %v11299_v36 = vmul.f32 %v10189_v22, %v1329_v32  ;;  %7792 = vmatprep.subr.bf16.mxu0 %v10874_v10  ;;  %7824 = vmatprep.subr.bf16.mxu1 %v10996_v15  ;;  %v13008_v32 = vld [vmem:[#allocation35_spill] sm:$0xff]  ;;  %v13009_v22 = vld [vmem:[#allocation25_spill] sm:$0xff] }
 0x1e1   : > { %12994 = vst [vmem:[#allocation54_spill] sm:$0xff] %v11299_v36  ;;  %1553 = vmatmul.mubr.f32.vlgmr.msra.gmra.mrb[12].mxu0 %v11299_v36  ;;  %1624 = vmatmul.mubr.f32.vlgmr.msra.gmra.mrb[44].mxu1 %v11299_v36  ;;  %v13010_v36 = vld [vmem:[#allocation36_spill] sm:$0xff] }
 0x1e2   : > { %7794 = vmatpush1.bf16.msra.mxu0 %v10881_v14  ;;  %7826 = vmatpush1.bf16.msra.mxu1 %v11071_v39 }
 0x1e3   : > { %7796 = vmatprep.subr.bf16.mxu0 %v10885_v18  ;;  %7828 = vmatprep.subr.bf16.mxu1 %v11073_v40 }
 0x1e4   : > { %1736 = vmatprep.mubr.f32.mxu0 %v12978_v58  ;;  %1807 = vmatprep.mubr.f32.mxu1 %v12978_v58 }
 0x1e6   : > { %7798 = vmatpush1.bf16.msra.mxu0 %v10889_v21  ;;  %7830 = vmatpush1.bf16.msra.mxu1 %v11081_v53 }
 0x1e7   : > { %7800 = vmatprep.subr.bf16.mxu0 %v10894_v23  ;;  %7832 = vmatprep.subr.bf16.mxu1 %v11084_v54 }
 0x1ea   : > { %7802 = vmatpush1.bf16.msra.mxu0 %v10904_v29  ;;  %7834 = vmatpush1.bf16.msra.mxu1 %v11094_v5 }
 0x1eb   : > { %7804 = vmatprep.subr.bf16.mxu0 %v10909_v30  ;;  %7836 = vmatprep.subr.bf16.mxu1 %v11097_v7 }
 0x1ee   : > { %7806 = vmatpush1.bf16.msra.mxu0 %v12995_v13  ;;  %7838 = vmatpush1.bf16.msra.mxu1 %v12996_v42 }
 0x1ef   : > { %7808 = vmatprep.subr.bf16.mxu0 %v12997_v61  ;;  %7840 = vmatprep.subr.bf16.mxu1 %v12998_v41  ;;  %v13016_v41 = vld [vmem:[#allocation40_spill] sm:$0xff] }
 0x1f2   : > { %7810 = vmatpush1.bf16.msra.mxu0 %v12999_v45  ;;  %7842 = vmatpush1.bf16.msra.mxu1 %v13000_v51  ;;  %v13015_v51 = vld [vmem:[#allocation39_spill] sm:$0xff] }
 0x1f3   : > { %7812 = vmatprep.subr.bf16.mxu0 %v13001_v1  ;;  %7844 = vmatprep.subr.bf16.mxu1 %v13002_v37  ;;  %v13012_v1 = vld [vmem:[#allocation37_spill] sm:$0xff]  ;;  %v13013_v37 = vld [vmem:[#allocation27_spill] sm:$0xff] }
 0x1f6   : > { %7814 = vmatpush1.bf16.msra.mxu0 %v13003_v8  ;;  %7846 = vmatpush1.bf16.msra.mxu1 %v13004_v33  ;;  %v13014_v8 = vld [vmem:[#allocation38_spill] sm:$0xff] }
 0x1f7   : > { %7816 = vmatprep.subr.bf16.mxu0 %v13005_v26  ;;  %7848 = vmatprep.subr.bf16.mxu1 %v13006_v59 }
 0x1fa   : > { %7818 = vmatpush1.bf16.msra.mxu0 %v13007_v2  ;;  %7850 = vmatpush1.bf16.msra.mxu1 %v13008_v32 }
 0x1fb   : > { %7820 = vmatprep.subr.bf16.mxu0 %v13009_v22  ;;  %7852 = vmatprep.subr.bf16.mxu1 %v13010_v36 }
 0x1fe   : > { %7822 = vmatpush1.bf16.msra.mxu0 %v13011_v48  ;;  %7854 = vmatpush1.bf16.msra.mxu1 %v13012_v1 }
 0x1ff   : > { %7856 = vmatprep.subr.bf16.mxu0 %v13013_v37  ;;  %7888 = vmatprep.subr.bf16.mxu1 %v13014_v8 }
 0x294   : > { %v1408_v33 = vpop.f32.mrb[18].mxu0  ;;  %v1479_v26 = vpop.f32.mrb[18].mxu1 }
 0x295   : > { %v1409_v59 = vadd.f32 %v1408_v33, %v13015_v51  ;;  %v1410_v45 = vpop.f32.mrb[19].mxu0  ;;  %v1481_v2 = vpop.f32.mrb[19].mxu1  ;;  %v1632_v48 = vmul.f32 0.5, %v1479_v26 }
 0x296   : > { %v1411_v32 = vadd.f32 %v1410_v45, %v13016_v41 }
 0x297   : > { %v1630_v61 = vmul.f32 0.5, %v1409_v59 }
 0x298   : > { %v1631_v22 = vmul.f32 0.5, %v1411_v32 }
 0x299   : > { %10190 = vtanh.f32 %v1630_v61 }
 0x29a   : > { %10192 = vtanh.f32 %v1631_v22 }
 0x29b   : > { %10194 = vtanh.f32 %v1481_v2 }
 0x29c   : > { %10196 = vtanh.f32 %v1632_v48 }
 0x2a3   : > { %v10191_v36 = vpop.eup %10190 }
 0x2a4   : > { %v10193_v1 = vpop.eup %10192  ;;  %v1636_v42 = vadd.f32 1.0, %v10191_v36 }
 0x2a5   : > { %v1637_v37 = vadd.f32 1.0, %v10193_v1  ;;  %v10195_v13 = vpop.eup %10194 }
 0x2a6   : > { %v1639_v8 = vmul.f32 0.5, %v1636_v42  ;;  %v10197_v41 = vpop.eup %10196 }
 0x2a7   : > { %v1640_v7 = vmul.f32 0.5, %v1637_v37  ;;  %v1638_v61 = vadd.f32 1.0, %v10197_v41 }
 0x2a8   : > { %v1644_v30 = vmul.f32 %v10195_v13, %v1639_v8 }
 0x2a9   : > { %v1643_v51 = vmul.f32 %v1640_v7, %v11257_v44  ;;  %v1641_v36 = vmul.f32 0.5, %v1638_v61 }
 0x2ab   : > { %v11342_v33 = vadd.f32 %v1644_v30, %v1643_v51 }
 0x2ad   : > { %10198 = vtanh.f32 %v11342_v33 }
 0x2b4   : > { %v1554_v45 = vpop.f32.mrb[12].mxu0  ;;  %v1625_v59 = vpop.f32.mrb[44].mxu1 }
 0x2b5   : > { %v1648_v26 = vmul.f32 0.5, %v1554_v45  ;;  %v1556_v2 = vpop.f32.mrb[13].mxu0  ;;  %v1627_v32 = vpop.f32.mrb[45].mxu1  ;;  %v1650_v7 = vmul.f32 0.5, %v1625_v59 }
 0x2b6   : > { %v1649_v48 = vmul.f32 0.5, %v1556_v2 }
 0x2b7   : > { %v10199_v1 = vpop.eup %10198  ;;  %10200 = vtanh.f32 %v1648_v26 }
 0x2b8   : > { %v11345_v42 = vmul.f32 %v10199_v1, %v1641_v36  ;;  %10202 = vtanh.f32 %v1649_v48  ;;  %v13019_v36 = vld [vmem:[#allocation17_spill] sm:$0xff]  ;;  %v13020_v48 = vld [vmem:[#allocation28_spill] sm:$0xff]  ;;  %v13021_v1 = vld [vmem:[#allocation18_spill] sm:$0xff] }
 0x2b9   : > { %10204 = vtanh.f32 %v1627_v32 }
 0x2ba   : > { %13017 = vst [vmem:[#allocation39_spill] sm:$0xff] %v11345_v42  ;;  %1737 = vmatmul.mubr.f32.vlgmr.msra.gmra.mrb[20].mxu0 %v11345_v42  ;;  %1808 = vmatmul.mubr.f32.vlgmr.msra.gmra.mrb[20].mxu1 %v11345_v42  ;;  %10206 = vtanh.f32 %v1650_v7  ;;  %v13023_v7 = vld [vmem:[#allocation19_spill] sm:$0xff]  ;;  %v13037_v42 = vld [vmem:[#allocation26_spill] sm:$0xff] }
 0x2bb   : > { %7858 = vmatpush1.bf16.msra.mxu0 %v10999_v16  ;;  %7890 = vmatpush1.bf16.msra.mxu1 %v11160_v55 }
 0x2bc   : > { %7860 = vmatprep.subr.bf16.mxu0 %v11004_v17  ;;  %7892 = vmatprep.subr.bf16.mxu1 %v11163_v63 }
 0x2bd   : > { %1882 = vmatprep.mubr.f32.mxu0 %v12978_v58  ;;  %1953 = vmatprep.mubr.f32.mxu1 %v12978_v58 }
 0x2bf   : > { %7862 = vmatpush1.bf16.msra.mxu0 %v11010_v25  ;;  %7894 = vmatpush1.bf16.msra.mxu1 %v11169_v62 }
 0x2c0   : > { %7864 = vmatprep.subr.bf16.mxu0 %v11016_v27  ;;  %7896 = vmatprep.subr.bf16.mxu1 %v11173_v24 }
 0x2c1   : > { %v10201_v30 = vpop.eup %10200 }
 0x2c2   : > { %v1654_v44 = vadd.f32 1.0, %v10201_v30  ;;  %v10203_v13 = vpop.eup %10202  ;;  %v13022_v30 = vld [vmem:[#allocation29_spill] sm:$0xff] }
 0x2c3   : > { %7866 = vmatpush1.bf16.msra.mxu0 %v11020_v35  ;;  %7898 = vmatpush1.bf16.msra.mxu1 %v11176_v50  ;;  %v1655_v8 = vadd.f32 1.0, %v10203_v13  ;;  %v10205_v22 = vpop.eup %10204  ;;  %v13025_v13 = vld [vmem:[#allocation20_spill] sm:$0xff] }
 0x2c4   : > { %v1657_v37 = vmul.f32 0.5, %v1654_v44  ;;  %7868 = vmatprep.subr.bf16.mxu0 %v11025_v38  ;;  %7900 = vmatprep.subr.bf16.mxu1 %v11179_v60  ;;  %v10207_v59 = vpop.eup %10206  ;;  %v13024_v44 = vld [vmem:[#allocation30_spill] sm:$0xff] }
 0x2c5   : > { %v1658_v51 = vmul.f32 0.5, %v1655_v8  ;;  %v13027_v8 = vld [vmem:[#allocation21_spill] sm:$0xff] }
 0x2c6   : > { %v1662_v41 = vmul.f32 %v10205_v22, %v1657_v37  ;;  %v13026_v37 = vld [vmem:[#allocation31_spill] sm:$0xff]  ;;  %v13028_v22 = vld [vmem:[#allocation32_spill] sm:$0xff] }
 0x2c7   : > { %7870 = vmatpush1.bf16.msra.mxu0 %v11029_v46  ;;  %7902 = vmatpush1.bf16.msra.mxu1 %v11182_v9  ;;  %v1661_v61 = vmul.f32 %v1658_v51, %v11282_v11  ;;  %v1656_v11 = vadd.f32 1.0, %v10207_v59  ;;  %v13029_v51 = vld [vmem:[#allocation22_spill] sm:$0xff] }
 0x2c8   : > { %7872 = vmatprep.subr.bf16.mxu0 %v11034_v47  ;;  %7904 = vmatprep.subr.bf16.mxu1 %v11185_v20  ;;  %v13032_v59 = vld [vmem:[#allocation34_spill] sm:$0xff] }
 0x2c9   : > { %v11368_v45 = vadd.f32 %v1662_v41, %v1661_v61  ;;  %v1659_v2 = vmul.f32 0.5, %v1656_v11  ;;  %v13030_v41 = vld [vmem:[#allocation33_spill] sm:$0xff]  ;;  %v13031_v61 = vld [vmem:[#allocation23_spill] sm:$0xff]  ;;  %v13033_v11 = vld [vmem:[#allocation24_spill] sm:$0xff] }
 0x2cb   : > { %7874 = vmatpush1.bf16.msra.mxu0 %v11038_v56  ;;  %7906 = vmatpush1.bf16.msra.mxu1 %v11188_v43  ;;  %10208 = vtanh.f32 %v11368_v45 }
 0x2cc   : > { %7876 = vmatprep.subr.bf16.mxu0 %v11043_v57  ;;  %7908 = vmatprep.subr.bf16.mxu1 %v11191_v49 }
 0x2cf   : > { %7878 = vmatpush1.bf16.msra.mxu0 %v11047_v3  ;;  %7910 = vmatpush1.bf16.msra.mxu1 %v11194_v0 }
 0x2d0   : > { %7880 = vmatprep.subr.bf16.mxu0 %v11052_v4  ;;  %7912 = vmatprep.subr.bf16.mxu1 %v11197_v6 }
 0x2d3   : > { %7882 = vmatpush1.bf16.msra.mxu0 %v11056_v12  ;;  %7914 = vmatpush1.bf16.msra.mxu1 %v11200_v28 }
 0x2d4   : > { %7884 = vmatprep.subr.bf16.mxu0 %v11061_v19  ;;  %7916 = vmatprep.subr.bf16.mxu1 %v11203_v31 }
 0x2d5   : > { %v10209_v26 = vpop.eup %10208 }
 0x2d6   : > { %v11385_v32 = vmul.f32 %v10209_v26, %v1659_v2  ;;  %v13034_v26 = vld [vmem:[#allocation35_spill] sm:$0xff]  ;;  %v13035_v2 = vld [vmem:[#allocation25_spill] sm:$0xff] }
 0x2d7   : > { %7886 = vmatpush1.bf16.msra.mxu0 %v11065_v34  ;;  %7918 = vmatpush1.bf16.msra.mxu1 %v11206_v52 }
 0x2d8   : > { %13018 = vst [vmem:[#allocation40_spill] sm:$0xff] %v11385_v32  ;;  %7920 = vmatprep.subr.bf16.mxu0 %v10874_v10  ;;  %7952 = vmatprep.subr.bf16.mxu1 %v10996_v15 }
 0x2da   : > { %1883 = vmatmul.mubr.f32.vlgmr.msra.gmra.mrb[10].mxu0 %v11385_v32  ;;  %1954 = vmatmul.mubr.f32.vlgmr.msra.gmra.mrb[42].mxu1 %v11385_v32  ;;  %v13036_v32 = vld [vmem:[#allocation36_spill] sm:$0xff] }
 0x2db   : > { %7922 = vmatpush1.bf16.msra.mxu0 %v10881_v14  ;;  %7954 = vmatpush1.bf16.msra.mxu1 %v11071_v39 }
 0x2dc   : > { %7924 = vmatprep.subr.bf16.mxu0 %v10885_v18  ;;  %7956 = vmatprep.subr.bf16.mxu1 %v11073_v40 }
 0x2dd   : > { %2066 = vmatprep.mubr.f32.mxu0 %v12978_v58  ;;  %2137 = vmatprep.mubr.f32.mxu1 %v12978_v58 }
 0x2df   : > { %7926 = vmatpush1.bf16.msra.mxu0 %v10889_v21  ;;  %7958 = vmatpush1.bf16.msra.mxu1 %v11081_v53 }
 0x2e0   : > { %7928 = vmatprep.subr.bf16.mxu0 %v10894_v23  ;;  %7960 = vmatprep.subr.bf16.mxu1 %v11084_v54 }
 0x2e3   : > { %7930 = vmatpush1.bf16.msra.mxu0 %v10904_v29  ;;  %7962 = vmatpush1.bf16.msra.mxu1 %v11094_v5 }
 0x2e4   : > { %7932 = vmatprep.subr.bf16.mxu0 %v13019_v36  ;;  %7964 = vmatprep.subr.bf16.mxu1 %v13020_v48 }
 0x2e7   : > { %7934 = vmatpush1.bf16.msra.mxu0 %v13021_v1  ;;  %7966 = vmatpush1.bf16.msra.mxu1 %v13022_v30 }
 0x2e8   : > { %7936 = vmatprep.subr.bf16.mxu0 %v13023_v7  ;;  %7968 = vmatprep.subr.bf16.mxu1 %v13024_v44  ;;  %v13042_v44 = vld [vmem:[#allocation42_spill] sm:$0xff] }
 0x2eb   : > { %7938 = vmatpush1.bf16.msra.mxu0 %v13025_v13  ;;  %7970 = vmatpush1.bf16.msra.mxu1 %v13026_v37  ;;  %v13041_v37 = vld [vmem:[#allocation41_spill] sm:$0xff] }
 0x2ec   : > { %7940 = vmatprep.subr.bf16.mxu0 %v13027_v8  ;;  %7972 = vmatprep.subr.bf16.mxu1 %v13028_v22  ;;  %v13038_v8 = vld [vmem:[#allocation37_spill] sm:$0xff]  ;;  %v13039_v22 = vld [vmem:[#allocation27_spill] sm:$0xff] }
 0x2ef   : > { %7942 = vmatpush1.bf16.msra.mxu0 %v13029_v51  ;;  %7974 = vmatpush1.bf16.msra.mxu1 %v13030_v41  ;;  %v13040_v51 = vld [vmem:[#allocation38_spill] sm:$0xff] }
 0x2f0   : > { %7944 = vmatprep.subr.bf16.mxu0 %v13031_v61  ;;  %7976 = vmatprep.subr.bf16.mxu1 %v13032_v59 }
 0x2f3   : > { %7946 = vmatpush1.bf16.msra.mxu0 %v13033_v11  ;;  %7978 = vmatpush1.bf16.msra.mxu1 %v13034_v26 }
 0x2f4   : > { %7948 = vmatprep.subr.bf16.mxu0 %v13035_v2  ;;  %7980 = vmatprep.subr.bf16.mxu1 %v13036_v32 }
 0x2f7   : > { %7950 = vmatpush1.bf16.msra.mxu0 %v13037_v42  ;;  %7982 = vmatpush1.bf16.msra.mxu1 %v13038_v8 }
 0x2f8   : > { %7984 = vmatprep.subr.bf16.mxu0 %v13039_v22  ;;  %8016 = vmatprep.subr.bf16.mxu1 %v13040_v51 }
 0x38d   : > { %v1738_v41 = vpop.f32.mrb[20].mxu0  ;;  %v1809_v61 = vpop.f32.mrb[20].mxu1 }
 0x38e   : > { %v1739_v59 = vadd.f32 %v1738_v41, %v13041_v37  ;;  %v1740_v13 = vpop.f32.mrb[21].mxu0  ;;  %v1811_v11 = vpop.f32.mrb[21].mxu1  ;;  %v1962_v42 = vmul.f32 0.5, %v1809_v61 }
 0x38f   : > { %v1741_v26 = vadd.f32 %v1740_v13, %v13042_v44 }
 0x390   : > { %v1960_v7 = vmul.f32 0.5, %v1739_v59 }
 0x391   : > { %v1961_v2 = vmul.f32 0.5, %v1741_v26 }
 0x392   : > { %10210 = vtanh.f32 %v1960_v7 }
 0x393   : > { %10212 = vtanh.f32 %v1961_v2 }
 0x394   : > { %10214 = vtanh.f32 %v1811_v11 }
 0x395   : > { %10216 = vtanh.f32 %v1962_v42 }
 0x39c   : > { %v10211_v32 = vpop.eup %10210 }
 0x39d   : > { %v10213_v8 = vpop.eup %10212  ;;  %v1966_v30 = vadd.f32 1.0, %v10211_v32 }
 0x39e   : > { %v1967_v22 = vadd.f32 1.0, %v10213_v8  ;;  %v10215_v1 = vpop.eup %10214 }
 0x39f   : > { %v1969_v51 = vmul.f32 0.5, %v1966_v30  ;;  %v10217_v44 = vpop.eup %10216 }
 0x3a0   : > { %v1970_v48 = vmul.f32 0.5, %v1967_v22  ;;  %v1968_v7 = vadd.f32 1.0, %v10217_v44 }
 0x3a1   : > { %v1974_v36 = vmul.f32 %v10215_v1, %v1969_v51 }
 0x3a2   : > { %v1973_v37 = vmul.f32 %v1970_v48, %v11342_v33  ;;  %v1971_v32 = vmul.f32 0.5, %v1968_v7 }
 0x3a4   : > { %v11428_v41 = vadd.f32 %v1974_v36, %v1973_v37 }
 0x3a6   : > { %10218 = vtanh.f32 %v11428_v41 }
 0x3ad   : > { %v1884_v13 = vpop.f32.mrb[10].mxu0  ;;  %v1955_v59 = vpop.f32.mrb[42].mxu1 }
 0x3ae   : > { %v1978_v61 = vmul.f32 0.5, %v1884_v13  ;;  %v1886_v11 = vpop.f32.mrb[11].mxu0  ;;  %v1957_v26 = vpop.f32.mrb[43].mxu1  ;;  %v1980_v36 = vmul.f32 0.5, %v1955_v59 }
 0x3af   : > { %v1979_v42 = vmul.f32 0.5, %v1886_v11 }
 0x3b0   : > { %v10219_v8 = vpop.eup %10218  ;;  %10220 = vtanh.f32 %v1978_v61 }
 0x3b1   : > { %v11431_v30 = vmul.f32 %v10219_v8, %v1971_v32  ;;  %10222 = vtanh.f32 %v1979_v42  ;;  %v13045_v32 = vld [vmem:[#allocation17_spill] sm:$0xff]  ;;  %v13046_v42 = vld [vmem:[#allocation28_spill] sm:$0xff]  ;;  %v13047_v8 = vld [vmem:[#allocation18_spill] sm:$0xff] }
 0x3b2   : > { %10224 = vtanh.f32 %v1957_v26 }
 0x3b3   : > { %13043 = vst [vmem:[#allocation41_spill] sm:$0xff] %v11431_v30  ;;  %2067 = vmatmul.mubr.f32.vlgmr.msra.gmra.mrb[22].mxu0 %v11431_v30  ;;  %2138 = vmatmul.mubr.f32.vlgmr.msra.gmra.mrb[22].mxu1 %v11431_v30  ;;  %10226 = vtanh.f32 %v1980_v36  ;;  %v13049_v36 = vld [vmem:[#allocation19_spill] sm:$0xff]  ;;  %v13063_v30 = vld [vmem:[#allocation26_spill] sm:$0xff] }
 0x3b4   : > { %7986 = vmatpush1.bf16.msra.mxu0 %v10999_v16  ;;  %8018 = vmatpush1.bf16.msra.mxu1 %v11160_v55 }
 0x3b5   : > { %7988 = vmatprep.subr.bf16.mxu0 %v11004_v17  ;;  %8020 = vmatprep.subr.bf16.mxu1 %v11163_v63 }
 0x3b6   : > { %2212 = vmatprep.mubr.f32.mxu0 %v12978_v58  ;;  %2283 = vmatprep.mubr.f32.mxu1 %v12978_v58 }
 0x3b8   : > { %7990 = vmatpush1.bf16.msra.mxu0 %v11010_v25  ;;  %8022 = vmatpush1.bf16.msra.mxu1 %v11169_v62 }
 0x3b9   : > { %7992 = vmatprep.subr.bf16.mxu0 %v11016_v27  ;;  %8024 = vmatprep.subr.bf16.mxu1 %v11173_v24 }
 0x3ba   : > { %v10221_v33 = vpop.eup %10220 }
 0x3bb   : > { %v1984_v48 = vadd.f32 1.0, %v10221_v33  ;;  %v10223_v1 = vpop.eup %10222  ;;  %v13048_v33 = vld [vmem:[#allocation29_spill] sm:$0xff] }
 0x3bc   : > { %7994 = vmatpush1.bf16.msra.mxu0 %v11020_v35  ;;  %8026 = vmatpush1.bf16.msra.mxu1 %v11176_v50  ;;  %v1985_v51 = vadd.f32 1.0, %v10223_v1  ;;  %v10225_v2 = vpop.eup %10224  ;;  %v13051_v1 = vld [vmem:[#allocation20_spill] sm:$0xff] }
 0x3bd   : > { %v1987_v22 = vmul.f32 0.5, %v1984_v48  ;;  %7996 = vmatprep.subr.bf16.mxu0 %v11025_v38  ;;  %8028 = vmatprep.subr.bf16.mxu1 %v11179_v60  ;;  %v10227_v59 = vpop.eup %10226  ;;  %v13050_v48 = vld [vmem:[#allocation30_spill] sm:$0xff] }
 0x3be   : > { %v1988_v37 = vmul.f32 0.5, %v1985_v51  ;;  %v13053_v51 = vld [vmem:[#allocation21_spill] sm:$0xff] }
 0x3bf   : > { %v1992_v44 = vmul.f32 %v10225_v2, %v1987_v22  ;;  %v13052_v22 = vld [vmem:[#allocation31_spill] sm:$0xff]  ;;  %v13054_v2 = vld [vmem:[#allocation32_spill] sm:$0xff] }
 0x3c0   : > { %7998 = vmatpush1.bf16.msra.mxu0 %v11029_v46  ;;  %8030 = vmatpush1.bf16.msra.mxu1 %v11182_v9  ;;  %v1991_v7 = vmul.f32 %v1988_v37, %v11368_v45  ;;  %v1986_v45 = vadd.f32 1.0, %v10227_v59  ;;  %v13055_v37 = vld [vmem:[#allocation22_spill] sm:$0xff] }
 0x3c1   : > { %8000 = vmatprep.subr.bf16.mxu0 %v11034_v47  ;;  %8032 = vmatprep.subr.bf16.mxu1 %v11185_v20  ;;  %v13058_v59 = vld [vmem:[#allocation34_spill] sm:$0xff] }
 0x3c2   : > { %v11454_v13 = vadd.f32 %v1992_v44, %v1991_v7  ;;  %v1989_v11 = vmul.f32 0.5, %v1986_v45  ;;  %v13056_v44 = vld [vmem:[#allocation33_spill] sm:$0xff]  ;;  %v13057_v7 = vld [vmem:[#allocation23_spill] sm:$0xff]  ;;  %v13059_v45 = vld [vmem:[#allocation24_spill] sm:$0xff] }
 0x3c4   : > { %8002 = vmatpush1.bf16.msra.mxu0 %v11038_v56  ;;  %8034 = vmatpush1.bf16.msra.mxu1 %v11188_v43  ;;  %10228 = vtanh.f32 %v11454_v13 }
 0x3c5   : > { %8004 = vmatprep.subr.bf16.mxu0 %v11043_v57  ;;  %8036 = vmatprep.subr.bf16.mxu1 %v11191_v49 }
 0x3c8   : > { %8006 = vmatpush1.bf16.msra.mxu0 %v11047_v3  ;;  %8038 = vmatpush1.bf16.msra.mxu1 %v11194_v0 }
 0x3c9   : > { %8008 = vmatprep.subr.bf16.mxu0 %v11052_v4  ;;  %8040 = vmatprep.subr.bf16.mxu1 %v11197_v6 }
 0x3cc   : > { %8010 = vmatpush1.bf16.msra.mxu0 %v11056_v12  ;;  %8042 = vmatpush1.bf16.msra.mxu1 %v11200_v28 }
 0x3cd   : > { %8012 = vmatprep.subr.bf16.mxu0 %v11061_v19  ;;  %8044 = vmatprep.subr.bf16.mxu1 %v11203_v31 }
 0x3ce   : > { %v10229_v61 = vpop.eup %10228 }
 0x3cf   : > { %v11471_v26 = vmul.f32 %v10229_v61, %v1989_v11  ;;  %v13060_v61 = vld [vmem:[#allocation35_spill] sm:$0xff]  ;;  %v13061_v11 = vld [vmem:[#allocation25_spill] sm:$0xff] }
 0x3d0   : > { %8014 = vmatpush1.bf16.msra.mxu0 %v11065_v34  ;;  %8046 = vmatpush1.bf16.msra.mxu1 %v11206_v52 }
 0x3d1   : > { %13044 = vst [vmem:[#allocation42_spill] sm:$0xff] %v11471_v26  ;;  %8048 = vmatprep.subr.bf16.mxu0 %v10874_v10  ;;  %8080 = vmatprep.subr.bf16.mxu1 %v10996_v15 }
 0x3d3   : > { %2213 = vmatmul.mubr.f32.vlgmr.msra.gmra.mrb[8].mxu0 %v11471_v26  ;;  %2284 = vmatmul.mubr.f32.vlgmr.msra.gmra.mrb[40].mxu1 %v11471_v26  ;;  %v13062_v26 = vld [vmem:[#allocation36_spill] sm:$0xff] }
 0x3d4   : > { %8050 = vmatpush1.bf16.msra.mxu0 %v10881_v14  ;;  %8082 = vmatpush1.bf16.msra.mxu1 %v11071_v39 }
 0x3d5   : > { %8052 = vmatprep.subr.bf16.mxu0 %v10885_v18  ;;  %8084 = vmatprep.subr.bf16.mxu1 %v11073_v40 }
 0x3d6   : > { %2396 = vmatprep.mubr.f32.mxu0 %v12978_v58  ;;  %2467 = vmatprep.mubr.f32.mxu1 %v12978_v58 }
 0x3d8   : > { %8054 = vmatpush1.bf16.msra.mxu0 %v10889_v21  ;;  %8086 = vmatpush1.bf16.msra.mxu1 %v11081_v53 }
 0x3d9   : > { %8056 = vmatprep.subr.bf16.mxu0 %v10894_v23  ;;  %8088 = vmatprep.subr.bf16.mxu1 %v11084_v54 }
 0x3dc   : > { %8058 = vmatpush1.bf16.msra.mxu0 %v10904_v29  ;;  %8090 = vmatpush1.bf16.msra.mxu1 %v11094_v5 }
 0x3dd   : > { %8060 = vmatprep.subr.bf16.mxu0 %v13045_v32  ;;  %8092 = vmatprep.subr.bf16.mxu1 %v13046_v42 }
 0x3e0   : > { %8062 = vmatpush1.bf16.msra.mxu0 %v13047_v8  ;;  %8094 = vmatpush1.bf16.msra.mxu1 %v13048_v33 }
 0x3e1   : > { %8064 = vmatprep.subr.bf16.mxu0 %v13049_v36  ;;  %8096 = vmatprep.subr.bf16.mxu1 %v13050_v48  ;;  %v13068_v48 = vld [vmem:[#allocation44_spill] sm:$0xff] }
 0x3e4   : > { %8066 = vmatpush1.bf16.msra.mxu0 %v13051_v1  ;;  %8098 = vmatpush1.bf16.msra.mxu1 %v13052_v22  ;;  %v13067_v22 = vld [vmem:[#allocation43_spill] sm:$0xff] }
 0x3e5   : > { %8068 = vmatprep.subr.bf16.mxu0 %v13053_v51  ;;  %8100 = vmatprep.subr.bf16.mxu1 %v13054_v2  ;;  %v13064_v51 = vld [vmem:[#allocation37_spill] sm:$0xff]  ;;  %v13065_v2 = vld [vmem:[#allocation27_spill] sm:$0xff] }
 0x3e8   : > { %8070 = vmatpush1.bf16.msra.mxu0 %v13055_v37  ;;  %8102 = vmatpush1.bf16.msra.mxu1 %v13056_v44  ;;  %v13066_v37 = vld [vmem:[#allocation38_spill] sm:$0xff] }
 0x3e9   : > { %8072 = vmatprep.subr.bf16.mxu0 %v13057_v7  ;;  %8104 = vmatprep.subr.bf16.mxu1 %v13058_v59 }
 0x3ec   : > { %8074 = vmatpush1.bf16.msra.mxu0 %v13059_v45  ;;  %8106 = vmatpush1.bf16.msra.mxu1 %v13060_v61 }
 0x3ed   : > { %8076 = vmatprep.subr.bf16.mxu0 %v13061_v11  ;;  %8108 = vmatprep.subr.bf16.mxu1 %v13062_v26 }
 0x3f0   : > { %8078 = vmatpush1.bf16.msra.mxu0 %v13063_v30  ;;  %8110 = vmatpush1.bf16.msra.mxu1 %v13064_v51 }
 0x3f1   : > { %8112 = vmatprep.subr.bf16.mxu0 %v13065_v2  ;;  %8144 = vmatprep.subr.bf16.mxu1 %v13066_v37 }
 0x486   : > { %v2068_v44 = vpop.f32.mrb[22].mxu0  ;;  %v2139_v7 = vpop.f32.mrb[22].mxu1 }
 0x487   : > { %v2069_v59 = vadd.f32 %v2068_v44, %v13067_v22  ;;  %v2070_v1 = vpop.f32.mrb[23].mxu0  ;;  %v2141_v45 = vpop.f32.mrb[23].mxu1  ;;  %v2292_v30 = vmul.f32 0.5, %v2139_v7 }
 0x488   : > { %v2071_v61 = vadd.f32 %v2070_v1, %v13068_v48 }
 0x489   : > { %v2290_v36 = vmul.f32 0.5, %v2069_v59 }
 0x48a   : > { %v2291_v11 = vmul.f32 0.5, %v2071_v61 }
 0x48b   : > { %10230 = vtanh.f32 %v2290_v36 }
 0x48c   : > { %10232 = vtanh.f32 %v2291_v11 }
 0x48d   : > { %10234 = vtanh.f32 %v2141_v45 }
 0x48e   : > { %10236 = vtanh.f32 %v2292_v30 }
 0x495   : > { %v10231_v26 = vpop.eup %10230 }
 0x496   : > { %v10233_v51 = vpop.eup %10232  ;;  %v2296_v33 = vadd.f32 1.0, %v10231_v26 }
 0x497   : > { %v2297_v2 = vadd.f32 1.0, %v10233_v51  ;;  %v10235_v8 = vpop.eup %10234 }
 0x498   : > { %v2299_v37 = vmul.f32 0.5, %v2296_v33  ;;  %v10237_v48 = vpop.eup %10236 }
 0x499   : > { %v2300_v42 = vmul.f32 0.5, %v2297_v2  ;;  %v2298_v36 = vadd.f32 1.0, %v10237_v48 }
 0x49a   : > { %v2304_v32 = vmul.f32 %v10235_v8, %v2299_v37 }
 0x49b   : > { %v2303_v22 = vmul.f32 %v2300_v42, %v11428_v41  ;;  %v2301_v26 = vmul.f32 0.5, %v2298_v36 }
 0x49d   : > { %v11514_v44 = vadd.f32 %v2304_v32, %v2303_v22 }
 0x49f   : > { %10238 = vtanh.f32 %v11514_v44 }
 0x4a6   : > { %v2214_v1 = vpop.f32.mrb[8].mxu0  ;;  %v2285_v59 = vpop.f32.mrb[40].mxu1 }
 0x4a7   : > { %v2308_v7 = vmul.f32 0.5, %v2214_v1  ;;  %v2216_v45 = vpop.f32.mrb[9].mxu0  ;;  %v2287_v61 = vpop.f32.mrb[41].mxu1  ;;  %v2310_v32 = vmul.f32 0.5, %v2285_v59 }
 0x4a8   : > { %v2309_v30 = vmul.f32 0.5, %v2216_v45 }
 0x4a9   : > { %v10239_v51 = vpop.eup %10238  ;;  %10240 = vtanh.f32 %v2308_v7 }
 0x4aa   : > { %v11517_v33 = vmul.f32 %v10239_v51, %v2301_v26  ;;  %10242 = vtanh.f32 %v2309_v30  ;;  %v13071_v26 = vld [vmem:[#allocation17_spill] sm:$0xff]  ;;  %v13072_v30 = vld [vmem:[#allocation28_spill] sm:$0xff]  ;;  %v13073_v51 = vld [vmem:[#allocation18_spill] sm:$0xff] }
 0x4ab   : > { %10244 = vtanh.f32 %v2287_v61 }
 0x4ac   : > { %13069 = vst [vmem:[#allocation43_spill] sm:$0xff] %v11517_v33  ;;  %2397 = vmatmul.mubr.f32.vlgmr.msra.gmra.mrb[24].mxu0 %v11517_v33  ;;  %2468 = vmatmul.mubr.f32.vlgmr.msra.gmra.mrb[24].mxu1 %v11517_v33  ;;  %10246 = vtanh.f32 %v2310_v32  ;;  %v13075_v32 = vld [vmem:[#allocation19_spill] sm:$0xff]  ;;  %v13089_v33 = vld [vmem:[#allocation26_spill] sm:$0xff] }
 0x4ad   : > { %8114 = vmatpush1.bf16.msra.mxu0 %v10999_v16  ;;  %8146 = vmatpush1.bf16.msra.mxu1 %v11160_v55 }
 0x4ae   : > { %8116 = vmatprep.subr.bf16.mxu0 %v11004_v17  ;;  %8148 = vmatprep.subr.bf16.mxu1 %v11163_v63 }
 0x4af   : > { %2542 = vmatprep.mubr.f32.mxu0 %v12978_v58  ;;  %2613 = vmatprep.mubr.f32.mxu1 %v12978_v58 }
 0x4b1   : > { %8118 = vmatpush1.bf16.msra.mxu0 %v11010_v25  ;;  %8150 = vmatpush1.bf16.msra.mxu1 %v11169_v62 }
 0x4b2   : > { %8120 = vmatprep.subr.bf16.mxu0 %v11016_v27  ;;  %8152 = vmatprep.subr.bf16.mxu1 %v11173_v24 }
 0x4b3   : > { %v10241_v41 = vpop.eup %10240 }
 0x4b4   : > { %v2314_v42 = vadd.f32 1.0, %v10241_v41  ;;  %v10243_v8 = vpop.eup %10242  ;;  %v13074_v41 = vld [vmem:[#allocation29_spill] sm:$0xff] }
 0x4b5   : > { %8122 = vmatpush1.bf16.msra.mxu0 %v11020_v35  ;;  %8154 = vmatpush1.bf16.msra.mxu1 %v11176_v50  ;;  %v2315_v37 = vadd.f32 1.0, %v10243_v8  ;;  %v10245_v11 = vpop.eup %10244  ;;  %v13077_v8 = vld [vmem:[#allocation20_spill] sm:$0xff] }
 0x4b6   : > { %v2317_v2 = vmul.f32 0.5, %v2314_v42  ;;  %8124 = vmatprep.subr.bf16.mxu0 %v11025_v38  ;;  %8156 = vmatprep.subr.bf16.mxu1 %v11179_v60  ;;  %v10247_v59 = vpop.eup %10246  ;;  %v13076_v42 = vld [vmem:[#allocation30_spill] sm:$0xff] }
 0x4b7   : > { %v2318_v22 = vmul.f32 0.5, %v2315_v37  ;;  %v13079_v37 = vld [vmem:[#allocation21_spill] sm:$0xff] }
 0x4b8   : > { %v2322_v48 = vmul.f32 %v10245_v11, %v2317_v2  ;;  %v13078_v2 = vld [vmem:[#allocation31_spill] sm:$0xff]  ;;  %v13080_v11 = vld [vmem:[#allocation32_spill] sm:$0xff] }
 0x4b9   : > { %8126 = vmatpush1.bf16.msra.mxu0 %v11029_v46  ;;  %8158 = vmatpush1.bf16.msra.mxu1 %v11182_v9  ;;  %v2321_v36 = vmul.f32 %v2318_v22, %v11454_v13  ;;  %v2316_v13 = vadd.f32 1.0, %v10247_v59  ;;  %v13081_v22 = vld [vmem:[#allocation22_spill] sm:$0xff] }
 0x4ba   : > { %8128 = vmatprep.subr.bf16.mxu0 %v11034_v47  ;;  %8160 = vmatprep.subr.bf16.mxu1 %v11185_v20  ;;  %v13084_v59 = vld [vmem:[#allocation34_spill] sm:$0xff] }
 0x4bb   : > { %v11540_v1 = vadd.f32 %v2322_v48, %v2321_v36  ;;  %v2319_v45 = vmul.f32 0.5, %v2316_v13  ;;  %v13082_v48 = vld [vmem:[#allocation33_spill] sm:$0xff]  ;;  %v13083_v36 = vld [vmem:[#allocation23_spill] sm:$0xff]  ;;  %v13085_v13 = vld [vmem:[#allocation24_spill] sm:$0xff] }
 0x4bd   : > { %8130 = vmatpush1.bf16.msra.mxu0 %v11038_v56  ;;  %8162 = vmatpush1.bf16.msra.mxu1 %v11188_v43  ;;  %10248 = vtanh.f32 %v11540_v1 }
 0x4be   : > { %8132 = vmatprep.subr.bf16.mxu0 %v11043_v57  ;;  %8164 = vmatprep.subr.bf16.mxu1 %v11191_v49 }
 0x4c1   : > { %8134 = vmatpush1.bf16.msra.mxu0 %v11047_v3  ;;  %8166 = vmatpush1.bf16.msra.mxu1 %v11194_v0 }
 0x4c2   : > { %8136 = vmatprep.subr.bf16.mxu0 %v11052_v4  ;;  %8168 = vmatprep.subr.bf16.mxu1 %v11197_v6 }
 0x4c5   : > { %8138 = vmatpush1.bf16.msra.mxu0 %v11056_v12  ;;  %8170 = vmatpush1.bf16.msra.mxu1 %v11200_v28 }
 0x4c6   : > { %8140 = vmatprep.subr.bf16.mxu0 %v11061_v19  ;;  %8172 = vmatprep.subr.bf16.mxu1 %v11203_v31 }
 0x4c7   : > { %v10249_v7 = vpop.eup %10248 }
 0x4c8   : > { %v11557_v61 = vmul.f32 %v10249_v7, %v2319_v45  ;;  %v13086_v7 = vld [vmem:[#allocation35_spill] sm:$0xff]  ;;  %v13087_v45 = vld [vmem:[#allocation25_spill] sm:$0xff] }
 0x4c9   : > { %8142 = vmatpush1.bf16.msra.mxu0 %v11065_v34  ;;  %8174 = vmatpush1.bf16.msra.mxu1 %v11206_v52 }
 0x4ca   : > { %13070 = vst [vmem:[#allocation44_spill] sm:$0xff] %v11557_v61  ;;  %8176 = vmatprep.subr.bf16.mxu0 %v10874_v10  ;;  %8208 = vmatprep.subr.bf16.mxu1 %v10996_v15 }
 0x4cc   : > { %2543 = vmatmul.mubr.f32.vlgmr.msra.gmra.mrb[6].mxu0 %v11557_v61  ;;  %2614 = vmatmul.mubr.f32.vlgmr.msra.gmra.mrb[38].mxu1 %v11557_v61  ;;  %v13088_v61 = vld [vmem:[#allocation36_spill] sm:$0xff] }
 0x4cd   : > { %8178 = vmatpush1.bf16.msra.mxu0 %v10881_v14  ;;  %8210 = vmatpush1.bf16.msra.mxu1 %v11071_v39 }
 0x4ce   : > { %8180 = vmatprep.subr.bf16.mxu0 %v10885_v18  ;;  %8212 = vmatprep.subr.bf16.mxu1 %v11073_v40 }
 0x4cf   : > { %2726 = vmatprep.mubr.f32.mxu0 %v12978_v58  ;;  %2797 = vmatprep.mubr.f32.mxu1 %v12978_v58 }
 0x4d1   : > { %8182 = vmatpush1.bf16.msra.mxu0 %v10889_v21  ;;  %8214 = vmatpush1.bf16.msra.mxu1 %v11081_v53 }
 0x4d2   : > { %8184 = vmatprep.subr.bf16.mxu0 %v10894_v23  ;;  %8216 = vmatprep.subr.bf16.mxu1 %v11084_v54 }
 0x4d5   : > { %8186 = vmatpush1.bf16.msra.mxu0 %v10904_v29  ;;  %8218 = vmatpush1.bf16.msra.mxu1 %v11094_v5 }
 0x4d6   : > { %8188 = vmatprep.subr.bf16.mxu0 %v13071_v26  ;;  %8220 = vmatprep.subr.bf16.mxu1 %v13072_v30 }
 0x4d9   : > { %8190 = vmatpush1.bf16.msra.mxu0 %v13073_v51  ;;  %8222 = vmatpush1.bf16.msra.mxu1 %v13074_v41 }
 0x4da   : > { %8192 = vmatprep.subr.bf16.mxu0 %v13075_v32  ;;  %8224 = vmatprep.subr.bf16.mxu1 %v13076_v42  ;;  %v13094_v42 = vld [vmem:[#allocation46_spill] sm:$0xff] }
 0x4dd   : > { %8194 = vmatpush1.bf16.msra.mxu0 %v13077_v8  ;;  %8226 = vmatpush1.bf16.msra.mxu1 %v13078_v2  ;;  %v13093_v2 = vld [vmem:[#allocation45_spill] sm:$0xff] }
 0x4de   : > { %8196 = vmatprep.subr.bf16.mxu0 %v13079_v37  ;;  %8228 = vmatprep.subr.bf16.mxu1 %v13080_v11  ;;  %v13090_v37 = vld [vmem:[#allocation37_spill] sm:$0xff]  ;;  %v13091_v11 = vld [vmem:[#allocation27_spill] sm:$0xff] }
 0x4e1   : > { %8198 = vmatpush1.bf16.msra.mxu0 %v13081_v22  ;;  %8230 = vmatpush1.bf16.msra.mxu1 %v13082_v48  ;;  %v13092_v22 = vld [vmem:[#allocation38_spill] sm:$0xff] }
 0x4e2   : > { %8200 = vmatprep.subr.bf16.mxu0 %v13083_v36  ;;  %8232 = vmatprep.subr.bf16.mxu1 %v13084_v59 }
 0x4e5   : > { %8202 = vmatpush1.bf16.msra.mxu0 %v13085_v13  ;;  %8234 = vmatpush1.bf16.msra.mxu1 %v13086_v7 }
 0x4e6   : > { %8204 = vmatprep.subr.bf16.mxu0 %v13087_v45  ;;  %8236 = vmatprep.subr.bf16.mxu1 %v13088_v61 }
 0x4e9   : > { %8206 = vmatpush1.bf16.msra.mxu0 %v13089_v33  ;;  %8238 = vmatpush1.bf16.msra.mxu1 %v13090_v37 }
 0x4ea   : > { %8240 = vmatprep.subr.bf16.mxu0 %v13091_v11  ;;  %8272 = vmatprep.subr.bf16.mxu1 %v13092_v22 }
 0x57f   : > { %v2398_v48 = vpop.f32.mrb[24].mxu0  ;;  %v2469_v36 = vpop.f32.mrb[24].mxu1 }
 0x580   : > { %v2399_v59 = vadd.f32 %v2398_v48, %v13093_v2  ;;  %v2400_v8 = vpop.f32.mrb[25].mxu0  ;;  %v2471_v13 = vpop.f32.mrb[25].mxu1  ;;  %v2622_v33 = vmul.f32 0.5, %v2469_v36 }
 0x581   : > { %v2401_v7 = vadd.f32 %v2400_v8, %v13094_v42 }
 0x582   : > { %v2620_v32 = vmul.f32 0.5, %v2399_v59 }
 0x583   : > { %v2621_v45 = vmul.f32 0.5, %v2401_v7 }
 0x584   : > { %10250 = vtanh.f32 %v2620_v32 }
 0x585   : > { %10252 = vtanh.f32 %v2621_v45 }
 0x586   : > { %10254 = vtanh.f32 %v2471_v13 }
 0x587   : > { %10256 = vtanh.f32 %v2622_v33 }
 0x58e   : > { %v10251_v61 = vpop.eup %10250 }
 0x58f   : > { %v10253_v37 = vpop.eup %10252  ;;  %v2626_v41 = vadd.f32 1.0, %v10251_v61 }
 0x590   : > { %v2627_v11 = vadd.f32 1.0, %v10253_v37  ;;  %v10255_v51 = vpop.eup %10254 }
 0x591   : > { %v2629_v22 = vmul.f32 0.5, %v2626_v41  ;;  %v10257_v42 = vpop.eup %10256 }
 0x592   : > { %v2630_v30 = vmul.f32 0.5, %v2627_v11  ;;  %v2628_v32 = vadd.f32 1.0, %v10257_v42 }
 0x593   : > { %v2634_v26 = vmul.f32 %v10255_v51, %v2629_v22 }
 0x594   : > { %v2633_v2 = vmul.f32 %v2630_v30, %v11514_v44  ;;  %v2631_v61 = vmul.f32 0.5, %v2628_v32 }
 0x596   : > { %v11600_v48 = vadd.f32 %v2634_v26, %v2633_v2 }
 0x598   : > { %10258 = vtanh.f32 %v11600_v48 }
 0x59f   : > { %v2544_v8 = vpop.f32.mrb[6].mxu0  ;;  %v2615_v59 = vpop.f32.mrb[38].mxu1 }
 0x5a0   : > { %v2638_v36 = vmul.f32 0.5, %v2544_v8  ;;  %v2546_v13 = vpop.f32.mrb[7].mxu0  ;;  %v2617_v7 = vpop.f32.mrb[39].mxu1  ;;  %v2640_v26 = vmul.f32 0.5, %v2615_v59 }
 0x5a1   : > { %v2639_v33 = vmul.f32 0.5, %v2546_v13 }
 0x5a2   : > { %v10259_v37 = vpop.eup %10258  ;;  %10260 = vtanh.f32 %v2638_v36 }
 0x5a3   : > { %v11603_v41 = vmul.f32 %v10259_v37, %v2631_v61  ;;  %10262 = vtanh.f32 %v2639_v33  ;;  %v13097_v61 = vld [vmem:[#allocation17_spill] sm:$0xff]  ;;  %v13098_v33 = vld [vmem:[#allocation28_spill] sm:$0xff]  ;;  %v13099_v37 = vld [vmem:[#allocation18_spill] sm:$0xff] }
 0x5a4   : > { %10264 = vtanh.f32 %v2617_v7 }
 0x5a5   : > { %13095 = vst [vmem:[#allocation45_spill] sm:$0xff] %v11603_v41  ;;  %2727 = vmatmul.mubr.f32.vlgmr.msra.gmra.mrb[26].mxu0 %v11603_v41  ;;  %2798 = vmatmul.mubr.f32.vlgmr.msra.gmra.mrb[26].mxu1 %v11603_v41  ;;  %10266 = vtanh.f32 %v2640_v26  ;;  %v13101_v26 = vld [vmem:[#allocation19_spill] sm:$0xff]  ;;  %v13114_v41 = vld [vmem:[#allocation36_spill] sm:$0xff] }
 0x5a6   : > { %8242 = vmatpush1.bf16.msra.mxu0 %v10999_v16  ;;  %8274 = vmatpush1.bf16.msra.mxu1 %v11160_v55 }
 0x5a7   : > { %8244 = vmatprep.subr.bf16.mxu0 %v11004_v17  ;;  %8276 = vmatprep.subr.bf16.mxu1 %v11163_v63 }
 0x5a8   : > { %2872 = vmatprep.mubr.f32.mxu0 %v12978_v58  ;;  %2943 = vmatprep.mubr.f32.mxu1 %v12978_v58 }
 0x5aa   : > { %8246 = vmatpush1.bf16.msra.mxu0 %v11010_v25  ;;  %8278 = vmatpush1.bf16.msra.mxu1 %v11169_v62 }
 0x5ab   : > { %8248 = vmatprep.subr.bf16.mxu0 %v11016_v27  ;;  %8280 = vmatprep.subr.bf16.mxu1 %v11173_v24 }
 0x5ac   : > { %v10261_v44 = vpop.eup %10260 }
 0x5ad   : > { %v2644_v30 = vadd.f32 1.0, %v10261_v44  ;;  %v10263_v51 = vpop.eup %10262  ;;  %v13100_v44 = vld [vmem:[#allocation29_spill] sm:$0xff] }
 0x5ae   : > { %8250 = vmatpush1.bf16.msra.mxu0 %v11020_v35  ;;  %8282 = vmatpush1.bf16.msra.mxu1 %v11176_v50  ;;  %v2645_v22 = vadd.f32 1.0, %v10263_v51  ;;  %v10265_v45 = vpop.eup %10264  ;;  %v13103_v51 = vld [vmem:[#allocation20_spill] sm:$0xff] }
 0x5af   : > { %v2647_v11 = vmul.f32 0.5, %v2644_v30  ;;  %8252 = vmatprep.subr.bf16.mxu0 %v11025_v38  ;;  %8284 = vmatprep.subr.bf16.mxu1 %v11179_v60  ;;  %v10267_v59 = vpop.eup %10266  ;;  %v13102_v30 = vld [vmem:[#allocation30_spill] sm:$0xff] }
 0x5b0   : > { %v2648_v2 = vmul.f32 0.5, %v2645_v22  ;;  %v13105_v22 = vld [vmem:[#allocation21_spill] sm:$0xff] }
 0x5b1   : > { %v2652_v42 = vmul.f32 %v10265_v45, %v2647_v11  ;;  %v13104_v11 = vld [vmem:[#allocation31_spill] sm:$0xff]  ;;  %v13106_v45 = vld [vmem:[#allocation32_spill] sm:$0xff] }
 0x5b2   : > { %8254 = vmatpush1.bf16.msra.mxu0 %v11029_v46  ;;  %8286 = vmatpush1.bf16.msra.mxu1 %v11182_v9  ;;  %v2651_v32 = vmul.f32 %v2648_v2, %v11540_v1  ;;  %v2646_v1 = vadd.f32 1.0, %v10267_v59  ;;  %v13107_v2 = vld [vmem:[#allocation22_spill] sm:$0xff] }
 0x5b3   : > { %8256 = vmatprep.subr.bf16.mxu0 %v11034_v47  ;;  %8288 = vmatprep.subr.bf16.mxu1 %v11185_v20  ;;  %v13110_v59 = vld [vmem:[#allocation34_spill] sm:$0xff] }
 0x5b4   : > { %v11626_v8 = vadd.f32 %v2652_v42, %v2651_v32  ;;  %v2649_v13 = vmul.f32 0.5, %v2646_v1  ;;  %v13108_v42 = vld [vmem:[#allocation33_spill] sm:$0xff]  ;;  %v13109_v32 = vld [vmem:[#allocation23_spill] sm:$0xff]  ;;  %v13111_v1 = vld [vmem:[#allocation24_spill] sm:$0xff] }
 0x5b6   : > { %8258 = vmatpush1.bf16.msra.mxu0 %v11038_v56  ;;  %8290 = vmatpush1.bf16.msra.mxu1 %v11188_v43  ;;  %10268 = vtanh.f32 %v11626_v8 }
 0x5b7   : > { %8260 = vmatprep.subr.bf16.mxu0 %v11043_v57  ;;  %8292 = vmatprep.subr.bf16.mxu1 %v11191_v49 }
 0x5ba   : > { %8262 = vmatpush1.bf16.msra.mxu0 %v11047_v3  ;;  %8294 = vmatpush1.bf16.msra.mxu1 %v11194_v0 }
 0x5bb   : > { %8264 = vmatprep.subr.bf16.mxu0 %v11052_v4  ;;  %8296 = vmatprep.subr.bf16.mxu1 %v11197_v6 }
 0x5be   : > { %8266 = vmatpush1.bf16.msra.mxu0 %v11056_v12  ;;  %8298 = vmatpush1.bf16.msra.mxu1 %v11200_v28 }
 0x5bf   : > { %8268 = vmatprep.subr.bf16.mxu0 %v11061_v19  ;;  %8300 = vmatprep.subr.bf16.mxu1 %v11203_v31 }
 0x5c0   : > { %v10269_v36 = vpop.eup %10268 }
 0x5c1   : > { %v11643_v7 = vmul.f32 %v10269_v36, %v2649_v13  ;;  %v13112_v36 = vld [vmem:[#allocation35_spill] sm:$0xff]  ;;  %v13113_v13 = vld [vmem:[#allocation25_spill] sm:$0xff] }
 0x5c2   : > { %8270 = vmatpush1.bf16.msra.mxu0 %v11065_v34  ;;  %8302 = vmatpush1.bf16.msra.mxu1 %v11206_v52 }
 0x5c3   : > { %13096 = vst [vmem:[#allocation46_spill] sm:$0xff] %v11643_v7  ;;  %8304 = vmatprep.subr.bf16.mxu0 %v10874_v10  ;;  %8336 = vmatprep.subr.bf16.mxu1 %v10996_v15 }
 0x5c5   : > { %2873 = vmatmul.mubr.f32.vlgmr.msra.gmra.mrb[4].mxu0 %v11643_v7  ;;  %2944 = vmatmul.mubr.f32.vlgmr.msra.gmra.mrb[36].mxu1 %v11643_v7  ;;  %v13115_v7 = vld [vmem:[#allocation26_spill] sm:$0xff] }
 0x5c6   : > { %8306 = vmatpush1.bf16.msra.mxu0 %v10881_v14  ;;  %8338 = vmatpush1.bf16.msra.mxu1 %v11071_v39 }
 0x5c7   : > { %8308 = vmatprep.subr.bf16.mxu0 %v10885_v18  ;;  %8340 = vmatprep.subr.bf16.mxu1 %v11073_v40 }
 0x5c8   : > { %3056 = vmatprep.mubr.f32.mxu0 %v12978_v58  ;;  %3127 = vmatprep.mubr.f32.mxu1 %v12978_v58 }
 0x5ca   : > { %8310 = vmatpush1.bf16.msra.mxu0 %v10889_v21  ;;  %8342 = vmatpush1.bf16.msra.mxu1 %v11081_v53 }
 0x5cb   : > { %8312 = vmatprep.subr.bf16.mxu0 %v10894_v23  ;;  %8344 = vmatprep.subr.bf16.mxu1 %v11084_v54 }
 0x5ce   : > { %8314 = vmatpush1.bf16.msra.mxu0 %v10904_v29  ;;  %8346 = vmatpush1.bf16.msra.mxu1 %v11094_v5 }
 0x5cf   : > { %8316 = vmatprep.subr.bf16.mxu0 %v13097_v61  ;;  %8348 = vmatprep.subr.bf16.mxu1 %v13098_v33 }
 0x5d2   : > { %8318 = vmatpush1.bf16.msra.mxu0 %v13099_v37  ;;  %8350 = vmatpush1.bf16.msra.mxu1 %v13100_v44 }
 0x5d3   : > { %8320 = vmatprep.subr.bf16.mxu0 %v13101_v26  ;;  %8352 = vmatprep.subr.bf16.mxu1 %v13102_v30  ;;  %v13120_v30 = vld [vmem:[#allocation48_spill] sm:$0xff] }
 0x5d6   : > { %8322 = vmatpush1.bf16.msra.mxu0 %v13103_v51  ;;  %8354 = vmatpush1.bf16.msra.mxu1 %v13104_v11  ;;  %v13119_v11 = vld [vmem:[#allocation47_spill] sm:$0xff] }
 0x5d7   : > { %8324 = vmatprep.subr.bf16.mxu0 %v13105_v22  ;;  %8356 = vmatprep.subr.bf16.mxu1 %v13106_v45  ;;  %v13116_v22 = vld [vmem:[#allocation37_spill] sm:$0xff]  ;;  %v13117_v45 = vld [vmem:[#allocation27_spill] sm:$0xff] }
 0x5da   : > { %8326 = vmatpush1.bf16.msra.mxu0 %v13107_v2  ;;  %8358 = vmatpush1.bf16.msra.mxu1 %v13108_v42  ;;  %v13118_v2 = vld [vmem:[#allocation38_spill] sm:$0xff] }
 0x5db   : > { %8328 = vmatprep.subr.bf16.mxu0 %v13109_v32  ;;  %8360 = vmatprep.subr.bf16.mxu1 %v13110_v59 }
 0x5de   : > { %8330 = vmatpush1.bf16.msra.mxu0 %v13111_v1  ;;  %8362 = vmatpush1.bf16.msra.mxu1 %v13112_v36 }
 0x5df   : > { %8332 = vmatprep.subr.bf16.mxu0 %v13113_v13  ;;  %8364 = vmatprep.subr.bf16.mxu1 %v13114_v41 }
 0x5e2   : > { %8334 = vmatpush1.bf16.msra.mxu0 %v13115_v7  ;;  %8366 = vmatpush1.bf16.msra.mxu1 %v13116_v22 }
 0x5e3   : > { %8368 = vmatprep.subr.bf16.mxu0 %v13117_v45  ;;  %8400 = vmatprep.subr.bf16.mxu1 %v13118_v2 }
 0x678   : > { %v2728_v42 = vpop.f32.mrb[26].mxu0  ;;  %v2799_v32 = vpop.f32.mrb[26].mxu1 }
 0x679   : > { %v2729_v59 = vadd.f32 %v2728_v42, %v13119_v11  ;;  %v2730_v51 = vpop.f32.mrb[27].mxu0  ;;  %v2801_v1 = vpop.f32.mrb[27].mxu1  ;;  %v2952_v7 = vmul.f32 0.5, %v2799_v32 }
 0x67a   : > { %v2731_v36 = vadd.f32 %v2730_v51, %v13120_v30 }
 0x67b   : > { %v2950_v26 = vmul.f32 0.5, %v2729_v59 }
 0x67c   : > { %v2951_v13 = vmul.f32 0.5, %v2731_v36 }
 0x67d   : > { %10270 = vtanh.f32 %v2950_v26 }
 0x67e   : > { %10272 = vtanh.f32 %v2951_v13 }
 0x67f   : > { %10274 = vtanh.f32 %v2801_v1 }
 0x680   : > { %10276 = vtanh.f32 %v2952_v7 }
 0x687   : > { %v10271_v41 = vpop.eup %10270 }
 0x688   : > { %v10273_v22 = vpop.eup %10272  ;;  %v2956_v44 = vadd.f32 1.0, %v10271_v41 }
 0x689   : > { %v2957_v45 = vadd.f32 1.0, %v10273_v22  ;;  %v10275_v37 = vpop.eup %10274 }
 0x68a   : > { %v2959_v2 = vmul.f32 0.5, %v2956_v44  ;;  %v10277_v30 = vpop.eup %10276 }
 0x68b   : > { %v2960_v33 = vmul.f32 0.5, %v2957_v45  ;;  %v2958_v26 = vadd.f32 1.0, %v10277_v30 }
 0x68c   : > { %v2964_v61 = vmul.f32 %v10275_v37, %v2959_v2 }
 0x68d   : > { %v2963_v11 = vmul.f32 %v2960_v33, %v11600_v48  ;;  %v2961_v41 = vmul.f32 0.5, %v2958_v26 }
 0x68f   : > { %v11686_v42 = vadd.f32 %v2964_v61, %v2963_v11 }
 0x691   : > { %10278 = vtanh.f32 %v11686_v42 }
 0x698   : > { %v2874_v51 = vpop.f32.mrb[4].mxu0  ;;  %v2945_v59 = vpop.f32.mrb[36].mxu1 }
 0x699   : > { %v2968_v32 = vmul.f32 0.5, %v2874_v51  ;;  %v2876_v1 = vpop.f32.mrb[5].mxu0  ;;  %v2947_v36 = vpop.f32.mrb[37].mxu1  ;;  %v2970_v61 = vmul.f32 0.5, %v2945_v59 }
 0x69a   : > { %v2969_v7 = vmul.f32 0.5, %v2876_v1 }
 0x69b   : > { %v10279_v22 = vpop.eup %10278  ;;  %10280 = vtanh.f32 %v2968_v32 }
 0x69c   : > { %v11689_v44 = vmul.f32 %v10279_v22, %v2961_v41  ;;  %10282 = vtanh.f32 %v2969_v7  ;;  %v13133_v41 = vld [vmem:[#allocation23_spill] sm:$0xff]  ;;  %v13134_v7 = vld [vmem:[#allocation34_spill] sm:$0xff]  ;;  %v13135_v22 = vld [vmem:[#allocation24_spill] sm:$0xff] }
 0x69d   : > { %10284 = vtanh.f32 %v2947_v36 }
 0x69e   : > { %3057 = vmatmul.mubr.f32.vlgmr.msra.gmra.mrb[28].mxu0 %v11689_v44  ;;  %3128 = vmatmul.mubr.f32.vlgmr.msra.gmra.mrb[28].mxu1 %v11689_v44  ;;  %10286 = vtanh.f32 %v2970_v61  ;;  %v13137_v61 = vld [vmem:[#allocation25_spill] sm:$0xff] }
 0x69f   : > { %8370 = vmatpush1.bf16.msra.mxu0 %v10999_v16  ;;  %8402 = vmatpush1.bf16.msra.mxu1 %v11160_v55 }
 0x6a0   : > { %8372 = vmatprep.subr.bf16.mxu0 %v11004_v17  ;;  %8404 = vmatprep.subr.bf16.mxu1 %v11163_v63 }
 0x6a1   : > { %3202 = vmatprep.mubr.f32.mxu0 %v12978_v58  ;;  %3273 = vmatprep.mubr.f32.mxu1 %v12978_v58 }
 0x6a3   : > { %8374 = vmatpush1.bf16.msra.mxu0 %v11010_v25  ;;  %8406 = vmatpush1.bf16.msra.mxu1 %v11169_v62 }
 0x6a4   : > { %8376 = vmatprep.subr.bf16.mxu0 %v11016_v27  ;;  %8408 = vmatprep.subr.bf16.mxu1 %v11173_v24 }
 0x6a5   : > { %v10281_v48 = vpop.eup %10280 }
 0x6a6   : > { %v2974_v33 = vadd.f32 1.0, %v10281_v48  ;;  %v10283_v37 = vpop.eup %10282  ;;  %v13136_v48 = vld [vmem:[#allocation35_spill] sm:$0xff] }
 0x6a7   : > { %8378 = vmatpush1.bf16.msra.mxu0 %v11020_v35  ;;  %8410 = vmatpush1.bf16.msra.mxu1 %v11176_v50  ;;  %v2975_v2 = vadd.f32 1.0, %v10283_v37  ;;  %v10285_v13 = vpop.eup %10284  ;;  %v13139_v37 = vld [vmem:[#allocation26_spill] sm:$0xff] }
 0x6a8   : > { %v2977_v45 = vmul.f32 0.5, %v2974_v33  ;;  %8380 = vmatprep.subr.bf16.mxu0 %v11025_v38  ;;  %8412 = vmatprep.subr.bf16.mxu1 %v11179_v60  ;;  %v10287_v59 = vpop.eup %10286  ;;  %v13138_v33 = vld [vmem:[#allocation36_spill] sm:$0xff] }
 0x6a9   : > { %v2978_v11 = vmul.f32 0.5, %v2975_v2  ;;  %v13141_v2 = vld [vmem:[#allocation27_spill] sm:$0xff] }
 0x6aa   : > { %v2982_v30 = vmul.f32 %v10285_v13, %v2977_v45  ;;  %v13140_v45 = vld [vmem:[#allocation37_spill] sm:$0xff]  ;;  %v13142_v13 = vld [vmem:[#allocation38_spill] sm:$0xff] }
 0x6ab   : > { %8382 = vmatpush1.bf16.msra.mxu0 %v11029_v46  ;;  %8414 = vmatpush1.bf16.msra.mxu1 %v11182_v9  ;;  %v2981_v26 = vmul.f32 %v2978_v11, %v11626_v8  ;;  %v2976_v8 = vadd.f32 1.0, %v10287_v59 }
 0x6ac   : > { %8384 = vmatprep.subr.bf16.mxu0 %v11034_v47  ;;  %8416 = vmatprep.subr.bf16.mxu1 %v11185_v20 }
 0x6ad   : > { %v11712_v51 = vadd.f32 %v2982_v30, %v2981_v26  ;;  %v2979_v1 = vmul.f32 0.5, %v2976_v8  ;;  %v13143_v26 = vld [vmem:[#allocation49_spill] sm:$0xff] }
 0x6af   : > { %8386 = vmatpush1.bf16.msra.mxu0 %v11038_v56  ;;  %8418 = vmatpush1.bf16.msra.mxu1 %v11188_v43  ;;  %10288 = vtanh.f32 %v11712_v51 }
 0x6b0   : > { %8388 = vmatprep.subr.bf16.mxu0 %v11043_v57  ;;  %8420 = vmatprep.subr.bf16.mxu1 %v11191_v49 }
 0x6b3   : > { %8390 = vmatpush1.bf16.msra.mxu0 %v11047_v3  ;;  %8422 = vmatpush1.bf16.msra.mxu1 %v11194_v0 }
 0x6b4   : > { %8392 = vmatprep.subr.bf16.mxu0 %v11052_v4  ;;  %8424 = vmatprep.subr.bf16.mxu1 %v11197_v6 }
 0x6b7   : > { %8394 = vmatpush1.bf16.msra.mxu0 %v11056_v12  ;;  %8426 = vmatpush1.bf16.msra.mxu1 %v11200_v28 }
 0x6b8   : > { %8396 = vmatprep.subr.bf16.mxu0 %v11061_v19  ;;  %8428 = vmatprep.subr.bf16.mxu1 %v11203_v31 }
 0x6b9   : > { %v10289_v32 = vpop.eup %10288 }
 0x6ba   : > { %v11729_v36 = vmul.f32 %v10289_v32, %v2979_v1  ;;  %v13144_v1 = vld [vmem:[#allocation50_spill] sm:$0xff] }
 0x6bb   : > { %8398 = vmatpush1.bf16.msra.mxu0 %v11065_v34  ;;  %8430 = vmatpush1.bf16.msra.mxu1 %v11206_v52 }
 0x6bc   : > { %8432 = vmatprep.subr.bf16.mxu0 %v10874_v10  ;;  %8464 = vmatprep.subr.bf16.mxu1 %v10996_v15  ;;  %v13121_v10 = vld [vmem:[#allocation17_spill] sm:$0xff] }
 0x6bd   : > { %v13124_v15 = vld [vmem:[#allocation29_spill] sm:$0xff] }
 0x6be   : > { %3203 = vmatmul.mubr.f32.vlgmr.msra.gmra.mrb[2].mxu0 %v11729_v36  ;;  %3274 = vmatmul.mubr.f32.vlgmr.msra.gmra.mrb[34].mxu1 %v11729_v36 }
 0x6bf   : > { %8434 = vmatpush1.bf16.msra.mxu0 %v10881_v14  ;;  %8466 = vmatpush1.bf16.msra.mxu1 %v11071_v39  ;;  %v13122_v14 = vld [vmem:[#allocation28_spill] sm:$0xff]  ;;  %v13125_v39 = vld [vmem:[#allocation19_spill] sm:$0xff] }
 0x6c0   : > { %8436 = vmatprep.subr.bf16.mxu0 %v10885_v18  ;;  %8468 = vmatprep.subr.bf16.mxu1 %v11073_v40  ;;  %v13123_v18 = vld [vmem:[#allocation18_spill] sm:$0xff]  ;;  %v13127_v40 = vld [vmem:[#allocation20_spill] sm:$0xff] }
 0x6c1   : > { %3386 = vmatprep.mubr.f32.mxu0 %v12978_v58  ;;  %3457 = vmatprep.mubr.f32.mxu1 %v12978_v58 }
 0x6c3   : > { %8438 = vmatpush1.bf16.msra.mxu0 %v10889_v21  ;;  %8470 = vmatpush1.bf16.msra.mxu1 %v11081_v53  ;;  %v13126_v21 = vld [vmem:[#allocation30_spill] sm:$0xff]  ;;  %v13129_v53 = vld [vmem:[#allocation21_spill] sm:$0xff] }
 0x6c4   : > { %8440 = vmatprep.subr.bf16.mxu0 %v10894_v23  ;;  %8472 = vmatprep.subr.bf16.mxu1 %v11084_v54  ;;  %v13128_v23 = vld [vmem:[#allocation31_spill] sm:$0xff]  ;;  %v13131_v54 = vld [vmem:[#allocation22_spill] sm:$0xff] }
 0x6c7   : > { %8442 = vmatpush1.bf16.msra.mxu0 %v10904_v29  ;;  %8474 = vmatpush1.bf16.msra.mxu1 %v11094_v5  ;;  %v13130_v29 = vld [vmem:[#allocation32_spill] sm:$0xff]  ;;  %v13132_v5 = vld [vmem:[#allocation33_spill] sm:$0xff] }
 0x6c8   : > { %8444 = vmatprep.subr.bf16.mxu0 %v13121_v10  ;;  %8476 = vmatprep.subr.bf16.mxu1 %v13122_v14 }
 0x6cb   : > { %8446 = vmatpush1.bf16.msra.mxu0 %v13123_v18  ;;  %8478 = vmatpush1.bf16.msra.mxu1 %v13124_v15 }
 0x6cc   : > { %8448 = vmatprep.subr.bf16.mxu0 %v13125_v39  ;;  %8480 = vmatprep.subr.bf16.mxu1 %v13126_v21 }
 0x6cf   : > { %8450 = vmatpush1.bf16.msra.mxu0 %v13127_v40  ;;  %8482 = vmatpush1.bf16.msra.mxu1 %v13128_v23 }
 0x6d0   : > { %8452 = vmatprep.subr.bf16.mxu0 %v13129_v53  ;;  %8484 = vmatprep.subr.bf16.mxu1 %v13130_v29 }
 0x6d3   : > { %8454 = vmatpush1.bf16.msra.mxu0 %v13131_v54  ;;  %8486 = vmatpush1.bf16.msra.mxu1 %v13132_v5 }
 0x6d4   : > { %8456 = vmatprep.subr.bf16.mxu0 %v13133_v41  ;;  %8488 = vmatprep.subr.bf16.mxu1 %v13134_v7 }
 0x6d7   : > { %8458 = vmatpush1.bf16.msra.mxu0 %v13135_v22  ;;  %8490 = vmatpush1.bf16.msra.mxu1 %v13136_v48 }
 0x6d8   : > { %8460 = vmatprep.subr.bf16.mxu0 %v13137_v61  ;;  %8492 = vmatprep.subr.bf16.mxu1 %v13138_v33 }
 0x6db   : > { %8462 = vmatpush1.bf16.msra.mxu0 %v13139_v37  ;;  %8494 = vmatpush1.bf16.msra.mxu1 %v13140_v45 }
 0x6dc   : > { %8496 = vmatprep.subr.bf16.mxu0 %v13141_v2  ;;  %8528 = vmatprep.subr.bf16.mxu1 %v13142_v13 }
 0x771   : > { %v3058_v11 = vpop.f32.mrb[28].mxu0  ;;  %v3129_v30 = vpop.f32.mrb[28].mxu1 }
 0x772   : > { %v3059_v59 = vadd.f32 %v3058_v11, %v13143_v26  ;;  %v3060_v8 = vpop.f32.mrb[29].mxu0  ;;  %v3131_v32 = vpop.f32.mrb[29].mxu1  ;;  %v3282_v15 = vmul.f32 0.5, %v3129_v30 }
 0x773   : > { %v3061_v10 = vadd.f32 %v3060_v8, %v13144_v1  ;;  %v3680_v8 = vld [vmem:[#allocation4 + $0x80] sm:$0xff] }
 0x774   : > { %v3280_v14 = vmul.f32 0.5, %v3059_v59 }
 0x775   : > { %v3281_v18 = vmul.f32 0.5, %v3061_v10 }
 0x776   : > { %10290 = vtanh.f32 %v3280_v14  ;;  %v3682_v14 = vld [vmem:[#allocation4 + $0x90] sm:$0xff] }
 0x777   : > { %10292 = vtanh.f32 %v3281_v18  ;;  %v3690_v18 = vld [vmem:[#allocation4 + $0xd0] sm:$0xff] }
 0x778   : > { %10294 = vtanh.f32 %v3131_v32  ;;  %v3688_v32 = vld [vmem:[#allocation4 + $0xc0] sm:$0xff] }
 0x779   : > { %10296 = vtanh.f32 %v3282_v15  ;;  %v8565_v10 = vpack.c.bf16 %v3688_v32, %v3680_v8  ;;  %v8629_v15 = vpack.c.bf16 %v3690_v18, %v3682_v14  ;;  %v3763_v8 = vld [vmem:[#allocation4 + $0x318] sm:$0xff]  ;;  %v3768_v14 = vld [vmem:[#allocation4 + $0x340] sm:$0xff] }
 0x780   : > { %v10291_v39 = vpop.eup %10290 }
 0x781   : > { %v10293_v21 = vpop.eup %10292  ;;  %v3286_v40 = vadd.f32 1.0, %v10291_v39  ;;  %v3697_v39 = vld [vmem:[#allocation4 + $0x108] sm:$0xff] }
 0x782   : > { %v3287_v23 = vadd.f32 1.0, %v10293_v21  ;;  %v10295_v29 = vpop.eup %10294  ;;  %v3705_v21 = vld [vmem:[#allocation4 + $0x148] sm:$0xff] }
 0x783   : > { %v3289_v53 = vmul.f32 0.5, %v3286_v40  ;;  %v10297_v22 = vpop.eup %10296  ;;  %v3699_v40 = vld [vmem:[#allocation4 + $0x118] sm:$0xff] }
 0x784   : > { %v3290_v54 = vmul.f32 0.5, %v3287_v23  ;;  %v3288_v48 = vadd.f32 1.0, %v10297_v22  ;;  %v8567_v23 = vpack.c.bf16 %v3705_v21, %v3697_v39  ;;  %v3698_v22 = vld [vmem:[#allocation4 + $0x110] sm:$0xff] }
 0x785   : > { %v3294_v5 = vmul.f32 %v10295_v29, %v3289_v53  ;;  %v3707_v53 = vld [vmem:[#allocation4 + $0x158] sm:$0xff]  ;;  %v3696_v29 = vld [vmem:[#allocation4 + $0x100] sm:$0xff]  ;;  %v3762_v39 = vld [vmem:[#allocation4 + $0x310] sm:$0xff] }
 0x786   : > { %v3293_v41 = vmul.f32 %v3290_v54, %v11686_v42  ;;  %v3291_v13 = vmul.f32 0.5, %v3288_v48  ;;  %v3704_v54 = vld [vmem:[#allocation4 + $0x140] sm:$0xff]  ;;  %v3706_v48 = vld [vmem:[#allocation4 + $0x150] sm:$0xff] }
 0x787   : > { %v3770_v21 = vld [vmem:[#allocation4 + $0x350] sm:$0xff] }
 0x788   : > { %v11772_v7 = vadd.f32 %v3294_v5, %v3293_v41  ;;  %v8631_v5 = vpack.c.bf16 %v3707_v53, %v3699_v40  ;;  %v8569_v41 = vpack.c.bf16 %v3704_v54, %v3696_v29  ;;  %v8649_v40 = vpack.c.bf16 %v3770_v21, %v3762_v39  ;;  %v3785_v53 = vld [vmem:[#allocation4 + $0x3c8] sm:$0xff]  ;;  %v3779_v29 = vld [vmem:[#allocation4 + $0x398] sm:$0xff]  ;;  %v3848_v39 = vld [vmem:[#allocation4 + $0x5c0] sm:$0xff] }
 0x78a   : > { %10298 = vtanh.f32 %v11772_v7 }
 0x791   : > { %v3204_v61 = vpop.f32.mrb[2].mxu0  ;;  %v3275_v33 = vpop.f32.mrb[34].mxu1 }
 0x792   : > { %v3298_v37 = vmul.f32 0.5, %v3204_v61  ;;  %v3206_v45 = vpop.f32.mrb[3].mxu0  ;;  %v3277_v2 = vpop.f32.mrb[35].mxu1  ;;  %v8633_v61 = vpack.c.bf16 %v3706_v48, %v3698_v22  ;;  %v3784_v22 = vld [vmem:[#allocation4 + $0x3c0] sm:$0xff] }
 0x793   : > { %v3299_v11 = vmul.f32 0.5, %v3206_v45  ;;  %v3715_v45 = vld [vmem:[#allocation4 + $0x198] sm:$0xff] }
 0x794   : > { %v10299_v30 = vpop.eup %10298  ;;  %10300 = vtanh.f32 %v3298_v37  ;;  %v3721_v37 = vld [vmem:[#allocation4 + $0x1c8] sm:$0xff] }
 0x795   : > { %v11775_v26 = vmul.f32 %v10299_v30, %v3291_v13  ;;  %10302 = vtanh.f32 %v3299_v11  ;;  %v3723_v13 = vld [vmem:[#allocation4 + $0x1d8] sm:$0xff]  ;;  %v3712_v11 = vld [vmem:[#allocation4 + $0x180] sm:$0xff] }
 0x796   : > { %10304 = vtanh.f32 %v3277_v2  ;;  %v3720_v30 = vld [vmem:[#allocation4 + $0x1c0] sm:$0xff] }
 0x797   : > { %3387 = vmatmul.mubr.f32.vlgmr.msra.gmra.mrb[30].mxu0 %v11775_v26  ;;  %3458 = vmatmul.mubr.f32.vlgmr.msra.gmra.mrb[30].mxu1 %v11775_v26 }
 0x798   : > { %8498 = vmatpush1.bf16.msra.mxu0 %v10999_v16  ;;  %8530 = vmatpush1.bf16.msra.mxu1 %v11160_v55  ;;  %v3300_v16 = vmul.f32 0.5, %v3275_v33  ;;  %v3713_v33 = vld [vmem:[#allocation4 + $0x188] sm:$0xff] }
 0x799   : > { %8500 = vmatprep.subr.bf16.mxu0 %v11004_v17  ;;  %8532 = vmatprep.subr.bf16.mxu1 %v11163_v63  ;;  %v8571_v2 = vpack.c.bf16 %v3721_v37, %v3713_v33  ;;  %v3778_v33 = vld [vmem:[#allocation4 + $0x390] sm:$0xff] }
 0x79a   : > { %3532 = vmatprep.mubr.f32.mxu0 %v12978_v58  ;;  %3603 = vmatprep.mubr.f32.mxu1 %v12978_v58  ;;  %10306 = vtanh.f32 %v3300_v16  ;;  %v8573_v16 = vpack.c.bf16 %v3720_v30, %v3712_v11  ;;  %v3786_v37 = vld [vmem:[#allocation4 + $0x3d0] sm:$0xff]  ;;  %v3795_v11 = vld [vmem:[#allocation4 + $0x418] sm:$0xff] }
 0x79c   : > { %8502 = vmatpush1.bf16.msra.mxu0 %v11010_v25  ;;  %8534 = vmatpush1.bf16.msra.mxu1 %v11169_v62 }
 0x79d   : > { %8504 = vmatprep.subr.bf16.mxu0 %v11016_v27  ;;  %8536 = vmatprep.subr.bf16.mxu1 %v11173_v24 }
 0x79e   : > { %v10301_v42 = vpop.eup %10300 }
 0x79f   : > { %v3304_v59 = vadd.f32 1.0, %v10301_v42  ;;  %v10303_v55 = vpop.eup %10302  ;;  %v8635_v42 = vpack.c.bf16 %v3723_v13, %v3715_v45  ;;  %v8653_v45 = vpack.c.bf16 %v3786_v37, %v3778_v33  ;;  %v3801_v13 = vld [vmem:[#allocation4 + $0x448] sm:$0xff]  ;;  %v3864_v33 = vld [vmem:[#allocation4 + $0x640] sm:$0xff] }
 0x7a0   : > { %8506 = vmatpush1.bf16.msra.mxu0 %v11020_v35  ;;  %8538 = vmatpush1.bf16.msra.mxu1 %v11176_v50  ;;  %v3305_v63 = vadd.f32 1.0, %v10303_v55  ;;  %v10305_v25 = vpop.eup %10304  ;;  %v3722_v55 = vld [vmem:[#allocation4 + $0x1d0] sm:$0xff] }
 0x7a1   : > { %v3307_v17 = vmul.f32 0.5, %v3304_v59  ;;  %8508 = vmatprep.subr.bf16.mxu0 %v11025_v38  ;;  %8540 = vmatprep.subr.bf16.mxu1 %v11179_v60  ;;  %v3675_v60 = vld [vmem:[#allocation4 + $0x58] sm:$0xff]  ;;  %v3714_v59 = vld [vmem:[#allocation4 + $0x190] sm:$0xff] }
 0x7a2   : > { %v3308_v62 = vmul.f32 0.5, %v3305_v63  ;;  %v3729_v63 = vld [vmem:[#allocation4 + $0x208] sm:$0xff] }
 0x7a3   : > { %v3312_v27 = vmul.f32 %v10305_v25, %v3307_v17  ;;  %v8637_v17 = vpack.c.bf16 %v3722_v55, %v3714_v59  ;;  %v3737_v25 = vld [vmem:[#allocation4 + $0x248] sm:$0xff]  ;;  %v3800_v59 = vld [vmem:[#allocation4 + $0x440] sm:$0xff] }
 0x7a4   : > { %8510 = vmatpush1.bf16.msra.mxu0 %v11029_v46  ;;  %8542 = vmatpush1.bf16.msra.mxu1 %v11182_v9  ;;  %v3311_v24 = vmul.f32 %v3308_v62, %v11712_v51  ;;  %v10307_v38 = vpop.eup %10306  ;;  %v3672_v9 = vld [vmem:[#allocation4 + $0x40] sm:$0xff]  ;;  %v3691_v51 = vld [vmem:[#allocation4 + $0xd8] sm:$0xff] }
 0x7a5   : > { %8512 = vmatprep.subr.bf16.mxu0 %v11034_v47  ;;  %8544 = vmatprep.subr.bf16.mxu1 %v11185_v20  ;;  %v3306_v46 = vadd.f32 1.0, %v10307_v38  ;;  %v3731_v62 = vld [vmem:[#allocation4 + $0x218] sm:$0xff]  ;;  %v3728_v38 = vld [vmem:[#allocation4 + $0x200] sm:$0xff] }
 0x7a6   : > { %v11798_v35 = vadd.f32 %v3312_v27, %v3311_v24  ;;  %v8575_v27 = vpack.c.bf16 %v3737_v25, %v3729_v63  ;;  %v3739_v24 = vld [vmem:[#allocation4 + $0x258] sm:$0xff]  ;;  %v3794_v63 = vld [vmem:[#allocation4 + $0x410] sm:$0xff] }
 0x7a7   : > { %v3802_v25 = vld [vmem:[#allocation4 + $0x450] sm:$0xff] }
 0x7a8   : > { %8514 = vmatpush1.bf16.msra.mxu0 %v11038_v56  ;;  %8546 = vmatpush1.bf16.msra.mxu1 %v11188_v43  ;;  %10308 = vtanh.f32 %v11798_v35  ;;  %v3309_v56 = vmul.f32 0.5, %v3306_v46  ;;  %v3736_v46 = vld [vmem:[#allocation4 + $0x240] sm:$0xff] }
 0x7a9   : > { %8516 = vmatprep.subr.bf16.mxu0 %v11043_v57  ;;  %8548 = vmatprep.subr.bf16.mxu1 %v11191_v49  ;;  %v3666_v49 = vld [vmem:[#allocation4 + $0x10] sm:$0xff] }
 0x7ac   : > { %8518 = vmatpush1.bf16.msra.mxu0 %v11047_v3  ;;  %8550 = vmatpush1.bf16.msra.mxu1 %v11194_v0  ;;  %v3665_v3 = vld [vmem:[#allocation4 + $0x8] sm:$0xff]  ;;  %v3674_v0 = vld [vmem:[#allocation4 + $0x50] sm:$0xff] }
 0x7ad   : > { %8520 = vmatprep.subr.bf16.mxu0 %v11052_v4  ;;  %8552 = vmatprep.subr.bf16.mxu1 %v11197_v6  ;;  %v3673_v4 = vld [vmem:[#allocation4 + $0x48] sm:$0xff] }
 0x7ae   : > { %v8559_v50 = vpack.c.bf16 %v3673_v4, %v3665_v3  ;;  %v3681_v6 = vld [vmem:[#allocation4 + $0x88] sm:$0xff]  ;;  %v3730_v3 = vld [vmem:[#allocation4 + $0x210] sm:$0xff] }
 0x7af   : > { %v3738_v4 = vld [vmem:[#allocation4 + $0x250] sm:$0xff] }
 0x7b0   : > { %8522 = vmatpush1.bf16.msra.mxu0 %v11056_v12  ;;  %8554 = vmatpush1.bf16.msra.mxu1 %v11200_v28  ;;  %v3667_v12 = vld [vmem:[#allocation4 + $0x18] sm:$0xff]  ;;  %v3689_v28 = vld [vmem:[#allocation4 + $0xc8] sm:$0xff] }
 0x7b1   : > { %8524 = vmatprep.subr.bf16.mxu0 %v11061_v19  ;;  %8556 = vmatprep.subr.bf16.mxu1 %v11203_v31  ;;  %v3664_v19 = vld [vmem:[#allocation4] sm:$0xff]  ;;  %v8623_v20 = vpack.c.bf16 %v3675_v60, %v3667_v12  ;;  %v3683_v31 = vld [vmem:[#allocation4 + $0x98] sm:$0xff]  ;;  %v8641_v12 = vpack.c.bf16 %v3738_v4, %v3730_v3  ;;  %v3753_v60 = vld [vmem:[#allocation4 + $0x2c8] sm:$0xff] }
 0x7b2   : > { %v10309_v47 = vpop.eup %10308  ;;  %v8561_v43 = vpack.c.bf16 %v3672_v9, %v3664_v19  ;;  %v8627_v1 = vpack.c.bf16 %v3691_v51, %v3683_v31  ;;  %v3747_v19 = vld [vmem:[#allocation4 + $0x298] sm:$0xff]  ;;  %v3769_v51 = vld [vmem:[#allocation4 + $0x348] sm:$0xff]  ;;  %v3816_v3 = vld [vmem:[#allocation4 + $0x4c0] sm:$0xff] }
 0x7b3   : > { %v11815_v57 = vmul.f32 %v10309_v47, %v3309_v56  ;;  %v8639_v47 = vpack.c.bf16 %v3739_v24, %v3731_v62  ;;  %v8577_v56 = vpack.c.bf16 %v3736_v46, %v3728_v38  ;;  %v8657_v62 = vpack.c.bf16 %v3802_v25, %v3794_v63  ;;  %v3817_v24 = vld [vmem:[#allocation4 + $0x4c8] sm:$0xff]  ;;  %v3811_v38 = vld [vmem:[#allocation4 + $0x498] sm:$0xff]  ;;  %v3880_v63 = vld [vmem:[#allocation4 + $0x6c0] sm:$0xff] }
 0x7b4   : > { %8526 = vmatpush1.bf16.msra.mxu0 %v11065_v34  ;;  %8558 = vmatpush1.bf16.msra.mxu1 %v11206_v52  ;;  %v8625_v34 = vpack.c.bf16 %v3674_v0, %v3666_v49  ;;  %v8563_v52 = vpack.c.bf16 %v3689_v28, %v3681_v6  ;;  %v3752_v49 = vld [vmem:[#allocation4 + $0x2c0] sm:$0xff]  ;;  %v3746_v6 = vld [vmem:[#allocation4 + $0x290] sm:$0xff] }
 0x7b5   : > { %8560 = vmatprep.subr.bf16.mxu0 %v8559_v50  ;;  %8624 = vmatprep.subr.bf16.mxu1 %v8623_v20  ;;  %v3745_v50 = vld [vmem:[#allocation4 + $0x288] sm:$0xff]  ;;  %v3755_v20 = vld [vmem:[#allocation4 + $0x2d8] sm:$0xff]  ;;  %v3754_v28 = vld [vmem:[#allocation4 + $0x2d0] sm:$0xff] }
 0x7b6   : > { %v8579_v9 = vpack.c.bf16 %v3753_v60, %v3745_v50  ;;  %v8643_v0 = vpack.c.bf16 %v3755_v20, %v3747_v19  ;;  %v8645_v31 = vpack.c.bf16 %v3754_v28, %v3746_v6  ;;  %v3810_v50 = vld [vmem:[#allocation4 + $0x490] sm:$0xff]  ;;  %v3833_v20 = vld [vmem:[#allocation4 + $0x548] sm:$0xff]  ;;  %v3832_v6 = vld [vmem:[#allocation4 + $0x540] sm:$0xff] }
 0x7b7   : > { %3533 = vmatmul.mubr.f32.vlgmr.msra.gmra.mrb[0].mxu0 %v11815_v57  ;;  %3604 = vmatmul.mubr.f32.vlgmr.msra.gmra.mrb[32].mxu1 %v11815_v57  ;;  %v3818_v60 = vld [vmem:[#allocation4 + $0x4d0] sm:$0xff] }
 0x7b8   : > { %8562 = vmatpush1.bf16.msra.mxu0 %v8561_v43  ;;  %8626 = vmatpush1.bf16.msra.mxu1 %v8625_v34  ;;  %v3744_v43 = vld [vmem:[#allocation4 + $0x280] sm:$0xff]  ;;  %v8661_v19 = vpack.c.bf16 %v3818_v60, %v3810_v50 }
 0x7b9   : > { %8564 = vmatprep.subr.bf16.mxu0 %v8563_v52  ;;  %8628 = vmatprep.subr.bf16.mxu1 %v8627_v1  ;;  %v8581_v34 = vpack.c.bf16 %v3752_v49, %v3744_v43  ;;  %v3761_v52 = vld [vmem:[#allocation4 + $0x308] sm:$0xff]  ;;  %v3771_v1 = vld [vmem:[#allocation4 + $0x358] sm:$0xff]  ;;  %v3888_v50 = vld [vmem:[#allocation4 + $0x700] sm:$0xff] }
 0x7ba   : > { %v8583_v32 = vpack.c.bf16 %v3769_v51, %v3761_v52  ;;  %v8647_v18 = vpack.c.bf16 %v3771_v1, %v3763_v8  ;;  %v3827_v43 = vld [vmem:[#allocation4 + $0x518] sm:$0xff]  ;;  %v3826_v52 = vld [vmem:[#allocation4 + $0x510] sm:$0xff]  ;;  %v3849_v1 = vld [vmem:[#allocation4 + $0x5c8] sm:$0xff] }
 0x7bb   : > { %v3834_v51 = vld [vmem:[#allocation4 + $0x550] sm:$0xff]  ;;  %v3896_v60 = vld [vmem:[#allocation4 + $0x740] sm:$0xff] }
 0x7bc   : > { %8566 = vmatpush1.bf16.msra.mxu0 %v8565_v10  ;;  %8630 = vmatpush1.bf16.msra.mxu1 %v8629_v15  ;;  %v3760_v10 = vld [vmem:[#allocation4 + $0x300] sm:$0xff]  ;;  %v8665_v8 = vpack.c.bf16 %v3834_v51, %v3826_v52 }
 0x7bd   : > { %8568 = vmatprep.subr.bf16.mxu0 %v8567_v23  ;;  %8632 = vmatprep.subr.bf16.mxu1 %v8631_v5  ;;  %v8585_v15 = vpack.c.bf16 %v3768_v14, %v3760_v10  ;;  %v3777_v23 = vld [vmem:[#allocation4 + $0x388] sm:$0xff]  ;;  %v3787_v5 = vld [vmem:[#allocation4 + $0x3d8] sm:$0xff]  ;;  %v3912_v51 = vld [vmem:[#allocation4 + $0x7c0] sm:$0xff] }
 0x7be   : > { %v8587_v54 = vpack.c.bf16 %v3785_v53, %v3777_v23  ;;  %v8651_v48 = vpack.c.bf16 %v3787_v5, %v3779_v29  ;;  %v3843_v10 = vld [vmem:[#allocation4 + $0x598] sm:$0xff]  ;;  %v3842_v23 = vld [vmem:[#allocation4 + $0x590] sm:$0xff]  ;;  %v3865_v5 = vld [vmem:[#allocation4 + $0x648] sm:$0xff] }
 0x7bf   : > { %v3850_v53 = vld [vmem:[#allocation4 + $0x5d0] sm:$0xff] }
 0x7c0   : > { %8570 = vmatpush1.bf16.msra.mxu0 %v8569_v41  ;;  %8634 = vmatpush1.bf16.msra.mxu1 %v8633_v61  ;;  %v3776_v41 = vld [vmem:[#allocation4 + $0x380] sm:$0xff]  ;;  %v8669_v29 = vpack.c.bf16 %v3850_v53, %v3842_v23 }
 0x7c1   : > { %8572 = vmatprep.subr.bf16.mxu0 %v8571_v2  ;;  %8636 = vmatprep.subr.bf16.mxu1 %v8635_v42  ;;  %v8589_v61 = vpack.c.bf16 %v3784_v22, %v3776_v41  ;;  %v3793_v2 = vld [vmem:[#allocation4 + $0x408] sm:$0xff]  ;;  %v3803_v42 = vld [vmem:[#allocation4 + $0x458] sm:$0xff] }
 0x7c2   : > { %v8591_v30 = vpack.c.bf16 %v3801_v13, %v3793_v2  ;;  %v8655_v55 = vpack.c.bf16 %v3803_v42, %v3795_v11  ;;  %v3859_v41 = vld [vmem:[#allocation4 + $0x618] sm:$0xff]  ;;  %v3858_v2 = vld [vmem:[#allocation4 + $0x610] sm:$0xff]  ;;  %v3881_v42 = vld [vmem:[#allocation4 + $0x6c8] sm:$0xff] }
 0x7c3   : > { %v3866_v13 = vld [vmem:[#allocation4 + $0x650] sm:$0xff] }
 0x7c4   : > { %8574 = vmatpush1.bf16.msra.mxu0 %v8573_v16  ;;  %8638 = vmatpush1.bf16.msra.mxu1 %v8637_v17  ;;  %v3792_v16 = vld [vmem:[#allocation4 + $0x400] sm:$0xff]  ;;  %v8673_v11 = vpack.c.bf16 %v3866_v13, %v3858_v2 }
 0x7c5   : > { %8576 = vmatprep.subr.bf16.mxu0 %v8575_v27  ;;  %8640 = vmatprep.subr.bf16.mxu1 %v8639_v47  ;;  %v8593_v17 = vpack.c.bf16 %v3800_v59, %v3792_v16  ;;  %v3809_v27 = vld [vmem:[#allocation4 + $0x488] sm:$0xff]  ;;  %v3819_v47 = vld [vmem:[#allocation4 + $0x4d8] sm:$0xff] }
 0x7c6   : > { %v8595_v46 = vpack.c.bf16 %v3817_v24, %v3809_v27  ;;  %v8659_v4 = vpack.c.bf16 %v3819_v47, %v3811_v38  ;;  %v3875_v16 = vld [vmem:[#allocation4 + $0x698] sm:$0xff]  ;;  %v3874_v27 = vld [vmem:[#allocation4 + $0x690] sm:$0xff]  ;;  %v3889_v38 = vld [vmem:[#allocation4 + $0x708] sm:$0xff] }
 0x7c7   : > { %v3882_v24 = vld [vmem:[#allocation4 + $0x6d0] sm:$0xff]  ;;  %v3897_v47 = vld [vmem:[#allocation4 + $0x748] sm:$0xff] }
 0x7c8   : > { %8578 = vmatpush1.bf16.msra.mxu0 %v8577_v56  ;;  %8642 = vmatpush1.bf16.msra.mxu1 %v8641_v12  ;;  %v3808_v56 = vld [vmem:[#allocation4 + $0x480] sm:$0xff] }
 0x7c9   : > { %8580 = vmatprep.subr.bf16.mxu0 %v8579_v9  ;;  %8644 = vmatprep.subr.bf16.mxu1 %v8643_v0  ;;  %v8597_v12 = vpack.c.bf16 %v3816_v3, %v3808_v56  ;;  %v3825_v9 = vld [vmem:[#allocation4 + $0x508] sm:$0xff]  ;;  %v3835_v0 = vld [vmem:[#allocation4 + $0x558] sm:$0xff] }
 0x7ca   : > { %v8599_v49 = vpack.c.bf16 %v3833_v20, %v3825_v9  ;;  %v8663_v28 = vpack.c.bf16 %v3835_v0, %v3827_v43  ;;  %v3891_v56 = vld [vmem:[#allocation4 + $0x718] sm:$0xff]  ;;  %v8617_v9 = vpack.c.bf16 %v3896_v60, %v3888_v50  ;;  %v3898_v20 = vld [vmem:[#allocation4 + $0x750] sm:$0xff]  ;;  %v3905_v43 = vld [vmem:[#allocation4 + $0x788] sm:$0xff] }
 0x7cb   : > { %v3899_v3 = vld [vmem:[#allocation4 + $0x758] sm:$0xff] }
 0x7cc   : > { %8582 = vmatpush1.bf16.msra.mxu0 %v8581_v34  ;;  %8646 = vmatpush1.bf16.msra.mxu1 %v8645_v31  ;;  %v3824_v34 = vld [vmem:[#allocation4 + $0x500] sm:$0xff] }
 0x7cd   : > { %8584 = vmatprep.subr.bf16.mxu0 %v8583_v32  ;;  %8648 = vmatprep.subr.bf16.mxu1 %v8647_v18  ;;  %v8601_v31 = vpack.c.bf16 %v3832_v6, %v3824_v34  ;;  %v3841_v32 = vld [vmem:[#allocation4 + $0x588] sm:$0xff]  ;;  %v3851_v18 = vld [vmem:[#allocation4 + $0x5d8] sm:$0xff] }
 0x7ce   : > { %v8603_v14 = vpack.c.bf16 %v3849_v1, %v3841_v32  ;;  %v8667_v21 = vpack.c.bf16 %v3851_v18, %v3843_v10  ;;  %v3907_v6 = vld [vmem:[#allocation4 + $0x798] sm:$0xff]  ;;  %v3914_v32 = vld [vmem:[#allocation4 + $0x7d0] sm:$0xff]  ;;  %v3677_v18 = vld [vmem:[#allocation4 + $0x68] sm:$0xff] }
 0x7d0   : > { %8586 = vmatpush1.bf16.msra.mxu0 %v8585_v15  ;;  %8650 = vmatpush1.bf16.msra.mxu1 %v8649_v40  ;;  %v3840_v15 = vld [vmem:[#allocation4 + $0x580] sm:$0xff] }
 0x7d1   : > { %8588 = vmatprep.subr.bf16.mxu0 %v8587_v54  ;;  %8652 = vmatprep.subr.bf16.mxu1 %v8651_v48  ;;  %v8605_v40 = vpack.c.bf16 %v3848_v39, %v3840_v15  ;;  %v3857_v54 = vld [vmem:[#allocation4 + $0x608] sm:$0xff]  ;;  %v3867_v48 = vld [vmem:[#allocation4 + $0x658] sm:$0xff] }
 0x7d2   : > { %v8607_v22 = vpack.c.bf16 %v3865_v5, %v3857_v54  ;;  %v8671_v37 = vpack.c.bf16 %v3867_v48, %v3859_v41  ;;  %v3671_v15 = vld [vmem:[#allocation4 + $0x38] sm:$0xff] }
 0x7d4   : > { %8590 = vmatpush1.bf16.msra.mxu0 %v8589_v61  ;;  %8654 = vmatpush1.bf16.msra.mxu1 %v8653_v45  ;;  %v3856_v61 = vld [vmem:[#allocation4 + $0x600] sm:$0xff] }
 0x7d5   : > { %8592 = vmatprep.subr.bf16.mxu0 %v8591_v30  ;;  %8656 = vmatprep.subr.bf16.mxu1 %v8655_v55  ;;  %v8609_v45 = vpack.c.bf16 %v3864_v33, %v3856_v61  ;;  %v3873_v30 = vld [vmem:[#allocation4 + $0x688] sm:$0xff]  ;;  %v3883_v55 = vld [vmem:[#allocation4 + $0x6d8] sm:$0xff] }
 0x7d6   : > { %v8611_v59 = vpack.c.bf16 %v3881_v42, %v3873_v30  ;;  %v8675_v25 = vpack.c.bf16 %v3883_v55, %v3875_v16 }
 0x7d8   : > { %8594 = vmatpush1.bf16.msra.mxu0 %v8593_v17  ;;  %8658 = vmatpush1.bf16.msra.mxu1 %v8657_v62  ;;  %v3872_v17 = vld [vmem:[#allocation4 + $0x680] sm:$0xff] }
 0x7d9   : > { %8596 = vmatprep.subr.bf16.mxu0 %v8595_v46  ;;  %8660 = vmatprep.subr.bf16.mxu1 %v8659_v4  ;;  %v8613_v62 = vpack.c.bf16 %v3880_v63, %v3872_v17  ;;  %v8677_v46 = vpack.c.bf16 %v3882_v24, %v3874_v27  ;;  %v8615_v4 = vpack.c.bf16 %v3897_v47, %v3889_v38 }
 0x7dc   : > { %8598 = vmatpush1.bf16.msra.mxu0 %v8597_v12  ;;  %8662 = vmatpush1.bf16.msra.mxu1 %v8661_v19  ;;  %v8679_v12 = vpack.c.bf16 %v3899_v3, %v3891_v56  ;;  %v3890_v19 = vld [vmem:[#allocation4 + $0x710] sm:$0xff] }
 0x7dd   : > { %8600 = vmatprep.subr.bf16.mxu0 %v8599_v49  ;;  %8664 = vmatprep.subr.bf16.mxu1 %v8663_v28  ;;  %v3913_v49 = vld [vmem:[#allocation4 + $0x7c8] sm:$0xff]  ;;  %v8681_v0 = vpack.c.bf16 %v3898_v20, %v3890_v19  ;;  %v3915_v28 = vld [vmem:[#allocation4 + $0x7d8] sm:$0xff] }
 0x7de   : > { %v8619_v34 = vpack.c.bf16 %v3913_v49, %v3905_v43  ;;  %v8683_v52 = vpack.c.bf16 %v3915_v28, %v3907_v6 }
 0x7e0   : > { %8602 = vmatpush1.bf16.msra.mxu0 %v8601_v31  ;;  %8666 = vmatpush1.bf16.msra.mxu1 %v8665_v8  ;;  %v3904_v31 = vld [vmem:[#allocation4 + $0x780] sm:$0xff]  ;;  %v3906_v8 = vld [vmem:[#allocation4 + $0x790] sm:$0xff] }
 0x7e1   : > { %8604 = vmatprep.subr.bf16.mxu0 %v8603_v14  ;;  %8668 = vmatprep.subr.bf16.mxu1 %v8667_v21  ;;  %v8621_v1 = vpack.c.bf16 %v3912_v51, %v3904_v31  ;;  %v8685_v10 = vpack.c.bf16 %v3914_v32, %v3906_v8  ;;  %v3669_v14 = vld [vmem:[#allocation4 + $0x28] sm:$0xff]  ;;  %v3679_v21 = vld [vmem:[#allocation4 + $0x78] sm:$0xff]  ;;  %v3668_v31 = vld [vmem:[#allocation4 + $0x20] sm:$0xff] }
 0x7e2   : > { %v8687_v39 = vpack.c.bf16 %v3677_v18, %v3669_v14  ;;  %v3670_v51 = vld [vmem:[#allocation4 + $0x30] sm:$0xff]  ;;  %v3693_v14 = vld [vmem:[#allocation4 + $0xe8] sm:$0xff]  ;;  %v3687_v18 = vld [vmem:[#allocation4 + $0xb8] sm:$0xff] }
 0x7e3   : > { %v3678_v8 = vld [vmem:[#allocation4 + $0x70] sm:$0xff] }
 0x7e4   : > { %8606 = vmatpush1.bf16.msra.mxu0 %v8605_v40  ;;  %8670 = vmatpush1.bf16.msra.mxu1 %v8669_v29  ;;  %v8751_v40 = vpack.c.bf16 %v3679_v21, %v3671_v15  ;;  %v13145_v29 = vld [vmem:[#allocation51_spill] sm:$0xff]  ;;  %v3695_v15 = vld [vmem:[#allocation4 + $0xf8] sm:$0xff] }
 0x7e5   : > { %8608 = vmatprep.subr.bf16.mxu0 %v8607_v22  ;;  %8672 = vmatprep.subr.bf16.mxu1 %v8671_v37  ;;  %v13146_v22 = vld [vmem:[#allocation52_spill] sm:$0xff] }
 0x7e8   : > { %8610 = vmatpush1.bf16.msra.mxu0 %v8609_v45  ;;  %8674 = vmatpush1.bf16.msra.mxu1 %v8673_v11 }
 0x7e9   : > { %8612 = vmatprep.subr.bf16.mxu0 %v8611_v59  ;;  %8676 = vmatprep.subr.bf16.mxu1 %v8675_v25 }
 0x7ec   : > { %8614 = vmatpush1.bf16.msra.mxu0 %v8613_v62  ;;  %8678 = vmatpush1.bf16.msra.mxu1 %v8677_v46 }
 0x7ed   : > { %8616 = vmatprep.subr.bf16.mxu0 %v8615_v4  ;;  %8680 = vmatprep.subr.bf16.mxu1 %v8679_v12 }
 0x7f0   : > { %8618 = vmatpush1.bf16.msra.mxu0 %v8617_v9  ;;  %8682 = vmatpush1.bf16.msra.mxu1 %v8681_v0 }
 0x7f1   : > { %8620 = vmatprep.subr.bf16.mxu0 %v8619_v34  ;;  %8684 = vmatprep.subr.bf16.mxu1 %v8683_v52  ;;  %v3676_v52 = vld [vmem:[#allocation4 + $0x60] sm:$0xff] }
 0x7f2   : > { %v8689_v21 = vpack.c.bf16 %v3676_v52, %v3668_v31  ;;  %v3749_v52 = vld [vmem:[#allocation4 + $0x2a8] sm:$0xff] }
 0x7f4   : > { %8622 = vmatpush1.bf16.msra.mxu0 %v8621_v1  ;;  %8686 = vmatpush1.bf16.msra.mxu1 %v8685_v10  ;;  %v3685_v1 = vld [vmem:[#allocation4 + $0xa8] sm:$0xff] }
 0x7f5   : > { %8688 = vmatprep.subr.bf16.mxu0 %v8687_v39  ;;  %8752 = vmatprep.subr.bf16.mxu1 %v8751_v40  ;;  %v8753_v40 = vpack.c.bf16 %v3678_v8, %v3670_v51  ;;  %v13151_v51 = vld [vmem:[#allocation43_spill] sm:$0xff]  ;;  %v3757_v8 = vld [vmem:[#allocation4 + $0x2e8] sm:$0xff] }
 0x86a   : > { %v3388_v23 = vpop.f32.mrb[30].mxu0  ;;  %v3459_v53 = vpop.f32.mrb[30].mxu1 }
 0x86b   : > { %v3389_v54 = vadd.f32 %v3388_v23, %v13145_v29  ;;  %v3390_v5 = vpop.f32.mrb[31].mxu0  ;;  %v3461_v41 = vpop.f32.mrb[31].mxu1  ;;  %v3612_v37 = vmul.f32 0.5, %v3459_v53  ;;  %v3684_v23 = vld [vmem:[#allocation4 + $0xa0] sm:$0xff]  ;;  %v3686_v53 = vld [vmem:[#allocation4 + $0xb0] sm:$0xff] }
 0x86c   : > { %v3391_v48 = vadd.f32 %v3390_v5, %v13146_v22  ;;  %v3694_v29 = vld [vmem:[#allocation4 + $0xf0] sm:$0xff]  ;;  %v8755_v5 = vpack.c.bf16 %v3695_v15, %v3687_v18  ;;  %v13147_v22 = vld [vmem:[#allocation53_spill] sm:$0xff]  ;;  %v13152_v15 = vld [vmem:[#allocation44_spill] sm:$0xff] }
 0x86d   : > { %v3610_v61 = vmul.f32 0.5, %v3389_v54  ;;  %v8691_v54 = vpack.c.bf16 %v3693_v14, %v3685_v1  ;;  %v3759_v1 = vld [vmem:[#allocation4 + $0x2f8] sm:$0xff]  ;;  %v3748_v18 = vld [vmem:[#allocation4 + $0x2a0] sm:$0xff] }
 0x86e   : > { %v3611_v33 = vmul.f32 0.5, %v3391_v48  ;;  %v3709_v48 = vld [vmem:[#allocation4 + $0x168] sm:$0xff] }
 0x86f   : > { %10310 = vtanh.f32 %v3610_v61  ;;  %v3703_v61 = vld [vmem:[#allocation4 + $0x138] sm:$0xff] }
 0x870   : > { %10312 = vtanh.f32 %v3611_v33  ;;  %v3711_v33 = vld [vmem:[#allocation4 + $0x178] sm:$0xff] }
 0x871   : > { %10314 = vtanh.f32 %v3461_v41  ;;  %v3701_v41 = vld [vmem:[#allocation4 + $0x128] sm:$0xff] }
 0x872   : > { %10316 = vtanh.f32 %v3612_v37 }
 0x879   : > { %v10311_v45 = vpop.eup %10310 }
 0x87a   : > { %v10313_v2 = vpop.eup %10312  ;;  %v3616_v13 = vadd.f32 1.0, %v10311_v45  ;;  %v8757_v45 = vpack.c.bf16 %v3694_v29, %v3686_v53  ;;  %v3765_v29 = vld [vmem:[#allocation4 + $0x328] sm:$0xff] }
 0x87b   : > { %v3617_v11 = vadd.f32 1.0, %v10313_v2  ;;  %v10315_v42 = vpop.eup %10314  ;;  %v3700_v2 = vld [vmem:[#allocation4 + $0x120] sm:$0xff] }
 0x87c   : > { %v3619_v30 = vmul.f32 0.5, %v3616_v13  ;;  %v10317_v63 = vpop.eup %10316  ;;  %v3708_v13 = vld [vmem:[#allocation4 + $0x160] sm:$0xff] }
 0x87d   : > { %v3620_v16 = vmul.f32 0.5, %v3617_v11  ;;  %v3618_v25 = vadd.f32 1.0, %v10317_v63  ;;  %v3702_v11 = vld [vmem:[#allocation4 + $0x130] sm:$0xff]  ;;  %v3719_v63 = vld [vmem:[#allocation4 + $0x1b8] sm:$0xff] }
 0x87e   : > { %v3624_v59 = vmul.f32 %v10315_v42, %v3619_v30  ;;  %v3710_v30 = vld [vmem:[#allocation4 + $0x170] sm:$0xff]  ;;  %v8695_v42 = vpack.c.bf16 %v3709_v48, %v3701_v41  ;;  %v3767_v41 = vld [vmem:[#allocation4 + $0x338] sm:$0xff] }
 0x87f   : > { %v3623_v55 = vmul.f32 %v3620_v16, %v11772_v7  ;;  %v3621_v47 = vmul.f32 0.5, %v3618_v25  ;;  %v8759_v16 = vpack.c.bf16 %v3711_v33, %v3703_v61  ;;  %v3727_v25 = vld [vmem:[#allocation4 + $0x1f8] sm:$0xff] }
 0x880   : > { %v3775_v48 = vld [vmem:[#allocation4 + $0x378] sm:$0xff] }
 0x881   : > { %v3625_v17 = vadd.f32 %v3624_v59, %v3623_v55  ;;  %v3717_v59 = vld [vmem:[#allocation4 + $0x1a8] sm:$0xff]  ;;  %v13148_v55 = vld [vmem:[#allocation39_spill] sm:$0xff] }
 0x883   : > { %10318 = vtanh.f32 %v3625_v17  ;;  %v3725_v17 = vld [vmem:[#allocation4 + $0x1e8] sm:$0xff] }
 0x88a   : > { %v3534_v62 = vpop.f32.mrb[0].mxu0  ;;  %v3605_v27 = vpop.f32.mrb[32].mxu1 }
 0x88b   : > { %v3628_v24 = vmul.f32 0.5, %v3534_v62  ;;  %v3536_v38 = vpop.f32.mrb[1].mxu0  ;;  %v3607_v46 = vpop.f32.mrb[33].mxu1  ;;  %v3630_v12 = vmul.f32 0.5, %v3605_v27  ;;  %v8697_v62 = vpack.c.bf16 %v3708_v13, %v3700_v2  ;;  %v8761_v27 = vpack.c.bf16 %v3710_v30, %v3702_v11  ;;  %v3772_v2 = vld [vmem:[#allocation4 + $0x360] sm:$0xff]  ;;  %v3766_v13 = vld [vmem:[#allocation4 + $0x330] sm:$0xff] }
 0x88c   : > { %v3629_v56 = vmul.f32 0.5, %v3536_v38  ;;  %v3724_v38 = vld [vmem:[#allocation4 + $0x1e0] sm:$0xff]  ;;  %v3774_v11 = vld [vmem:[#allocation4 + $0x370] sm:$0xff] }
 0x88d   : > { %v10319_v3 = vpop.eup %10318  ;;  %10320 = vtanh.f32 %v3628_v24  ;;  %v3716_v24 = vld [vmem:[#allocation4 + $0x1a0] sm:$0xff] }
 0x88e   : > { %v11822_v4 = vmul.f32 %v10319_v3, %v3621_v47  ;;  %10322 = vtanh.f32 %v3629_v56  ;;  %v3726_v47 = vld [vmem:[#allocation4 + $0x1f0] sm:$0xff]  ;;  %v8699_v56 = vpack.c.bf16 %v3725_v17, %v3717_v59  ;;  %v8763_v3 = vpack.c.bf16 %v3727_v25, %v3719_v63  ;;  %v3789_v59 = vld [vmem:[#allocation4 + $0x3e8] sm:$0xff]  ;;  %v3783_v17 = vld [vmem:[#allocation4 + $0x3b8] sm:$0xff] }
 0x88f   : > { %10324 = vtanh.f32 %v3607_v46  ;;  %v3718_v46 = vld [vmem:[#allocation4 + $0x1b0] sm:$0xff]  ;;  %v3791_v63 = vld [vmem:[#allocation4 + $0x3f8] sm:$0xff] }
 0x890   : > { %10326 = vtanh.f32 %v3630_v12  ;;  %v3733_v12 = vld [vmem:[#allocation4 + $0x228] sm:$0xff] }
 0x897   : > { %v10321_v50 = vpop.eup %10320 }
 0x898   : > { %v3634_v7 = vadd.f32 1.0, %v10321_v50  ;;  %v10323_v60 = vpop.eup %10322  ;;  %v13149_v50 = vld [vmem:[#allocation41_spill] sm:$0xff] }
 0x899   : > { %v3635_v9 = vadd.f32 1.0, %v10323_v60  ;;  %v10325_v20 = vpop.eup %10324  ;;  %v3735_v60 = vld [vmem:[#allocation4 + $0x238] sm:$0xff] }
 0x89a   : > { %v3637_v19 = vmul.f32 0.5, %v3634_v7  ;;  %v10327_v6 = vpop.eup %10326  ;;  %v3741_v7 = vld [vmem:[#allocation4 + $0x268] sm:$0xff] }
 0x89b   : > { %v3638_v43 = vmul.f32 0.5, %v3635_v9  ;;  %v3636_v28 = vadd.f32 1.0, %v10327_v6  ;;  %v8701_v9 = vpack.c.bf16 %v3724_v38, %v3716_v24  ;;  %v3742_v6 = vld [vmem:[#allocation4 + $0x270] sm:$0xff]  ;;  %v13155_v24 = vld [vmem:[#allocation40_spill] sm:$0xff]  ;;  %v3788_v38 = vld [vmem:[#allocation4 + $0x3e0] sm:$0xff] }
 0x89c   : > { %v3642_v49 = vmul.f32 %v10325_v20, %v3637_v19  ;;  %v3743_v19 = vld [vmem:[#allocation4 + $0x278] sm:$0xff]  ;;  %v8765_v20 = vpack.c.bf16 %v3726_v47, %v3718_v46  ;;  %v3782_v46 = vld [vmem:[#allocation4 + $0x3b0] sm:$0xff] }
 0x89d   : > { %v3641_v0 = vmul.f32 %v3638_v43, %v11798_v35  ;;  %v3639_v32 = vmul.f32 0.5, %v3636_v28  ;;  %v3692_v35 = vld [vmem:[#allocation4 + $0xe0] sm:$0xff]  ;;  %v8703_v28 = vpack.c.bf16 %v3741_v7, %v3733_v12  ;;  %v8767_v31 = vpack.c.bf16 %v3743_v19, %v3735_v60  ;;  %v3790_v47 = vld [vmem:[#allocation4 + $0x3f0] sm:$0xff]  ;;  %v3797_v12 = vld [vmem:[#allocation4 + $0x428] sm:$0xff] }
 0x89e   : > { %v8693_v37 = vpack.c.bf16 %v3692_v35, %v3684_v23  ;;  %v3732_v43 = vld [vmem:[#allocation4 + $0x220] sm:$0xff]  ;;  %v3758_v23 = vld [vmem:[#allocation4 + $0x2f0] sm:$0xff]  ;;  %v8707_v35 = vpack.c.bf16 %v3757_v8, %v3749_v52  ;;  %v3805_v7 = vld [vmem:[#allocation4 + $0x468] sm:$0xff] }
 0x89f   : > { %v3643_v34 = vadd.f32 %v3642_v49, %v3641_v0  ;;  %v13150_v49 = vld [vmem:[#allocation46_spill] sm:$0xff]  ;;  %v3740_v0 = vld [vmem:[#allocation4 + $0x260] sm:$0xff]  ;;  %v3799_v60 = vld [vmem:[#allocation4 + $0x438] sm:$0xff]  ;;  %v8719_v52 = vpack.c.bf16 %v3805_v7, %v3797_v12 }
 0x8a0   : > { %v3807_v19 = vld [vmem:[#allocation4 + $0x478] sm:$0xff]  ;;  %v3861_v12 = vld [vmem:[#allocation4 + $0x628] sm:$0xff] }
 0x8a1   : > { %10328 = vtanh.f32 %v3643_v34  ;;  %v3734_v34 = vld [vmem:[#allocation4 + $0x230] sm:$0xff]  ;;  %v8783_v8 = vpack.c.bf16 %v3807_v19, %v3799_v60  ;;  %v3869_v7 = vld [vmem:[#allocation4 + $0x668] sm:$0xff]  ;;  %v3863_v60 = vld [vmem:[#allocation4 + $0x638] sm:$0xff] }
 0x8a2   : > { %v8769_v14 = vpack.c.bf16 %v3742_v6, %v3734_v34  ;;  %v13156_v34 = vld [vmem:[#allocation54_spill] sm:$0xff]  ;;  %v3798_v6 = vld [vmem:[#allocation4 + $0x430] sm:$0xff]  ;;  %v3871_v19 = vld [vmem:[#allocation4 + $0x678] sm:$0xff] }
 0x8ab   : > { %v10329_v10 = vpop.eup %10328 }
 0x8ac   : > { %v11825_v39 = vmul.f32 %v10329_v10, %v3639_v32  ;;  %v3751_v32 = vld [vmem:[#allocation4 + $0x2b8] sm:$0xff]  ;;  %v8705_v10 = vpack.c.bf16 %v3740_v0, %v3732_v43  ;;  %v3796_v43 = vld [vmem:[#allocation4 + $0x420] sm:$0xff] }
 0x8ad   : > { %v8771_v53 = vpack.c.bf16 %v3759_v1, %v3751_v32  ;;  %v3804_v0 = vld [vmem:[#allocation4 + $0x460] sm:$0xff]  ;;  %v3821_v32 = vld [vmem:[#allocation4 + $0x4e8] sm:$0xff]  ;;  %v3815_v1 = vld [vmem:[#allocation4 + $0x4b8] sm:$0xff] }
 0x8ae   : > { %4026 = vmatprep.mubr.f32.mxu0 %v11825_v39  ;;  %4139 = vmatprep.mubr.f32.mxu1 %v11825_v39 }
 0x8af   : > { %4027 = vmatmul.mubr.f32.vlgmr.msra.gmra.mrb[32].mxu0 %v13147_v22  ;;  %4140 = vmatmul.mubr.f32.vlgmr.msra.gmra.mrb[48].mxu1 %v13147_v22 }
 0x8b0   : > { %8690 = vmatpush1.bf16.msra.mxu0 %v8689_v21  ;;  %8754 = vmatpush1.bf16.msra.mxu1 %v8753_v40  ;;  %v3756_v21 = vld [vmem:[#allocation4 + $0x2e0] sm:$0xff]  ;;  %v3750_v40 = vld [vmem:[#allocation4 + $0x2b0] sm:$0xff] }
 0x8b1   : > { %4032 = vmatprep.mubr.f32.mxu0 %v11815_v57  ;;  %4145 = vmatprep.mubr.f32.mxu1 %v11815_v57  ;;  %v8709_v61 = vpack.c.bf16 %v3756_v21, %v3748_v18  ;;  %v8773_v33 = vpack.c.bf16 %v3758_v23, %v3750_v40  ;;  %v3812_v21 = vld [vmem:[#allocation4 + $0x4a0] sm:$0xff] }
 0x8b2   : > { %8692 = vmatprep.subr.bf16.mxu0 %v8691_v54  ;;  %8756 = vmatprep.subr.bf16.mxu1 %v8755_v5  ;;  %v13153_v54 = vld [vmem:[#allocation45_spill] sm:$0xff]  ;;  %v3773_v5 = vld [vmem:[#allocation4 + $0x368] sm:$0xff] }
 0x8b3   : > { %4033 = vmatmul.mubr.f32.gmra.mrb[34].mxu0 %v13148_v55  ;;  %4146 = vmatmul.mubr.f32.gmra.mrb[50].mxu1 %v13148_v55  ;;  %v8711_v30 = vpack.c.bf16 %v3773_v5, %v3765_v29  ;;  %v3820_v40 = vld [vmem:[#allocation4 + $0x4e0] sm:$0xff]  ;;  %v3822_v29 = vld [vmem:[#allocation4 + $0x4f0] sm:$0xff]  ;;  %v3829_v5 = vld [vmem:[#allocation4 + $0x528] sm:$0xff] }
 0x8b4   : > { %8694 = vmatpush1.bf16.msra.mxu0 %v8693_v37  ;;  %8758 = vmatpush1.bf16.msra.mxu1 %v8757_v45  ;;  %v3764_v37 = vld [vmem:[#allocation4 + $0x320] sm:$0xff]  ;;  %v13154_v45 = vld [vmem:[#allocation42_spill] sm:$0xff] }
 0x8b5   : > { %4038 = vmatprep.mubr.f32.mxu0 %v11729_v36  ;;  %4151 = vmatprep.mubr.f32.mxu1 %v11729_v36  ;;  %v8713_v25 = vpack.c.bf16 %v3772_v2, %v3764_v37  ;;  %v3828_v2 = vld [vmem:[#allocation4 + $0x520] sm:$0xff] }
 0x8b6   : > { %8696 = vmatprep.subr.bf16.mxu0 %v8695_v42  ;;  %8760 = vmatprep.subr.bf16.mxu1 %v8759_v16  ;;  %v8775_v42 = vpack.c.bf16 %v3775_v48, %v3767_v41  ;;  %v3781_v16 = vld [vmem:[#allocation4 + $0x3a8] sm:$0xff]  ;;  %v3831_v48 = vld [vmem:[#allocation4 + $0x538] sm:$0xff] }
 0x8b7   : > { %4039 = vmatmul.mubr.f32.gmra.mrb[36].mxu0 %v13149_v50  ;;  %4152 = vmatmul.mubr.f32.gmra.mrb[52].mxu1 %v13149_v50  ;;  %v3837_v41 = vld [vmem:[#allocation4 + $0x568] sm:$0xff] }
 0x8b8   : > { %8698 = vmatpush1.bf16.msra.mxu0 %v8697_v62  ;;  %8762 = vmatpush1.bf16.msra.mxu1 %v8761_v27  ;;  %v8777_v62 = vpack.c.bf16 %v3774_v11, %v3766_v13  ;;  %v3780_v27 = vld [vmem:[#allocation4 + $0x3a0] sm:$0xff]  ;;  %v8727_v11 = vpack.c.bf16 %v3837_v41, %v3829_v5  ;;  %v3893_v5 = vld [vmem:[#allocation4 + $0x728] sm:$0xff] }
 0x8b9   : > { %4044 = vmatprep.mubr.f32.mxu0 %v13150_v49  ;;  %4157 = vmatprep.mubr.f32.mxu1 %v13150_v49  ;;  %v3836_v13 = vld [vmem:[#allocation4 + $0x560] sm:$0xff]  ;;  %v3901_v41 = vld [vmem:[#allocation4 + $0x768] sm:$0xff] }
 0x8ba   : > { %8700 = vmatprep.subr.bf16.mxu0 %v8699_v56  ;;  %8764 = vmatprep.subr.bf16.mxu1 %v8763_v3  ;;  %v8715_v56 = vpack.c.bf16 %v3789_v59, %v3781_v16  ;;  %v8779_v3 = vpack.c.bf16 %v3791_v63, %v3783_v17  ;;  %v3845_v16 = vld [vmem:[#allocation4 + $0x5a8] sm:$0xff]  ;;  %v3847_v17 = vld [vmem:[#allocation4 + $0x5b8] sm:$0xff] }
 0x8bb   : > { %4045 = vmatmul.mubr.f32.gmra.mrb[38].mxu0 %v13151_v51  ;;  %4158 = vmatmul.mubr.f32.gmra.mrb[54].mxu1 %v13151_v51  ;;  %v3853_v59 = vld [vmem:[#allocation4 + $0x5e8] sm:$0xff]  ;;  %v3855_v63 = vld [vmem:[#allocation4 + $0x5f8] sm:$0xff] }
 0x8bc   : > { %8702 = vmatpush1.bf16.msra.mxu0 %v8701_v9  ;;  %8766 = vmatpush1.bf16.msra.mxu1 %v8765_v20  ;;  %v8717_v9 = vpack.c.bf16 %v3788_v38, %v3780_v27  ;;  %v8781_v20 = vpack.c.bf16 %v3790_v47, %v3782_v46  ;;  %v3844_v27 = vld [vmem:[#allocation4 + $0x5a0] sm:$0xff]  ;;  %v8731_v46 = vpack.c.bf16 %v3853_v59, %v3845_v16  ;;  %v3909_v16 = vld [vmem:[#allocation4 + $0x7a8] sm:$0xff] }
 0x8bd   : > { %4050 = vmatprep.mubr.f32.mxu0 %v13152_v15  ;;  %4163 = vmatprep.mubr.f32.mxu1 %v13152_v15  ;;  %v3852_v38 = vld [vmem:[#allocation4 + $0x5e0] sm:$0xff]  ;;  %v8795_v47 = vpack.c.bf16 %v3855_v63, %v3847_v17  ;;  %v3917_v59 = vld [vmem:[#allocation4 + $0x7e8] sm:$0xff]  ;;  %v3911_v17 = vld [vmem:[#allocation4 + $0x7b8] sm:$0xff] }
 0x8be   : > { %8704 = vmatprep.subr.bf16.mxu0 %v8703_v28  ;;  %8768 = vmatprep.subr.bf16.mxu1 %v8767_v31  ;;  %v3806_v28 = vld [vmem:[#allocation4 + $0x470] sm:$0xff]  ;;  %v3813_v31 = vld [vmem:[#allocation4 + $0x4a8] sm:$0xff]  ;;  %v3919_v63 = vld [vmem:[#allocation4 + $0x7f8] sm:$0xff] }
 0x8bf   : > { %4051 = vmatmul.mubr.f32.gmra.mrb[40].mxu0 %v13153_v54  ;;  %4164 = vmatmul.mubr.f32.gmra.mrb[56].mxu1 %v13153_v54  ;;  %v8785_v18 = vpack.c.bf16 %v3806_v28, %v3798_v6  ;;  %v8723_v23 = vpack.c.bf16 %v3821_v32, %v3813_v31  ;;  %v8735_v6 = vpack.c.bf16 %v3869_v7, %v3861_v12  ;;  %v3862_v31 = vld [vmem:[#allocation4 + $0x630] sm:$0xff]  ;;  %v3885_v32 = vld [vmem:[#allocation4 + $0x6e8] sm:$0xff] }
 0x8c0   : > { %8706 = vmatpush1.bf16.msra.mxu0 %v8705_v10  ;;  %8770 = vmatpush1.bf16.msra.mxu1 %v8769_v14  ;;  %v3823_v10 = vld [vmem:[#allocation4 + $0x4f8] sm:$0xff]  ;;  %v8721_v14 = vpack.c.bf16 %v3804_v0, %v3796_v43  ;;  %v3860_v43 = vld [vmem:[#allocation4 + $0x620] sm:$0xff]  ;;  %v8799_v28 = vpack.c.bf16 %v3871_v19, %v3863_v60  ;;  %v4479_v12 = vld [vmem:[#allocation7 + $0x408] sm:$0xff] }
 0x8c1   : > { %4056 = vmatprep.mubr.f32.mxu0 %v13154_v45  ;;  %4169 = vmatprep.mubr.f32.mxu1 %v13154_v45  ;;  %v3868_v0 = vld [vmem:[#allocation4 + $0x660] sm:$0xff]  ;;  %v4483_v7 = vld [vmem:[#allocation7 + $0x448] sm:$0xff]  ;;  %v4481_v60 = vld [vmem:[#allocation7 + $0x418] sm:$0xff] }
 0x8c2   : > { %8708 = vmatprep.subr.bf16.mxu0 %v8707_v35  ;;  %8772 = vmatprep.subr.bf16.mxu1 %v8771_v53  ;;  %v8787_v35 = vpack.c.bf16 %v3823_v10, %v3815_v1  ;;  %v3814_v53 = vld [vmem:[#allocation4 + $0x4b0] sm:$0xff]  ;;  %v3879_v1 = vld [vmem:[#allocation4 + $0x6b8] sm:$0xff] }
 0x8c3   : > { %4057 = vmatmul.mubr.f32.gmra.mrb[42].mxu0 %v11689_v44  ;;  %4170 = vmatmul.mubr.f32.gmra.mrb[58].mxu1 %v11689_v44  ;;  %v8789_v37 = vpack.c.bf16 %v3822_v29, %v3814_v53  ;;  %v3887_v10 = vld [vmem:[#allocation4 + $0x6f8] sm:$0xff]  ;;  %v3878_v53 = vld [vmem:[#allocation4 + $0x6b0] sm:$0xff] }
 0x8c4   : > { %8710 = vmatpush1.bf16.msra.mxu0 %v8709_v61  ;;  %8774 = vmatpush1.bf16.msra.mxu1 %v8773_v33  ;;  %v3839_v61 = vld [vmem:[#allocation4 + $0x578] sm:$0xff]  ;;  %v8725_v33 = vpack.c.bf16 %v3820_v40, %v3812_v21  ;;  %v3876_v21 = vld [vmem:[#allocation4 + $0x6a0] sm:$0xff]  ;;  %v3886_v29 = vld [vmem:[#allocation4 + $0x6f0] sm:$0xff] }
 0x8c5   : > { %4062 = vmatprep.mubr.f32.mxu0 %v13155_v24  ;;  %4175 = vmatprep.mubr.f32.mxu1 %v13155_v24  ;;  %v3884_v40 = vld [vmem:[#allocation4 + $0x6e0] sm:$0xff]  ;;  %v4485_v19 = vld [vmem:[#allocation7 + $0x458] sm:$0xff] }
 0x8c6   : > { %8712 = vmatprep.subr.bf16.mxu0 %v8711_v30  ;;  %8776 = vmatprep.subr.bf16.mxu1 %v8775_v42  ;;  %v3830_v30 = vld [vmem:[#allocation4 + $0x530] sm:$0xff] }
 0x8c7   : > { %4063 = vmatmul.mubr.f32.gmra.mrb[44].mxu0 %v11775_v26  ;;  %4176 = vmatmul.mubr.f32.gmra.mrb[60].mxu1 %v11775_v26  ;;  %v3838_v42 = vld [vmem:[#allocation4 + $0x570] sm:$0xff] }
 0x8c8   : > { %8714 = vmatpush1.bf16.msra.mxu0 %v8713_v25  ;;  %8778 = vmatpush1.bf16.msra.mxu1 %v8777_v62  ;;  %v8729_v25 = vpack.c.bf16 %v3836_v13, %v3828_v2  ;;  %v8793_v62 = vpack.c.bf16 %v3838_v42, %v3830_v30  ;;  %v3892_v2 = vld [vmem:[#allocation4 + $0x720] sm:$0xff]  ;;  %v3894_v30 = vld [vmem:[#allocation4 + $0x730] sm:$0xff] }
 0x8c9   : > { %4068 = vmatprep.mubr.f32.mxu0 %v13156_v34  ;;  %4181 = vmatprep.mubr.f32.mxu1 %v13156_v34  ;;  %v3900_v13 = vld [vmem:[#allocation4 + $0x760] sm:$0xff]  ;;  %v3902_v42 = vld [vmem:[#allocation4 + $0x770] sm:$0xff] }
 0x8ca   : > { %8716 = vmatprep.subr.bf16.mxu0 %v8715_v56  ;;  %8780 = vmatprep.subr.bf16.mxu1 %v8779_v3  ;;  %v3846_v56 = vld [vmem:[#allocation4 + $0x5b0] sm:$0xff] }
 0x8cb   : > { %4069 = vmatmul.mubr.f32.gmra.mrb[46].mxu0 %v11822_v4  ;;  %4182 = vmatmul.mubr.f32.gmra.mrb[62].mxu1 %v11822_v4  ;;  %v3854_v3 = vld [vmem:[#allocation4 + $0x5f0] sm:$0xff] }
 0x8cc   : > { %8718 = vmatpush1.bf16.msra.mxu0 %v8717_v9  ;;  %8782 = vmatpush1.bf16.msra.mxu1 %v8781_v20  ;;  %v8733_v9 = vpack.c.bf16 %v3852_v38, %v3844_v27  ;;  %v8797_v20 = vpack.c.bf16 %v3854_v3, %v3846_v56  ;;  %v3908_v27 = vld [vmem:[#allocation4 + $0x7a0] sm:$0xff]  ;;  %v3910_v56 = vld [vmem:[#allocation4 + $0x7b0] sm:$0xff] }
 0x8cd   : > { %4252 = vmatprep.mubr.f32.mxu0 %v11825_v39  ;;  %4365 = vmatprep.mubr.f32.mxu1 %v11825_v39  ;;  %v8791_v39 = vpack.c.bf16 %v3839_v61, %v3831_v48  ;;  %v3895_v48 = vld [vmem:[#allocation4 + $0x738] sm:$0xff]  ;;  %v3916_v38 = vld [vmem:[#allocation4 + $0x7e0] sm:$0xff]  ;;  %v3918_v3 = vld [vmem:[#allocation4 + $0x7f0] sm:$0xff] }
 0x8ce   : > { %8720 = vmatprep.subr.bf16.mxu0 %v8719_v52  ;;  %8784 = vmatprep.subr.bf16.mxu1 %v8783_v8  ;;  %v3870_v52 = vld [vmem:[#allocation4 + $0x670] sm:$0xff]  ;;  %v3877_v8 = vld [vmem:[#allocation4 + $0x6a8] sm:$0xff]  ;;  %v3903_v61 = vld [vmem:[#allocation4 + $0x778] sm:$0xff] }
 0x8d0   : > { %8722 = vmatpush1.bf16.msra.mxu0 %v8721_v14  ;;  %8786 = vmatpush1.bf16.msra.mxu1 %v8785_v18  ;;  %v8737_v14 = vpack.c.bf16 %v3868_v0, %v3860_v43  ;;  %v8801_v18 = vpack.c.bf16 %v3870_v52, %v3862_v31  ;;  %v11861_v43 = vpack.c.bf16 %v4483_v7, %v4479_v12  ;;  %v4480_v31 = vld [vmem:[#allocation7 + $0x410] sm:$0xff] }
 0x8d1   : > { %8724 = vmatprep.subr.bf16.mxu0 %v8723_v23  ;;  %8788 = vmatprep.subr.bf16.mxu1 %v8787_v35  ;;  %v8739_v23 = vpack.c.bf16 %v3885_v32, %v3877_v8  ;;  %v8803_v35 = vpack.c.bf16 %v3887_v10, %v3879_v1  ;;  %v11863_v0 = vpack.c.bf16 %v4485_v19, %v4481_v60  ;;  %v4484_v52 = vld [vmem:[#allocation7 + $0x450] sm:$0xff]  ;;  %v4487_v8 = vld [vmem:[#allocation7 + $0x488] sm:$0xff]  ;;  %v4489_v1 = vld [vmem:[#allocation7 + $0x498] sm:$0xff] }
 0x8d2   : > { %v4491_v32 = vld [vmem:[#allocation7 + $0x4c8] sm:$0xff]  ;;  %v4493_v10 = vld [vmem:[#allocation7 + $0x4d8] sm:$0xff]  ;;  %v4510_v60 = vld [vmem:[#allocation7 + $0x600] sm:$0xff] }
 0x8d3   : > { %v4514_v19 = vld [vmem:[#allocation7 + $0x640] sm:$0xff] }
 0x8d4   : > { %8726 = vmatpush1.bf16.msra.mxu0 %v8725_v33  ;;  %8790 = vmatpush1.bf16.msra.mxu1 %v8789_v37  ;;  %v8741_v33 = vpack.c.bf16 %v3884_v40, %v3876_v21  ;;  %v8805_v37 = vpack.c.bf16 %v3886_v29, %v3878_v53  ;;  %v4486_v21 = vld [vmem:[#allocation7 + $0x480] sm:$0xff]  ;;  %v4488_v53 = vld [vmem:[#allocation7 + $0x490] sm:$0xff] }
 0x8d5   : > { %8728 = vmatprep.subr.bf16.mxu0 %v8727_v11  ;;  %8792 = vmatprep.subr.bf16.mxu1 %v8791_v39  ;;  %v8743_v11 = vpack.c.bf16 %v3901_v41, %v3893_v5  ;;  %v8807_v39 = vpack.c.bf16 %v3903_v61, %v3895_v48  ;;  %v4490_v40 = vld [vmem:[#allocation7 + $0x4c0] sm:$0xff]  ;;  %v4492_v29 = vld [vmem:[#allocation7 + $0x4d0] sm:$0xff]  ;;  %v4495_v5 = vld [vmem:[#allocation7 + $0x508] sm:$0xff] }
 0x8d6   : > { %v4499_v41 = vld [vmem:[#allocation7 + $0x548] sm:$0xff]  ;;  %v4497_v48 = vld [vmem:[#allocation7 + $0x518] sm:$0xff] }
 0x8d7   : > { %v4501_v61 = vld [vmem:[#allocation7 + $0x558] sm:$0xff] }
 0x8d8   : > { %8730 = vmatpush1.bf16.msra.mxu0 %v8729_v25  ;;  %8794 = vmatpush1.bf16.msra.mxu1 %v8793_v62  ;;  %v8745_v25 = vpack.c.bf16 %v3900_v13, %v3892_v2  ;;  %v8809_v62 = vpack.c.bf16 %v3902_v42, %v3894_v30  ;;  %v4494_v2 = vld [vmem:[#allocation7 + $0x500] sm:$0xff]  ;;  %v4503_v30 = vld [vmem:[#allocation7 + $0x588] sm:$0xff] }
 0x8d9   : > { %8732 = vmatprep.subr.bf16.mxu0 %v8731_v46  ;;  %8796 = vmatprep.subr.bf16.mxu1 %v8795_v47  ;;  %v8747_v46 = vpack.c.bf16 %v3917_v59, %v3909_v16  ;;  %v8811_v47 = vpack.c.bf16 %v3919_v63, %v3911_v17  ;;  %v4498_v13 = vld [vmem:[#allocation7 + $0x540] sm:$0xff]  ;;  %v4507_v42 = vld [vmem:[#allocation7 + $0x5c8] sm:$0xff]  ;;  %v4505_v16 = vld [vmem:[#allocation7 + $0x598] sm:$0xff] }
 0x8da   : > { %v4509_v59 = vld [vmem:[#allocation7 + $0x5d8] sm:$0xff]  ;;  %v11897_v17 = vpack.c.bf16 %v4498_v13, %v4494_v2  ;;  %v4526_v2 = vld [vmem:[#allocation7 + $0x700] sm:$0xff] }
 0x8db   : > { %v4530_v13 = vld [vmem:[#allocation7 + $0x740] sm:$0xff] }
 0x8dc   : > { %8734 = vmatpush1.bf16.msra.mxu0 %v8733_v9  ;;  %8798 = vmatpush1.bf16.msra.mxu1 %v8797_v20  ;;  %v8749_v9 = vpack.c.bf16 %v3916_v38, %v3908_v27  ;;  %v8813_v20 = vpack.c.bf16 %v3918_v3, %v3910_v56  ;;  %13161 = vst [vmem:[#allocation18_spill] sm:$0xff] %v11897_v17  ;;  %v4504_v38 = vld [vmem:[#allocation7 + $0x590] sm:$0xff]  ;;  %v4513_v56 = vld [vmem:[#allocation7 + $0x618] sm:$0xff] }
 0x8dd   : > { %8736 = vmatprep.subr.bf16.mxu0 %v8735_v6  ;;  %8800 = vmatprep.subr.bf16.mxu1 %v8799_v28  ;;  %v4478_v6 = vld [vmem:[#allocation7 + $0x400] sm:$0xff]  ;;  %v11905_v27 = vpack.c.bf16 %v4509_v59, %v4505_v16  ;;  %v4517_v3 = vld [vmem:[#allocation7 + $0x658] sm:$0xff] }
 0x8de   : > { %v4482_v28 = vld [vmem:[#allocation7 + $0x440] sm:$0xff]  ;;  %v4537_v16 = vld [vmem:[#allocation7 + $0x798] sm:$0xff] }
 0x8df   : > { %13164 = vst [vmem:[#allocation30_spill] sm:$0xff] %v11905_v27  ;;  %v4541_v59 = vld [vmem:[#allocation7 + $0x7d8] sm:$0xff] }
 0x8e0   : > { %8738 = vmatpush1.bf16.msra.mxu0 %v8737_v14  ;;  %8802 = vmatpush1.bf16.msra.mxu1 %v8801_v18  ;;  %v11867_v14 = vpack.c.bf16 %v4482_v28, %v4478_v6  ;;  %v11869_v18 = vpack.c.bf16 %v4484_v52, %v4480_v31  ;;  %v4519_v6 = vld [vmem:[#allocation7 + $0x688] sm:$0xff]  ;;  %v4521_v31 = vld [vmem:[#allocation7 + $0x698] sm:$0xff] }
 0x8e1   : > { %8740 = vmatprep.subr.bf16.mxu0 %v8739_v23  ;;  %8804 = vmatprep.subr.bf16.mxu1 %v8803_v35  ;;  %v11871_v23 = vpack.c.bf16 %v4491_v32, %v4487_v8  ;;  %v11873_v35 = vpack.c.bf16 %v4493_v10, %v4489_v1  ;;  %v4523_v28 = vld [vmem:[#allocation7 + $0x6c8] sm:$0xff]  ;;  %v4525_v52 = vld [vmem:[#allocation7 + $0x6d8] sm:$0xff]  ;;  %v11929_v8 = vpack.c.bf16 %v4514_v19, %v4510_v60  ;;  %v4518_v1 = vld [vmem:[#allocation7 + $0x680] sm:$0xff] }
 0x8e2   : > { %v4522_v10 = vld [vmem:[#allocation7 + $0x6c0] sm:$0xff]  ;;  %v4545_v60 = vld [vmem:[#allocation7 + $0x438] sm:$0xff] }
 0x8e3   : > { %13169 = vst [vmem:[#allocation22_spill] sm:$0xff] %v11929_v8  ;;  %v4549_v19 = vld [vmem:[#allocation7 + $0x478] sm:$0xff] }
 0x8e4   : > { %8742 = vmatpush1.bf16.msra.mxu0 %v8741_v33  ;;  %8806 = vmatpush1.bf16.msra.mxu1 %v8805_v37  ;;  %v11881_v33 = vpack.c.bf16 %v4490_v40, %v4486_v21  ;;  %v11883_v37 = vpack.c.bf16 %v4492_v29, %v4488_v53  ;;  %v11937_v21 = vpack.c.bf16 %v4525_v52, %v4521_v31  ;;  %v4520_v40 = vld [vmem:[#allocation7 + $0x690] sm:$0xff]  ;;  %v4527_v53 = vld [vmem:[#allocation7 + $0x708] sm:$0xff] }
 0x8e5   : > { %8744 = vmatprep.subr.bf16.mxu0 %v8743_v11  ;;  %8808 = vmatprep.subr.bf16.mxu1 %v8807_v39  ;;  %v11889_v11 = vpack.c.bf16 %v4501_v61, %v4497_v48  ;;  %v4496_v39 = vld [vmem:[#allocation7 + $0x510] sm:$0xff]  ;;  %v4531_v29 = vld [vmem:[#allocation7 + $0x748] sm:$0xff]  ;;  %v11945_v48 = vpack.c.bf16 %v4522_v10, %v4518_v1  ;;  %v11985_v31 = vpack.c.bf16 %v4549_v19, %v4545_v60 }
 0x8e6   : > { %13157 = vst [vmem:[#allocation47_spill] sm:$0xff] %v11881_v33  ;;  %13158 = vst [vmem:[#allocation48_spill] sm:$0xff] %v11883_v37  ;;  %v4544_v52 = vld [vmem:[#allocation7 + $0x430] sm:$0xff]  ;;  %v4551_v1 = vld [vmem:[#allocation7 + $0x4a8] sm:$0xff] }
 0x8e7   : > { %13160 = vst [vmem:[#allocation28_spill] sm:$0xff] %v11889_v11  ;;  %13172 = vst [vmem:[#allocation34_spill] sm:$0xff] %v11937_v21  ;;  %v4555_v10 = vld [vmem:[#allocation7 + $0x4e8] sm:$0xff]  ;;  %v4564_v60 = vld [vmem:[#allocation7 + $0x570] sm:$0xff] }
 0x8e8   : > { %8746 = vmatpush1.bf16.msra.mxu0 %v8745_v25  ;;  %8810 = vmatpush1.bf16.msra.mxu1 %v8809_v62  ;;  %v4502_v25 = vld [vmem:[#allocation7 + $0x580] sm:$0xff]  ;;  %13173 = vst [vmem:[#allocation24_spill] sm:$0xff] %v11945_v48  ;;  %13184 = vst [vmem:[#allocation52_spill] sm:$0xff] %v11985_v31  ;;  %v4567_v19 = vld [vmem:[#allocation7 + $0x5a8] sm:$0xff] }
 0x8e9   : > { %8748 = vmatprep.subr.bf16.mxu0 %v8747_v46  ;;  %8812 = vmatprep.subr.bf16.mxu1 %v8811_v47  ;;  %v4506_v62 = vld [vmem:[#allocation7 + $0x5c0] sm:$0xff]  ;;  %v4511_v46 = vld [vmem:[#allocation7 + $0x608] sm:$0xff] }
 0x8ea   : > { %v4515_v47 = vld [vmem:[#allocation7 + $0x648] sm:$0xff]  ;;  %v11913_v12 = vpack.c.bf16 %v4506_v62, %v4502_v25  ;;  %v11961_v25 = vpack.c.bf16 %v4530_v13, %v4526_v2  ;;  %v4552_v13 = vld [vmem:[#allocation7 + $0x4b0] sm:$0xff] }
 0x8ec   : > { %8750 = vmatpush1.bf16.msra.mxu0 %v8749_v9  ;;  %8814 = vmatpush1.bf16.msra.mxu1 %v8813_v20  ;;  %13165 = vst [vmem:[#allocation20_spill] sm:$0xff] %v11913_v12  ;;  %v11921_v9 = vpack.c.bf16 %v4517_v3, %v4513_v56  ;;  %v4512_v20 = vld [vmem:[#allocation7 + $0x610] sm:$0xff]  ;;  %13177 = vst [vmem:[#allocation26_spill] sm:$0xff] %v11961_v25  ;;  %v4543_v56 = vld [vmem:[#allocation7 + $0x428] sm:$0xff] }
 0x8ed   : > { %8816 = vmatprep.subr.bf16.mxu0 %v11861_v43  ;;  %8848 = vmatprep.subr.bf16.mxu1 %v11863_v0  ;;  %v4547_v3 = vld [vmem:[#allocation7 + $0x468] sm:$0xff] }
 0x8ee   : > { %13168 = vst [vmem:[#allocation32_spill] sm:$0xff] %v11921_v9 }
 0x8ef   : > { %4253 = vmatmul.mubr.f32.vlgmr.msra.gmra.mrb[48].mxu0 %v13147_v22  ;;  %4366 = vmatmul.mubr.f32.vlgmr.msra.gmra.mrb[64].mxu1 %v13147_v22  ;;  %v11887_v22 = vpack.c.bf16 %v4499_v41, %v4495_v5  ;;  %v4529_v5 = vld [vmem:[#allocation7 + $0x718] sm:$0xff] }
 0x8f0   : > { %4258 = vmatprep.mubr.f32.mxu0 %v11815_v57  ;;  %4371 = vmatprep.mubr.f32.mxu1 %v11815_v57  ;;  %v4500_v57 = vld [vmem:[#allocation7 + $0x550] sm:$0xff]  ;;  %v4533_v41 = vld [vmem:[#allocation7 + $0x758] sm:$0xff] }
 0x8f1   : > { %8818 = vmatpush1.bf16.msra.mxu0 %v11867_v14  ;;  %8850 = vmatpush1.bf16.msra.mxu1 %v11869_v18  ;;  %13159 = vst [vmem:[#allocation17_spill] sm:$0xff] %v11887_v22  ;;  %v11899_v63 = vpack.c.bf16 %v4500_v57, %v4496_v39  ;;  %v11953_v39 = vpack.c.bf16 %v4533_v41, %v4529_v5  ;;  %v4528_v57 = vld [vmem:[#allocation7 + $0x710] sm:$0xff]  ;;  %v4550_v5 = vld [vmem:[#allocation7 + $0x4a0] sm:$0xff] }
 0x8f2   : > { %8820 = vmatprep.subr.bf16.mxu0 %v11871_v23  ;;  %8852 = vmatprep.subr.bf16.mxu1 %v11873_v35  ;;  %v4554_v41 = vld [vmem:[#allocation7 + $0x4e0] sm:$0xff] }
 0x8f3   : > { %4259 = vmatmul.mubr.f32.gmra.mrb[50].mxu0 %v13148_v55  ;;  %4372 = vmatmul.mubr.f32.gmra.mrb[66].mxu1 %v13148_v55  ;;  %13162 = vst [vmem:[#allocation29_spill] sm:$0xff] %v11899_v63  ;;  %v11903_v55 = vpack.c.bf16 %v4507_v42, %v4503_v30  ;;  %13176 = vst [vmem:[#allocation36_spill] sm:$0xff] %v11953_v39  ;;  %v4535_v30 = vld [vmem:[#allocation7 + $0x788] sm:$0xff] }
 0x8f4   : > { %4264 = vmatprep.mubr.f32.mxu0 %v11729_v36  ;;  %4377 = vmatprep.mubr.f32.mxu1 %v11729_v36  ;;  %v4508_v36 = vld [vmem:[#allocation7 + $0x5d0] sm:$0xff]  ;;  %v4539_v42 = vld [vmem:[#allocation7 + $0x7c8] sm:$0xff] }
 0x8f5   : > { %8822 = vmatpush1.bf16.msra.mxu0 %v11881_v33  ;;  %8854 = vmatpush1.bf16.msra.mxu1 %v11883_v37  ;;  %13163 = vst [vmem:[#allocation19_spill] sm:$0xff] %v11903_v55  ;;  %v11915_v7 = vpack.c.bf16 %v4508_v36, %v4504_v38  ;;  %v4534_v38 = vld [vmem:[#allocation7 + $0x780] sm:$0xff] }
 0x8f6   : > { %8824 = vmatprep.subr.bf16.mxu0 %v11887_v22  ;;  %8856 = vmatprep.subr.bf16.mxu1 %v11889_v11  ;;  %v4538_v36 = vld [vmem:[#allocation7 + $0x7c0] sm:$0xff] }
 0x8f7   : > { %4265 = vmatmul.mubr.f32.gmra.mrb[52].mxu0 %v13149_v50  ;;  %4378 = vmatmul.mubr.f32.gmra.mrb[68].mxu1 %v13149_v50  ;;  %13166 = vst [vmem:[#allocation31_spill] sm:$0xff] %v11915_v7  ;;  %v11919_v50 = vpack.c.bf16 %v4515_v47, %v4511_v46  ;;  %v11969_v46 = vpack.c.bf16 %v4541_v59, %v4537_v16  ;;  %v4536_v47 = vld [vmem:[#allocation7 + $0x790] sm:$0xff]  ;;  %v4565_v16 = vld [vmem:[#allocation7 + $0x578] sm:$0xff] }
 0x8f8   : > { %4270 = vmatprep.mubr.f32.mxu0 %v13150_v49  ;;  %4383 = vmatprep.mubr.f32.mxu1 %v13150_v49  ;;  %v4516_v49 = vld [vmem:[#allocation7 + $0x650] sm:$0xff]  ;;  %v12007_v59 = vpack.c.bf16 %v4554_v41, %v4550_v5 }
 0x8f9   : > { %8826 = vmatpush1.bf16.msra.mxu0 %v11897_v17  ;;  %8858 = vmatpush1.bf16.msra.mxu1 %v11899_v63  ;;  %13167 = vst [vmem:[#allocation21_spill] sm:$0xff] %v11919_v50  ;;  %v11931_v32 = vpack.c.bf16 %v4516_v49, %v4512_v20  ;;  %13180 = vst [vmem:[#allocation38_spill] sm:$0xff] %v11969_v46  ;;  %v11977_v20 = vpack.c.bf16 %v4538_v36, %v4534_v38  ;;  %v4558_v36 = vld [vmem:[#allocation7 + $0x520] sm:$0xff]  ;;  %v4568_v41 = vld [vmem:[#allocation7 + $0x5b0] sm:$0xff] }
 0x8fa   : > { %8828 = vmatprep.subr.bf16.mxu0 %v11903_v55  ;;  %8860 = vmatprep.subr.bf16.mxu1 %v11905_v27 }
 0x8fb   : > { %4271 = vmatmul.mubr.f32.gmra.mrb[54].mxu0 %v13151_v51  ;;  %4384 = vmatmul.mubr.f32.gmra.mrb[70].mxu1 %v13151_v51  ;;  %13170 = vst [vmem:[#allocation33_spill] sm:$0xff] %v11931_v32  ;;  %v11935_v51 = vpack.c.bf16 %v4523_v28, %v4519_v6  ;;  %13181 = vst [vmem:[#allocation49_spill] sm:$0xff] %v11977_v20  ;;  %v4542_v6 = vld [vmem:[#allocation7 + $0x420] sm:$0xff] }
 0x8fc   : > { %4276 = vmatprep.mubr.f32.mxu0 %v13152_v15  ;;  %4389 = vmatprep.mubr.f32.mxu1 %v13152_v15  ;;  %v4524_v15 = vld [vmem:[#allocation7 + $0x6d0] sm:$0xff]  ;;  %v4546_v28 = vld [vmem:[#allocation7 + $0x460] sm:$0xff] }
 0x8fd   : > { %8830 = vmatpush1.bf16.msra.mxu0 %v11913_v12  ;;  %8862 = vmatpush1.bf16.msra.mxu1 %v11915_v7  ;;  %13171 = vst [vmem:[#allocation23_spill] sm:$0xff] %v11935_v51  ;;  %v11947_v61 = vpack.c.bf16 %v4524_v15, %v4520_v40  ;;  %v4553_v40 = vld [vmem:[#allocation7 + $0x4b8] sm:$0xff] }
 0x8fe   : > { %8832 = vmatprep.subr.bf16.mxu0 %v11919_v50  ;;  %8864 = vmatprep.subr.bf16.mxu1 %v11921_v9  ;;  %v4557_v15 = vld [vmem:[#allocation7 + $0x4f8] sm:$0xff] }
 0x8ff   : > { %4277 = vmatmul.mubr.f32.gmra.mrb[56].mxu0 %v13153_v54  ;;  %4390 = vmatmul.mubr.f32.gmra.mrb[72].mxu1 %v13153_v54  ;;  %13174 = vst [vmem:[#allocation35_spill] sm:$0xff] %v11947_v61  ;;  %v11951_v54 = vpack.c.bf16 %v4531_v29, %v4527_v53  ;;  %v11993_v53 = vpack.c.bf16 %v4546_v28, %v4542_v6  ;;  %v4571_v6 = vld [vmem:[#allocation7 + $0x5e8] sm:$0xff]  ;;  %v4569_v28 = vld [vmem:[#allocation7 + $0x5b8] sm:$0xff] }
 0x900   : > { %4282 = vmatprep.mubr.f32.mxu0 %v13154_v45  ;;  %4395 = vmatprep.mubr.f32.mxu1 %v13154_v45  ;;  %v4532_v45 = vld [vmem:[#allocation7 + $0x750] sm:$0xff]  ;;  %v12001_v2 = vpack.c.bf16 %v4557_v15, %v4553_v40  ;;  %v4570_v40 = vld [vmem:[#allocation7 + $0x5e0] sm:$0xff]  ;;  %v12027_v15 = vpack.c.bf16 %v4571_v6, %v4567_v19 }
 0x901   : > { %8834 = vmatpush1.bf16.msra.mxu0 %v11929_v8  ;;  %8866 = vmatpush1.bf16.msra.mxu1 %v11931_v32  ;;  %13175 = vst [vmem:[#allocation25_spill] sm:$0xff] %v11951_v54  ;;  %v11963_v62 = vpack.c.bf16 %v4532_v45, %v4528_v57  ;;  %v4556_v57 = vld [vmem:[#allocation7 + $0x4f0] sm:$0xff]  ;;  %v4559_v45 = vld [vmem:[#allocation7 + $0x528] sm:$0xff] }
 0x902   : > { %8836 = vmatprep.subr.bf16.mxu0 %v11935_v51  ;;  %8868 = vmatprep.subr.bf16.mxu1 %v11937_v21  ;;  %v12009_v38 = vpack.c.bf16 %v4556_v57, %v4552_v13  ;;  %13188 = vst [vmem:[#allocation46_spill] sm:$0xff] %v12027_v15  ;;  %v4572_v13 = vld [vmem:[#allocation7 + $0x5f0] sm:$0xff]  ;;  %v4575_v57 = vld [vmem:[#allocation7 + $0x628] sm:$0xff] }
 0x903   : > { %4283 = vmatmul.mubr.f32.gmra.mrb[58].mxu0 %v11689_v44  ;;  %4396 = vmatmul.mubr.f32.gmra.mrb[74].mxu1 %v11689_v44  ;;  %13178 = vst [vmem:[#allocation37_spill] sm:$0xff] %v11963_v62  ;;  %v11967_v44 = vpack.c.bf16 %v4539_v42, %v4535_v30  ;;  %v4563_v30 = vld [vmem:[#allocation7 + $0x568] sm:$0xff]  ;;  %v4561_v42 = vld [vmem:[#allocation7 + $0x538] sm:$0xff]  ;;  %v4576_v6 = vld [vmem:[#allocation7 + $0x630] sm:$0xff] }
 0x904   : > { %4288 = vmatprep.mubr.f32.mxu0 %v13155_v24  ;;  %4401 = vmatprep.mubr.f32.mxu1 %v13155_v24  ;;  %v4540_v24 = vld [vmem:[#allocation7 + $0x7d0] sm:$0xff] }
 0x905   : > { %8838 = vmatpush1.bf16.msra.mxu0 %v11945_v48  ;;  %8870 = vmatpush1.bf16.msra.mxu1 %v11947_v61  ;;  %13179 = vst [vmem:[#allocation27_spill] sm:$0xff] %v11967_v44  ;;  %v11979_v49 = vpack.c.bf16 %v4540_v24, %v4536_v47  ;;  %v4562_v47 = vld [vmem:[#allocation7 + $0x560] sm:$0xff]  ;;  %v12013_v24 = vpack.c.bf16 %v4563_v30, %v4559_v45  ;;  %v4579_v45 = vld [vmem:[#allocation7 + $0x668] sm:$0xff]  ;;  %v4577_v30 = vld [vmem:[#allocation7 + $0x638] sm:$0xff] }
 0x906   : > { %8840 = vmatprep.subr.bf16.mxu0 %v11951_v54  ;;  %8872 = vmatprep.subr.bf16.mxu1 %v11953_v39 }
 0x907   : > { %4289 = vmatmul.mubr.f32.gmra.mrb[60].mxu0 %v11775_v26  ;;  %4402 = vmatmul.mubr.f32.gmra.mrb[76].mxu1 %v11775_v26  ;;  %13182 = vst [vmem:[#allocation50_spill] sm:$0xff] %v11979_v49  ;;  %v11983_v26 = vpack.c.bf16 %v4547_v3, %v4543_v56  ;;  %v12015_v56 = vpack.c.bf16 %v4565_v16, %v4561_v42  ;;  %v4560_v3 = vld [vmem:[#allocation7 + $0x530] sm:$0xff]  ;;  %v4581_v42 = vld [vmem:[#allocation7 + $0x678] sm:$0xff] }
 0x908   : > { %4294 = vmatprep.mubr.f32.mxu0 %v13156_v34  ;;  %4407 = vmatprep.mubr.f32.mxu1 %v13156_v34  ;;  %v4548_v34 = vld [vmem:[#allocation7 + $0x470] sm:$0xff]  ;;  %v12041_v19 = vpack.c.bf16 %v4581_v42, %v4577_v30 }
 0x909   : > { %8842 = vmatpush1.bf16.msra.mxu0 %v11961_v25  ;;  %8874 = vmatpush1.bf16.msra.mxu1 %v11963_v62  ;;  %13183 = vst [vmem:[#allocation51_spill] sm:$0xff] %v11983_v26  ;;  %v11995_v29 = vpack.c.bf16 %v4548_v34, %v4544_v52  ;;  %13185 = vst [vmem:[#allocation53_spill] sm:$0xff] %v12015_v56  ;;  %v4573_v52 = vld [vmem:[#allocation7 + $0x5f8] sm:$0xff]  ;;  %v12021_v34 = vpack.c.bf16 %v4562_v47, %v4558_v36  ;;  %v4574_v47 = vld [vmem:[#allocation7 + $0x620] sm:$0xff] }
 0x90a   : > { %8844 = vmatprep.subr.bf16.mxu0 %v11967_v44  ;;  %8876 = vmatprep.subr.bf16.mxu1 %v11969_v46  ;;  %v12029_v5 = vpack.c.bf16 %v4573_v52, %v4569_v28  ;;  %v12035_v36 = vpack.c.bf16 %v4572_v13, %v4568_v41  ;;  %13193 = vst [vmem:[#allocation40_spill] sm:$0xff] %v12041_v19  ;;  %v4580_v28 = vld [vmem:[#allocation7 + $0x670] sm:$0xff]  ;;  %v4583_v52 = vld [vmem:[#allocation7 + $0x6a8] sm:$0xff]  ;;  %v4582_v41 = vld [vmem:[#allocation7 + $0x6a0] sm:$0xff] }
 0x90b   : > { %4295 = vmatmul.mubr.f32.gmra.mrb[62].mxu0 %v11822_v4  ;;  %4408 = vmatmul.mubr.f32.gmra.mrb[78].mxu1 %v11822_v4  ;;  %v11999_v4 = vpack.c.bf16 %v4555_v10, %v4551_v1  ;;  %13186 = vst [vmem:[#allocation39_spill] sm:$0xff] %v12021_v34  ;;  %v12023_v1 = vpack.c.bf16 %v4564_v60, %v4560_v3  ;;  %v4566_v10 = vld [vmem:[#allocation7 + $0x5a0] sm:$0xff]  ;;  %v4584_v30 = vld [vmem:[#allocation7 + $0x6b0] sm:$0xff] }
 0x90c   : > { %4674 = vmatprep.mubr.f32.mxu0 %v12978_v58  ;;  %4745 = vmatprep.mubr.f32.mxu1 %v12978_v58  ;;  %13189 = vst [vmem:[#allocation43_spill] sm:$0xff] %v12029_v5  ;;  %v12033_v16 = vpack.c.bf16 %v4570_v40, %v4566_v10  ;;  %13191 = vst [vmem:[#allocation45_spill] sm:$0xff] %v12035_v36  ;;  %v4578_v3 = vld [vmem:[#allocation7 + $0x660] sm:$0xff]  ;;  %v12039_v60 = vpack.c.bf16 %v4579_v45, %v4575_v57  ;;  %v4588_v42 = vld [vmem:[#allocation7 + $0x6f0] sm:$0xff] }
 0x90d   : > { %8846 = vmatpush1.bf16.msra.mxu0 %v11977_v20  ;;  %8878 = vmatpush1.bf16.msra.mxu1 %v11979_v49  ;;  %13187 = vst [vmem:[#allocation41_spill] sm:$0xff] %v12023_v1  ;;  %v12045_v10 = vpack.c.bf16 %v4578_v3, %v4574_v47  ;;  %v12047_v40 = vpack.c.bf16 %v4580_v28, %v4576_v6  ;;  %v4586_v13 = vld [vmem:[#allocation7 + $0x6e0] sm:$0xff] }
 0x90e   : > { %8880 = vmatprep.subr.bf16.mxu0 %v11983_v26  ;;  %8912 = vmatprep.subr.bf16.mxu1 %v11985_v31  ;;  %13190 = vst [vmem:[#allocation44_spill] sm:$0xff] %v12033_v16  ;;  %13192 = vst [vmem:[#allocation42_spill] sm:$0xff] %v12039_v60  ;;  %v12057_v47 = vpack.c.bf16 %v4586_v13, %v4582_v41  ;;  %v12059_v3 = vpack.c.bf16 %v4588_v42, %v4584_v30  ;;  %v4590_v6 = vld [vmem:[#allocation7 + $0x720] sm:$0xff]  ;;  %v4604_v42 = vld [vmem:[#allocation7 + $0x7f0] sm:$0xff] }
 0x90f   : > { %13194 = vst [vmem:[#allocation54_spill] sm:$0xff] %v12045_v10  ;;  %13195 = vst [vmem:[#allocation55_spill] sm:$0xff] %v12047_v40  ;;  %v4594_v28 = vld [vmem:[#allocation7 + $0x760] sm:$0xff] }
 0x910   : > { %4675 = vmatmul.mubr.f32.vlgmr.msra.gmra.mrb[32].mxu0 %v12978_v58  ;;  %4746 = vmatmul.mubr.f32.vlgmr.msra.gmra.mrb[48].mxu1 %v12978_v58  ;;  %v12069_v41 = vpack.c.bf16 %v4594_v28, %v4590_v6  ;;  %v4598_v30 = vld [vmem:[#allocation7 + $0x7a0] sm:$0xff] }
 0x911   : > { %8882 = vmatpush1.bf16.msra.mxu0 %v11993_v53  ;;  %8914 = vmatpush1.bf16.msra.mxu1 %v11995_v29 }
 0x912   : > { %8884 = vmatprep.subr.bf16.mxu0 %v11999_v4  ;;  %8916 = vmatprep.subr.bf16.mxu1 %v12001_v2 }
 0x913   : > { %4820 = vmatprep.mubr.f32.mxu0 %v12978_v58  ;;  %4891 = vmatprep.mubr.f32.mxu1 %v12978_v58 }
 0x915   : > { %8886 = vmatpush1.bf16.msra.mxu0 %v12007_v59  ;;  %8918 = vmatpush1.bf16.msra.mxu1 %v12009_v38 }
 0x916   : > { %8888 = vmatprep.subr.bf16.mxu0 %v12013_v24  ;;  %8920 = vmatprep.subr.bf16.mxu1 %v12015_v56  ;;  %v4585_v56 = vld [vmem:[#allocation7 + $0x6b8] sm:$0xff] }
 0x919   : > { %8890 = vmatpush1.bf16.msra.mxu0 %v12021_v34  ;;  %8922 = vmatpush1.bf16.msra.mxu1 %v12023_v1  ;;  %v4587_v34 = vld [vmem:[#allocation7 + $0x6e8] sm:$0xff]  ;;  %v4589_v1 = vld [vmem:[#allocation7 + $0x6f8] sm:$0xff] }
 0x91a   : > { %8892 = vmatprep.subr.bf16.mxu0 %v12027_v15  ;;  %8924 = vmatprep.subr.bf16.mxu1 %v12029_v5  ;;  %v12051_v57 = vpack.c.bf16 %v4587_v34, %v4583_v52  ;;  %v12053_v45 = vpack.c.bf16 %v4589_v1, %v4585_v56  ;;  %v4591_v5 = vld [vmem:[#allocation7 + $0x728] sm:$0xff]  ;;  %v4593_v15 = vld [vmem:[#allocation7 + $0x738] sm:$0xff]  ;;  %v4592_v1 = vld [vmem:[#allocation7 + $0x730] sm:$0xff] }
 0x91b   : > { %v4596_v52 = vld [vmem:[#allocation7 + $0x770] sm:$0xff] }
 0x91c   : > { %v12071_v13 = vpack.c.bf16 %v4596_v52, %v4592_v1 }
 0x91d   : > { %8894 = vmatpush1.bf16.msra.mxu0 %v12033_v16  ;;  %8926 = vmatpush1.bf16.msra.mxu1 %v12035_v36  ;;  %v4595_v16 = vld [vmem:[#allocation7 + $0x768] sm:$0xff]  ;;  %v4597_v36 = vld [vmem:[#allocation7 + $0x778] sm:$0xff] }
 0x91e   : > { %8896 = vmatprep.subr.bf16.mxu0 %v12039_v60  ;;  %8928 = vmatprep.subr.bf16.mxu1 %v12041_v19  ;;  %v12063_v56 = vpack.c.bf16 %v4595_v16, %v4591_v5  ;;  %v12065_v34 = vpack.c.bf16 %v4597_v36, %v4593_v15  ;;  %v4599_v19 = vld [vmem:[#allocation7 + $0x7a8] sm:$0xff]  ;;  %v4601_v60 = vld [vmem:[#allocation7 + $0x7b8] sm:$0xff]  ;;  %v4602_v16 = vld [vmem:[#allocation7 + $0x7e0] sm:$0xff] }
 0x91f   : > { %v4600_v36 = vld [vmem:[#allocation7 + $0x7b0] sm:$0xff]  ;;  %v12081_v6 = vpack.c.bf16 %v4602_v16, %v4598_v30 }
 0x920   : > { %v12083_v28 = vpack.c.bf16 %v4604_v42, %v4600_v36 }
 0x921   : > { %8898 = vmatpush1.bf16.msra.mxu0 %v12045_v10  ;;  %8930 = vmatpush1.bf16.msra.mxu1 %v12047_v40  ;;  %v4603_v10 = vld [vmem:[#allocation7 + $0x7e8] sm:$0xff]  ;;  %v4605_v40 = vld [vmem:[#allocation7 + $0x7f8] sm:$0xff] }
 0x922   : > { %8900 = vmatprep.subr.bf16.mxu0 %v12051_v57  ;;  %8932 = vmatprep.subr.bf16.mxu1 %v12053_v45  ;;  %v12075_v15 = vpack.c.bf16 %v4603_v10, %v4599_v19  ;;  %v12077_v5 = vpack.c.bf16 %v4605_v40, %v4601_v60  ;;  %v3922_v60 = vlaneseq  ;;  %v3920_v40 = vld [vmem:[%s12777_s3] sm:$0xff] }
 0x924   : > { %v12127_v19 = vshrl.u32 %v3922_v60, 7 }
 0x925   : > { %8902 = vmatpush1.bf16.msra.mxu0 %v12057_v47  ;;  %8934 = vmatpush1.bf16.msra.mxu1 %v12059_v3 }
 0x926   : > { %8904 = vmatprep.subr.bf16.mxu0 %v12063_v56  ;;  %8936 = vmatprep.subr.bf16.mxu1 %v12065_v34  ;;  %13196 = vst [vmem:[#allocation56_spill] sm:$0xff] %v12127_v19  ;;  %v12886_v10 = vsub.s32 0, %v12127_v19  ;;  %v12893_v1 = vsub.s32 1, %v12127_v19  ;;  %v3936_v30 = vsub.s32 3, %v12127_v19 }
 0x928   : > { %v12136_v52 = vrot.slane %v3920_v40, %v12886_v10  ;;  %v12141_v16 = vrot.slane %v3920_v40, %v12893_v1 }
 0x929   : > { %8906 = vmatpush1.bf16.msra.mxu0 %v12069_v41  ;;  %8938 = vmatpush1.bf16.msra.mxu1 %v12071_v13 }
 0x92a   : > { %8908 = vmatprep.subr.bf16.mxu0 %v12075_v15  ;;  %8940 = vmatprep.subr.bf16.mxu1 %v12077_v5  ;;  %13197 = vst [vmem:[#allocation57_spill] sm:$0xff] %v12136_v52 }
 0x92d   : > { %8910 = vmatpush1.bf16.msra.mxu0 %v12081_v6  ;;  %8942 = vmatpush1.bf16.msra.mxu1 %v12083_v28 }
 0x92e   : > { %8944 = vmatprep.subr.bf16.mxu0 %v11861_v43  ;;  %8976 = vmatprep.subr.bf16.mxu1 %v11863_v0 }
 0x930   : > { %4821 = vmatmul.mubr.f32.vlgmr.msra.gmra.mrb[62].mxu0 %v12978_v58  ;;  %4892 = vmatmul.mubr.f32.vlgmr.msra.gmra.mrb[78].mxu1 %v12978_v58 }
 0x931   : > { %8946 = vmatpush1.bf16.msra.mxu0 %v11867_v14  ;;  %8978 = vmatpush1.bf16.msra.mxu1 %v11869_v18 }
 0x932   : > { %8948 = vmatprep.subr.bf16.mxu0 %v11871_v23  ;;  %8980 = vmatprep.subr.bf16.mxu1 %v11873_v35 }
 0x933   : > { %5002 = vmatprep.mubr.f32.mxu0 %v12978_v58  ;;  %5073 = vmatprep.mubr.f32.mxu1 %v12978_v58 }
 0x935   : > { %8950 = vmatpush1.bf16.msra.mxu0 %v11881_v33  ;;  %8982 = vmatpush1.bf16.msra.mxu1 %v11883_v37 }
 0x936   : > { %8952 = vmatprep.subr.bf16.mxu0 %v11887_v22  ;;  %8984 = vmatprep.subr.bf16.mxu1 %v11889_v11 }
 0x939   : > { %8954 = vmatpush1.bf16.msra.mxu0 %v11897_v17  ;;  %8986 = vmatpush1.bf16.msra.mxu1 %v11899_v63 }
 0x93a   : > { %8956 = vmatprep.subr.bf16.mxu0 %v11903_v55  ;;  %8988 = vmatprep.subr.bf16.mxu1 %v11905_v27 }
 0x93d   : > { %8958 = vmatpush1.bf16.msra.mxu0 %v11913_v12  ;;  %8990 = vmatpush1.bf16.msra.mxu1 %v11915_v7 }
 0x93e   : > { %8960 = vmatprep.subr.bf16.mxu0 %v11919_v50  ;;  %8992 = vmatprep.subr.bf16.mxu1 %v11921_v9 }
 0x941   : > { %8962 = vmatpush1.bf16.msra.mxu0 %v11929_v8  ;;  %8994 = vmatpush1.bf16.msra.mxu1 %v11931_v32 }
 0x942   : > { %8964 = vmatprep.subr.bf16.mxu0 %v11935_v51  ;;  %8996 = vmatprep.subr.bf16.mxu1 %v11937_v21 }
 0x945   : > { %8966 = vmatpush1.bf16.msra.mxu0 %v11945_v48  ;;  %8998 = vmatpush1.bf16.msra.mxu1 %v11947_v61 }
 0x946   : > { %8968 = vmatprep.subr.bf16.mxu0 %v11951_v54  ;;  %9000 = vmatprep.subr.bf16.mxu1 %v11953_v39 }
 0x949   : > { %8970 = vmatpush1.bf16.msra.mxu0 %v11961_v25  ;;  %9002 = vmatpush1.bf16.msra.mxu1 %v11963_v62 }
 0x94a   : > { %8972 = vmatprep.subr.bf16.mxu0 %v11967_v44  ;;  %9004 = vmatprep.subr.bf16.mxu1 %v11969_v46 }
 0x94d   : > { %8974 = vmatpush1.bf16.msra.mxu0 %v11977_v20  ;;  %9006 = vmatpush1.bf16.msra.mxu1 %v11979_v49  ;;  %v3932_v20 = vsub.s32 2, %v12127_v19 }
 0x94e   : > { %9008 = vmatprep.subr.bf16.mxu0 %v11983_v26  ;;  %9040 = vmatprep.subr.bf16.mxu1 %v11985_v31  ;;  %v12144_v26 = vrot.slane %v3920_v40, %v3936_v30 }
 0x94f   : > { %v12149_v25 = vrot.slane %v3920_v40, %v3932_v20  ;;  %v3940_v20 = vsub.s32 4, %v12127_v19 }
 0x950   : > { %13198 = vst [vmem:[#allocation58_spill] sm:$0xff] %v12144_v26 }
 0x951   : > { %13199 = vst [vmem:[#allocation59_spill] sm:$0xff] %v12149_v25 }
 0x9e3   : > { %v4676_v36 = vpop.f32.mrb[32].mxu0  ;;  %v4747_v42 = vpop.f32.mrb[48].mxu1 }
 0x9e4   : > { %v9919_v60 = vadd.f32 %v4676_v36, %v12136_v52  ;;  %v4678_v31 = vpop.f32.mrb[33].mxu0  ;;  %v4749_v49 = vpop.f32.mrb[49].mxu1  ;;  %v9935_v1 = vadd.f32 %v4747_v42, %v12149_v25 }
 0x9e5   : > { %v9920_v46 = vadd.f32 %v4678_v31, %v12141_v16  ;;  %v9936_v62 = vadd.f32 %v4749_v49, %v12144_v26  ;;  %v12157_v49 = vrot.slane %v3920_v40, %v3940_v20 }
 0x9e6   : > { %v4898_v10 = vmul.f32 0.5, %v9919_v60  ;;  %v4900_v36 = vmul.f32 0.5, %v9935_v1  ;;  %v3952_v1 = vsub.s32 7, %v12127_v19 }
 0x9e7   : > { %v4899_v44 = vmul.f32 0.5, %v9920_v46 }
 0x9e8   : > { %10330 = vtanh.f32 %v4898_v10 }
 0x9e9   : > { %10332 = vtanh.f32 %v4899_v44 }
 0x9ea   : > { %10334 = vtanh.f32 %v9936_v62  ;;  %v3944_v62 = vsub.s32 5, %v12127_v19 }
 0x9eb   : > { %10336 = vtanh.f32 %v4900_v36  ;;  %v12163_v36 = vrot.slane %v3920_v40, %v3952_v1 }
 0x9f2   : > { %v10331_v52 = vpop.eup %10330 }
 0x9f3   : > { %v4904_v30 = vadd.f32 1.0, %v10331_v52  ;;  %v10333_v39 = vpop.eup %10332  ;;  %v12160_v52 = vrot.slane %v3920_v40, %v3944_v62 }
 0x9f4   : > { %v4905_v61 = vadd.f32 1.0, %v10333_v39  ;;  %v10335_v48 = vpop.eup %10334 }
 0x9f5   : > { %v4907_v54 = vmul.f32 0.5, %v4904_v30  ;;  %v10337_v44 = vpop.eup %10336 }
 0x9f6   : > { %v4908_v31 = vmul.f32 0.5, %v4905_v61  ;;  %v4906_v39 = vadd.f32 1.0, %v10337_v44 }
 0x9f7   : > { %v4912_v60 = vmul.f32 %v10335_v48, %v4907_v54 }
 0x9f8   : > { %v4911_v46 = vmul.f32 0.0, %v4908_v31  ;;  %v3948_v31 = vsub.s32 6, %v12127_v19  ;;  %v13209_v19 = vld [vmem:[#allocation40_spill] sm:$0xff] }
 0x9fa   : > { %v12152_v10 = vadd.f32 %v4912_v60, %v4911_v46  ;;  %v4909_v46 = vmul.f32 0.5, %v4906_v39  ;;  %v12168_v26 = vrot.slane %v3920_v40, %v3948_v31 }
 0x9fc   : > { %13200 = vst [vmem:[#allocation60_spill] sm:$0xff] %v12152_v10  ;;  %10338 = vtanh.f32 %v12152_v10 }
 0xa03   : > { %v4822_v42 = vpop.f32.mrb[62].mxu0  ;;  %v4893_v61 = vpop.f32.mrb[78].mxu1 }
 0xa04   : > { %v9965_v48 = vadd.f32 %v4822_v42, %v12157_v49  ;;  %v4824_v54 = vpop.f32.mrb[63].mxu0  ;;  %v4895_v30 = vpop.f32.mrb[79].mxu1  ;;  %v9981_v1 = vadd.f32 %v4893_v61, %v12168_v26  ;;  %v13202_v42 = vld [vmem:[#allocation39_spill] sm:$0xff] }
 0xa05   : > { %v9966_v60 = vadd.f32 %v4824_v54, %v12160_v52  ;;  %v9982_v62 = vadd.f32 %v4895_v30, %v12163_v36  ;;  %v13204_v54 = vld [vmem:[#allocation46_spill] sm:$0xff]  ;;  %v13205_v30 = vld [vmem:[#allocation43_spill] sm:$0xff] }
 0xa06   : > { %v4916_v20 = vmul.f32 0.5, %v9965_v48  ;;  %v10339_v10 = vpop.eup %10338  ;;  %v4918_v40 = vmul.f32 0.5, %v9981_v1  ;;  %v13203_v48 = vld [vmem:[#allocation41_spill] sm:$0xff] }
 0xa07   : > { %v4917_v25 = vmul.f32 0.5, %v9966_v60  ;;  %v4915_v44 = vmul.f32 %v10339_v10, %v4909_v46  ;;  %v13207_v1 = vld [vmem:[#allocation45_spill] sm:$0xff] }
 0xa08   : > { %10340 = vtanh.f32 %v4916_v20 }
 0xa09   : > { %10342 = vtanh.f32 %v4917_v25  ;;  %5003 = vmatmul.mubr.f32.vlgmr.msra.gmra.mrb[34].mxu0 %v4915_v44  ;;  %5074 = vmatmul.mubr.f32.vlgmr.msra.gmra.mrb[50].mxu1 %v4915_v44  ;;  %v13201_v25 = vld [vmem:[#allocation53_spill] sm:$0xff]  ;;  %v13206_v44 = vld [vmem:[#allocation44_spill] sm:$0xff] }
 0xa0a   : > { %9010 = vmatpush1.bf16.msra.mxu0 %v11993_v53  ;;  %9042 = vmatpush1.bf16.msra.mxu1 %v11995_v29  ;;  %10344 = vtanh.f32 %v9982_v62 }
 0xa0b   : > { %9012 = vmatprep.subr.bf16.mxu0 %v11999_v4  ;;  %9044 = vmatprep.subr.bf16.mxu1 %v12001_v2  ;;  %10346 = vtanh.f32 %v4918_v40 }
 0xa0c   : > { %5148 = vmatprep.mubr.f32.mxu0 %v12978_v58  ;;  %5219 = vmatprep.mubr.f32.mxu1 %v12978_v58 }
 0xa0e   : > { %9014 = vmatpush1.bf16.msra.mxu0 %v12007_v59  ;;  %9046 = vmatpush1.bf16.msra.mxu1 %v12009_v38 }
 0xa0f   : > { %9016 = vmatprep.subr.bf16.mxu0 %v12013_v24  ;;  %9048 = vmatprep.subr.bf16.mxu1 %v13201_v25 }
 0xa12   : > { %v10341_v10 = vpop.eup %10340  ;;  %9018 = vmatpush1.bf16.msra.mxu0 %v13202_v42  ;;  %9050 = vmatpush1.bf16.msra.mxu1 %v13203_v48 }
 0xa13   : > { %v4922_v39 = vadd.f32 1.0, %v10341_v10  ;;  %v10343_v61 = vpop.eup %10342  ;;  %9020 = vmatprep.subr.bf16.mxu0 %v13204_v54  ;;  %9052 = vmatprep.subr.bf16.mxu1 %v13205_v30  ;;  %v13208_v10 = vld [vmem:[#allocation42_spill] sm:$0xff]  ;;  %v13211_v30 = vld [vmem:[#allocation55_spill] sm:$0xff] }
 0xa14   : > { %v4923_v60 = vadd.f32 1.0, %v10343_v61  ;;  %v10345_v46 = vpop.eup %10344  ;;  %v13210_v54 = vld [vmem:[#allocation54_spill] sm:$0xff] }
 0xa15   : > { %v4925_v31 = vmul.f32 0.5, %v4922_v39  ;;  %v10347_v40 = vpop.eup %10346 }
 0xa16   : > { %v4926_v20 = vmul.f32 0.5, %v4923_v60  ;;  %9022 = vmatpush1.bf16.msra.mxu0 %v13206_v44  ;;  %9054 = vmatpush1.bf16.msra.mxu1 %v13207_v1  ;;  %v4924_v39 = vadd.f32 1.0, %v10347_v40  ;;  %v13212_v60 = vld [vmem:[#allocation24_spill] sm:$0xff]  ;;  %v13216_v40 = vld [vmem:[#allocation26_spill] sm:$0xff] }
 0xa17   : > { %v4930_v62 = vmul.f32 %v10345_v46, %v4925_v31  ;;  %9024 = vmatprep.subr.bf16.mxu0 %v13208_v10  ;;  %9056 = vmatprep.subr.bf16.mxu1 %v13209_v19  ;;  %v13213_v46 = vld [vmem:[#allocation35_spill] sm:$0xff] }
 0xa18   : > { %v4929_v48 = vmul.f32 0.0, %v4926_v20  ;;  %v13214_v20 = vld [vmem:[#allocation25_spill] sm:$0xff] }
 0xa1a   : > { %v12189_v42 = vadd.f32 %v4930_v62, %v4929_v48  ;;  %9026 = vmatpush1.bf16.msra.mxu0 %v13210_v54  ;;  %9058 = vmatpush1.bf16.msra.mxu1 %v13211_v30  ;;  %v4927_v48 = vmul.f32 0.5, %v4924_v39  ;;  %v13215_v62 = vld [vmem:[#allocation36_spill] sm:$0xff]  ;;  %v13217_v39 = vld [vmem:[#allocation37_spill] sm:$0xff] }
 0xa1b   : > { %9028 = vmatprep.subr.bf16.mxu0 %v12051_v57  ;;  %9060 = vmatprep.subr.bf16.mxu1 %v12053_v45 }
 0xa1c   : > { %10348 = vtanh.f32 %v12189_v42 }
 0xa1e   : > { %9030 = vmatpush1.bf16.msra.mxu0 %v12057_v47  ;;  %9062 = vmatpush1.bf16.msra.mxu1 %v12059_v3 }
 0xa1f   : > { %9032 = vmatprep.subr.bf16.mxu0 %v12063_v56  ;;  %9064 = vmatprep.subr.bf16.mxu1 %v12065_v34 }
 0xa22   : > { %9034 = vmatpush1.bf16.msra.mxu0 %v12069_v41  ;;  %9066 = vmatpush1.bf16.msra.mxu1 %v12071_v13 }
 0xa23   : > { %9036 = vmatprep.subr.bf16.mxu0 %v12075_v15  ;;  %9068 = vmatprep.subr.bf16.mxu1 %v12077_v5 }
 0xa26   : > { %v10349_v61 = vpop.eup %10348  ;;  %9038 = vmatpush1.bf16.msra.mxu0 %v12081_v6  ;;  %9070 = vmatpush1.bf16.msra.mxu1 %v12083_v28 }
 0xa27   : > { %v4933_v31 = vmul.f32 %v10349_v61, %v4927_v48  ;;  %9072 = vmatprep.subr.bf16.mxu0 %v11861_v43  ;;  %9104 = vmatprep.subr.bf16.mxu1 %v11863_v0  ;;  %v13218_v48 = vld [vmem:[#allocation27_spill] sm:$0xff]  ;;  %v13219_v61 = vld [vmem:[#allocation38_spill] sm:$0xff] }
 0xa29   : > { %5149 = vmatmul.mubr.f32.vlgmr.msra.gmra.mrb[60].mxu0 %v4933_v31  ;;  %5220 = vmatmul.mubr.f32.vlgmr.msra.gmra.mrb[76].mxu1 %v4933_v31  ;;  %v13220_v31 = vld [vmem:[#allocation49_spill] sm:$0xff] }
 0xa2a   : > { %9074 = vmatpush1.bf16.msra.mxu0 %v11867_v14  ;;  %9106 = vmatpush1.bf16.msra.mxu1 %v11869_v18 }
 0xa2b   : > { %9076 = vmatprep.subr.bf16.mxu0 %v11871_v23  ;;  %9108 = vmatprep.subr.bf16.mxu1 %v11873_v35 }
 0xa2c   : > { %5330 = vmatprep.mubr.f32.mxu0 %v12978_v58  ;;  %5401 = vmatprep.mubr.f32.mxu1 %v12978_v58 }
 0xa2e   : > { %9078 = vmatpush1.bf16.msra.mxu0 %v11881_v33  ;;  %9110 = vmatpush1.bf16.msra.mxu1 %v11883_v37 }
 0xa2f   : > { %9080 = vmatprep.subr.bf16.mxu0 %v11887_v22  ;;  %9112 = vmatprep.subr.bf16.mxu1 %v11889_v11 }
 0xa32   : > { %9082 = vmatpush1.bf16.msra.mxu0 %v11897_v17  ;;  %9114 = vmatpush1.bf16.msra.mxu1 %v11899_v63 }
 0xa33   : > { %9084 = vmatprep.subr.bf16.mxu0 %v11903_v55  ;;  %9116 = vmatprep.subr.bf16.mxu1 %v11905_v27 }
 0xa36   : > { %9086 = vmatpush1.bf16.msra.mxu0 %v11913_v12  ;;  %9118 = vmatpush1.bf16.msra.mxu1 %v11915_v7 }
 0xa37   : > { %9088 = vmatprep.subr.bf16.mxu0 %v11919_v50  ;;  %9120 = vmatprep.subr.bf16.mxu1 %v11921_v9 }
 0xa3a   : > { %9090 = vmatpush1.bf16.msra.mxu0 %v11929_v8  ;;  %9122 = vmatpush1.bf16.msra.mxu1 %v11931_v32  ;;  %v13224_v32 = vld [vmem:[#allocation57_spill] sm:$0xff] }
 0xa3b   : > { %9092 = vmatprep.subr.bf16.mxu0 %v11935_v51  ;;  %9124 = vmatprep.subr.bf16.mxu1 %v11937_v21  ;;  %v13221_v51 = vld [vmem:[#allocation50_spill] sm:$0xff]  ;;  %v13222_v21 = vld [vmem:[#allocation51_spill] sm:$0xff] }
 0xa3e   : > { %9094 = vmatpush1.bf16.msra.mxu0 %v13212_v60  ;;  %9126 = vmatpush1.bf16.msra.mxu1 %v13213_v46  ;;  %v13223_v60 = vld [vmem:[#allocation52_spill] sm:$0xff] }
 0xa3f   : > { %9096 = vmatprep.subr.bf16.mxu0 %v13214_v20  ;;  %9128 = vmatprep.subr.bf16.mxu1 %v13215_v62 }
 0xa42   : > { %9098 = vmatpush1.bf16.msra.mxu0 %v13216_v40  ;;  %9130 = vmatpush1.bf16.msra.mxu1 %v13217_v39 }
 0xa43   : > { %9100 = vmatprep.subr.bf16.mxu0 %v13218_v48  ;;  %9132 = vmatprep.subr.bf16.mxu1 %v13219_v61  ;;  %v13225_v61 = vld [vmem:[#allocation58_spill] sm:$0xff] }
 0xa46   : > { %9102 = vmatpush1.bf16.msra.mxu0 %v13220_v31  ;;  %9134 = vmatpush1.bf16.msra.mxu1 %v13221_v51  ;;  %v13226_v51 = vld [vmem:[#allocation59_spill] sm:$0xff] }
 0xa47   : > { %9136 = vmatprep.subr.bf16.mxu0 %v13222_v21  ;;  %9168 = vmatprep.subr.bf16.mxu1 %v13223_v60 }
 0xadc   : > { %v5004_v46 = vpop.f32.mrb[34].mxu0  ;;  %v5075_v20 = vpop.f32.mrb[50].mxu1 }
 0xadd   : > { %v9921_v62 = vadd.f32 %v5004_v46, %v13224_v32  ;;  %v5006_v8 = vpop.f32.mrb[35].mxu0  ;;  %v5077_v40 = vpop.f32.mrb[51].mxu1  ;;  %v9937_v31 = vadd.f32 %v5075_v20, %v13226_v51 }
 0xade   : > { %v9922_v39 = vadd.f32 %v5006_v8, %v12141_v16  ;;  %v9938_v50 = vadd.f32 %v5077_v40, %v13225_v61  ;;  %v13227_v8 = vld [vmem:[#allocation60_spill] sm:$0xff] }
 0xadf   : > { %v5226_v9 = vmul.f32 0.5, %v9921_v62  ;;  %v5228_v21 = vmul.f32 0.5, %v9937_v31 }
 0xae0   : > { %v5227_v48 = vmul.f32 0.5, %v9922_v39 }
 0xae1   : > { %10350 = vtanh.f32 %v5226_v9 }
 0xae2   : > { %10352 = vtanh.f32 %v5227_v48 }
 0xae3   : > { %10354 = vtanh.f32 %v9938_v50 }
 0xae4   : > { %10356 = vtanh.f32 %v5228_v21 }
 0xaeb   : > { %v10351_v7 = vpop.eup %10350 }
 0xaec   : > { %v5232_v60 = vadd.f32 1.0, %v10351_v7  ;;  %v10353_v12 = vpop.eup %10352 }
 0xaed   : > { %v5233_v46 = vadd.f32 1.0, %v10353_v12  ;;  %v10355_v32 = vpop.eup %10354 }
 0xaee   : > { %v5235_v27 = vmul.f32 0.5, %v5232_v60  ;;  %v10357_v9 = vpop.eup %10356 }
 0xaef   : > { %v5236_v55 = vmul.f32 0.5, %v5233_v46  ;;  %v5234_v50 = vadd.f32 1.0, %v10357_v9 }
 0xaf0   : > { %v5240_v63 = vmul.f32 %v10355_v32, %v5235_v27 }
 0xaf1   : > { %v5239_v62 = vmul.f32 %v5236_v55, %v13227_v8  ;;  %v5237_v12 = vmul.f32 0.5, %v5234_v50  ;;  %v13228_v50 = vld [vmem:[#allocation39_spill] sm:$0xff] }
 0xaf3   : > { %v12247_v39 = vadd.f32 %v5240_v63, %v5239_v62 }
 0xaf5   : > { %10358 = vtanh.f32 %v12247_v39 }
 0xafc   : > { %v5150_v40 = vpop.f32.mrb[60].mxu0  ;;  %v5221_v20 = vpop.f32.mrb[76].mxu1 }
 0xafd   : > { %v9963_v48 = vadd.f32 %v5150_v40, %v12157_v49  ;;  %v5152_v7 = vpop.f32.mrb[61].mxu0  ;;  %v5223_v31 = vpop.f32.mrb[77].mxu1  ;;  %v9979_v32 = vadd.f32 %v5221_v20, %v12168_v26  ;;  %v13229_v40 = vld [vmem:[#allocation41_spill] sm:$0xff] }
 0xafe   : > { %v9964_v21 = vadd.f32 %v5152_v7, %v12160_v52  ;;  %v9980_v63 = vadd.f32 %v5223_v31, %v12163_v36  ;;  %v13231_v7 = vld [vmem:[#allocation43_spill] sm:$0xff] }
 0xaff   : > { %v5244_v60 = vmul.f32 0.5, %v9963_v48  ;;  %v10359_v46 = vpop.eup %10358  ;;  %v5246_v8 = vmul.f32 0.5, %v9979_v32  ;;  %v13230_v48 = vld [vmem:[#allocation46_spill] sm:$0xff] }
 0xb00   : > { %v5245_v27 = vmul.f32 0.5, %v9964_v21  ;;  %v5243_v55 = vmul.f32 %v10359_v46, %v5237_v12 }
 0xb01   : > { %10360 = vtanh.f32 %v5244_v60 }
 0xb02   : > { %10362 = vtanh.f32 %v5245_v27  ;;  %5331 = vmatmul.mubr.f32.vlgmr.msra.gmra.mrb[36].mxu0 %v5243_v55  ;;  %5402 = vmatmul.mubr.f32.vlgmr.msra.gmra.mrb[52].mxu1 %v5243_v55 }
 0xb03   : > { %9138 = vmatpush1.bf16.msra.mxu0 %v11993_v53  ;;  %9170 = vmatpush1.bf16.msra.mxu1 %v11995_v29  ;;  %10364 = vtanh.f32 %v9980_v63 }
 0xb04   : > { %9140 = vmatprep.subr.bf16.mxu0 %v11999_v4  ;;  %9172 = vmatprep.subr.bf16.mxu1 %v12001_v2  ;;  %10366 = vtanh.f32 %v5246_v8 }
 0xb05   : > { %5476 = vmatprep.mubr.f32.mxu0 %v12978_v58  ;;  %5547 = vmatprep.mubr.f32.mxu1 %v12978_v58 }
 0xb07   : > { %9142 = vmatpush1.bf16.msra.mxu0 %v12007_v59  ;;  %9174 = vmatpush1.bf16.msra.mxu1 %v12009_v38 }
 0xb08   : > { %9144 = vmatprep.subr.bf16.mxu0 %v12013_v24  ;;  %9176 = vmatprep.subr.bf16.mxu1 %v13201_v25 }
 0xb0b   : > { %v10361_v62 = vpop.eup %10360  ;;  %9146 = vmatpush1.bf16.msra.mxu0 %v13228_v50  ;;  %9178 = vmatpush1.bf16.msra.mxu1 %v13229_v40 }
 0xb0c   : > { %v5250_v9 = vadd.f32 1.0, %v10361_v62  ;;  %v10363_v20 = vpop.eup %10362  ;;  %9148 = vmatprep.subr.bf16.mxu0 %v13230_v48  ;;  %9180 = vmatprep.subr.bf16.mxu1 %v13231_v7 }
 0xb0d   : > { %v5251_v21 = vadd.f32 1.0, %v10363_v20  ;;  %v10365_v12 = vpop.eup %10364  ;;  %v13233_v20 = vld [vmem:[#allocation19_spill] sm:$0xff] }
 0xb0e   : > { %v5253_v31 = vmul.f32 0.5, %v5250_v9  ;;  %v10367_v55 = vpop.eup %10366  ;;  %v13232_v9 = vld [vmem:[#allocation29_spill] sm:$0xff] }
 0xb0f   : > { %v5254_v60 = vmul.f32 0.5, %v5251_v21  ;;  %9150 = vmatpush1.bf16.msra.mxu0 %v13206_v44  ;;  %9182 = vmatpush1.bf16.msra.mxu1 %v13207_v1  ;;  %v13235_v21 = vld [vmem:[#allocation20_spill] sm:$0xff] }
 0xb10   : > { %v5258_v46 = vmul.f32 %v10365_v12, %v5253_v31  ;;  %9152 = vmatprep.subr.bf16.mxu0 %v13208_v10  ;;  %9184 = vmatprep.subr.bf16.mxu1 %v13209_v19  ;;  %v13234_v31 = vld [vmem:[#allocation30_spill] sm:$0xff]  ;;  %v13236_v12 = vld [vmem:[#allocation31_spill] sm:$0xff] }
 0xb11   : > { %v5257_v27 = vmul.f32 %v5254_v60, %v12189_v42  ;;  %v5252_v42 = vadd.f32 1.0, %v10367_v55  ;;  %v13237_v60 = vld [vmem:[#allocation21_spill] sm:$0xff] }
 0xb12   : > { %v13240_v55 = vld [vmem:[#allocation33_spill] sm:$0xff] }
 0xb13   : > { %v12273_v63 = vadd.f32 %v5258_v46, %v5257_v27  ;;  %9154 = vmatpush1.bf16.msra.mxu0 %v13210_v54  ;;  %9186 = vmatpush1.bf16.msra.mxu1 %v13211_v30  ;;  %v5255_v32 = vmul.f32 0.5, %v5252_v42  ;;  %v13238_v46 = vld [vmem:[#allocation32_spill] sm:$0xff]  ;;  %v13239_v27 = vld [vmem:[#allocation22_spill] sm:$0xff]  ;;  %v13241_v42 = vld [vmem:[#allocation23_spill] sm:$0xff] }
 0xb14   : > { %9156 = vmatprep.subr.bf16.mxu0 %v12051_v57  ;;  %9188 = vmatprep.subr.bf16.mxu1 %v12053_v45 }
 0xb15   : > { %10368 = vtanh.f32 %v12273_v63 }
 0xb17   : > { %9158 = vmatpush1.bf16.msra.mxu0 %v12057_v47  ;;  %9190 = vmatpush1.bf16.msra.mxu1 %v12059_v3 }
 0xb18   : > { %9160 = vmatprep.subr.bf16.mxu0 %v12063_v56  ;;  %9192 = vmatprep.subr.bf16.mxu1 %v12065_v34 }
 0xb1b   : > { %9162 = vmatpush1.bf16.msra.mxu0 %v12069_v41  ;;  %9194 = vmatpush1.bf16.msra.mxu1 %v12071_v13 }
 0xb1c   : > { %9164 = vmatprep.subr.bf16.mxu0 %v12075_v15  ;;  %9196 = vmatprep.subr.bf16.mxu1 %v12077_v5 }
 0xb1f   : > { %v10369_v8 = vpop.eup %10368  ;;  %9166 = vmatpush1.bf16.msra.mxu0 %v12081_v6  ;;  %9198 = vmatpush1.bf16.msra.mxu1 %v12083_v28 }
 0xb20   : > { %v5261_v62 = vmul.f32 %v10369_v8, %v5255_v32  ;;  %9200 = vmatprep.subr.bf16.mxu0 %v11861_v43  ;;  %9232 = vmatprep.subr.bf16.mxu1 %v11863_v0  ;;  %v13242_v32 = vld [vmem:[#allocation34_spill] sm:$0xff]  ;;  %v13243_v8 = vld [vmem:[#allocation24_spill] sm:$0xff] }
 0xb22   : > { %5477 = vmatmul.mubr.f32.vlgmr.msra.gmra.mrb[58].mxu0 %v5261_v62  ;;  %5548 = vmatmul.mubr.f32.vlgmr.msra.gmra.mrb[74].mxu1 %v5261_v62  ;;  %v13244_v62 = vld [vmem:[#allocation35_spill] sm:$0xff] }
 0xb23   : > { %9202 = vmatpush1.bf16.msra.mxu0 %v11867_v14  ;;  %9234 = vmatpush1.bf16.msra.mxu1 %v11869_v18 }
 0xb24   : > { %9204 = vmatprep.subr.bf16.mxu0 %v11871_v23  ;;  %9236 = vmatprep.subr.bf16.mxu1 %v11873_v35 }
 0xb25   : > { %5658 = vmatprep.mubr.f32.mxu0 %v12978_v58  ;;  %5729 = vmatprep.mubr.f32.mxu1 %v12978_v58 }
 0xb27   : > { %9206 = vmatpush1.bf16.msra.mxu0 %v11881_v33  ;;  %9238 = vmatpush1.bf16.msra.mxu1 %v11883_v37 }
 0xb28   : > { %9208 = vmatprep.subr.bf16.mxu0 %v11887_v22  ;;  %9240 = vmatprep.subr.bf16.mxu1 %v11889_v11 }
 0xb2b   : > { %9210 = vmatpush1.bf16.msra.mxu0 %v11897_v17  ;;  %9242 = vmatpush1.bf16.msra.mxu1 %v13232_v9 }
 0xb2c   : > { %9212 = vmatprep.subr.bf16.mxu0 %v13233_v20  ;;  %9244 = vmatprep.subr.bf16.mxu1 %v13234_v31  ;;  %v13245_v31 = vld [vmem:[#allocation25_spill] sm:$0xff] }
 0xb2d   : > { %v13255_v20 = vld [vmem:[#allocation57_spill] sm:$0xff] }
 0xb2f   : > { %9214 = vmatpush1.bf16.msra.mxu0 %v13235_v21  ;;  %9246 = vmatpush1.bf16.msra.mxu1 %v13236_v12  ;;  %v13246_v21 = vld [vmem:[#allocation36_spill] sm:$0xff]  ;;  %v13247_v12 = vld [vmem:[#allocation26_spill] sm:$0xff] }
 0xb30   : > { %9216 = vmatprep.subr.bf16.mxu0 %v13237_v60  ;;  %9248 = vmatprep.subr.bf16.mxu1 %v13238_v46  ;;  %v13248_v60 = vld [vmem:[#allocation37_spill] sm:$0xff]  ;;  %v13249_v46 = vld [vmem:[#allocation27_spill] sm:$0xff] }
 0xb33   : > { %9218 = vmatpush1.bf16.msra.mxu0 %v13239_v27  ;;  %9250 = vmatpush1.bf16.msra.mxu1 %v13240_v55  ;;  %v13250_v27 = vld [vmem:[#allocation38_spill] sm:$0xff]  ;;  %v13251_v55 = vld [vmem:[#allocation49_spill] sm:$0xff] }
 0xb34   : > { %9220 = vmatprep.subr.bf16.mxu0 %v13241_v42  ;;  %9252 = vmatprep.subr.bf16.mxu1 %v13242_v32  ;;  %v13252_v42 = vld [vmem:[#allocation50_spill] sm:$0xff]  ;;  %v13253_v32 = vld [vmem:[#allocation51_spill] sm:$0xff] }
 0xb37   : > { %9222 = vmatpush1.bf16.msra.mxu0 %v13243_v8  ;;  %9254 = vmatpush1.bf16.msra.mxu1 %v13244_v62  ;;  %v13254_v8 = vld [vmem:[#allocation52_spill] sm:$0xff] }
 0xb38   : > { %9224 = vmatprep.subr.bf16.mxu0 %v13245_v31  ;;  %9256 = vmatprep.subr.bf16.mxu1 %v13246_v21 }
 0xb3b   : > { %9226 = vmatpush1.bf16.msra.mxu0 %v13247_v12  ;;  %9258 = vmatpush1.bf16.msra.mxu1 %v13248_v60 }
 0xb3c   : > { %9228 = vmatprep.subr.bf16.mxu0 %v13249_v46  ;;  %9260 = vmatprep.subr.bf16.mxu1 %v13250_v27 }
 0xb3f   : > { %9230 = vmatpush1.bf16.msra.mxu0 %v13251_v55  ;;  %9262 = vmatpush1.bf16.msra.mxu1 %v13252_v42 }
 0xb40   : > { %9264 = vmatprep.subr.bf16.mxu0 %v13253_v32  ;;  %9296 = vmatprep.subr.bf16.mxu1 %v13254_v8 }
 0xbd5   : > { %v5332_v62 = vpop.f32.mrb[36].mxu0  ;;  %v5403_v31 = vpop.f32.mrb[52].mxu1 }
 0xbd6   : > { %v9923_v21 = vadd.f32 %v5332_v62, %v13255_v20  ;;  %v5334_v9 = vpop.f32.mrb[37].mxu0  ;;  %v5405_v12 = vpop.f32.mrb[53].mxu1  ;;  %v9939_v42 = vadd.f32 %v5403_v31, %v13226_v51 }
 0xbd7   : > { %v9924_v60 = vadd.f32 %v5334_v9, %v12141_v16  ;;  %v9940_v27 = vadd.f32 %v5405_v12, %v13225_v61 }
 0xbd8   : > { %v5554_v17 = vmul.f32 0.5, %v9923_v21  ;;  %v5556_v32 = vmul.f32 0.5, %v9939_v42 }
 0xbd9   : > { %v5555_v46 = vmul.f32 0.5, %v9924_v60 }
 0xbda   : > { %10370 = vtanh.f32 %v5554_v17 }
 0xbdb   : > { %10372 = vtanh.f32 %v5555_v46 }
 0xbdc   : > { %10374 = vtanh.f32 %v9940_v27 }
 0xbdd   : > { %10376 = vtanh.f32 %v5556_v32 }
 0xbe4   : > { %v10371_v55 = vpop.eup %10370 }
 0xbe5   : > { %v5560_v8 = vadd.f32 1.0, %v10371_v55  ;;  %v10373_v11 = vpop.eup %10372 }
 0xbe6   : > { %v5561_v62 = vadd.f32 1.0, %v10373_v11  ;;  %v10375_v20 = vpop.eup %10374 }
 0xbe7   : > { %v5563_v22 = vmul.f32 0.5, %v5560_v8  ;;  %v10377_v17 = vpop.eup %10376 }
 0xbe8   : > { %v5564_v37 = vmul.f32 0.5, %v5561_v62  ;;  %v5562_v12 = vadd.f32 1.0, %v10377_v17 }
 0xbe9   : > { %v5568_v33 = vmul.f32 %v10375_v20, %v5563_v22 }
 0xbea   : > { %v5567_v9 = vmul.f32 %v5564_v37, %v12247_v39  ;;  %v5565_v11 = vmul.f32 0.5, %v5562_v12 }
 0xbec   : > { %v12331_v21 = vadd.f32 %v5568_v33, %v5567_v9 }
 0xbee   : > { %10378 = vtanh.f32 %v12331_v21 }
 0xbf5   : > { %v5478_v60 = vpop.f32.mrb[58].mxu0  ;;  %v5549_v31 = vpop.f32.mrb[74].mxu1 }
 0xbf6   : > { %v9961_v46 = vadd.f32 %v5478_v60, %v12157_v49  ;;  %v5480_v27 = vpop.f32.mrb[59].mxu0  ;;  %v5551_v55 = vpop.f32.mrb[75].mxu1  ;;  %v9977_v39 = vadd.f32 %v5549_v31, %v12168_v26 }
 0xbf7   : > { %v9962_v42 = vadd.f32 %v5480_v27, %v12160_v52  ;;  %v9978_v33 = vadd.f32 %v5551_v55, %v12163_v36 }
 0xbf8   : > { %v5572_v32 = vmul.f32 0.5, %v9961_v46  ;;  %v10379_v8 = vpop.eup %10378  ;;  %v5574_v20 = vmul.f32 0.5, %v9977_v39  ;;  %v13258_v39 = vld [vmem:[#allocation17_spill] sm:$0xff] }
 0xbf9   : > { %v5573_v22 = vmul.f32 0.5, %v9962_v42  ;;  %v5571_v37 = vmul.f32 %v10379_v8, %v5565_v11 }
 0xbfa   : > { %10380 = vtanh.f32 %v5572_v32 }
 0xbfb   : > { %10382 = vtanh.f32 %v5573_v22  ;;  %5659 = vmatmul.mubr.f32.vlgmr.msra.gmra.mrb[38].mxu0 %v5571_v37  ;;  %5730 = vmatmul.mubr.f32.vlgmr.msra.gmra.mrb[54].mxu1 %v5571_v37  ;;  %v13257_v37 = vld [vmem:[#allocation48_spill] sm:$0xff] }
 0xbfc   : > { %9266 = vmatpush1.bf16.msra.mxu0 %v11993_v53  ;;  %9298 = vmatpush1.bf16.msra.mxu1 %v11995_v29  ;;  %10384 = vtanh.f32 %v9978_v33  ;;  %v13256_v33 = vld [vmem:[#allocation47_spill] sm:$0xff] }
 0xbfd   : > { %9268 = vmatprep.subr.bf16.mxu0 %v11999_v4  ;;  %9300 = vmatprep.subr.bf16.mxu1 %v12001_v2  ;;  %10386 = vtanh.f32 %v5574_v20  ;;  %v13259_v20 = vld [vmem:[#allocation28_spill] sm:$0xff] }
 0xbfe   : > { %5804 = vmatprep.mubr.f32.mxu0 %v12978_v58  ;;  %5875 = vmatprep.mubr.f32.mxu1 %v12978_v58 }
 0xc00   : > { %9270 = vmatpush1.bf16.msra.mxu0 %v12007_v59  ;;  %9302 = vmatpush1.bf16.msra.mxu1 %v12009_v38 }
 0xc01   : > { %9272 = vmatprep.subr.bf16.mxu0 %v12013_v24  ;;  %9304 = vmatprep.subr.bf16.mxu1 %v13201_v25 }
 0xc04   : > { %v10381_v62 = vpop.eup %10380  ;;  %9274 = vmatpush1.bf16.msra.mxu0 %v13228_v50  ;;  %9306 = vmatpush1.bf16.msra.mxu1 %v13229_v40 }
 0xc05   : > { %v5578_v9 = vadd.f32 1.0, %v10381_v62  ;;  %v10383_v17 = vpop.eup %10382  ;;  %9276 = vmatprep.subr.bf16.mxu0 %v13230_v48  ;;  %9308 = vmatprep.subr.bf16.mxu1 %v13231_v7  ;;  %v13260_v62 = vld [vmem:[#allocation18_spill] sm:$0xff] }
 0xc06   : > { %v5579_v60 = vadd.f32 1.0, %v10383_v17  ;;  %v10385_v31 = vpop.eup %10384  ;;  %v13262_v17 = vld [vmem:[#allocation19_spill] sm:$0xff] }
 0xc07   : > { %v5581_v12 = vmul.f32 0.5, %v5578_v9  ;;  %v10387_v11 = vpop.eup %10386  ;;  %v13261_v9 = vld [vmem:[#allocation29_spill] sm:$0xff] }
 0xc08   : > { %v5582_v46 = vmul.f32 0.5, %v5579_v60  ;;  %9278 = vmatpush1.bf16.msra.mxu0 %v13206_v44  ;;  %9310 = vmatpush1.bf16.msra.mxu1 %v13207_v1  ;;  %v13264_v60 = vld [vmem:[#allocation20_spill] sm:$0xff] }
 0xc09   : > { %v5586_v27 = vmul.f32 %v10385_v31, %v5581_v12  ;;  %9280 = vmatprep.subr.bf16.mxu0 %v13208_v10  ;;  %9312 = vmatprep.subr.bf16.mxu1 %v13209_v19  ;;  %v13263_v12 = vld [vmem:[#allocation30_spill] sm:$0xff]  ;;  %v13265_v31 = vld [vmem:[#allocation31_spill] sm:$0xff] }
 0xc0a   : > { %v5585_v55 = vmul.f32 %v5582_v46, %v12273_v63  ;;  %v5580_v63 = vadd.f32 1.0, %v10387_v11  ;;  %v13266_v46 = vld [vmem:[#allocation21_spill] sm:$0xff] }
 0xc0b   : > { %v13269_v11 = vld [vmem:[#allocation33_spill] sm:$0xff] }
 0xc0c   : > { %v12357_v42 = vadd.f32 %v5586_v27, %v5585_v55  ;;  %9282 = vmatpush1.bf16.msra.mxu0 %v13210_v54  ;;  %9314 = vmatpush1.bf16.msra.mxu1 %v13211_v30  ;;  %v5583_v32 = vmul.f32 0.5, %v5580_v63  ;;  %v13267_v27 = vld [vmem:[#allocation32_spill] sm:$0xff]  ;;  %v13268_v55 = vld [vmem:[#allocation22_spill] sm:$0xff]  ;;  %v13270_v63 = vld [vmem:[#allocation23_spill] sm:$0xff] }
 0xc0d   : > { %9284 = vmatprep.subr.bf16.mxu0 %v12051_v57  ;;  %9316 = vmatprep.subr.bf16.mxu1 %v12053_v45 }
 0xc0e   : > { %10388 = vtanh.f32 %v12357_v42 }
 0xc10   : > { %9286 = vmatpush1.bf16.msra.mxu0 %v12057_v47  ;;  %9318 = vmatpush1.bf16.msra.mxu1 %v12059_v3 }
 0xc11   : > { %9288 = vmatprep.subr.bf16.mxu0 %v12063_v56  ;;  %9320 = vmatprep.subr.bf16.mxu1 %v12065_v34 }
 0xc14   : > { %9290 = vmatpush1.bf16.msra.mxu0 %v12069_v41  ;;  %9322 = vmatpush1.bf16.msra.mxu1 %v12071_v13 }
 0xc15   : > { %9292 = vmatprep.subr.bf16.mxu0 %v12075_v15  ;;  %9324 = vmatprep.subr.bf16.mxu1 %v12077_v5 }
 0xc18   : > { %v10389_v8 = vpop.eup %10388  ;;  %9294 = vmatpush1.bf16.msra.mxu0 %v12081_v6  ;;  %9326 = vmatpush1.bf16.msra.mxu1 %v12083_v28 }
 0xc19   : > { %v5589_v22 = vmul.f32 %v10389_v8, %v5583_v32  ;;  %9328 = vmatprep.subr.bf16.mxu0 %v11861_v43  ;;  %9360 = vmatprep.subr.bf16.mxu1 %v11863_v0  ;;  %v13271_v32 = vld [vmem:[#allocation34_spill] sm:$0xff]  ;;  %v13272_v8 = vld [vmem:[#allocation24_spill] sm:$0xff] }
 0xc1b   : > { %5805 = vmatmul.mubr.f32.vlgmr.msra.gmra.mrb[56].mxu0 %v5589_v22  ;;  %5876 = vmatmul.mubr.f32.vlgmr.msra.gmra.mrb[72].mxu1 %v5589_v22  ;;  %v13273_v22 = vld [vmem:[#allocation35_spill] sm:$0xff] }
 0xc1c   : > { %9330 = vmatpush1.bf16.msra.mxu0 %v11867_v14  ;;  %9362 = vmatpush1.bf16.msra.mxu1 %v11869_v18 }
 0xc1d   : > { %9332 = vmatprep.subr.bf16.mxu0 %v11871_v23  ;;  %9364 = vmatprep.subr.bf16.mxu1 %v11873_v35 }
 0xc1e   : > { %5986 = vmatprep.mubr.f32.mxu0 %v12978_v58  ;;  %6057 = vmatprep.mubr.f32.mxu1 %v12978_v58 }
 0xc20   : > { %9334 = vmatpush1.bf16.msra.mxu0 %v13256_v33  ;;  %9366 = vmatpush1.bf16.msra.mxu1 %v13257_v37 }
 0xc21   : > { %9336 = vmatprep.subr.bf16.mxu0 %v13258_v39  ;;  %9368 = vmatprep.subr.bf16.mxu1 %v13259_v20 }
 0xc24   : > { %9338 = vmatpush1.bf16.msra.mxu0 %v13260_v62  ;;  %9370 = vmatpush1.bf16.msra.mxu1 %v13261_v9 }
 0xc25   : > { %9340 = vmatprep.subr.bf16.mxu0 %v13262_v17  ;;  %9372 = vmatprep.subr.bf16.mxu1 %v13263_v12  ;;  %v13274_v12 = vld [vmem:[#allocation25_spill] sm:$0xff] }
 0xc26   : > { %v13284_v17 = vld [vmem:[#allocation57_spill] sm:$0xff] }
 0xc28   : > { %9342 = vmatpush1.bf16.msra.mxu0 %v13264_v60  ;;  %9374 = vmatpush1.bf16.msra.mxu1 %v13265_v31  ;;  %v13275_v60 = vld [vmem:[#allocation36_spill] sm:$0xff]  ;;  %v13276_v31 = vld [vmem:[#allocation26_spill] sm:$0xff] }
 0xc29   : > { %9344 = vmatprep.subr.bf16.mxu0 %v13266_v46  ;;  %9376 = vmatprep.subr.bf16.mxu1 %v13267_v27  ;;  %v13277_v46 = vld [vmem:[#allocation37_spill] sm:$0xff]  ;;  %v13278_v27 = vld [vmem:[#allocation27_spill] sm:$0xff] }
 0xc2c   : > { %9346 = vmatpush1.bf16.msra.mxu0 %v13268_v55  ;;  %9378 = vmatpush1.bf16.msra.mxu1 %v13269_v11  ;;  %v13279_v55 = vld [vmem:[#allocation38_spill] sm:$0xff]  ;;  %v13280_v11 = vld [vmem:[#allocation49_spill] sm:$0xff] }
 0xc2d   : > { %9348 = vmatprep.subr.bf16.mxu0 %v13270_v63  ;;  %9380 = vmatprep.subr.bf16.mxu1 %v13271_v32  ;;  %v13281_v63 = vld [vmem:[#allocation50_spill] sm:$0xff]  ;;  %v13282_v32 = vld [vmem:[#allocation51_spill] sm:$0xff] }
 0xc30   : > { %9350 = vmatpush1.bf16.msra.mxu0 %v13272_v8  ;;  %9382 = vmatpush1.bf16.msra.mxu1 %v13273_v22  ;;  %v13283_v8 = vld [vmem:[#allocation52_spill] sm:$0xff] }
 0xc31   : > { %9352 = vmatprep.subr.bf16.mxu0 %v13274_v12  ;;  %9384 = vmatprep.subr.bf16.mxu1 %v13275_v60 }
 0xc34   : > { %9354 = vmatpush1.bf16.msra.mxu0 %v13276_v31  ;;  %9386 = vmatpush1.bf16.msra.mxu1 %v13277_v46 }
 0xc35   : > { %9356 = vmatprep.subr.bf16.mxu0 %v13278_v27  ;;  %9388 = vmatprep.subr.bf16.mxu1 %v13279_v55 }
 0xc38   : > { %9358 = vmatpush1.bf16.msra.mxu0 %v13280_v11  ;;  %9390 = vmatpush1.bf16.msra.mxu1 %v13281_v63 }
 0xc39   : > { %9392 = vmatprep.subr.bf16.mxu0 %v13282_v32  ;;  %9424 = vmatprep.subr.bf16.mxu1 %v13283_v8 }
 0xcce   : > { %v5660_v22 = vpop.f32.mrb[38].mxu0  ;;  %v5731_v12 = vpop.f32.mrb[54].mxu1 }
 0xccf   : > { %v9925_v60 = vadd.f32 %v5660_v22, %v13284_v17  ;;  %v5662_v9 = vpop.f32.mrb[39].mxu0  ;;  %v5733_v31 = vpop.f32.mrb[55].mxu1  ;;  %v9941_v63 = vadd.f32 %v5731_v12, %v13226_v51 }
 0xcd0   : > { %v9926_v46 = vadd.f32 %v5662_v9, %v12141_v16  ;;  %v9942_v55 = vadd.f32 %v5733_v31, %v13225_v61 }
 0xcd1   : > { %v5882_v62 = vmul.f32 0.5, %v9925_v60  ;;  %v5884_v32 = vmul.f32 0.5, %v9941_v63 }
 0xcd2   : > { %v5883_v27 = vmul.f32 0.5, %v9926_v46 }
 0xcd3   : > { %10390 = vtanh.f32 %v5882_v62 }
 0xcd4   : > { %10392 = vtanh.f32 %v5883_v27 }
 0xcd5   : > { %10394 = vtanh.f32 %v9942_v55 }
 0xcd6   : > { %10396 = vtanh.f32 %v5884_v32 }
 0xcdd   : > { %v10391_v11 = vpop.eup %10390 }
 0xcde   : > { %v5888_v8 = vadd.f32 1.0, %v10391_v11  ;;  %v10393_v20 = vpop.eup %10392 }
 0xcdf   : > { %v5889_v22 = vadd.f32 1.0, %v10393_v20  ;;  %v10395_v17 = vpop.eup %10394 }
 0xce0   : > { %v5891_v39 = vmul.f32 0.5, %v5888_v8  ;;  %v10397_v62 = vpop.eup %10396 }
 0xce1   : > { %v5892_v37 = vmul.f32 0.5, %v5889_v22  ;;  %v5890_v31 = vadd.f32 1.0, %v10397_v62 }
 0xce2   : > { %v5896_v33 = vmul.f32 %v10395_v17, %v5891_v39 }
 0xce3   : > { %v5895_v9 = vmul.f32 %v5892_v37, %v12331_v21  ;;  %v5893_v20 = vmul.f32 0.5, %v5890_v31 }
 0xce5   : > { %v12415_v60 = vadd.f32 %v5896_v33, %v5895_v9 }
 0xce7   : > { %10398 = vtanh.f32 %v12415_v60 }
 0xcee   : > { %v5806_v46 = vpop.f32.mrb[56].mxu0  ;;  %v5877_v12 = vpop.f32.mrb[72].mxu1 }
 0xcef   : > { %v9959_v27 = vadd.f32 %v5806_v46, %v12157_v49  ;;  %v5808_v55 = vpop.f32.mrb[57].mxu0  ;;  %v5879_v11 = vpop.f32.mrb[73].mxu1  ;;  %v9975_v37 = vadd.f32 %v5877_v12, %v12168_v26 }
 0xcf0   : > { %v9960_v63 = vadd.f32 %v5808_v55, %v12160_v52  ;;  %v9976_v21 = vadd.f32 %v5879_v11, %v12163_v36 }
 0xcf1   : > { %v5900_v32 = vmul.f32 0.5, %v9959_v27  ;;  %v10399_v8 = vpop.eup %10398  ;;  %v5902_v17 = vmul.f32 0.5, %v9975_v37  ;;  %v13287_v37 = vld [vmem:[#allocation17_spill] sm:$0xff] }
 0xcf2   : > { %v5901_v39 = vmul.f32 0.5, %v9960_v63  ;;  %v5899_v33 = vmul.f32 %v10399_v8, %v5893_v20 }
 0xcf3   : > { %10400 = vtanh.f32 %v5900_v32 }
 0xcf4   : > { %10402 = vtanh.f32 %v5901_v39  ;;  %5987 = vmatmul.mubr.f32.vlgmr.msra.gmra.mrb[40].mxu0 %v5899_v33  ;;  %6058 = vmatmul.mubr.f32.vlgmr.msra.gmra.mrb[56].mxu1 %v5899_v33  ;;  %v13286_v33 = vld [vmem:[#allocation48_spill] sm:$0xff] }
 0xcf5   : > { %9394 = vmatpush1.bf16.msra.mxu0 %v11993_v53  ;;  %9426 = vmatpush1.bf16.msra.mxu1 %v11995_v29  ;;  %10404 = vtanh.f32 %v9976_v21  ;;  %v13285_v21 = vld [vmem:[#allocation47_spill] sm:$0xff] }
 0xcf6   : > { %9396 = vmatprep.subr.bf16.mxu0 %v11999_v4  ;;  %9428 = vmatprep.subr.bf16.mxu1 %v12001_v2  ;;  %10406 = vtanh.f32 %v5902_v17  ;;  %v13288_v17 = vld [vmem:[#allocation28_spill] sm:$0xff] }
 0xcf7   : > { %6132 = vmatprep.mubr.f32.mxu0 %v12978_v58  ;;  %6203 = vmatprep.mubr.f32.mxu1 %v12978_v58 }
 0xcf9   : > { %9398 = vmatpush1.bf16.msra.mxu0 %v12007_v59  ;;  %9430 = vmatpush1.bf16.msra.mxu1 %v12009_v38 }
 0xcfa   : > { %9400 = vmatprep.subr.bf16.mxu0 %v12013_v24  ;;  %9432 = vmatprep.subr.bf16.mxu1 %v13201_v25 }
 0xcfd   : > { %v10401_v22 = vpop.eup %10400  ;;  %9402 = vmatpush1.bf16.msra.mxu0 %v13228_v50  ;;  %9434 = vmatpush1.bf16.msra.mxu1 %v13229_v40 }
 0xcfe   : > { %v5906_v9 = vadd.f32 1.0, %v10401_v22  ;;  %v10403_v62 = vpop.eup %10402  ;;  %9404 = vmatprep.subr.bf16.mxu0 %v13230_v48  ;;  %9436 = vmatprep.subr.bf16.mxu1 %v13231_v7  ;;  %v13289_v22 = vld [vmem:[#allocation18_spill] sm:$0xff] }
 0xcff   : > { %v5907_v46 = vadd.f32 1.0, %v10403_v62  ;;  %v10405_v12 = vpop.eup %10404  ;;  %v13291_v62 = vld [vmem:[#allocation19_spill] sm:$0xff] }
 0xd00   : > { %v5909_v31 = vmul.f32 0.5, %v5906_v9  ;;  %v10407_v20 = vpop.eup %10406  ;;  %v13290_v9 = vld [vmem:[#allocation29_spill] sm:$0xff] }
 0xd01   : > { %v5910_v27 = vmul.f32 0.5, %v5907_v46  ;;  %9406 = vmatpush1.bf16.msra.mxu0 %v13206_v44  ;;  %9438 = vmatpush1.bf16.msra.mxu1 %v13207_v1  ;;  %v13293_v46 = vld [vmem:[#allocation20_spill] sm:$0xff] }
 0xd02   : > { %v5914_v55 = vmul.f32 %v10405_v12, %v5909_v31  ;;  %9408 = vmatprep.subr.bf16.mxu0 %v13208_v10  ;;  %9440 = vmatprep.subr.bf16.mxu1 %v13209_v19  ;;  %v13292_v31 = vld [vmem:[#allocation30_spill] sm:$0xff]  ;;  %v13294_v12 = vld [vmem:[#allocation31_spill] sm:$0xff] }
 0xd03   : > { %v5913_v11 = vmul.f32 %v5910_v27, %v12357_v42  ;;  %v5908_v42 = vadd.f32 1.0, %v10407_v20  ;;  %v13295_v27 = vld [vmem:[#allocation21_spill] sm:$0xff] }
 0xd04   : > { %v13298_v20 = vld [vmem:[#allocation33_spill] sm:$0xff] }
 0xd05   : > { %v12441_v63 = vadd.f32 %v5914_v55, %v5913_v11  ;;  %9410 = vmatpush1.bf16.msra.mxu0 %v13210_v54  ;;  %9442 = vmatpush1.bf16.msra.mxu1 %v13211_v30  ;;  %v5911_v32 = vmul.f32 0.5, %v5908_v42  ;;  %v13296_v55 = vld [vmem:[#allocation32_spill] sm:$0xff]  ;;  %v13297_v11 = vld [vmem:[#allocation22_spill] sm:$0xff]  ;;  %v13299_v42 = vld [vmem:[#allocation23_spill] sm:$0xff] }
 0xd06   : > { %9412 = vmatprep.subr.bf16.mxu0 %v12051_v57  ;;  %9444 = vmatprep.subr.bf16.mxu1 %v12053_v45 }
 0xd07   : > { %10408 = vtanh.f32 %v12441_v63 }
 0xd09   : > { %9414 = vmatpush1.bf16.msra.mxu0 %v12057_v47  ;;  %9446 = vmatpush1.bf16.msra.mxu1 %v12059_v3 }
 0xd0a   : > { %9416 = vmatprep.subr.bf16.mxu0 %v12063_v56  ;;  %9448 = vmatprep.subr.bf16.mxu1 %v12065_v34 }
 0xd0d   : > { %9418 = vmatpush1.bf16.msra.mxu0 %v12069_v41  ;;  %9450 = vmatpush1.bf16.msra.mxu1 %v12071_v13 }
 0xd0e   : > { %9420 = vmatprep.subr.bf16.mxu0 %v12075_v15  ;;  %9452 = vmatprep.subr.bf16.mxu1 %v12077_v5 }
 0xd11   : > { %v10409_v8 = vpop.eup %10408  ;;  %9422 = vmatpush1.bf16.msra.mxu0 %v12081_v6  ;;  %9454 = vmatpush1.bf16.msra.mxu1 %v12083_v28 }
 0xd12   : > { %v5917_v39 = vmul.f32 %v10409_v8, %v5911_v32  ;;  %9456 = vmatprep.subr.bf16.mxu0 %v11861_v43  ;;  %9488 = vmatprep.subr.bf16.mxu1 %v11863_v0  ;;  %v13300_v32 = vld [vmem:[#allocation34_spill] sm:$0xff]  ;;  %v13301_v8 = vld [vmem:[#allocation24_spill] sm:$0xff] }
 0xd14   : > { %6133 = vmatmul.mubr.f32.vlgmr.msra.gmra.mrb[54].mxu0 %v5917_v39  ;;  %6204 = vmatmul.mubr.f32.vlgmr.msra.gmra.mrb[70].mxu1 %v5917_v39  ;;  %v13302_v39 = vld [vmem:[#allocation35_spill] sm:$0xff] }
 0xd15   : > { %9458 = vmatpush1.bf16.msra.mxu0 %v11867_v14  ;;  %9490 = vmatpush1.bf16.msra.mxu1 %v11869_v18 }
 0xd16   : > { %9460 = vmatprep.subr.bf16.mxu0 %v11871_v23  ;;  %9492 = vmatprep.subr.bf16.mxu1 %v11873_v35 }
 0xd17   : > { %6314 = vmatprep.mubr.f32.mxu0 %v12978_v58  ;;  %6385 = vmatprep.mubr.f32.mxu1 %v12978_v58 }
 0xd19   : > { %9462 = vmatpush1.bf16.msra.mxu0 %v13285_v21  ;;  %9494 = vmatpush1.bf16.msra.mxu1 %v13286_v33 }
 0xd1a   : > { %9464 = vmatprep.subr.bf16.mxu0 %v13287_v37  ;;  %9496 = vmatprep.subr.bf16.mxu1 %v13288_v17 }
 0xd1d   : > { %9466 = vmatpush1.bf16.msra.mxu0 %v13289_v22  ;;  %9498 = vmatpush1.bf16.msra.mxu1 %v13290_v9 }
 0xd1e   : > { %9468 = vmatprep.subr.bf16.mxu0 %v13291_v62  ;;  %9500 = vmatprep.subr.bf16.mxu1 %v13292_v31  ;;  %v13303_v31 = vld [vmem:[#allocation25_spill] sm:$0xff] }
 0xd1f   : > { %v13313_v62 = vld [vmem:[#allocation57_spill] sm:$0xff] }
 0xd21   : > { %9470 = vmatpush1.bf16.msra.mxu0 %v13293_v46  ;;  %9502 = vmatpush1.bf16.msra.mxu1 %v13294_v12  ;;  %v13304_v46 = vld [vmem:[#allocation36_spill] sm:$0xff]  ;;  %v13305_v12 = vld [vmem:[#allocation26_spill] sm:$0xff] }
 0xd22   : > { %9472 = vmatprep.subr.bf16.mxu0 %v13295_v27  ;;  %9504 = vmatprep.subr.bf16.mxu1 %v13296_v55  ;;  %v13306_v27 = vld [vmem:[#allocation37_spill] sm:$0xff]  ;;  %v13307_v55 = vld [vmem:[#allocation27_spill] sm:$0xff] }
 0xd25   : > { %9474 = vmatpush1.bf16.msra.mxu0 %v13297_v11  ;;  %9506 = vmatpush1.bf16.msra.mxu1 %v13298_v20  ;;  %v13308_v11 = vld [vmem:[#allocation38_spill] sm:$0xff]  ;;  %v13309_v20 = vld [vmem:[#allocation49_spill] sm:$0xff] }
 0xd26   : > { %9476 = vmatprep.subr.bf16.mxu0 %v13299_v42  ;;  %9508 = vmatprep.subr.bf16.mxu1 %v13300_v32  ;;  %v13310_v42 = vld [vmem:[#allocation50_spill] sm:$0xff]  ;;  %v13311_v32 = vld [vmem:[#allocation51_spill] sm:$0xff] }
 0xd29   : > { %9478 = vmatpush1.bf16.msra.mxu0 %v13301_v8  ;;  %9510 = vmatpush1.bf16.msra.mxu1 %v13302_v39  ;;  %v13312_v8 = vld [vmem:[#allocation52_spill] sm:$0xff] }
 0xd2a   : > { %9480 = vmatprep.subr.bf16.mxu0 %v13303_v31  ;;  %9512 = vmatprep.subr.bf16.mxu1 %v13304_v46 }
 0xd2d   : > { %9482 = vmatpush1.bf16.msra.mxu0 %v13305_v12  ;;  %9514 = vmatpush1.bf16.msra.mxu1 %v13306_v27 }
 0xd2e   : > { %9484 = vmatprep.subr.bf16.mxu0 %v13307_v55  ;;  %9516 = vmatprep.subr.bf16.mxu1 %v13308_v11 }
 0xd31   : > { %9486 = vmatpush1.bf16.msra.mxu0 %v13309_v20  ;;  %9518 = vmatpush1.bf16.msra.mxu1 %v13310_v42 }
 0xd32   : > { %9520 = vmatprep.subr.bf16.mxu0 %v13311_v32  ;;  %9552 = vmatprep.subr.bf16.mxu1 %v13312_v8 }
 0xdc7   : > { %v5988_v39 = vpop.f32.mrb[40].mxu0  ;;  %v6059_v31 = vpop.f32.mrb[56].mxu1 }
 0xdc8   : > { %v9927_v46 = vadd.f32 %v5988_v39, %v13313_v62  ;;  %v5990_v9 = vpop.f32.mrb[41].mxu0  ;;  %v6061_v12 = vpop.f32.mrb[57].mxu1  ;;  %v9943_v42 = vadd.f32 %v6059_v31, %v13226_v51 }
 0xdc9   : > { %v9928_v27 = vadd.f32 %v5990_v9, %v12141_v16  ;;  %v9944_v11 = vadd.f32 %v6061_v12, %v13225_v61 }
 0xdca   : > { %v6210_v22 = vmul.f32 0.5, %v9927_v46  ;;  %v6212_v32 = vmul.f32 0.5, %v9943_v42 }
 0xdcb   : > { %v6211_v55 = vmul.f32 0.5, %v9928_v27 }
 0xdcc   : > { %10410 = vtanh.f32 %v6210_v22 }
 0xdcd   : > { %10412 = vtanh.f32 %v6211_v55 }
 0xdce   : > { %10414 = vtanh.f32 %v9944_v11 }
 0xdcf   : > { %10416 = vtanh.f32 %v6212_v32 }
 0xdd6   : > { %v10411_v20 = vpop.eup %10410 }
 0xdd7   : > { %v6216_v8 = vadd.f32 1.0, %v10411_v20  ;;  %v10413_v17 = vpop.eup %10412 }
 0xdd8   : > { %v6217_v39 = vadd.f32 1.0, %v10413_v17  ;;  %v10415_v62 = vpop.eup %10414 }
 0xdd9   : > { %v6219_v37 = vmul.f32 0.5, %v6216_v8  ;;  %v10417_v22 = vpop.eup %10416 }
 0xdda   : > { %v6220_v33 = vmul.f32 0.5, %v6217_v39  ;;  %v6218_v12 = vadd.f32 1.0, %v10417_v22 }
 0xddb   : > { %v6224_v21 = vmul.f32 %v10415_v62, %v6219_v37 }
 0xddc   : > { %v6223_v9 = vmul.f32 %v6220_v33, %v12415_v60  ;;  %v6221_v17 = vmul.f32 0.5, %v6218_v12 }
 0xdde   : > { %v12499_v46 = vadd.f32 %v6224_v21, %v6223_v9 }
 0xde0   : > { %10418 = vtanh.f32 %v12499_v46 }
 0xde7   : > { %v6134_v27 = vpop.f32.mrb[54].mxu0  ;;  %v6205_v31 = vpop.f32.mrb[70].mxu1 }
 0xde8   : > { %v9957_v55 = vadd.f32 %v6134_v27, %v12157_v49  ;;  %v6136_v11 = vpop.f32.mrb[55].mxu0  ;;  %v6207_v20 = vpop.f32.mrb[71].mxu1  ;;  %v9973_v33 = vadd.f32 %v6205_v31, %v12168_v26 }
 0xde9   : > { %v9958_v42 = vadd.f32 %v6136_v11, %v12160_v52  ;;  %v9974_v60 = vadd.f32 %v6207_v20, %v12163_v36 }
 0xdea   : > { %v6228_v32 = vmul.f32 0.5, %v9957_v55  ;;  %v10419_v8 = vpop.eup %10418  ;;  %v6230_v62 = vmul.f32 0.5, %v9973_v33  ;;  %v13316_v33 = vld [vmem:[#allocation17_spill] sm:$0xff] }
 0xdeb   : > { %v6229_v37 = vmul.f32 0.5, %v9958_v42  ;;  %v6227_v21 = vmul.f32 %v10419_v8, %v6221_v17 }
 0xdec   : > { %10420 = vtanh.f32 %v6228_v32 }
 0xded   : > { %10422 = vtanh.f32 %v6229_v37  ;;  %6315 = vmatmul.mubr.f32.vlgmr.msra.gmra.mrb[42].mxu0 %v6227_v21  ;;  %6386 = vmatmul.mubr.f32.vlgmr.msra.gmra.mrb[58].mxu1 %v6227_v21  ;;  %v13315_v21 = vld [vmem:[#allocation48_spill] sm:$0xff] }
 0xdee   : > { %9522 = vmatpush1.bf16.msra.mxu0 %v11993_v53  ;;  %9554 = vmatpush1.bf16.msra.mxu1 %v11995_v29  ;;  %10424 = vtanh.f32 %v9974_v60  ;;  %v13314_v60 = vld [vmem:[#allocation47_spill] sm:$0xff] }
 0xdef   : > { %9524 = vmatprep.subr.bf16.mxu0 %v11999_v4  ;;  %9556 = vmatprep.subr.bf16.mxu1 %v12001_v2  ;;  %10426 = vtanh.f32 %v6230_v62  ;;  %v13317_v62 = vld [vmem:[#allocation28_spill] sm:$0xff] }
 0xdf0   : > { %6460 = vmatprep.mubr.f32.mxu0 %v12978_v58  ;;  %6531 = vmatprep.mubr.f32.mxu1 %v12978_v58 }
 0xdf2   : > { %9526 = vmatpush1.bf16.msra.mxu0 %v12007_v59  ;;  %9558 = vmatpush1.bf16.msra.mxu1 %v12009_v38 }
 0xdf3   : > { %9528 = vmatprep.subr.bf16.mxu0 %v12013_v24  ;;  %9560 = vmatprep.subr.bf16.mxu1 %v13201_v25 }
 0xdf6   : > { %v10421_v39 = vpop.eup %10420  ;;  %9530 = vmatpush1.bf16.msra.mxu0 %v13228_v50  ;;  %9562 = vmatpush1.bf16.msra.mxu1 %v13229_v40 }
 0xdf7   : > { %v6234_v9 = vadd.f32 1.0, %v10421_v39  ;;  %v10423_v22 = vpop.eup %10422  ;;  %9532 = vmatprep.subr.bf16.mxu0 %v13230_v48  ;;  %9564 = vmatprep.subr.bf16.mxu1 %v13231_v7  ;;  %v13318_v39 = vld [vmem:[#allocation18_spill] sm:$0xff] }
 0xdf8   : > { %v6235_v27 = vadd.f32 1.0, %v10423_v22  ;;  %v10425_v31 = vpop.eup %10424  ;;  %v13320_v22 = vld [vmem:[#allocation19_spill] sm:$0xff] }
 0xdf9   : > { %v6237_v12 = vmul.f32 0.5, %v6234_v9  ;;  %v10427_v17 = vpop.eup %10426  ;;  %v13319_v9 = vld [vmem:[#allocation29_spill] sm:$0xff] }
 0xdfa   : > { %v6238_v55 = vmul.f32 0.5, %v6235_v27  ;;  %9534 = vmatpush1.bf16.msra.mxu0 %v13206_v44  ;;  %9566 = vmatpush1.bf16.msra.mxu1 %v13207_v1  ;;  %v13322_v27 = vld [vmem:[#allocation20_spill] sm:$0xff] }
 0xdfb   : > { %v6242_v11 = vmul.f32 %v10425_v31, %v6237_v12  ;;  %9536 = vmatprep.subr.bf16.mxu0 %v13208_v10  ;;  %9568 = vmatprep.subr.bf16.mxu1 %v13209_v19  ;;  %v13321_v12 = vld [vmem:[#allocation30_spill] sm:$0xff]  ;;  %v13323_v31 = vld [vmem:[#allocation31_spill] sm:$0xff] }
 0xdfc   : > { %v6241_v20 = vmul.f32 %v6238_v55, %v12441_v63  ;;  %v6236_v63 = vadd.f32 1.0, %v10427_v17  ;;  %v13324_v55 = vld [vmem:[#allocation21_spill] sm:$0xff] }
 0xdfd   : > { %v13327_v17 = vld [vmem:[#allocation33_spill] sm:$0xff] }
 0xdfe   : > { %v12525_v42 = vadd.f32 %v6242_v11, %v6241_v20  ;;  %9538 = vmatpush1.bf16.msra.mxu0 %v13210_v54  ;;  %9570 = vmatpush1.bf16.msra.mxu1 %v13211_v30  ;;  %v6239_v32 = vmul.f32 0.5, %v6236_v63  ;;  %v13325_v11 = vld [vmem:[#allocation32_spill] sm:$0xff]  ;;  %v13326_v20 = vld [vmem:[#allocation22_spill] sm:$0xff]  ;;  %v13328_v63 = vld [vmem:[#allocation23_spill] sm:$0xff] }
 0xdff   : > { %9540 = vmatprep.subr.bf16.mxu0 %v12051_v57  ;;  %9572 = vmatprep.subr.bf16.mxu1 %v12053_v45 }
 0xe00   : > { %10428 = vtanh.f32 %v12525_v42 }
 0xe02   : > { %9542 = vmatpush1.bf16.msra.mxu0 %v12057_v47  ;;  %9574 = vmatpush1.bf16.msra.mxu1 %v12059_v3 }
 0xe03   : > { %9544 = vmatprep.subr.bf16.mxu0 %v12063_v56  ;;  %9576 = vmatprep.subr.bf16.mxu1 %v12065_v34 }
 0xe06   : > { %9546 = vmatpush1.bf16.msra.mxu0 %v12069_v41  ;;  %9578 = vmatpush1.bf16.msra.mxu1 %v12071_v13 }
 0xe07   : > { %9548 = vmatprep.subr.bf16.mxu0 %v12075_v15  ;;  %9580 = vmatprep.subr.bf16.mxu1 %v12077_v5 }
 0xe0a   : > { %v10429_v8 = vpop.eup %10428  ;;  %9550 = vmatpush1.bf16.msra.mxu0 %v12081_v6  ;;  %9582 = vmatpush1.bf16.msra.mxu1 %v12083_v28 }
 0xe0b   : > { %v6245_v37 = vmul.f32 %v10429_v8, %v6239_v32  ;;  %9584 = vmatprep.subr.bf16.mxu0 %v11861_v43  ;;  %9616 = vmatprep.subr.bf16.mxu1 %v11863_v0  ;;  %v13329_v32 = vld [vmem:[#allocation34_spill] sm:$0xff]  ;;  %v13330_v8 = vld [vmem:[#allocation24_spill] sm:$0xff] }
 0xe0d   : > { %6461 = vmatmul.mubr.f32.vlgmr.msra.gmra.mrb[52].mxu0 %v6245_v37  ;;  %6532 = vmatmul.mubr.f32.vlgmr.msra.gmra.mrb[68].mxu1 %v6245_v37  ;;  %v13331_v37 = vld [vmem:[#allocation35_spill] sm:$0xff] }
 0xe0e   : > { %9586 = vmatpush1.bf16.msra.mxu0 %v11867_v14  ;;  %9618 = vmatpush1.bf16.msra.mxu1 %v11869_v18 }
 0xe0f   : > { %9588 = vmatprep.subr.bf16.mxu0 %v11871_v23  ;;  %9620 = vmatprep.subr.bf16.mxu1 %v11873_v35 }
 0xe10   : > { %6642 = vmatprep.mubr.f32.mxu0 %v12978_v58  ;;  %6713 = vmatprep.mubr.f32.mxu1 %v12978_v58 }
 0xe12   : > { %9590 = vmatpush1.bf16.msra.mxu0 %v13314_v60  ;;  %9622 = vmatpush1.bf16.msra.mxu1 %v13315_v21 }
 0xe13   : > { %9592 = vmatprep.subr.bf16.mxu0 %v13316_v33  ;;  %9624 = vmatprep.subr.bf16.mxu1 %v13317_v62 }
 0xe16   : > { %9594 = vmatpush1.bf16.msra.mxu0 %v13318_v39  ;;  %9626 = vmatpush1.bf16.msra.mxu1 %v13319_v9 }
 0xe17   : > { %9596 = vmatprep.subr.bf16.mxu0 %v13320_v22  ;;  %9628 = vmatprep.subr.bf16.mxu1 %v13321_v12  ;;  %v13332_v12 = vld [vmem:[#allocation25_spill] sm:$0xff] }
 0xe18   : > { %v13342_v22 = vld [vmem:[#allocation57_spill] sm:$0xff] }
 0xe1a   : > { %9598 = vmatpush1.bf16.msra.mxu0 %v13322_v27  ;;  %9630 = vmatpush1.bf16.msra.mxu1 %v13323_v31  ;;  %v13333_v27 = vld [vmem:[#allocation36_spill] sm:$0xff]  ;;  %v13334_v31 = vld [vmem:[#allocation26_spill] sm:$0xff] }
 0xe1b   : > { %9600 = vmatprep.subr.bf16.mxu0 %v13324_v55  ;;  %9632 = vmatprep.subr.bf16.mxu1 %v13325_v11  ;;  %v13335_v55 = vld [vmem:[#allocation37_spill] sm:$0xff]  ;;  %v13336_v11 = vld [vmem:[#allocation27_spill] sm:$0xff] }
 0xe1e   : > { %9602 = vmatpush1.bf16.msra.mxu0 %v13326_v20  ;;  %9634 = vmatpush1.bf16.msra.mxu1 %v13327_v17  ;;  %v13337_v20 = vld [vmem:[#allocation38_spill] sm:$0xff]  ;;  %v13338_v17 = vld [vmem:[#allocation49_spill] sm:$0xff] }
 0xe1f   : > { %9604 = vmatprep.subr.bf16.mxu0 %v13328_v63  ;;  %9636 = vmatprep.subr.bf16.mxu1 %v13329_v32  ;;  %v13339_v63 = vld [vmem:[#allocation50_spill] sm:$0xff]  ;;  %v13340_v32 = vld [vmem:[#allocation51_spill] sm:$0xff] }
 0xe22   : > { %9606 = vmatpush1.bf16.msra.mxu0 %v13330_v8  ;;  %9638 = vmatpush1.bf16.msra.mxu1 %v13331_v37  ;;  %v13341_v8 = vld [vmem:[#allocation52_spill] sm:$0xff] }
 0xe23   : > { %9608 = vmatprep.subr.bf16.mxu0 %v13332_v12  ;;  %9640 = vmatprep.subr.bf16.mxu1 %v13333_v27 }
 0xe26   : > { %9610 = vmatpush1.bf16.msra.mxu0 %v13334_v31  ;;  %9642 = vmatpush1.bf16.msra.mxu1 %v13335_v55 }
 0xe27   : > { %9612 = vmatprep.subr.bf16.mxu0 %v13336_v11  ;;  %9644 = vmatprep.subr.bf16.mxu1 %v13337_v20 }
 0xe2a   : > { %9614 = vmatpush1.bf16.msra.mxu0 %v13338_v17  ;;  %9646 = vmatpush1.bf16.msra.mxu1 %v13339_v63 }
 0xe2b   : > { %9648 = vmatprep.subr.bf16.mxu0 %v13340_v32  ;;  %9680 = vmatprep.subr.bf16.mxu1 %v13341_v8 }
 0xec0   : > { %v6316_v37 = vpop.f32.mrb[42].mxu0  ;;  %v6387_v12 = vpop.f32.mrb[58].mxu1 }
 0xec1   : > { %v9929_v27 = vadd.f32 %v6316_v37, %v13342_v22  ;;  %v6318_v9 = vpop.f32.mrb[43].mxu0  ;;  %v6389_v31 = vpop.f32.mrb[59].mxu1  ;;  %v9945_v63 = vadd.f32 %v6387_v12, %v13226_v51 }
 0xec2   : > { %v9930_v55 = vadd.f32 %v6318_v9, %v12141_v16  ;;  %v9946_v20 = vadd.f32 %v6389_v31, %v13225_v61 }
 0xec3   : > { %v6538_v39 = vmul.f32 0.5, %v9929_v27  ;;  %v6540_v32 = vmul.f32 0.5, %v9945_v63 }
 0xec4   : > { %v6539_v11 = vmul.f32 0.5, %v9930_v55 }
 0xec5   : > { %10430 = vtanh.f32 %v6538_v39 }
 0xec6   : > { %10432 = vtanh.f32 %v6539_v11 }
 0xec7   : > { %10434 = vtanh.f32 %v9946_v20 }
 0xec8   : > { %10436 = vtanh.f32 %v6540_v32 }
 0xecf   : > { %v10431_v17 = vpop.eup %10430 }
 0xed0   : > { %v6544_v8 = vadd.f32 1.0, %v10431_v17  ;;  %v10433_v62 = vpop.eup %10432 }
 0xed1   : > { %v6545_v37 = vadd.f32 1.0, %v10433_v62  ;;  %v10435_v22 = vpop.eup %10434 }
 0xed2   : > { %v6547_v33 = vmul.f32 0.5, %v6544_v8  ;;  %v10437_v39 = vpop.eup %10436 }
 0xed3   : > { %v6548_v21 = vmul.f32 0.5, %v6545_v37  ;;  %v6546_v31 = vadd.f32 1.0, %v10437_v39 }
 0xed4   : > { %v6552_v60 = vmul.f32 %v10435_v22, %v6547_v33 }
 0xed5   : > { %v6551_v9 = vmul.f32 %v6548_v21, %v12499_v46  ;;  %v6549_v62 = vmul.f32 0.5, %v6546_v31 }
 0xed7   : > { %v12583_v27 = vadd.f32 %v6552_v60, %v6551_v9 }
 0xed9   : > { %10438 = vtanh.f32 %v12583_v27 }
 0xee0   : > { %v6462_v55 = vpop.f32.mrb[52].mxu0  ;;  %v6533_v12 = vpop.f32.mrb[68].mxu1 }
 0xee1   : > { %v9955_v11 = vadd.f32 %v6462_v55, %v12157_v49  ;;  %v6464_v20 = vpop.f32.mrb[53].mxu0  ;;  %v6535_v17 = vpop.f32.mrb[69].mxu1  ;;  %v9971_v21 = vadd.f32 %v6533_v12, %v12168_v26 }
 0xee2   : > { %v9956_v63 = vadd.f32 %v6464_v20, %v12160_v52  ;;  %v9972_v46 = vadd.f32 %v6535_v17, %v12163_v36 }
 0xee3   : > { %v6556_v32 = vmul.f32 0.5, %v9955_v11  ;;  %v10439_v8 = vpop.eup %10438  ;;  %v6558_v22 = vmul.f32 0.5, %v9971_v21  ;;  %v13347_v21 = vld [vmem:[#allocation18_spill] sm:$0xff] }
 0xee4   : > { %v6557_v33 = vmul.f32 0.5, %v9956_v63  ;;  %v6555_v60 = vmul.f32 %v10439_v8, %v6549_v62 }
 0xee5   : > { %10440 = vtanh.f32 %v6556_v32 }
 0xee6   : > { %10442 = vtanh.f32 %v6557_v33  ;;  %6643 = vmatmul.mubr.f32.vlgmr.msra.gmra.mrb[44].mxu0 %v6555_v60  ;;  %6714 = vmatmul.mubr.f32.vlgmr.msra.gmra.mrb[60].mxu1 %v6555_v60  ;;  %v13344_v60 = vld [vmem:[#allocation48_spill] sm:$0xff] }
 0xee7   : > { %9650 = vmatpush1.bf16.msra.mxu0 %v11993_v53  ;;  %9682 = vmatpush1.bf16.msra.mxu1 %v11995_v29  ;;  %10444 = vtanh.f32 %v9972_v46  ;;  %v13343_v46 = vld [vmem:[#allocation47_spill] sm:$0xff] }
 0xee8   : > { %9652 = vmatprep.subr.bf16.mxu0 %v11999_v4  ;;  %9684 = vmatprep.subr.bf16.mxu1 %v12001_v2  ;;  %10446 = vtanh.f32 %v6558_v22  ;;  %v13352_v22 = vld [vmem:[#allocation31_spill] sm:$0xff] }
 0xee9   : > { %6788 = vmatprep.mubr.f32.mxu0 %v12978_v58  ;;  %6859 = vmatprep.mubr.f32.mxu1 %v12978_v58 }
 0xeeb   : > { %9654 = vmatpush1.bf16.msra.mxu0 %v12007_v59  ;;  %9686 = vmatpush1.bf16.msra.mxu1 %v12009_v38 }
 0xeec   : > { %9656 = vmatprep.subr.bf16.mxu0 %v12013_v24  ;;  %9688 = vmatprep.subr.bf16.mxu1 %v13201_v25 }
 0xeef   : > { %v10441_v37 = vpop.eup %10440  ;;  %9658 = vmatpush1.bf16.msra.mxu0 %v13228_v50  ;;  %9690 = vmatpush1.bf16.msra.mxu1 %v13229_v40 }
 0xef0   : > { %v6562_v9 = vadd.f32 1.0, %v10441_v37  ;;  %v10443_v39 = vpop.eup %10442  ;;  %9660 = vmatprep.subr.bf16.mxu0 %v13230_v48  ;;  %9692 = vmatprep.subr.bf16.mxu1 %v13231_v7  ;;  %v13353_v37 = vld [vmem:[#allocation21_spill] sm:$0xff] }
 0xef1   : > { %v6563_v55 = vadd.f32 1.0, %v10443_v39  ;;  %v10445_v12 = vpop.eup %10444  ;;  %v13355_v39 = vld [vmem:[#allocation22_spill] sm:$0xff] }
 0xef2   : > { %v6565_v31 = vmul.f32 0.5, %v6562_v9  ;;  %v10447_v62 = vpop.eup %10446  ;;  %v13354_v9 = vld [vmem:[#allocation32_spill] sm:$0xff] }
 0xef3   : > { %v6566_v11 = vmul.f32 0.5, %v6563_v55  ;;  %9662 = vmatpush1.bf16.msra.mxu0 %v13206_v44  ;;  %9694 = vmatpush1.bf16.msra.mxu1 %v13207_v1  ;;  %v13357_v55 = vld [vmem:[#allocation23_spill] sm:$0xff] }
 0xef4   : > { %v6570_v20 = vmul.f32 %v10445_v12, %v6565_v31  ;;  %9664 = vmatprep.subr.bf16.mxu0 %v13208_v10  ;;  %9696 = vmatprep.subr.bf16.mxu1 %v13209_v19  ;;  %v13356_v31 = vld [vmem:[#allocation33_spill] sm:$0xff]  ;;  %v13358_v12 = vld [vmem:[#allocation34_spill] sm:$0xff] }
 0xef5   : > { %v6569_v17 = vmul.f32 %v6566_v11, %v12525_v42  ;;  %v6564_v42 = vadd.f32 1.0, %v10447_v62  ;;  %v13359_v11 = vld [vmem:[#allocation24_spill] sm:$0xff] }
 0xef6   : > { %v13362_v62 = vld [vmem:[#allocation36_spill] sm:$0xff] }
 0xef7   : > { %v12609_v63 = vadd.f32 %v6570_v20, %v6569_v17  ;;  %9666 = vmatpush1.bf16.msra.mxu0 %v13210_v54  ;;  %9698 = vmatpush1.bf16.msra.mxu1 %v13211_v30  ;;  %v6567_v32 = vmul.f32 0.5, %v6564_v42  ;;  %v13360_v20 = vld [vmem:[#allocation35_spill] sm:$0xff]  ;;  %v13361_v17 = vld [vmem:[#allocation25_spill] sm:$0xff]  ;;  %v13363_v42 = vld [vmem:[#allocation26_spill] sm:$0xff] }
 0xef8   : > { %9668 = vmatprep.subr.bf16.mxu0 %v12051_v57  ;;  %9700 = vmatprep.subr.bf16.mxu1 %v12053_v45 }
 0xef9   : > { %10448 = vtanh.f32 %v12609_v63 }
 0xefb   : > { %9670 = vmatpush1.bf16.msra.mxu0 %v12057_v47  ;;  %9702 = vmatpush1.bf16.msra.mxu1 %v12059_v3 }
 0xefc   : > { %9672 = vmatprep.subr.bf16.mxu0 %v12063_v56  ;;  %9704 = vmatprep.subr.bf16.mxu1 %v12065_v34 }
 0xeff   : > { %9674 = vmatpush1.bf16.msra.mxu0 %v12069_v41  ;;  %9706 = vmatpush1.bf16.msra.mxu1 %v12071_v13 }
 0xf00   : > { %9676 = vmatprep.subr.bf16.mxu0 %v12075_v15  ;;  %9708 = vmatprep.subr.bf16.mxu1 %v12077_v5 }
 0xf03   : > { %v10449_v8 = vpop.eup %10448  ;;  %9678 = vmatpush1.bf16.msra.mxu0 %v12081_v6  ;;  %9710 = vmatpush1.bf16.msra.mxu1 %v12083_v28 }
 0xf04   : > { %v6573_v33 = vmul.f32 %v10449_v8, %v6567_v32  ;;  %9712 = vmatprep.subr.bf16.mxu0 %v11861_v43  ;;  %9744 = vmatprep.subr.bf16.mxu1 %v11863_v0  ;;  %v13345_v43 = vld [vmem:[#allocation17_spill] sm:$0xff]  ;;  %v13346_v0 = vld [vmem:[#allocation28_spill] sm:$0xff]  ;;  %v13365_v8 = vld [vmem:[#allocation27_spill] sm:$0xff] }
 0xf05   : > { %v13364_v32 = vld [vmem:[#allocation37_spill] sm:$0xff] }
 0xf06   : > { %6789 = vmatmul.mubr.f32.vlgmr.msra.gmra.mrb[50].mxu0 %v6573_v33  ;;  %6860 = vmatmul.mubr.f32.vlgmr.msra.gmra.mrb[66].mxu1 %v6573_v33  ;;  %v13366_v33 = vld [vmem:[#allocation38_spill] sm:$0xff] }
 0xf07   : > { %9714 = vmatpush1.bf16.msra.mxu0 %v11867_v14  ;;  %9746 = vmatpush1.bf16.msra.mxu1 %v11869_v18  ;;  %v13348_v14 = vld [vmem:[#allocation29_spill] sm:$0xff]  ;;  %v13349_v18 = vld [vmem:[#allocation19_spill] sm:$0xff] }
 0xf08   : > { %9716 = vmatprep.subr.bf16.mxu0 %v11871_v23  ;;  %9748 = vmatprep.subr.bf16.mxu1 %v11873_v35  ;;  %v13350_v23 = vld [vmem:[#allocation30_spill] sm:$0xff]  ;;  %v13351_v35 = vld [vmem:[#allocation20_spill] sm:$0xff] }
 0xf09   : > { %6970 = vmatprep.mubr.f32.mxu0 %v12978_v58  ;;  %7041 = vmatprep.mubr.f32.mxu1 %v12978_v58 }
 0xf0b   : > { %9718 = vmatpush1.bf16.msra.mxu0 %v13343_v46  ;;  %9750 = vmatpush1.bf16.msra.mxu1 %v13344_v60  ;;  %v13367_v46 = vld [vmem:[#allocation49_spill] sm:$0xff]  ;;  %v13368_v60 = vld [vmem:[#allocation50_spill] sm:$0xff] }
 0xf0c   : > { %9720 = vmatprep.subr.bf16.mxu0 %v13345_v43  ;;  %9752 = vmatprep.subr.bf16.mxu1 %v13346_v0  ;;  %v13369_v43 = vld [vmem:[#allocation51_spill] sm:$0xff]  ;;  %v13370_v0 = vld [vmem:[#allocation52_spill] sm:$0xff] }
 0xf0f   : > { %9722 = vmatpush1.bf16.msra.mxu0 %v13347_v21  ;;  %9754 = vmatpush1.bf16.msra.mxu1 %v13348_v14 }
 0xf10   : > { %9724 = vmatprep.subr.bf16.mxu0 %v13349_v18  ;;  %9756 = vmatprep.subr.bf16.mxu1 %v13350_v23  ;;  %v13371_v18 = vld [vmem:[#allocation57_spill] sm:$0xff] }
 0xf13   : > { %9726 = vmatpush1.bf16.msra.mxu0 %v13351_v35  ;;  %9758 = vmatpush1.bf16.msra.mxu1 %v13352_v22 }
 0xf14   : > { %9728 = vmatprep.subr.bf16.mxu0 %v13353_v37  ;;  %9760 = vmatprep.subr.bf16.mxu1 %v13354_v9 }
 0xf17   : > { %9730 = vmatpush1.bf16.msra.mxu0 %v13355_v39  ;;  %9762 = vmatpush1.bf16.msra.mxu1 %v13356_v31 }
 0xf18   : > { %9732 = vmatprep.subr.bf16.mxu0 %v13357_v55  ;;  %9764 = vmatprep.subr.bf16.mxu1 %v13358_v12 }
 0xf1b   : > { %9734 = vmatpush1.bf16.msra.mxu0 %v13359_v11  ;;  %9766 = vmatpush1.bf16.msra.mxu1 %v13360_v20 }
 0xf1c   : > { %9736 = vmatprep.subr.bf16.mxu0 %v13361_v17  ;;  %9768 = vmatprep.subr.bf16.mxu1 %v13362_v62 }
 0xf1f   : > { %9738 = vmatpush1.bf16.msra.mxu0 %v13363_v42  ;;  %9770 = vmatpush1.bf16.msra.mxu1 %v13364_v32 }
 0xf20   : > { %9740 = vmatprep.subr.bf16.mxu0 %v13365_v8  ;;  %9772 = vmatprep.subr.bf16.mxu1 %v13366_v33 }
 0xf23   : > { %9742 = vmatpush1.bf16.msra.mxu0 %v13367_v46  ;;  %9774 = vmatpush1.bf16.msra.mxu1 %v13368_v60 }
 0xf24   : > { %9776 = vmatprep.subr.bf16.mxu0 %v13369_v43  ;;  %9808 = vmatprep.subr.bf16.mxu1 %v13370_v0 }
 0xfb9   : > { %v6644_v21 = vpop.f32.mrb[44].mxu0  ;;  %v6715_v14 = vpop.f32.mrb[60].mxu1 }
 0xfba   : > { %v9931_v23 = vadd.f32 %v6644_v21, %v13371_v18  ;;  %v6646_v35 = vpop.f32.mrb[45].mxu0  ;;  %v6717_v22 = vpop.f32.mrb[61].mxu1  ;;  %v9947_v55 = vadd.f32 %v6715_v14, %v13226_v51 }
 0xfbb   : > { %v9932_v37 = vadd.f32 %v6646_v35, %v12141_v16  ;;  %v9948_v31 = vadd.f32 %v6717_v22, %v13225_v61 }
 0xfbc   : > { %v6866_v9 = vmul.f32 0.5, %v9931_v23  ;;  %v6868_v12 = vmul.f32 0.5, %v9947_v55 }
 0xfbd   : > { %v6867_v39 = vmul.f32 0.5, %v9932_v37 }
 0xfbe   : > { %10450 = vtanh.f32 %v6866_v9 }
 0xfbf   : > { %10452 = vtanh.f32 %v6867_v39 }
 0xfc0   : > { %10454 = vtanh.f32 %v9948_v31 }
 0xfc1   : > { %10456 = vtanh.f32 %v6868_v12 }
 0xfc8   : > { %v10451_v11 = vpop.eup %10450 }
 0xfc9   : > { %v6872_v20 = vadd.f32 1.0, %v10451_v11  ;;  %v10453_v17 = vpop.eup %10452 }
 0xfca   : > { %v6873_v42 = vadd.f32 1.0, %v10453_v17  ;;  %v10455_v32 = vpop.eup %10454 }
 0xfcb   : > { %v6875_v62 = vmul.f32 0.5, %v6872_v20  ;;  %v10457_v43 = vpop.eup %10456 }
 0xfcc   : > { %v6876_v8 = vmul.f32 0.5, %v6873_v42  ;;  %v6874_v0 = vadd.f32 1.0, %v10457_v43  ;;  %v7245_v42 = vld [vmem:[#allocation9 + $0x78] sm:$0xff]  ;;  %v7247_v43 = vld [vmem:[#allocation9 + $0x88] sm:$0xff] }
 0xfcd   : > { %v6880_v33 = vmul.f32 %v10455_v32, %v6875_v62  ;;  %v7243_v62 = vld [vmem:[#allocation9 + $0x68] sm:$0xff] }
 0xfce   : > { %v6879_v46 = vmul.f32 %v6876_v8, %v12583_v27  ;;  %v6877_v9 = vmul.f32 0.5, %v6874_v0  ;;  %v9851_v32 = vpack.c.bf16 %v7245_v42, %v7243_v62  ;;  %v7242_v8 = vld [vmem:[#allocation9 + $0x60] sm:$0xff]  ;;  %v7249_v0 = vld [vmem:[#allocation9 + $0x98] sm:$0xff]  ;;  %v7279_v62 = vld [vmem:[#allocation9 + $0x188] sm:$0xff] }
 0xfcf   : > { %v7281_v42 = vld [vmem:[#allocation9 + $0x198] sm:$0xff] }
 0xfd0   : > { %v12667_v60 = vadd.f32 %v6880_v33, %v6879_v46  ;;  %v7244_v33 = vld [vmem:[#allocation9 + $0x70] sm:$0xff] }
 0xfd1   : > { %v9853_v46 = vpack.c.bf16 %v7244_v33, %v7242_v8  ;;  %v7278_v8 = vld [vmem:[#allocation9 + $0x180] sm:$0xff]  ;;  %v7280_v33 = vld [vmem:[#allocation9 + $0x190] sm:$0xff] }
 0xfd2   : > { %10458 = vtanh.f32 %v12667_v60 }
 0xfd9   : > { %v6790_v21 = vpop.f32.mrb[50].mxu0  ;;  %v6861_v14 = vpop.f32.mrb[66].mxu1 }
 0xfda   : > { %v9953_v23 = vadd.f32 %v6790_v21, %v12157_v49  ;;  %v6792_v35 = vpop.f32.mrb[51].mxu0  ;;  %v6863_v22 = vpop.f32.mrb[67].mxu1  ;;  %v9969_v11 = vadd.f32 %v6861_v14, %v12168_v26  ;;  %v9855_v21 = vpack.c.bf16 %v7249_v0, %v7247_v43  ;;  %v7246_v14 = vld [vmem:[#allocation9 + $0x80] sm:$0xff]  ;;  %v7283_v43 = vld [vmem:[#allocation9 + $0x1a8] sm:$0xff]  ;;  %v7285_v0 = vld [vmem:[#allocation9 + $0x1b8] sm:$0xff] }
 0xfdb   : > { %v9954_v37 = vadd.f32 %v6792_v35, %v12160_v52  ;;  %v9970_v27 = vadd.f32 %v6863_v22, %v12163_v36  ;;  %v7251_v22 = vld [vmem:[#allocation9 + $0xa8] sm:$0xff] }
 0xfdc   : > { %v6884_v39 = vmul.f32 0.5, %v9953_v23  ;;  %v10459_v31 = vpop.eup %10458  ;;  %v7248_v23 = vld [vmem:[#allocation9 + $0x90] sm:$0xff] }
 0xfdd   : > { %v6885_v55 = vmul.f32 0.5, %v9954_v37  ;;  %v6883_v12 = vmul.f32 %v10459_v31, %v6877_v9  ;;  %v9857_v35 = vpack.c.bf16 %v7248_v23, %v7246_v14  ;;  %v7253_v37 = vld [vmem:[#allocation9 + $0xb8] sm:$0xff]  ;;  %v7252_v31 = vld [vmem:[#allocation9 + $0xb0] sm:$0xff]  ;;  %v7282_v14 = vld [vmem:[#allocation9 + $0x1a0] sm:$0xff] }
 0xfde   : > { %10460 = vtanh.f32 %v6884_v39  ;;  %v9859_v9 = vpack.c.bf16 %v7253_v37, %v7251_v22  ;;  %v7250_v39 = vld [vmem:[#allocation9 + $0xa0] sm:$0xff]  ;;  %v7284_v23 = vld [vmem:[#allocation9 + $0x1b0] sm:$0xff]  ;;  %v7289_v37 = vld [vmem:[#allocation9 + $0x1d8] sm:$0xff] }
 0xfdf   : > { %10462 = vtanh.f32 %v6885_v55  ;;  %6971 = vmatmul.mubr.f32.vlgmr.msra.gmra.mrb[46].mxu0 %v6883_v12  ;;  %7042 = vmatmul.mubr.f32.vlgmr.msra.gmra.mrb[62].mxu1 %v6883_v12  ;;  %v7255_v55 = vld [vmem:[#allocation9 + $0xc8] sm:$0xff]  ;;  %v7257_v12 = vld [vmem:[#allocation9 + $0xd8] sm:$0xff]  ;;  %v9893_v22 = vpack.c.bf16 %v7284_v23, %v7282_v14 }
 0xfe0   : > { %9778 = vmatpush1.bf16.msra.mxu0 %v11993_v53  ;;  %9810 = vmatpush1.bf16.msra.mxu1 %v11995_v29  ;;  %10464 = vtanh.f32 %v9970_v27  ;;  %v6886_v53 = vmul.f32 0.5, %v9969_v11  ;;  %v9861_v27 = vpack.c.bf16 %v7252_v31, %v7250_v39  ;;  %v9863_v11 = vpack.c.bf16 %v7257_v12, %v7255_v55  ;;  %v7288_v39 = vld [vmem:[#allocation9 + $0x1d0] sm:$0xff]  ;;  %v7291_v55 = vld [vmem:[#allocation9 + $0x1e8] sm:$0xff] }
 0xfe1   : > { %9780 = vmatprep.subr.bf16.mxu0 %v11999_v4  ;;  %9812 = vmatprep.subr.bf16.mxu1 %v12001_v2 }
 0xfe2   : > { %7116 = vmatprep.mubr.f32.mxu0 %v12978_v58  ;;  %7187 = vmatprep.mubr.f32.mxu1 %v12978_v58  ;;  %10466 = vtanh.f32 %v6886_v53  ;;  %v7254_v53 = vld [vmem:[#allocation9 + $0xc0] sm:$0xff] }
 0xfe4   : > { %9782 = vmatpush1.bf16.msra.mxu0 %v12007_v59  ;;  %9814 = vmatpush1.bf16.msra.mxu1 %v12009_v38 }
 0xfe5   : > { %9784 = vmatprep.subr.bf16.mxu0 %v12013_v24  ;;  %9816 = vmatprep.subr.bf16.mxu1 %v13201_v25 }
 0xfe8   : > { %v10461_v29 = vpop.eup %10460  ;;  %9786 = vmatpush1.bf16.msra.mxu0 %v13228_v50  ;;  %9818 = vmatpush1.bf16.msra.mxu1 %v13229_v40 }
 0xfe9   : > { %v6890_v20 = vadd.f32 1.0, %v10461_v29  ;;  %v10463_v4 = vpop.eup %10462  ;;  %9788 = vmatprep.subr.bf16.mxu0 %v13230_v48  ;;  %9820 = vmatprep.subr.bf16.mxu1 %v13231_v7  ;;  %v7238_v7 = vld [vmem:[#allocation9 + $0x40] sm:$0xff]  ;;  %v7256_v29 = vld [vmem:[#allocation9 + $0xd0] sm:$0xff] }
 0xfea   : > { %v6891_v2 = vadd.f32 1.0, %v10463_v4  ;;  %v10465_v59 = vpop.eup %10464  ;;  %v7259_v4 = vld [vmem:[#allocation9 + $0xe8] sm:$0xff] }
 0xfeb   : > { %v6893_v58 = vmul.f32 0.5, %v6890_v20  ;;  %v9865_v20 = vpack.c.bf16 %v7256_v29, %v7254_v53  ;;  %v7290_v53 = vld [vmem:[#allocation9 + $0x1e0] sm:$0xff]  ;;  %v7292_v29 = vld [vmem:[#allocation9 + $0x1f0] sm:$0xff] }
 0xfec   : > { %v6894_v38 = vmul.f32 0.5, %v6891_v2  ;;  %9790 = vmatpush1.bf16.msra.mxu0 %v13206_v44  ;;  %9822 = vmatpush1.bf16.msra.mxu1 %v13207_v1  ;;  %v10467_v44 = vpop.eup %10466  ;;  %v7234_v1 = vld [vmem:[#allocation9 + $0x20] sm:$0xff] }
 0xfed   : > { %v6898_v24 = vmul.f32 %v10465_v59, %v6893_v58  ;;  %9792 = vmatprep.subr.bf16.mxu0 %v13208_v10  ;;  %9824 = vmatprep.subr.bf16.mxu1 %v13209_v19  ;;  %v6892_v19 = vadd.f32 1.0, %v10467_v44  ;;  %v7236_v10 = vld [vmem:[#allocation9 + $0x30] sm:$0xff]  ;;  %v7261_v58 = vld [vmem:[#allocation9 + $0xf8] sm:$0xff]  ;;  %v7258_v59 = vld [vmem:[#allocation9 + $0xe0] sm:$0xff] }
 0xfee   : > { %v6897_v25 = vmul.f32 %v6894_v38, %v12609_v63  ;;  %v9845_v40 = vpack.c.bf16 %v7236_v10, %v7234_v1  ;;  %v7240_v63 = vld [vmem:[#allocation9 + $0x50] sm:$0xff]  ;;  %v9867_v2 = vpack.c.bf16 %v7261_v58, %v7259_v4  ;;  %v7265_v44 = vld [vmem:[#allocation9 + $0x118] sm:$0xff]  ;;  %v7270_v1 = vld [vmem:[#allocation9 + $0x140] sm:$0xff] }
 0xfef   : > { %v9849_v17 = vpack.c.bf16 %v7240_v63, %v7238_v7  ;;  %v7260_v38 = vld [vmem:[#allocation9 + $0xf0] sm:$0xff]  ;;  %v7274_v7 = vld [vmem:[#allocation9 + $0x160] sm:$0xff] }
 0xff0   : > { %v12693_v50 = vadd.f32 %v6898_v24, %v6897_v25  ;;  %9794 = vmatpush1.bf16.msra.mxu0 %v13210_v54  ;;  %9826 = vmatpush1.bf16.msra.mxu1 %v13211_v30  ;;  %v7230_v54 = vld [vmem:[#allocation9] sm:$0xff]  ;;  %v9869_v24 = vpack.c.bf16 %v7260_v38, %v7258_v59  ;;  %v7263_v25 = vld [vmem:[#allocation9 + $0x108] sm:$0xff]  ;;  %v7272_v10 = vld [vmem:[#allocation9 + $0x150] sm:$0xff] }
 0xff1   : > { %9796 = vmatprep.subr.bf16.mxu0 %v12051_v57  ;;  %9828 = vmatprep.subr.bf16.mxu1 %v12053_v45  ;;  %v6895_v57 = vmul.f32 0.5, %v6892_v19  ;;  %v9871_v19 = vpack.c.bf16 %v7265_v44, %v7263_v25  ;;  %v7276_v63 = vld [vmem:[#allocation9 + $0x170] sm:$0xff] }
 0xff2   : > { %10468 = vtanh.f32 %v12693_v50 }
 0xff4   : > { %9798 = vmatpush1.bf16.msra.mxu0 %v12057_v47  ;;  %9830 = vmatpush1.bf16.msra.mxu1 %v12059_v3  ;;  %v7231_v3 = vld [vmem:[#allocation9 + $0x8] sm:$0xff] }
 0xff5   : > { %9800 = vmatprep.subr.bf16.mxu0 %v12063_v56  ;;  %9832 = vmatprep.subr.bf16.mxu1 %v12065_v34  ;;  %v7233_v56 = vld [vmem:[#allocation9 + $0x18] sm:$0xff] }
 0xff6   : > { %v9839_v34 = vpack.c.bf16 %v7233_v56, %v7231_v3  ;;  %v7267_v3 = vld [vmem:[#allocation9 + $0x128] sm:$0xff]  ;;  %v7269_v56 = vld [vmem:[#allocation9 + $0x138] sm:$0xff] }
 0xff8   : > { %9802 = vmatpush1.bf16.msra.mxu0 %v12069_v41  ;;  %9834 = vmatpush1.bf16.msra.mxu1 %v12071_v13  ;;  %v7232_v41 = vld [vmem:[#allocation9 + $0x10] sm:$0xff]  ;;  %v7235_v13 = vld [vmem:[#allocation9 + $0x28] sm:$0xff] }
 0xff9   : > { %9804 = vmatprep.subr.bf16.mxu0 %v12075_v15  ;;  %9836 = vmatprep.subr.bf16.mxu1 %v12077_v5  ;;  %v9841_v30 = vpack.c.bf16 %v7232_v41, %v7230_v54  ;;  %v7237_v15 = vld [vmem:[#allocation9 + $0x38] sm:$0xff]  ;;  %v7266_v54 = vld [vmem:[#allocation9 + $0x120] sm:$0xff]  ;;  %v7268_v41 = vld [vmem:[#allocation9 + $0x130] sm:$0xff] }
 0xffa   : > { %v9843_v5 = vpack.c.bf16 %v7237_v15, %v7235_v13  ;;  %v7271_v13 = vld [vmem:[#allocation9 + $0x148] sm:$0xff]  ;;  %v7273_v15 = vld [vmem:[#allocation9 + $0x158] sm:$0xff] }
 0xffc   : > { %v10469_v45 = vpop.eup %10468  ;;  %9806 = vmatpush1.bf16.msra.mxu0 %v12081_v6  ;;  %9838 = vmatpush1.bf16.msra.mxu1 %v12083_v28  ;;  %v7239_v6 = vld [vmem:[#allocation9 + $0x48] sm:$0xff]  ;;  %v7241_v28 = vld [vmem:[#allocation9 + $0x58] sm:$0xff] }
 0xffd   : > { %v6901_v47 = vmul.f32 %v10469_v45, %v6895_v57  ;;  %9840 = vmatprep.subr.bf16.mxu0 %v9839_v34  ;;  %v9847_v48 = vpack.c.bf16 %v7241_v28, %v7239_v6  ;;  %v7262_v57 = vld [vmem:[#allocation9 + $0x100] sm:$0xff]  ;;  %v7264_v45 = vld [vmem:[#allocation9 + $0x110] sm:$0xff]  ;;  %v9875_v34 = vpack.c.bf16 %v7269_v56, %v7267_v3  ;;  %v7275_v6 = vld [vmem:[#allocation9 + $0x168] sm:$0xff] }
 0xffe   : > { %v7277_v28 = vld [vmem:[#allocation9 + $0x178] sm:$0xff] }
 0xfff   : > { %7117 = vmatmul.mubr.f32.vlgmr.msra.gmra.mrb[48].mxu0 %v6901_v47  ;;  %7188 = vmatmul.mubr.f32.vlgmr.msra.gmra.mrb[64].mxu1 %v6901_v47  ;;  %v9873_v47 = vpack.c.bf16 %v7264_v45, %v7262_v57 }
0x1000   : > { %9842 = vmatpush1.bf16.msra.mxu0 %v9841_v30  ;;  %v9877_v30 = vpack.c.bf16 %v7268_v41, %v7266_v54 }
0x1001   : > { %9844 = vmatprep.subr.bf16.mxu0 %v9843_v5  ;;  %v9879_v5 = vpack.c.bf16 %v7273_v15, %v7271_v13 }
0x1004   : > { %9846 = vmatpush1.bf16.msra.mxu0 %v9845_v40  ;;  %v9881_v40 = vpack.c.bf16 %v7272_v10, %v7270_v1 }
0x1005   : > { %9848 = vmatprep.subr.bf16.mxu0 %v9847_v48  ;;  %v9883_v48 = vpack.c.bf16 %v7277_v28, %v7275_v6 }
0x1008   : > { %9850 = vmatpush1.bf16.msra.mxu0 %v9849_v17  ;;  %v9885_v17 = vpack.c.bf16 %v7276_v63, %v7274_v7 }
0x1009   : > { %9852 = vmatprep.subr.bf16.mxu0 %v9851_v32  ;;  %v9887_v32 = vpack.c.bf16 %v7281_v42, %v7279_v62 }
0x100c   : > { %9854 = vmatpush1.bf16.msra.mxu0 %v9853_v46  ;;  %v9889_v46 = vpack.c.bf16 %v7280_v33, %v7278_v8 }
0x100d   : > { %9856 = vmatprep.subr.bf16.mxu0 %v9855_v21  ;;  %v9891_v21 = vpack.c.bf16 %v7285_v0, %v7283_v43 }
0x1010   : > { %9858 = vmatpush1.bf16.msra.mxu0 %v9857_v35  ;;  %v7287_v35 = vld [vmem:[#allocation9 + $0x1c8] sm:$0xff] }
0x1011   : > { %9860 = vmatprep.subr.bf16.mxu0 %v9859_v9  ;;  %v7286_v9 = vld [vmem:[#allocation9 + $0x1c0] sm:$0xff]  ;;  %v9895_v31 = vpack.c.bf16 %v7289_v37, %v7287_v35 }
0x1012   : > { %v9897_v12 = vpack.c.bf16 %v7288_v39, %v7286_v9  ;;  %v7294_v37 = vld [vmem:[%s12780_s6] sm:$0x3]  ;;  %v13372_v9 = vld [vmem:[#allocation56_spill] sm:$0xff] }
0x1013   : > { %v13373_v39 = vsub.s32 0, %v13372_v9 }
0x1014   : > { %9862 = vmatpush1.bf16.msra.mxu0 %v9861_v27  ;;  %v7293_v27 = vld [vmem:[#allocation9 + $0x1f8] sm:$0xff] }
0x1015   : > { %9864 = vmatprep.subr.bf16.mxu0 %v9863_v11  ;;  %v9899_v11 = vpack.c.bf16 %v7293_v27, %v7291_v55 }
0x1018   : > { %9866 = vmatpush1.bf16.msra.mxu0 %v9865_v20  ;;  %v9901_v20 = vpack.c.bf16 %v7292_v29, %v7290_v53 }
0x1019   : > { %9868 = vmatprep.subr.bf16.mxu0 %v9867_v2 }
0x101c   : > { %9870 = vmatpush1.bf16.msra.mxu0 %v9869_v24 }
0x101d   : > { %9872 = vmatprep.subr.bf16.mxu0 %v9871_v19 }
0x1020   : > { %9874 = vmatpush1.bf16.msra.mxu0 %v9873_v47 }
0x1021   : > { %9876 = vmatprep.subr.bf16.mxu0 %v9875_v34 }
0x1024   : > { %9878 = vmatpush1.bf16.msra.mxu0 %v9877_v30 }
0x1025   : > { %9880 = vmatprep.subr.bf16.mxu0 %v9879_v5 }
0x1028   : > { %9882 = vmatpush1.bf16.msra.mxu0 %v9881_v40 }
0x1029   : > { %9884 = vmatprep.subr.bf16.mxu0 %v9883_v48 }
0x102c   : > { %9886 = vmatpush1.bf16.msra.mxu0 %v9885_v17 }
0x102d   : > { %9888 = vmatprep.subr.bf16.mxu0 %v9887_v32 }
0x1030   : > { %9890 = vmatpush1.bf16.msra.mxu0 %v9889_v46 }
0x1031   : > { %9892 = vmatprep.subr.bf16.mxu0 %v9891_v21 }
0x1034   : > { %9894 = vmatpush1.bf16.msra.mxu0 %v9893_v22 }
0x1035   : > { %9896 = vmatprep.subr.bf16.mxu0 %v9895_v31  ;;  %v7299_v31 = vrot.slane %v7294_v37, %v13373_v39 }
0x1038   : > { %9898 = vmatpush1.bf16.msra.mxu0 %v9897_v12 }
0x1039   : > { %9900 = vmatprep.subr.bf16.mxu0 %v9899_v11 }
0x103c   : > { %9902 = vmatpush1.bf16.msra.mxu0 %v9901_v20 }
0x10b2   : > { %v6972_v4 = vpop.f32.mrb[46].mxu0  ;;  %v7043_v58 = vpop.f32.mrb[62].mxu1 }
0x10b3   : > { %v9933_v2 = vadd.f32 %v6972_v4, %v13371_v18  ;;  %v6974_v59 = vpop.f32.mrb[47].mxu0  ;;  %v7045_v38 = vpop.f32.mrb[63].mxu1  ;;  %v9949_v57 = vadd.f32 %v7043_v58, %v13226_v51 }
0x10b4   : > { %v9934_v24 = vadd.f32 %v6974_v59, %v12141_v16  ;;  %v9950_v19 = vadd.f32 %v7045_v38, %v13225_v61 }
0x10b5   : > { %v7194_v25 = vmul.f32 0.5, %v9933_v2  ;;  %v7196_v45 = vmul.f32 0.5, %v9949_v57 }
0x10b6   : > { %v7195_v44 = vmul.f32 0.5, %v9934_v24 }
0x10b7   : > { %10470 = vtanh.f32 %v7194_v25 }
0x10b8   : > { %10472 = vtanh.f32 %v7195_v44 }
0x10b9   : > { %10474 = vtanh.f32 %v9950_v19 }
0x10ba   : > { %10476 = vtanh.f32 %v7196_v45 }
0x10c1   : > { %v10471_v47 = vpop.eup %10470 }
0x10c2   : > { %v7200_v3 = vadd.f32 1.0, %v10471_v47  ;;  %v10473_v56 = vpop.eup %10472 }
0x10c3   : > { %v7201_v18 = vadd.f32 1.0, %v10473_v56  ;;  %v10475_v54 = vpop.eup %10474 }
0x10c4   : > { %v7203_v34 = vmul.f32 0.5, %v7200_v3  ;;  %v10477_v15 = vpop.eup %10476 }
0x10c5   : > { %v7204_v41 = vmul.f32 0.5, %v7201_v18  ;;  %v7202_v61 = vadd.f32 1.0, %v10477_v15 }
0x10c6   : > { %v7208_v30 = vmul.f32 %v10475_v54, %v7203_v34 }
0x10c7   : > { %v7207_v16 = vmul.f32 %v7204_v41, %v12667_v60  ;;  %v7205_v28 = vmul.f32 0.5, %v7202_v61 }
0x10c9   : > { %v7209_v13 = vadd.f32 %v7208_v30, %v7207_v16 }
0x10cb   : > { %10478 = vtanh.f32 %v7209_v13 }
0x10d2   : > { %v7118_v5 = vpop.f32.mrb[48].mxu0  ;;  %v7189_v1 = vpop.f32.mrb[64].mxu1 }
0x10d3   : > { %v9951_v51 = vadd.f32 %v7118_v5, %v12157_v49  ;;  %v7120_v10 = vpop.f32.mrb[49].mxu0  ;;  %v7191_v40 = vpop.f32.mrb[65].mxu1  ;;  %v9967_v62 = vadd.f32 %v7189_v1, %v12168_v26 }
0x10d4   : > { %v9952_v6 = vadd.f32 %v7120_v10, %v12160_v52  ;;  %v9968_v17 = vadd.f32 %v7191_v40, %v12163_v36 }
0x10d5   : > { %v7212_v48 = vmul.f32 0.5, %v9951_v51  ;;  %v10479_v7 = vpop.eup %10478  ;;  %v7214_v42 = vmul.f32 0.5, %v9967_v62 }
0x10d6   : > { %v7213_v63 = vmul.f32 0.5, %v9952_v6  ;;  %v7211_v60 = vmul.f32 %v10479_v7, %v7205_v28 }
0x10d7   : > { %10480 = vtanh.f32 %v7212_v48 }
0x10d8   : > { %10482 = vtanh.f32 %v7213_v63 }
0x10d9   : > { %10484 = vtanh.f32 %v9968_v17 }
0x10da   : > { %10486 = vtanh.f32 %v7214_v42 }
0x10e1   : > { %v10481_v32 = vpop.eup %10480 }
0x10e2   : > { %v7218_v8 = vadd.f32 1.0, %v10481_v32  ;;  %v10483_v49 = vpop.eup %10482 }
0x10e3   : > { %v7219_v52 = vadd.f32 1.0, %v10483_v49  ;;  %v10485_v46 = vpop.eup %10484 }
0x10e4   : > { %v7221_v33 = vmul.f32 0.5, %v7218_v8  ;;  %v10487_v14 = vpop.eup %10486 }
0x10e5   : > { %v7222_v43 = vmul.f32 0.5, %v7219_v52  ;;  %v7220_v23 = vadd.f32 1.0, %v10487_v14 }
0x10e6   : > { %v7226_v0 = vmul.f32 %v10485_v46, %v7221_v33 }
0x10e7   : > { %v7225_v21 = vmul.f32 %v7222_v43, %v12693_v50  ;;  %v7223_v35 = vmul.f32 0.5, %v7220_v23  ;;  %v13374_v50 = vsub.s32 1, %v13372_v9 }
0x10e9   : > { %v7227_v36 = vadd.f32 %v7226_v0, %v7225_v21  ;;  %v7303_v55 = vrot.slane %v7294_v37, %v13374_v50 }
0x10eb   : > { %10488 = vtanh.f32 %v7227_v36 }
0x10f5   : > { %v10489_v26 = vpop.eup %10488 }
0x10f6   : > { %v7229_v22 = vmul.f32 %v10489_v26, %v7223_v35 }
0x10f8   : > { %7370 = vmatprep.mubr.f32.mxu0 %v7229_v22 }
0x10f9   : > { %7371 = vmatmul.mubr.f32.vlgmr.msra.gmra.mrb[64].mxu0 %v7211_v60 }
0x11cc   : > { %v7372_v27 = vpop.f32.mrb[64].mxu0 }
0x11cd   : > { %v7373_v12 = vadd.f32 %v7372_v27, %v7299_v31  ;;  %v7374_v11 = vpop.f32.mrb[65].mxu0 }
0x11ce   : > { %v7375_v53 = vadd.f32 %v7374_v11, %v7303_v55 }
0x11cf   : > { %7377 = vst [vmem:[%s316_s19] sm:$0xff] %v7373_v12 }
0x11d0   : > { %7378 = vst [vmem:[%s316_s19 + $0x8] sm:$0xff] %v7375_v53 }
0x11d1   : > { %10587 = shalt.err (!%p10584_p9)
}
0x11d2   : > { %s10588_s9 = scalar_lea.hbm %s12732_s22, 256  ;;  %s10592_s23 = scalar_lea.hbm %s12781_s7, 512 }
0x11d3   : > { %p10589_p2 = scmp.ne.s32.totalorder %s12732_s22, %s10588_s9  ;;  %p10593_p5 = scmp.lt.u32.totalorder %s12732_s22, %s12781_s7 }
0x11d4   : > { %p10594_p10 = scmp.lt.u32.totalorder %s10592_s23, %s10588_s9  ;;  %p10596_p4 = scmp.lt.u32.totalorder %s10588_s9, %s12732_s22 }
0x11d5   : > { %p10590_p3 = pnand %p10589_p2, %p13375_p7 }
0x11d6   : > { %p10595_p12 = por %p10594_p10, %p10593_p5 }
0x11d7   : > { %p10591_p0 = pneg %p10590_p3 }
0x11d8   : > { %p10597_p8 = por %p10596_p4, %p10595_p12 }
0x11da   : > { %p10598_p11 = pnand %p10597_p8, %p10591_p0 }
0x11dc   : > { %10601 = shalt.err (!%p10598_p11)
}
0x11dd   : > { %10107 = dma.vmem_to_hbm [thread:$0]  (%p13375_p7), %s12734_s15, 256, %s12732_s22, %s7380_s26  }
0x11de PF: > { %p10129_p13 = scmp.ge.s32.totalorder %s10644_s27, 2  ;;  %s7406_s14 = sand.u32 1, %s10632_s24  }
0x11df   : > { %p13376_p1 = scmp.ne.s32.totalorder %s12947_s12, 0  ;;  %s7407_s17 = scalar_lea.sflag [#allocation6], %s7406_s14 }
0x11e1   : > { %p10120_p6 = pnand %p10129_p13, %p13376_p1 }
0x11e3   : > { %10627 = dma.done.wait (!%p10120_p6), %s7407_s17, 256  }
0x11e4   : > { %10629 = vsyncadd (!%p10120_p6), %s7407_s17, 4294967040  ;;  %s13377_s27 = sld [smem:[#allocation15_spill]]  ;;  %s13378_s19 = sld [smem:[#allocation14_spill]] }
0x11e5   : > { %s13379_s26 = sld [smem:[#allocation16_spill]]  ;;  %s13380_s24 = smov %s10636_s25 }
0x11ea   : > { %p19_p9 = scmp.ge.s32.totalorder %s13377_s27, 4   ;;  %s13381_s25 = smov %s13378_s19 }
0x11ec   :  { %21 = sbr.rel (!%p19_p9) target bundleno = 5 (0x5), region = 96 }
0x11f3   :  { %7412 = vsyncpa [#allocation5], 1 }
0x11f4   :  { %7414 = vsyncpa [#allocation5 + $0x1], 1 }
0x11f5   :  { %7415 = vsyncpa [#allocation8], 1 }
0x11f6   :  { %7416 = vsyncpa [#allocation6], 1 }
0x11f7   :  { %7418 = vsyncpa [#allocation6 + $0x1], 1 }

</bundles_post_ra>
